<compile_context>
chip_gen: v7x
topology: tpu7x:2x2x1
jax: 0.10.0
libtpu: 0.0.40
codegen_flags: <defaults>
</compile_context>

<pallas_src>
import numpy as np

import jax
import jax.numpy as jnp
from jax.experimental import pallas as pl
from jax.experimental.pallas import tpu as pltpu


# ---------------------------------------------------------------------------
# Constant 0/1 spatial-gather matrices (one (Ho*Wo, Hin*Win) matrix per tap).
# P_t[m, n] = 1  iff output pixel m reads input pixel n at kernel tap t
# (zero rows where the tap falls into zero-padding).
# ---------------------------------------------------------------------------
def _select_matrices(hin, win, hout, wout, stride, pad):
    mats = np.zeros((9, hout * wout, hin * win), np.float32)
    for i in range(3):
        for j in range(3):
            t = i * 3 + j
            for oh in range(hout):
                ih = stride * oh + i - pad
                if ih < 0 or ih >= hin:
                    continue
                for ow in range(wout):
                    iw = stride * ow + j - pad
                    if 0 <= iw < win:
                        mats[t, oh * wout + ow, ih * win + iw] = 1.0
    return mats


_P2 = _select_matrices(20, 20, 10, 10, 2, 1)   # conv2: (9, 100, 400)
_P3 = _select_matrices(10, 10, 5, 5, 2, 1)     # conv3: (9,  25, 100)
_P4 = _select_matrices(5, 5, 3, 3, 1, 0)       # conv4: (9,   9,  25)


# ---------------------------------------------------------------------------
# Fused whole-network kernel (one grid step = one sample).
# ---------------------------------------------------------------------------
def _cnet_kernel(patches_ref, w1_ref, b1_ref,
                 p2_ref, w2_ref, b2_ref,
                 p3_ref, w3_ref, b3_ref,
                 p4_ref, w4_ref, b4_ref,
                 wf1_ref, bf1_ref, wf2_ref, bf2_ref, wf3_ref, bf3_ref,
                 out_ref):
    def mm(a, b):
        return jnp.dot(a, b, preferred_element_type=jnp.float32)

    # conv1 + BN + ReLU: im2col patches (400, 9) @ (9, 16).
    a = jnp.maximum(mm(patches_ref[...], w1_ref[...]) + b1_ref[...], 0.0)

    # conv2..conv4 + BN + ReLU:  out = ReLU( sum_t (P_t @ A) @ W_t + bias ).
    def conv(a, p_ref, w_ref, b_ref):
        acc = None
        for t in range(9):                       # static unroll, 9 taps
            y = mm(mm(p_ref[t], a), w_ref[t])
            acc = y if acc is None else acc + y
        return jnp.maximum(acc + b_ref[...], 0.0)

    a = conv(a, p2_ref, w2_ref, b2_ref)          # (100, 32)
    a = conv(a, p3_ref, w3_ref, b3_ref)          # ( 25, 64)
    a = conv(a, p4_ref, w4_ref, b4_ref)          # (  9, 64)

    # fc1: the PyTorch NCHW flatten is absorbed into per-spatial-row weight
    # blocks wf1[m] of shape (64, 100); fc1..fc3 chained fully in VMEM.
    y = bf1_ref[...]                             # (1, 100)
    for m in range(9):
        y = y + mm(a[m:m + 1, :], wf1_ref[m])
    y = mm(y, wf2_ref[...]) + bf2_ref[...]       # (1, 20)
    y = mm(y, wf3_ref[...]) + bf3_ref[...]       # (1, 5)
    out_ref[0] = y


# ---------------------------------------------------------------------------
# Wrapper-side parameter folding / layout prep (pure data movement, tiny).
# ---------------------------------------------------------------------------
def _fold_conv(w, b, gamma, beta, mean, var, eps=1e-5):
    """OIHW conv weight + eval-mode BN  ->  (9, Cin, Cout) taps, (1, Cout) bias."""
    cout, cin = w.shape[0], w.shape[1]
    scale = gamma / jnp.sqrt(var + eps)
    w_s = w * scale[:, None, None, None]
    taps = jnp.transpose(w_s, (2, 3, 1, 0)).reshape(9, cin, cout)  # t = i*3+j
    bias = ((b - mean) * scale + beta).reshape(1, cout)
    return taps, bias


def _conv1_patches(x_nchw, pad=1):
    """(B, 1, 20, 20) -> im2col patches (B*400, 9), column order t = i*3+j."""
    x = jnp.pad(x_nchw[:, 0, :, :], ((0, 0), (pad, pad), (pad, pad)))
    B, Hp, Wp = x.shape
    Ho, Wo = Hp - 2, Wp - 2
    cols = [x[:, i:i + Ho, j:j + Wo] for i in range(3) for j in range(3)]
    return jnp.stack(cols, axis=-1).reshape(B * Ho * Wo, 9)


def cnet_forward(x_nchw, params):
    B = x_nchw.shape[0]
    patches = _conv1_patches(x_nchw.astype(jnp.float32))           # (B*400, 9)

    w1t, b1 = _fold_conv(*params["conv1"])
    w1 = w1t.reshape(9, 16)                                        # Cin = 1
    w2, b2 = _fold_conv(*params["conv2"])                          # (9, 16, 32)
    w3, b3 = _fold_conv(*params["conv3"])                          # (9, 32, 64)
    w4, b4 = _fold_conv(*params["conv4"])                          # (9, 64, 64)

    p2, p3, p4 = jnp.asarray(_P2), jnp.asarray(_P3), jnp.asarray(_P4)

    # fc1 weight re-blocked per spatial position m: wf1[m, c, o] = W[o, c*9+m]
    wf1 = jnp.transpose(params["fc1_w"].reshape(100, 64, 9), (2, 1, 0))
    bf1 = params["fc1_b"].reshape(1, 100)
    wf2 = params["fc2_w"].T
    bf2 = params["fc2_b"].reshape(1, 20)
    wf3 = params["fc3_w"].T
    bf3 = params["fc3_b"].reshape(1, 5)

    fixed_ins = [w1, b1, p2, w2, b2, p3, w3, b3, p4, w4, b4,
                 wf1, bf1, wf2, bf2, wf3, bf3]

    def whole(a):
        zeros = (0,) * a.ndim
        return pl.BlockSpec(a.shape, lambda b, z=zeros: z)

    in_specs = [pl.BlockSpec((400, 9), lambda b: (b, 0))] + [whole(a) for a in fixed_ins]
    out_spec = pl.BlockSpec((1, 1, 5), lambda b: (b, 0, 0))

    flops = 2 * B * (
        400 * 9 * 16
        + 9 * (100 * 400 * 16 + 100 * 16 * 32)
        + 9 * (25 * 100 * 32 + 25 * 32 * 64)
        + 9 * (9 * 25 * 64 + 9 * 64 * 64)
        + 576 * 100 + 100 * 20 + 20 * 5)
    bytes_accessed = sum(int(a.size) * 4 for a in [patches] + fixed_ins) + B * 5 * 4

    out = pl.pallas_call(
        _cnet_kernel,
        out_shape=jax.ShapeDtypeStruct((B, 1, 5), jnp.float32),
        grid=(B,),
        in_specs=in_specs,
        out_specs=out_spec,
        compiler_params=pltpu.CompilerParams(dimension_semantics=("parallel",)),
        cost_estimate=pl.CostEstimate(
            flops=flops, transcendentals=0, bytes_accessed=bytes_accessed),
    )(patches, *fixed_ins)
    return out[:, 0, :]


# ---------------------------------------------------------------------------
# Deterministic parameter construction (synthetic, PyTorch layouts).
# ---------------------------------------------------------------------------
def make_params(key):
    def conv_block(key, cin, cout):
        k = jax.random.split(key, 6)
        w = 0.1 * jax.random.normal(k[0], (cout, cin, 3, 3), jnp.float32)
        b = 0.05 * jax.random.normal(k[1], (cout,), jnp.float32)
        gamma = 1.0 + 0.1 * jax.random.normal(k[2], (cout,), jnp.float32)
        beta = 0.1 * jax.random.normal(k[3], (cout,), jnp.float32)
        mean = 0.1 * jax.random.normal(k[4], (cout,), jnp.float32)
        var = 1.0 + jnp.abs(0.1 * jax.random.normal(k[5], (cout,), jnp.float32))
        return (w, b, gamma, beta, mean, var)

    keys = jax.random.split(key, 8)
    return {
        "conv1": conv_block(keys[0], 1, 16),
        "conv2": conv_block(keys[1], 16, 32),
        "conv3": conv_block(keys[2], 32, 64),
        "conv4": conv_block(keys[3], 64, 64),
        "fc1_w": 0.05 * jax.random.normal(keys[4], (100, 576), jnp.float32),
        "fc1_b": jnp.zeros((100,), jnp.float32),
        "fc2_w": 0.05 * jax.random.normal(keys[5], (20, 100), jnp.float32),
        "fc2_b": jnp.zeros((20,), jnp.float32),
        "fc3_w": 0.05 * jax.random.normal(keys[6], (5, 20), jnp.float32),
        "fc3_b": jnp.zeros((5,), jnp.float32),
    }


if __name__ == "__main__":
    key = jax.random.PRNGKey(0)
    k_params, k_x = jax.random.split(key)
    params = make_params(k_params)
    # The architecture requires 20x20 spatial input (-> 3x3x64 = 576 flatten).
    x = jax.random.normal(k_x, (2, 1, 20, 20), jnp.float32)  # NCHW, like PyTorch
    out = jax.jit(cnet_forward)(x, params)
    out = jax.block_until_ready(out)
    assert out.shape == (2, 5), out.shape
    print("KERNEL_OK")
</pallas_src>

<mosaic_0001>
module attributes {stable_mosaic.version = 11 : i64} {
  func.func @_cnet_kernel(%arg0: i32, %arg1: memref<400x9xf32, #tpu.memory_space<vmem>>, %arg2: memref<9x16xf32, #tpu.memory_space<vmem>>, %arg3: memref<1x16xf32, #tpu.memory_space<vmem>>, %arg4: memref<9x100x400xf32, #tpu.memory_space<vmem>>, %arg5: memref<9x16x32xf32, #tpu.memory_space<vmem>>, %arg6: memref<1x32xf32, #tpu.memory_space<vmem>>, %arg7: memref<9x25x100xf32, #tpu.memory_space<vmem>>, %arg8: memref<9x32x64xf32, #tpu.memory_space<vmem>>, %arg9: memref<1x64xf32, #tpu.memory_space<vmem>>, %arg10: memref<9x9x25xf32, #tpu.memory_space<vmem>>, %arg11: memref<9x64x64xf32, #tpu.memory_space<vmem>>, %arg12: memref<1x64xf32, #tpu.memory_space<vmem>>, %arg13: memref<9x64x100xf32, #tpu.memory_space<vmem>>, %arg14: memref<1x100xf32, #tpu.memory_space<vmem>>, %arg15: memref<100x20xf32, #tpu.memory_space<vmem>>, %arg16: memref<1x20xf32, #tpu.memory_space<vmem>>, %arg17: memref<20x5xf32, #tpu.memory_space<vmem>>, %arg18: memref<1x5xf32, #tpu.memory_space<vmem>>, %arg19: memref<1x1x5xf32, #tpu.memory_space<vmem>>) attributes {dimension_semantics = [#tpu.dimension_semantics<parallel>], iteration_bounds = array<i64: 2>, scalar_prefetch = 0 : i64, scratch_operands = 0 : i64, tpu.core_type = #tpu.core_type<tc>, window_params = [{transform_indices = @transform_0, window_bounds = array<i64: 400, 9>}, {pipeline_mode = #tpu.pipeline_mode<synchronous>, transform_indices = @transform_1, window_bounds = array<i64: 9, 16>}, {pipeline_mode = #tpu.pipeline_mode<synchronous>, transform_indices = @transform_2, window_bounds = array<i64: 1, 16>}, {pipeline_mode = #tpu.pipeline_mode<synchronous>, transform_indices = @transform_3, window_bounds = array<i64: 9, 100, 400>}, {pipeline_mode = #tpu.pipeline_mode<synchronous>, transform_indices = @transform_4, window_bounds = array<i64: 9, 16, 32>}, {pipeline_mode = #tpu.pipeline_mode<synchronous>, transform_indices = @transform_5, window_bounds = array<i64: 1, 32>}, {pipeline_mode = #tpu.pipeline_mode<synchronous>, transform_indices = @transform_6, window_bounds = array<i64: 9, 25, 100>}, {pipeline_mode = #tpu.pipeline_mode<synchronous>, transform_indices = @transform_7, window_bounds = array<i64: 9, 32, 64>}, {pipeline_mode = #tpu.pipeline_mode<synchronous>, transform_indices = @transform_8, window_bounds = array<i64: 1, 64>}, {pipeline_mode = #tpu.pipeline_mode<synchronous>, transform_indices = @transform_9, window_bounds = array<i64: 9, 9, 25>}, {pipeline_mode = #tpu.pipeline_mode<synchronous>, transform_indices = @transform_10, window_bounds = array<i64: 9, 64, 64>}, {pipeline_mode = #tpu.pipeline_mode<synchronous>, transform_indices = @transform_11, window_bounds = array<i64: 1, 64>}, {pipeline_mode = #tpu.pipeline_mode<synchronous>, transform_indices = @transform_12, window_bounds = array<i64: 9, 64, 100>}, {pipeline_mode = #tpu.pipeline_mode<synchronous>, transform_indices = @transform_13, window_bounds = array<i64: 1, 100>}, {pipeline_mode = #tpu.pipeline_mode<synchronous>, transform_indices = @transform_14, window_bounds = array<i64: 100, 20>}, {pipeline_mode = #tpu.pipeline_mode<synchronous>, transform_indices = @transform_15, window_bounds = array<i64: 1, 20>}, {pipeline_mode = #tpu.pipeline_mode<synchronous>, transform_indices = @transform_16, window_bounds = array<i64: 20, 5>}, {pipeline_mode = #tpu.pipeline_mode<synchronous>, transform_indices = @transform_17, window_bounds = array<i64: 1, 5>}, {transform_indices = @transform_18, window_bounds = array<i64: 1, 1, 5>}]} {
    %c0 = arith.constant 0 : index
    %c0_0 = arith.constant 0 : index
    %0 = vector.load %arg1[%c0, %c0_0] : memref<400x9xf32, #tpu.memory_space<vmem>>, vector<400x9xf32>
    %c0_1 = arith.constant 0 : index
    %c0_2 = arith.constant 0 : index
    %1 = vector.load %arg2[%c0_1, %c0_2] : memref<9x16xf32, #tpu.memory_space<vmem>>, vector<9x16xf32>
    %cst = arith.constant dense<0.000000e+00> : vector<400x16xf32>
    %2 = tpu.matmul %0, %1, %cst {dimension_numbers = #tpu.dot_dimension_numbers<[1], [0], [0], [1], [0, 0, 1, 1], [], []>} : vector<400x9xf32>, vector<9x16xf32>, vector<400x16xf32> -> vector<400x16xf32>
    %c0_3 = arith.constant 0 : index
    %c0_4 = arith.constant 0 : index
    %3 = vector.load %arg3[%c0_3, %c0_4] : memref<1x16xf32, #tpu.memory_space<vmem>>, vector<1x16xf32>
    %4 = vector.broadcast %3 : vector<1x16xf32> to vector<400x16xf32>
    %5 = arith.addf %2, %4 : vector<400x16xf32>
    %cst_5 = arith.constant 0.000000e+00 : f32
    %6 = vector.broadcast %cst_5 : f32 to vector<400x16xf32>
    %7 = arith.maximumf %5, %6 : vector<400x16xf32>
    %c0_6 = arith.constant 0 : index
    %c0_7 = arith.constant 0 : index
    %c0_8 = arith.constant 0 : index
    %8 = vector.load %arg4[%c0_6, %c0_7, %c0_8] : memref<9x100x400xf32, #tpu.memory_space<vmem>>, vector<1x100x400xf32>
    %9 = vector.shape_cast %8 : vector<1x100x400xf32> to vector<100x400xf32>
    %cst_9 = arith.constant dense<0.000000e+00> : vector<100x16xf32>
    %10 = tpu.matmul %9, %7, %cst_9 {dimension_numbers = #tpu.dot_dimension_numbers<[1], [0], [0], [1], [0, 0, 1, 1], [], []>} : vector<100x400xf32>, vector<400x16xf32>, vector<100x16xf32> -> vector<100x16xf32>
    %c0_10 = arith.constant 0 : index
    %c0_11 = arith.constant 0 : index
    %c0_12 = arith.constant 0 : index
    %11 = vector.load %arg5[%c0_10, %c0_11, %c0_12] : memref<9x16x32xf32, #tpu.memory_space<vmem>>, vector<1x16x32xf32>
    %12 = vector.shape_cast %11 : vector<1x16x32xf32> to vector<16x32xf32>
    %cst_13 = arith.constant dense<0.000000e+00> : vector<100x32xf32>
    %13 = tpu.matmul %10, %12, %cst_13 {dimension_numbers = #tpu.dot_dimension_numbers<[1], [0], [0], [1], [0, 0, 1, 1], [], []>} : vector<100x16xf32>, vector<16x32xf32>, vector<100x32xf32> -> vector<100x32xf32>
    %c1 = arith.constant 1 : index
    %c0_14 = arith.constant 0 : index
    %c0_15 = arith.constant 0 : index
    %14 = vector.load %arg4[%c1, %c0_14, %c0_15] : memref<9x100x400xf32, #tpu.memory_space<vmem>>, vector<1x100x400xf32>
    %15 = vector.shape_cast %14 : vector<1x100x400xf32> to vector<100x400xf32>
    %cst_16 = arith.constant dense<0.000000e+00> : vector<100x16xf32>
    %16 = tpu.matmul %15, %7, %cst_16 {dimension_numbers = #tpu.dot_dimension_numbers<[1], [0], [0], [1], [0, 0, 1, 1], [], []>} : vector<100x400xf32>, vector<400x16xf32>, vector<100x16xf32> -> vector<100x16xf32>
    %c1_17 = arith.constant 1 : index
    %c0_18 = arith.constant 0 : index
    %c0_19 = arith.constant 0 : index
    %17 = vector.load %arg5[%c1_17, %c0_18, %c0_19] : memref<9x16x32xf32, #tpu.memory_space<vmem>>, vector<1x16x32xf32>
    %18 = vector.shape_cast %17 : vector<1x16x32xf32> to vector<16x32xf32>
    %cst_20 = arith.constant dense<0.000000e+00> : vector<100x32xf32>
    %19 = tpu.matmul %16, %18, %cst_20 {dimension_numbers = #tpu.dot_dimension_numbers<[1], [0], [0], [1], [0, 0, 1, 1], [], []>} : vector<100x16xf32>, vector<16x32xf32>, vector<100x32xf32> -> vector<100x32xf32>
    %20 = arith.addf %13, %19 : vector<100x32xf32>
    %c2 = arith.constant 2 : index
    %c0_21 = arith.constant 0 : index
    %c0_22 = arith.constant 0 : index
    %21 = vector.load %arg4[%c2, %c0_21, %c0_22] : memref<9x100x400xf32, #tpu.memory_space<vmem>>, vector<1x100x400xf32>
    %22 = vector.shape_cast %21 : vector<1x100x400xf32> to vector<100x400xf32>
    %cst_23 = arith.constant dense<0.000000e+00> : vector<100x16xf32>
    %23 = tpu.matmul %22, %7, %cst_23 {dimension_numbers = #tpu.dot_dimension_numbers<[1], [0], [0], [1], [0, 0, 1, 1], [], []>} : vector<100x400xf32>, vector<400x16xf32>, vector<100x16xf32> -> vector<100x16xf32>
    %c2_24 = arith.constant 2 : index
    %c0_25 = arith.constant 0 : index
    %c0_26 = arith.constant 0 : index
    %24 = vector.load %arg5[%c2_24, %c0_25, %c0_26] : memref<9x16x32xf32, #tpu.memory_space<vmem>>, vector<1x16x32xf32>
    %25 = vector.shape_cast %24 : vector<1x16x32xf32> to vector<16x32xf32>
    %cst_27 = arith.constant dense<0.000000e+00> : vector<100x32xf32>
    %26 = tpu.matmul %23, %25, %cst_27 {dimension_numbers = #tpu.dot_dimension_numbers<[1], [0], [0], [1], [0, 0, 1, 1], [], []>} : vector<100x16xf32>, vector<16x32xf32>, vector<100x32xf32> -> vector<100x32xf32>
    %27 = arith.addf %20, %26 : vector<100x32xf32>
    %c3 = arith.constant 3 : index
    %c0_28 = arith.constant 0 : index
    %c0_29 = arith.constant 0 : index
    %28 = vector.load %arg4[%c3, %c0_28, %c0_29] : memref<9x100x400xf32, #tpu.memory_space<vmem>>, vector<1x100x400xf32>
    %29 = vector.shape_cast %28 : vector<1x100x400xf32> to vector<100x400xf32>
    %cst_30 = arith.constant dense<0.000000e+00> : vector<100x16xf32>
    %30 = tpu.matmul %29, %7, %cst_30 {dimension_numbers = #tpu.dot_dimension_numbers<[1], [0], [0], [1], [0, 0, 1, 1], [], []>} : vector<100x400xf32>, vector<400x16xf32>, vector<100x16xf32> -> vector<100x16xf32>
    %c3_31 = arith.constant 3 : index
    %c0_32 = arith.constant 0 : index
    %c0_33 = arith.constant 0 : index
    %31 = vector.load %arg5[%c3_31, %c0_32, %c0_33] : memref<9x16x32xf32, #tpu.memory_space<vmem>>, vector<1x16x32xf32>
    %32 = vector.shape_cast %31 : vector<1x16x32xf32> to vector<16x32xf32>
    %cst_34 = arith.constant dense<0.000000e+00> : vector<100x32xf32>
    %33 = tpu.matmul %30, %32, %cst_34 {dimension_numbers = #tpu.dot_dimension_numbers<[1], [0], [0], [1], [0, 0, 1, 1], [], []>} : vector<100x16xf32>, vector<16x32xf32>, vector<100x32xf32> -> vector<100x32xf32>
    %34 = arith.addf %27, %33 : vector<100x32xf32>
    %c4 = arith.constant 4 : index
    %c0_35 = arith.constant 0 : index
    %c0_36 = arith.constant 0 : index
    %35 = vector.load %arg4[%c4, %c0_35, %c0_36] : memref<9x100x400xf32, #tpu.memory_space<vmem>>, vector<1x100x400xf32>
    %36 = vector.shape_cast %35 : vector<1x100x400xf32> to vector<100x400xf32>
    %cst_37 = arith.constant dense<0.000000e+00> : vector<100x16xf32>
    %37 = tpu.matmul %36, %7, %cst_37 {dimension_numbers = #tpu.dot_dimension_numbers<[1], [0], [0], [1], [0, 0, 1, 1], [], []>} : vector<100x400xf32>, vector<400x16xf32>, vector<100x16xf32> -> vector<100x16xf32>
    %c4_38 = arith.constant 4 : index
    %c0_39 = arith.constant 0 : index
    %c0_40 = arith.constant 0 : index
    %38 = vector.load %arg5[%c4_38, %c0_39, %c0_40] : memref<9x16x32xf32, #tpu.memory_space<vmem>>, vector<1x16x32xf32>
    %39 = vector.shape_cast %38 : vector<1x16x32xf32> to vector<16x32xf32>
    %cst_41 = arith.constant dense<0.000000e+00> : vector<100x32xf32>
    %40 = tpu.matmul %37, %39, %cst_41 {dimension_numbers = #tpu.dot_dimension_numbers<[1], [0], [0], [1], [0, 0, 1, 1], [], []>} : vector<100x16xf32>, vector<16x32xf32>, vector<100x32xf32> -> vector<100x32xf32>
    %41 = arith.addf %34, %40 : vector<100x32xf32>
    %c5 = arith.constant 5 : index
    %c0_42 = arith.constant 0 : index
    %c0_43 = arith.constant 0 : index
    %42 = vector.load %arg4[%c5, %c0_42, %c0_43] : memref<9x100x400xf32, #tpu.memory_space<vmem>>, vector<1x100x400xf32>
    %43 = vector.shape_cast %42 : vector<1x100x400xf32> to vector<100x400xf32>
    %cst_44 = arith.constant dense<0.000000e+00> : vector<100x16xf32>
    %44 = tpu.matmul %43, %7, %cst_44 {dimension_numbers = #tpu.dot_dimension_numbers<[1], [0], [0], [1], [0, 0, 1, 1], [], []>} : vector<100x400xf32>, vector<400x16xf32>, vector<100x16xf32> -> vector<100x16xf32>
    %c5_45 = arith.constant 5 : index
    %c0_46 = arith.constant 0 : index
    %c0_47 = arith.constant 0 : index
    %45 = vector.load %arg5[%c5_45, %c0_46, %c0_47] : memref<9x16x32xf32, #tpu.memory_space<vmem>>, vector<1x16x32xf32>
    %46 = vector.shape_cast %45 : vector<1x16x32xf32> to vector<16x32xf32>
    %cst_48 = arith.constant dense<0.000000e+00> : vector<100x32xf32>
    %47 = tpu.matmul %44, %46, %cst_48 {dimension_numbers = #tpu.dot_dimension_numbers<[1], [0], [0], [1], [0, 0, 1, 1], [], []>} : vector<100x16xf32>, vector<16x32xf32>, vector<100x32xf32> -> vector<100x32xf32>
    %48 = arith.addf %41, %47 : vector<100x32xf32>
    %c6 = arith.constant 6 : index
    %c0_49 = arith.constant 0 : index
    %c0_50 = arith.constant 0 : index
    %49 = vector.load %arg4[%c6, %c0_49, %c0_50] : memref<9x100x400xf32, #tpu.memory_space<vmem>>, vector<1x100x400xf32>
    %50 = vector.shape_cast %49 : vector<1x100x400xf32> to vector<100x400xf32>
    %cst_51 = arith.constant dense<0.000000e+00> : vector<100x16xf32>
    %51 = tpu.matmul %50, %7, %cst_51 {dimension_numbers = #tpu.dot_dimension_numbers<[1], [0], [0], [1], [0, 0, 1, 1], [], []>} : vector<100x400xf32>, vector<400x16xf32>, vector<100x16xf32> -> vector<100x16xf32>
    %c6_52 = arith.constant 6 : index
    %c0_53 = arith.constant 0 : index
    %c0_54 = arith.constant 0 : index
    %52 = vector.load %arg5[%c6_52, %c0_53, %c0_54] : memref<9x16x32xf32, #tpu.memory_space<vmem>>, vector<1x16x32xf32>
    %53 = vector.shape_cast %52 : vector<1x16x32xf32> to vector<16x32xf32>
    %cst_55 = arith.constant dense<0.000000e+00> : vector<100x32xf32>
    %54 = tpu.matmul %51, %53, %cst_55 {dimension_numbers = #tpu.dot_dimension_numbers<[1], [0], [0], [1], [0, 0, 1, 1], [], []>} : vector<100x16xf32>, vector<16x32xf32>, vector<100x32xf32> -> vector<100x32xf32>
    %55 = arith.addf %48, %54 : vector<100x32xf32>
    %c7 = arith.constant 7 : index
    %c0_56 = arith.constant 0 : index
    %c0_57 = arith.constant 0 : index
    %56 = vector.load %arg4[%c7, %c0_56, %c0_57] : memref<9x100x400xf32, #tpu.memory_space<vmem>>, vector<1x100x400xf32>
    %57 = vector.shape_cast %56 : vector<1x100x400xf32> to vector<100x400xf32>
    %cst_58 = arith.constant dense<0.000000e+00> : vector<100x16xf32>
    %58 = tpu.matmul %57, %7, %cst_58 {dimension_numbers = #tpu.dot_dimension_numbers<[1], [0], [0], [1], [0, 0, 1, 1], [], []>} : vector<100x400xf32>, vector<400x16xf32>, vector<100x16xf32> -> vector<100x16xf32>
    %c7_59 = arith.constant 7 : index
    %c0_60 = arith.constant 0 : index
    %c0_61 = arith.constant 0 : index
    %59 = vector.load %arg5[%c7_59, %c0_60, %c0_61] : memref<9x16x32xf32, #tpu.memory_space<vmem>>, vector<1x16x32xf32>
    %60 = vector.shape_cast %59 : vector<1x16x32xf32> to vector<16x32xf32>
    %cst_62 = arith.constant dense<0.000000e+00> : vector<100x32xf32>
    %61 = tpu.matmul %58, %60, %cst_62 {dimension_numbers = #tpu.dot_dimension_numbers<[1], [0], [0], [1], [0, 0, 1, 1], [], []>} : vector<100x16xf32>, vector<16x32xf32>, vector<100x32xf32> -> vector<100x32xf32>
    %62 = arith.addf %55, %61 : vector<100x32xf32>
    %c8 = arith.constant 8 : index
    %c0_63 = arith.constant 0 : index
    %c0_64 = arith.constant 0 : index
    %63 = vector.load %arg4[%c8, %c0_63, %c0_64] : memref<9x100x400xf32, #tpu.memory_space<vmem>>, vector<1x100x400xf32>
    %64 = vector.shape_cast %63 : vector<1x100x400xf32> to vector<100x400xf32>
    %cst_65 = arith.constant dense<0.000000e+00> : vector<100x16xf32>
    %65 = tpu.matmul %64, %7, %cst_65 {dimension_numbers = #tpu.dot_dimension_numbers<[1], [0], [0], [1], [0, 0, 1, 1], [], []>} : vector<100x400xf32>, vector<400x16xf32>, vector<100x16xf32> -> vector<100x16xf32>
    %c8_66 = arith.constant 8 : index
    %c0_67 = arith.constant 0 : index
    %c0_68 = arith.constant 0 : index
    %66 = vector.load %arg5[%c8_66, %c0_67, %c0_68] : memref<9x16x32xf32, #tpu.memory_space<vmem>>, vector<1x16x32xf32>
    %67 = vector.shape_cast %66 : vector<1x16x32xf32> to vector<16x32xf32>
    %cst_69 = arith.constant dense<0.000000e+00> : vector<100x32xf32>
    %68 = tpu.matmul %65, %67, %cst_69 {dimension_numbers = #tpu.dot_dimension_numbers<[1], [0], [0], [1], [0, 0, 1, 1], [], []>} : vector<100x16xf32>, vector<16x32xf32>, vector<100x32xf32> -> vector<100x32xf32>
    %69 = arith.addf %62, %68 : vector<100x32xf32>
    %c0_70 = arith.constant 0 : index
    %c0_71 = arith.constant 0 : index
    %70 = vector.load %arg6[%c0_70, %c0_71] : memref<1x32xf32, #tpu.memory_space<vmem>>, vector<1x32xf32>
    %71 = vector.broadcast %70 : vector<1x32xf32> to vector<100x32xf32>
    %72 = arith.addf %69, %71 : vector<100x32xf32>
    %cst_72 = arith.constant 0.000000e+00 : f32
    %73 = vector.broadcast %cst_72 : f32 to vector<100x32xf32>
    %74 = arith.maximumf %72, %73 : vector<100x32xf32>
    %c0_73 = arith.constant 0 : index
    %c0_74 = arith.constant 0 : index
    %c0_75 = arith.constant 0 : index
    %75 = vector.load %arg7[%c0_73, %c0_74, %c0_75] : memref<9x25x100xf32, #tpu.memory_space<vmem>>, vector<1x25x100xf32>
    %76 = vector.shape_cast %75 : vector<1x25x100xf32> to vector<25x100xf32>
    %cst_76 = arith.constant dense<0.000000e+00> : vector<25x32xf32>
    %77 = tpu.matmul %76, %74, %cst_76 {dimension_numbers = #tpu.dot_dimension_numbers<[1], [0], [0], [1], [0, 0, 1, 1], [], []>} : vector<25x100xf32>, vector<100x32xf32>, vector<25x32xf32> -> vector<25x32xf32>
    %c0_77 = arith.constant 0 : index
    %c0_78 = arith.constant 0 : index
    %c0_79 = arith.constant 0 : index
    %78 = vector.load %arg8[%c0_77, %c0_78, %c0_79] : memref<9x32x64xf32, #tpu.memory_space<vmem>>, vector<1x32x64xf32>
    %79 = vector.shape_cast %78 : vector<1x32x64xf32> to vector<32x64xf32>
    %cst_80 = arith.constant dense<0.000000e+00> : vector<25x64xf32>
    %80 = tpu.matmul %77, %79, %cst_80 {dimension_numbers = #tpu.dot_dimension_numbers<[1], [0], [0], [1], [0, 0, 1, 1], [], []>} : vector<25x32xf32>, vector<32x64xf32>, vector<25x64xf32> -> vector<25x64xf32>
    %c1_81 = arith.constant 1 : index
    %c0_82 = arith.constant 0 : index
    %c0_83 = arith.constant 0 : index
    %81 = vector.load %arg7[%c1_81, %c0_82, %c0_83] : memref<9x25x100xf32, #tpu.memory_space<vmem>>, vector<1x25x100xf32>
    %82 = vector.shape_cast %81 : vector<1x25x100xf32> to vector<25x100xf32>
    %cst_84 = arith.constant dense<0.000000e+00> : vector<25x32xf32>
    %83 = tpu.matmul %82, %74, %cst_84 {dimension_numbers = #tpu.dot_dimension_numbers<[1], [0], [0], [1], [0, 0, 1, 1], [], []>} : vector<25x100xf32>, vector<100x32xf32>, vector<25x32xf32> -> vector<25x32xf32>
    %c1_85 = arith.constant 1 : index
    %c0_86 = arith.constant 0 : index
    %c0_87 = arith.constant 0 : index
    %84 = vector.load %arg8[%c1_85, %c0_86, %c0_87] : memref<9x32x64xf32, #tpu.memory_space<vmem>>, vector<1x32x64xf32>
    %85 = vector.shape_cast %84 : vector<1x32x64xf32> to vector<32x64xf32>
    %cst_88 = arith.constant dense<0.000000e+00> : vector<25x64xf32>
    %86 = tpu.matmul %83, %85, %cst_88 {dimension_numbers = #tpu.dot_dimension_numbers<[1], [0], [0], [1], [0, 0, 1, 1], [], []>} : vector<25x32xf32>, vector<32x64xf32>, vector<25x64xf32> -> vector<25x64xf32>
    %87 = arith.addf %80, %86 : vector<25x64xf32>
    %c2_89 = arith.constant 2 : index
    %c0_90 = arith.constant 0 : index
    %c0_91 = arith.constant 0 : index
    %88 = vector.load %arg7[%c2_89, %c0_90, %c0_91] : memref<9x25x100xf32, #tpu.memory_space<vmem>>, vector<1x25x100xf32>
    %89 = vector.shape_cast %88 : vector<1x25x100xf32> to vector<25x100xf32>
    %cst_92 = arith.constant dense<0.000000e+00> : vector<25x32xf32>
    %90 = tpu.matmul %89, %74, %cst_92 {dimension_numbers = #tpu.dot_dimension_numbers<[1], [0], [0], [1], [0, 0, 1, 1], [], []>} : vector<25x100xf32>, vector<100x32xf32>, vector<25x32xf32> -> vector<25x32xf32>
    %c2_93 = arith.constant 2 : index
    %c0_94 = arith.constant 0 : index
    %c0_95 = arith.constant 0 : index
    %91 = vector.load %arg8[%c2_93, %c0_94, %c0_95] : memref<9x32x64xf32, #tpu.memory_space<vmem>>, vector<1x32x64xf32>
    %92 = vector.shape_cast %91 : vector<1x32x64xf32> to vector<32x64xf32>
    %cst_96 = arith.constant dense<0.000000e+00> : vector<25x64xf32>
    %93 = tpu.matmul %90, %92, %cst_96 {dimension_numbers = #tpu.dot_dimension_numbers<[1], [0], [0], [1], [0, 0, 1, 1], [], []>} : vector<25x32xf32>, vector<32x64xf32>, vector<25x64xf32> -> vector<25x64xf32>
    %94 = arith.addf %87, %93 : vector<25x64xf32>
    %c3_97 = arith.constant 3 : index
    %c0_98 = arith.constant 0 : index
    %c0_99 = arith.constant 0 : index
    %95 = vector.load %arg7[%c3_97, %c0_98, %c0_99] : memref<9x25x100xf32, #tpu.memory_space<vmem>>, vector<1x25x100xf32>
    %96 = vector.shape_cast %95 : vector<1x25x100xf32> to vector<25x100xf32>
    %cst_100 = arith.constant dense<0.000000e+00> : vector<25x32xf32>
    %97 = tpu.matmul %96, %74, %cst_100 {dimension_numbers = #tpu.dot_dimension_numbers<[1], [0], [0], [1], [0, 0, 1, 1], [], []>} : vector<25x100xf32>, vector<100x32xf32>, vector<25x32xf32> -> vector<25x32xf32>
    %c3_101 = arith.constant 3 : index
    %c0_102 = arith.constant 0 : index
    %c0_103 = arith.constant 0 : index
    %98 = vector.load %arg8[%c3_101, %c0_102, %c0_103] : memref<9x32x64xf32, #tpu.memory_space<vmem>>, vector<1x32x64xf32>
    %99 = vector.shape_cast %98 : vector<1x32x64xf32> to vector<32x64xf32>
    %cst_104 = arith.constant dense<0.000000e+00> : vector<25x64xf32>
    %100 = tpu.matmul %97, %99, %cst_104 {dimension_numbers = #tpu.dot_dimension_numbers<[1], [0], [0], [1], [0, 0, 1, 1], [], []>} : vector<25x32xf32>, vector<32x64xf32>, vector<25x64xf32> -> vector<25x64xf32>
    %101 = arith.addf %94, %100 : vector<25x64xf32>
    %c4_105 = arith.constant 4 : index
    %c0_106 = arith.constant 0 : index
    %c0_107 = arith.constant 0 : index
    %102 = vector.load %arg7[%c4_105, %c0_106, %c0_107] : memref<9x25x100xf32, #tpu.memory_space<vmem>>, vector<1x25x100xf32>
    %103 = vector.shape_cast %102 : vector<1x25x100xf32> to vector<25x100xf32>
    %cst_108 = arith.constant dense<0.000000e+00> : vector<25x32xf32>
    %104 = tpu.matmul %103, %74, %cst_108 {dimension_numbers = #tpu.dot_dimension_numbers<[1], [0], [0], [1], [0, 0, 1, 1], [], []>} : vector<25x100xf32>, vector<100x32xf32>, vector<25x32xf32> -> vector<25x32xf32>
    %c4_109 = arith.constant 4 : index
    %c0_110 = arith.constant 0 : index
    %c0_111 = arith.constant 0 : index
    %105 = vector.load %arg8[%c4_109, %c0_110, %c0_111] : memref<9x32x64xf32, #tpu.memory_space<vmem>>, vector<1x32x64xf32>
    %106 = vector.shape_cast %105 : vector<1x32x64xf32> to vector<32x64xf32>
    %cst_112 = arith.constant dense<0.000000e+00> : vector<25x64xf32>
    %107 = tpu.matmul %104, %106, %cst_112 {dimension_numbers = #tpu.dot_dimension_numbers<[1], [0], [0], [1], [0, 0, 1, 1], [], []>} : vector<25x32xf32>, vector<32x64xf32>, vector<25x64xf32> -> vector<25x64xf32>
    %108 = arith.addf %101, %107 : vector<25x64xf32>
    %c5_113 = arith.constant 5 : index
    %c0_114 = arith.constant 0 : index
    %c0_115 = arith.constant 0 : index
    %109 = vector.load %arg7[%c5_113, %c0_114, %c0_115] : memref<9x25x100xf32, #tpu.memory_space<vmem>>, vector<1x25x100xf32>
    %110 = vector.shape_cast %109 : vector<1x25x100xf32> to vector<25x100xf32>
    %cst_116 = arith.constant dense<0.000000e+00> : vector<25x32xf32>
    %111 = tpu.matmul %110, %74, %cst_116 {dimension_numbers = #tpu.dot_dimension_numbers<[1], [0], [0], [1], [0, 0, 1, 1], [], []>} : vector<25x100xf32>, vector<100x32xf32>, vector<25x32xf32> -> vector<25x32xf32>
    %c5_117 = arith.constant 5 : index
    %c0_118 = arith.constant 0 : index
    %c0_119 = arith.constant 0 : index
    %112 = vector.load %arg8[%c5_117, %c0_118, %c0_119] : memref<9x32x64xf32, #tpu.memory_space<vmem>>, vector<1x32x64xf32>
    %113 = vector.shape_cast %112 : vector<1x32x64xf32> to vector<32x64xf32>
    %cst_120 = arith.constant dense<0.000000e+00> : vector<25x64xf32>
    %114 = tpu.matmul %111, %113, %cst_120 {dimension_numbers = #tpu.dot_dimension_numbers<[1], [0], [0], [1], [0, 0, 1, 1], [], []>} : vector<25x32xf32>, vector<32x64xf32>, vector<25x64xf32> -> vector<25x64xf32>
    %115 = arith.addf %108, %114 : vector<25x64xf32>
    %c6_121 = arith.constant 6 : index
    %c0_122 = arith.constant 0 : index
    %c0_123 = arith.constant 0 : index
    %116 = vector.load %arg7[%c6_121, %c0_122, %c0_123] : memref<9x25x100xf32, #tpu.memory_space<vmem>>, vector<1x25x100xf32>
    %117 = vector.shape_cast %116 : vector<1x25x100xf32> to vector<25x100xf32>
    %cst_124 = arith.constant dense<0.000000e+00> : vector<25x32xf32>
    %118 = tpu.matmul %117, %74, %cst_124 {dimension_numbers = #tpu.dot_dimension_numbers<[1], [0], [0], [1], [0, 0, 1, 1], [], []>} : vector<25x100xf32>, vector<100x32xf32>, vector<25x32xf32> -> vector<25x32xf32>
    %c6_125 = arith.constant 6 : index
    %c0_126 = arith.constant 0 : index
    %c0_127 = arith.constant 0 : index
    %119 = vector.load %arg8[%c6_125, %c0_126, %c0_127] : memref<9x32x64xf32, #tpu.memory_space<vmem>>, vector<1x32x64xf32>
    %120 = vector.shape_cast %119 : vector<1x32x64xf32> to vector<32x64xf32>
    %cst_128 = arith.constant dense<0.000000e+00> : vector<25x64xf32>
    %121 = tpu.matmul %118, %120, %cst_128 {dimension_numbers = #tpu.dot_dimension_numbers<[1], [0], [0], [1], [0, 0, 1, 1], [], []>} : vector<25x32xf32>, vector<32x64xf32>, vector<25x64xf32> -> vector<25x64xf32>
    %122 = arith.addf %115, %121 : vector<25x64xf32>
    %c7_129 = arith.constant 7 : index
    %c0_130 = arith.constant 0 : index
    %c0_131 = arith.constant 0 : index
    %123 = vector.load %arg7[%c7_129, %c0_130, %c0_131] : memref<9x25x100xf32, #tpu.memory_space<vmem>>, vector<1x25x100xf32>
    %124 = vector.shape_cast %123 : vector<1x25x100xf32> to vector<25x100xf32>
    %cst_132 = arith.constant dense<0.000000e+00> : vector<25x32xf32>
    %125 = tpu.matmul %124, %74, %cst_132 {dimension_numbers = #tpu.dot_dimension_numbers<[1], [0], [0], [1], [0, 0, 1, 1], [], []>} : vector<25x100xf32>, vector<100x32xf32>, vector<25x32xf32> -> vector<25x32xf32>
    %c7_133 = arith.constant 7 : index
    %c0_134 = arith.constant 0 : index
    %c0_135 = arith.constant 0 : index
    %126 = vector.load %arg8[%c7_133, %c0_134, %c0_135] : memref<9x32x64xf32, #tpu.memory_space<vmem>>, vector<1x32x64xf32>
    %127 = vector.shape_cast %126 : vector<1x32x64xf32> to vector<32x64xf32>
    %cst_136 = arith.constant dense<0.000000e+00> : vector<25x64xf32>
    %128 = tpu.matmul %125, %127, %cst_136 {dimension_numbers = #tpu.dot_dimension_numbers<[1], [0], [0], [1], [0, 0, 1, 1], [], []>} : vector<25x32xf32>, vector<32x64xf32>, vector<25x64xf32> -> vector<25x64xf32>
    %129 = arith.addf %122, %128 : vector<25x64xf32>
    %c8_137 = arith.constant 8 : index
    %c0_138 = arith.constant 0 : index
    %c0_139 = arith.constant 0 : index
    %130 = vector.load %arg7[%c8_137, %c0_138, %c0_139] : memref<9x25x100xf32, #tpu.memory_space<vmem>>, vector<1x25x100xf32>
    %131 = vector.shape_cast %130 : vector<1x25x100xf32> to vector<25x100xf32>
    %cst_140 = arith.constant dense<0.000000e+00> : vector<25x32xf32>
    %132 = tpu.matmul %131, %74, %cst_140 {dimension_numbers = #tpu.dot_dimension_numbers<[1], [0], [0], [1], [0, 0, 1, 1], [], []>} : vector<25x100xf32>, vector<100x32xf32>, vector<25x32xf32> -> vector<25x32xf32>
    %c8_141 = arith.constant 8 : index
    %c0_142 = arith.constant 0 : index
    %c0_143 = arith.constant 0 : index
    %133 = vector.load %arg8[%c8_141, %c0_142, %c0_143] : memref<9x32x64xf32, #tpu.memory_space<vmem>>, vector<1x32x64xf32>
    %134 = vector.shape_cast %133 : vector<1x32x64xf32> to vector<32x64xf32>
    %cst_144 = arith.constant dense<0.000000e+00> : vector<25x64xf32>
    %135 = tpu.matmul %132, %134, %cst_144 {dimension_numbers = #tpu.dot_dimension_numbers<[1], [0], [0], [1], [0, 0, 1, 1], [], []>} : vector<25x32xf32>, vector<32x64xf32>, vector<25x64xf32> -> vector<25x64xf32>
    %136 = arith.addf %129, %135 : vector<25x64xf32>
    %c0_145 = arith.constant 0 : index
    %c0_146 = arith.constant 0 : index
    %137 = vector.load %arg9[%c0_145, %c0_146] : memref<1x64xf32, #tpu.memory_space<vmem>>, vector<1x64xf32>
    %138 = vector.broadcast %137 : vector<1x64xf32> to vector<25x64xf32>
    %139 = arith.addf %136, %138 : vector<25x64xf32>
    %cst_147 = arith.constant 0.000000e+00 : f32
    %140 = vector.broadcast %cst_147 : f32 to vector<25x64xf32>
    %141 = arith.maximumf %139, %140 : vector<25x64xf32>
    %c0_148 = arith.constant 0 : index
    %c0_149 = arith.constant 0 : index
    %c0_150 = arith.constant 0 : index
    %142 = vector.load %arg10[%c0_148, %c0_149, %c0_150] : memref<9x9x25xf32, #tpu.memory_space<vmem>>, vector<1x9x25xf32>
    %143 = vector.shape_cast %142 : vector<1x9x25xf32> to vector<9x25xf32>
    %cst_151 = arith.constant dense<0.000000e+00> : vector<9x64xf32>
    %144 = tpu.matmul %143, %141, %cst_151 {dimension_numbers = #tpu.dot_dimension_numbers<[1], [0], [0], [1], [0, 0, 1, 1], [], []>} : vector<9x25xf32>, vector<25x64xf32>, vector<9x64xf32> -> vector<9x64xf32>
    %c0_152 = arith.constant 0 : index
    %c0_153 = arith.constant 0 : index
    %c0_154 = arith.constant 0 : index
    %145 = vector.load %arg11[%c0_152, %c0_153, %c0_154] : memref<9x64x64xf32, #tpu.memory_space<vmem>>, vector<1x64x64xf32>
    %146 = vector.shape_cast %145 : vector<1x64x64xf32> to vector<64x64xf32>
    %cst_155 = arith.constant dense<0.000000e+00> : vector<9x64xf32>
    %147 = tpu.matmul %144, %146, %cst_155 {dimension_numbers = #tpu.dot_dimension_numbers<[1], [0], [0], [1], [0, 0, 1, 1], [], []>} : vector<9x64xf32>, vector<64x64xf32>, vector<9x64xf32> -> vector<9x64xf32>
    %c1_156 = arith.constant 1 : index
    %c0_157 = arith.constant 0 : index
    %c0_158 = arith.constant 0 : index
    %148 = vector.load %arg10[%c1_156, %c0_157, %c0_158] : memref<9x9x25xf32, #tpu.memory_space<vmem>>, vector<1x9x25xf32>
    %149 = vector.shape_cast %148 : vector<1x9x25xf32> to vector<9x25xf32>
    %cst_159 = arith.constant dense<0.000000e+00> : vector<9x64xf32>
    %150 = tpu.matmul %149, %141, %cst_159 {dimension_numbers = #tpu.dot_dimension_numbers<[1], [0], [0], [1], [0, 0, 1, 1], [], []>} : vector<9x25xf32>, vector<25x64xf32>, vector<9x64xf32> -> vector<9x64xf32>
    %c1_160 = arith.constant 1 : index
    %c0_161 = arith.constant 0 : index
    %c0_162 = arith.constant 0 : index
    %151 = vector.load %arg11[%c1_160, %c0_161, %c0_162] : memref<9x64x64xf32, #tpu.memory_space<vmem>>, vector<1x64x64xf32>
    %152 = vector.shape_cast %151 : vector<1x64x64xf32> to vector<64x64xf32>
    %cst_163 = arith.constant dense<0.000000e+00> : vector<9x64xf32>
    %153 = tpu.matmul %150, %152, %cst_163 {dimension_numbers = #tpu.dot_dimension_numbers<[1], [0], [0], [1], [0, 0, 1, 1], [], []>} : vector<9x64xf32>, vector<64x64xf32>, vector<9x64xf32> -> vector<9x64xf32>
    %154 = arith.addf %147, %153 : vector<9x64xf32>
    %c2_164 = arith.constant 2 : index
    %c0_165 = arith.constant 0 : index
    %c0_166 = arith.constant 0 : index
    %155 = vector.load %arg10[%c2_164, %c0_165, %c0_166] : memref<9x9x25xf32, #tpu.memory_space<vmem>>, vector<1x9x25xf32>
    %156 = vector.shape_cast %155 : vector<1x9x25xf32> to vector<9x25xf32>
    %cst_167 = arith.constant dense<0.000000e+00> : vector<9x64xf32>
    %157 = tpu.matmul %156, %141, %cst_167 {dimension_numbers = #tpu.dot_dimension_numbers<[1], [0], [0], [1], [0, 0, 1, 1], [], []>} : vector<9x25xf32>, vector<25x64xf32>, vector<9x64xf32> -> vector<9x64xf32>
    %c2_168 = arith.constant 2 : index
    %c0_169 = arith.constant 0 : index
    %c0_170 = arith.constant 0 : index
    %158 = vector.load %arg11[%c2_168, %c0_169, %c0_170] : memref<9x64x64xf32, #tpu.memory_space<vmem>>, vector<1x64x64xf32>
    %159 = vector.shape_cast %158 : vector<1x64x64xf32> to vector<64x64xf32>
    %cst_171 = arith.constant dense<0.000000e+00> : vector<9x64xf32>
    %160 = tpu.matmul %157, %159, %cst_171 {dimension_numbers = #tpu.dot_dimension_numbers<[1], [0], [0], [1], [0, 0, 1, 1], [], []>} : vector<9x64xf32>, vector<64x64xf32>, vector<9x64xf32> -> vector<9x64xf32>
    %161 = arith.addf %154, %160 : vector<9x64xf32>
    %c3_172 = arith.constant 3 : index
    %c0_173 = arith.constant 0 : index
    %c0_174 = arith.constant 0 : index
    %162 = vector.load %arg10[%c3_172, %c0_173, %c0_174] : memref<9x9x25xf32, #tpu.memory_space<vmem>>, vector<1x9x25xf32>
    %163 = vector.shape_cast %162 : vector<1x9x25xf32> to vector<9x25xf32>
    %cst_175 = arith.constant dense<0.000000e+00> : vector<9x64xf32>
    %164 = tpu.matmul %163, %141, %cst_175 {dimension_numbers = #tpu.dot_dimension_numbers<[1], [0], [0], [1], [0, 0, 1, 1], [], []>} : vector<9x25xf32>, vector<25x64xf32>, vector<9x64xf32> -> vector<9x64xf32>
    %c3_176 = arith.constant 3 : index
    %c0_177 = arith.constant 0 : index
    %c0_178 = arith.constant 0 : index
    %165 = vector.load %arg11[%c3_176, %c0_177, %c0_178] : memref<9x64x64xf32, #tpu.memory_space<vmem>>, vector<1x64x64xf32>
    %166 = vector.shape_cast %165 : vector<1x64x64xf32> to vector<64x64xf32>
    %cst_179 = arith.constant dense<0.000000e+00> : vector<9x64xf32>
    %167 = tpu.matmul %164, %166, %cst_179 {dimension_numbers = #tpu.dot_dimension_numbers<[1], [0], [0], [1], [0, 0, 1, 1], [], []>} : vector<9x64xf32>, vector<64x64xf32>, vector<9x64xf32> -> vector<9x64xf32>
    %168 = arith.addf %161, %167 : vector<9x64xf32>
    %c4_180 = arith.constant 4 : index
    %c0_181 = arith.constant 0 : index
    %c0_182 = arith.constant 0 : index
    %169 = vector.load %arg10[%c4_180, %c0_181, %c0_182] : memref<9x9x25xf32, #tpu.memory_space<vmem>>, vector<1x9x25xf32>
    %170 = vector.shape_cast %169 : vector<1x9x25xf32> to vector<9x25xf32>
    %cst_183 = arith.constant dense<0.000000e+00> : vector<9x64xf32>
    %171 = tpu.matmul %170, %141, %cst_183 {dimension_numbers = #tpu.dot_dimension_numbers<[1], [0], [0], [1], [0, 0, 1, 1], [], []>} : vector<9x25xf32>, vector<25x64xf32>, vector<9x64xf32> -> vector<9x64xf32>
    %c4_184 = arith.constant 4 : index
    %c0_185 = arith.constant 0 : index
    %c0_186 = arith.constant 0 : index
    %172 = vector.load %arg11[%c4_184, %c0_185, %c0_186] : memref<9x64x64xf32, #tpu.memory_space<vmem>>, vector<1x64x64xf32>
    %173 = vector.shape_cast %172 : vector<1x64x64xf32> to vector<64x64xf32>
    %cst_187 = arith.constant dense<0.000000e+00> : vector<9x64xf32>
    %174 = tpu.matmul %171, %173, %cst_187 {dimension_numbers = #tpu.dot_dimension_numbers<[1], [0], [0], [1], [0, 0, 1, 1], [], []>} : vector<9x64xf32>, vector<64x64xf32>, vector<9x64xf32> -> vector<9x64xf32>
    %175 = arith.addf %168, %174 : vector<9x64xf32>
    %c5_188 = arith.constant 5 : index
    %c0_189 = arith.constant 0 : index
    %c0_190 = arith.constant 0 : index
    %176 = vector.load %arg10[%c5_188, %c0_189, %c0_190] : memref<9x9x25xf32, #tpu.memory_space<vmem>>, vector<1x9x25xf32>
    %177 = vector.shape_cast %176 : vector<1x9x25xf32> to vector<9x25xf32>
    %cst_191 = arith.constant dense<0.000000e+00> : vector<9x64xf32>
    %178 = tpu.matmul %177, %141, %cst_191 {dimension_numbers = #tpu.dot_dimension_numbers<[1], [0], [0], [1], [0, 0, 1, 1], [], []>} : vector<9x25xf32>, vector<25x64xf32>, vector<9x64xf32> -> vector<9x64xf32>
    %c5_192 = arith.constant 5 : index
    %c0_193 = arith.constant 0 : index
    %c0_194 = arith.constant 0 : index
    %179 = vector.load %arg11[%c5_192, %c0_193, %c0_194] : memref<9x64x64xf32, #tpu.memory_space<vmem>>, vector<1x64x64xf32>
    %180 = vector.shape_cast %179 : vector<1x64x64xf32> to vector<64x64xf32>
    %cst_195 = arith.constant dense<0.000000e+00> : vector<9x64xf32>
    %181 = tpu.matmul %178, %180, %cst_195 {dimension_numbers = #tpu.dot_dimension_numbers<[1], [0], [0], [1], [0, 0, 1, 1], [], []>} : vector<9x64xf32>, vector<64x64xf32>, vector<9x64xf32> -> vector<9x64xf32>
    %182 = arith.addf %175, %181 : vector<9x64xf32>
    %c6_196 = arith.constant 6 : index
    %c0_197 = arith.constant 0 : index
    %c0_198 = arith.constant 0 : index
    %183 = vector.load %arg10[%c6_196, %c0_197, %c0_198] : memref<9x9x25xf32, #tpu.memory_space<vmem>>, vector<1x9x25xf32>
    %184 = vector.shape_cast %183 : vector<1x9x25xf32> to vector<9x25xf32>
    %cst_199 = arith.constant dense<0.000000e+00> : vector<9x64xf32>
    %185 = tpu.matmul %184, %141, %cst_199 {dimension_numbers = #tpu.dot_dimension_numbers<[1], [0], [0], [1], [0, 0, 1, 1], [], []>} : vector<9x25xf32>, vector<25x64xf32>, vector<9x64xf32> -> vector<9x64xf32>
    %c6_200 = arith.constant 6 : index
    %c0_201 = arith.constant 0 : index
    %c0_202 = arith.constant 0 : index
    %186 = vector.load %arg11[%c6_200, %c0_201, %c0_202] : memref<9x64x64xf32, #tpu.memory_space<vmem>>, vector<1x64x64xf32>
    %187 = vector.shape_cast %186 : vector<1x64x64xf32> to vector<64x64xf32>
    %cst_203 = arith.constant dense<0.000000e+00> : vector<9x64xf32>
    %188 = tpu.matmul %185, %187, %cst_203 {dimension_numbers = #tpu.dot_dimension_numbers<[1], [0], [0], [1], [0, 0, 1, 1], [], []>} : vector<9x64xf32>, vector<64x64xf32>, vector<9x64xf32> -> vector<9x64xf32>
    %189 = arith.addf %182, %188 : vector<9x64xf32>
    %c7_204 = arith.constant 7 : index
    %c0_205 = arith.constant 0 : index
    %c0_206 = arith.constant 0 : index
    %190 = vector.load %arg10[%c7_204, %c0_205, %c0_206] : memref<9x9x25xf32, #tpu.memory_space<vmem>>, vector<1x9x25xf32>
    %191 = vector.shape_cast %190 : vector<1x9x25xf32> to vector<9x25xf32>
    %cst_207 = arith.constant dense<0.000000e+00> : vector<9x64xf32>
    %192 = tpu.matmul %191, %141, %cst_207 {dimension_numbers = #tpu.dot_dimension_numbers<[1], [0], [0], [1], [0, 0, 1, 1], [], []>} : vector<9x25xf32>, vector<25x64xf32>, vector<9x64xf32> -> vector<9x64xf32>
    %c7_208 = arith.constant 7 : index
    %c0_209 = arith.constant 0 : index
    %c0_210 = arith.constant 0 : index
    %193 = vector.load %arg11[%c7_208, %c0_209, %c0_210] : memref<9x64x64xf32, #tpu.memory_space<vmem>>, vector<1x64x64xf32>
    %194 = vector.shape_cast %193 : vector<1x64x64xf32> to vector<64x64xf32>
    %cst_211 = arith.constant dense<0.000000e+00> : vector<9x64xf32>
    %195 = tpu.matmul %192, %194, %cst_211 {dimension_numbers = #tpu.dot_dimension_numbers<[1], [0], [0], [1], [0, 0, 1, 1], [], []>} : vector<9x64xf32>, vector<64x64xf32>, vector<9x64xf32> -> vector<9x64xf32>
    %196 = arith.addf %189, %195 : vector<9x64xf32>
    %c8_212 = arith.constant 8 : index
    %c0_213 = arith.constant 0 : index
    %c0_214 = arith.constant 0 : index
    %197 = vector.load %arg10[%c8_212, %c0_213, %c0_214] : memref<9x9x25xf32, #tpu.memory_space<vmem>>, vector<1x9x25xf32>
    %198 = vector.shape_cast %197 : vector<1x9x25xf32> to vector<9x25xf32>
    %cst_215 = arith.constant dense<0.000000e+00> : vector<9x64xf32>
    %199 = tpu.matmul %198, %141, %cst_215 {dimension_numbers = #tpu.dot_dimension_numbers<[1], [0], [0], [1], [0, 0, 1, 1], [], []>} : vector<9x25xf32>, vector<25x64xf32>, vector<9x64xf32> -> vector<9x64xf32>
    %c8_216 = arith.constant 8 : index
    %c0_217 = arith.constant 0 : index
    %c0_218 = arith.constant 0 : index
    %200 = vector.load %arg11[%c8_216, %c0_217, %c0_218] : memref<9x64x64xf32, #tpu.memory_space<vmem>>, vector<1x64x64xf32>
    %201 = vector.shape_cast %200 : vector<1x64x64xf32> to vector<64x64xf32>
    %cst_219 = arith.constant dense<0.000000e+00> : vector<9x64xf32>
    %202 = tpu.matmul %199, %201, %cst_219 {dimension_numbers = #tpu.dot_dimension_numbers<[1], [0], [0], [1], [0, 0, 1, 1], [], []>} : vector<9x64xf32>, vector<64x64xf32>, vector<9x64xf32> -> vector<9x64xf32>
    %203 = arith.addf %196, %202 : vector<9x64xf32>
    %c0_220 = arith.constant 0 : index
    %c0_221 = arith.constant 0 : index
    %204 = vector.load %arg12[%c0_220, %c0_221] : memref<1x64xf32, #tpu.memory_space<vmem>>, vector<1x64xf32>
    %205 = vector.broadcast %204 : vector<1x64xf32> to vector<9x64xf32>
    %206 = arith.addf %203, %205 : vector<9x64xf32>
    %cst_222 = arith.constant 0.000000e+00 : f32
    %207 = vector.broadcast %cst_222 : f32 to vector<9x64xf32>
    %208 = arith.maximumf %206, %207 : vector<9x64xf32>
    %c0_223 = arith.constant 0 : index
    %c0_224 = arith.constant 0 : index
    %209 = vector.load %arg14[%c0_223, %c0_224] : memref<1x100xf32, #tpu.memory_space<vmem>>, vector<1x100xf32>
    %210 = vector.extract_strided_slice %208 {offsets = [0, 0], sizes = [1, 64], strides = [1, 1]} : vector<9x64xf32> to vector<1x64xf32>
    %c0_225 = arith.constant 0 : index
    %c0_226 = arith.constant 0 : index
    %c0_227 = arith.constant 0 : index
    %211 = vector.load %arg13[%c0_225, %c0_226, %c0_227] : memref<9x64x100xf32, #tpu.memory_space<vmem>>, vector<1x64x100xf32>
    %212 = vector.shape_cast %211 : vector<1x64x100xf32> to vector<64x100xf32>
    %cst_228 = arith.constant dense<0.000000e+00> : vector<1x100xf32>
    %213 = tpu.matmul %210, %212, %cst_228 {dimension_numbers = #tpu.dot_dimension_numbers<[1], [0], [0], [1], [0, 0, 1, 1], [], []>} : vector<1x64xf32>, vector<64x100xf32>, vector<1x100xf32> -> vector<1x100xf32>
    %214 = arith.addf %209, %213 : vector<1x100xf32>
    %215 = vector.extract_strided_slice %208 {offsets = [1, 0], sizes = [1, 64], strides = [1, 1]} : vector<9x64xf32> to vector<1x64xf32>
    %c1_229 = arith.constant 1 : index
    %c0_230 = arith.constant 0 : index
    %c0_231 = arith.constant 0 : index
    %216 = vector.load %arg13[%c1_229, %c0_230, %c0_231] : memref<9x64x100xf32, #tpu.memory_space<vmem>>, vector<1x64x100xf32>
    %217 = vector.shape_cast %216 : vector<1x64x100xf32> to vector<64x100xf32>
    %cst_232 = arith.constant dense<0.000000e+00> : vector<1x100xf32>
    %218 = tpu.matmul %215, %217, %cst_232 {dimension_numbers = #tpu.dot_dimension_numbers<[1], [0], [0], [1], [0, 0, 1, 1], [], []>} : vector<1x64xf32>, vector<64x100xf32>, vector<1x100xf32> -> vector<1x100xf32>
    %219 = arith.addf %214, %218 : vector<1x100xf32>
    %220 = vector.extract_strided_slice %208 {offsets = [2, 0], sizes = [1, 64], strides = [1, 1]} : vector<9x64xf32> to vector<1x64xf32>
    %c2_233 = arith.constant 2 : index
    %c0_234 = arith.constant 0 : index
    %c0_235 = arith.constant 0 : index
    %221 = vector.load %arg13[%c2_233, %c0_234, %c0_235] : memref<9x64x100xf32, #tpu.memory_space<vmem>>, vector<1x64x100xf32>
    %222 = vector.shape_cast %221 : vector<1x64x100xf32> to vector<64x100xf32>
    %cst_236 = arith.constant dense<0.000000e+00> : vector<1x100xf32>
    %223 = tpu.matmul %220, %222, %cst_236 {dimension_numbers = #tpu.dot_dimension_numbers<[1], [0], [0], [1], [0, 0, 1, 1], [], []>} : vector<1x64xf32>, vector<64x100xf32>, vector<1x100xf32> -> vector<1x100xf32>
    %224 = arith.addf %219, %223 : vector<1x100xf32>
    %225 = vector.extract_strided_slice %208 {offsets = [3, 0], sizes = [1, 64], strides = [1, 1]} : vector<9x64xf32> to vector<1x64xf32>
    %c3_237 = arith.constant 3 : index
    %c0_238 = arith.constant 0 : index
    %c0_239 = arith.constant 0 : index
    %226 = vector.load %arg13[%c3_237, %c0_238, %c0_239] : memref<9x64x100xf32, #tpu.memory_space<vmem>>, vector<1x64x100xf32>
    %227 = vector.shape_cast %226 : vector<1x64x100xf32> to vector<64x100xf32>
    %cst_240 = arith.constant dense<0.000000e+00> : vector<1x100xf32>
    %228 = tpu.matmul %225, %227, %cst_240 {dimension_numbers = #tpu.dot_dimension_numbers<[1], [0], [0], [1], [0, 0, 1, 1], [], []>} : vector<1x64xf32>, vector<64x100xf32>, vector<1x100xf32> -> vector<1x100xf32>
    %229 = arith.addf %224, %228 : vector<1x100xf32>
    %230 = vector.extract_strided_slice %208 {offsets = [4, 0], sizes = [1, 64], strides = [1, 1]} : vector<9x64xf32> to vector<1x64xf32>
    %c4_241 = arith.constant 4 : index
    %c0_242 = arith.constant 0 : index
    %c0_243 = arith.constant 0 : index
    %231 = vector.load %arg13[%c4_241, %c0_242, %c0_243] : memref<9x64x100xf32, #tpu.memory_space<vmem>>, vector<1x64x100xf32>
    %232 = vector.shape_cast %231 : vector<1x64x100xf32> to vector<64x100xf32>
    %cst_244 = arith.constant dense<0.000000e+00> : vector<1x100xf32>
    %233 = tpu.matmul %230, %232, %cst_244 {dimension_numbers = #tpu.dot_dimension_numbers<[1], [0], [0], [1], [0, 0, 1, 1], [], []>} : vector<1x64xf32>, vector<64x100xf32>, vector<1x100xf32> -> vector<1x100xf32>
    %234 = arith.addf %229, %233 : vector<1x100xf32>
    %235 = vector.extract_strided_slice %208 {offsets = [5, 0], sizes = [1, 64], strides = [1, 1]} : vector<9x64xf32> to vector<1x64xf32>
    %c5_245 = arith.constant 5 : index
    %c0_246 = arith.constant 0 : index
    %c0_247 = arith.constant 0 : index
    %236 = vector.load %arg13[%c5_245, %c0_246, %c0_247] : memref<9x64x100xf32, #tpu.memory_space<vmem>>, vector<1x64x100xf32>
    %237 = vector.shape_cast %236 : vector<1x64x100xf32> to vector<64x100xf32>
    %cst_248 = arith.constant dense<0.000000e+00> : vector<1x100xf32>
    %238 = tpu.matmul %235, %237, %cst_248 {dimension_numbers = #tpu.dot_dimension_numbers<[1], [0], [0], [1], [0, 0, 1, 1], [], []>} : vector<1x64xf32>, vector<64x100xf32>, vector<1x100xf32> -> vector<1x100xf32>
    %239 = arith.addf %234, %238 : vector<1x100xf32>
    %240 = vector.extract_strided_slice %208 {offsets = [6, 0], sizes = [1, 64], strides = [1, 1]} : vector<9x64xf32> to vector<1x64xf32>
    %c6_249 = arith.constant 6 : index
    %c0_250 = arith.constant 0 : index
    %c0_251 = arith.constant 0 : index
    %241 = vector.load %arg13[%c6_249, %c0_250, %c0_251] : memref<9x64x100xf32, #tpu.memory_space<vmem>>, vector<1x64x100xf32>
    %242 = vector.shape_cast %241 : vector<1x64x100xf32> to vector<64x100xf32>
    %cst_252 = arith.constant dense<0.000000e+00> : vector<1x100xf32>
    %243 = tpu.matmul %240, %242, %cst_252 {dimension_numbers = #tpu.dot_dimension_numbers<[1], [0], [0], [1], [0, 0, 1, 1], [], []>} : vector<1x64xf32>, vector<64x100xf32>, vector<1x100xf32> -> vector<1x100xf32>
    %244 = arith.addf %239, %243 : vector<1x100xf32>
    %245 = vector.extract_strided_slice %208 {offsets = [7, 0], sizes = [1, 64], strides = [1, 1]} : vector<9x64xf32> to vector<1x64xf32>
    %c7_253 = arith.constant 7 : index
    %c0_254 = arith.constant 0 : index
    %c0_255 = arith.constant 0 : index
    %246 = vector.load %arg13[%c7_253, %c0_254, %c0_255] : memref<9x64x100xf32, #tpu.memory_space<vmem>>, vector<1x64x100xf32>
    %247 = vector.shape_cast %246 : vector<1x64x100xf32> to vector<64x100xf32>
    %cst_256 = arith.constant dense<0.000000e+00> : vector<1x100xf32>
    %248 = tpu.matmul %245, %247, %cst_256 {dimension_numbers = #tpu.dot_dimension_numbers<[1], [0], [0], [1], [0, 0, 1, 1], [], []>} : vector<1x64xf32>, vector<64x100xf32>, vector<1x100xf32> -> vector<1x100xf32>
    %249 = arith.addf %244, %248 : vector<1x100xf32>
    %250 = vector.extract_strided_slice %208 {offsets = [8, 0], sizes = [1, 64], strides = [1, 1]} : vector<9x64xf32> to vector<1x64xf32>
    %c8_257 = arith.constant 8 : index
    %c0_258 = arith.constant 0 : index
    %c0_259 = arith.constant 0 : index
    %251 = vector.load %arg13[%c8_257, %c0_258, %c0_259] : memref<9x64x100xf32, #tpu.memory_space<vmem>>, vector<1x64x100xf32>
    %252 = vector.shape_cast %251 : vector<1x64x100xf32> to vector<64x100xf32>
    %cst_260 = arith.constant dense<0.000000e+00> : vector<1x100xf32>
    %253 = tpu.matmul %250, %252, %cst_260 {dimension_numbers = #tpu.dot_dimension_numbers<[1], [0], [0], [1], [0, 0, 1, 1], [], []>} : vector<1x64xf32>, vector<64x100xf32>, vector<1x100xf32> -> vector<1x100xf32>
    %254 = arith.addf %249, %253 : vector<1x100xf32>
    %c0_261 = arith.constant 0 : index
    %c0_262 = arith.constant 0 : index
    %255 = vector.load %arg15[%c0_261, %c0_262] : memref<100x20xf32, #tpu.memory_space<vmem>>, vector<100x20xf32>
    %cst_263 = arith.constant dense<0.000000e+00> : vector<1x20xf32>
    %256 = tpu.matmul %254, %255, %cst_263 {dimension_numbers = #tpu.dot_dimension_numbers<[1], [0], [0], [1], [0, 0, 1, 1], [], []>} : vector<1x100xf32>, vector<100x20xf32>, vector<1x20xf32> -> vector<1x20xf32>
    %c0_264 = arith.constant 0 : index
    %c0_265 = arith.constant 0 : index
    %257 = vector.load %arg16[%c0_264, %c0_265] : memref<1x20xf32, #tpu.memory_space<vmem>>, vector<1x20xf32>
    %258 = arith.addf %256, %257 : vector<1x20xf32>
    %c0_266 = arith.constant 0 : index
    %c0_267 = arith.constant 0 : index
    %259 = vector.load %arg17[%c0_266, %c0_267] : memref<20x5xf32, #tpu.memory_space<vmem>>, vector<20x5xf32>
    %cst_268 = arith.constant dense<0.000000e+00> : vector<1x5xf32>
    %260 = tpu.matmul %258, %259, %cst_268 {dimension_numbers = #tpu.dot_dimension_numbers<[1], [0], [0], [1], [0, 0, 1, 1], [], []>} : vector<1x20xf32>, vector<20x5xf32>, vector<1x5xf32> -> vector<1x5xf32>
    %c0_269 = arith.constant 0 : index
    %c0_270 = arith.constant 0 : index
    %261 = vector.load %arg18[%c0_269, %c0_270] : memref<1x5xf32, #tpu.memory_space<vmem>>, vector<1x5xf32>
    %262 = arith.addf %260, %261 : vector<1x5xf32>
    %c0_271 = arith.constant 0 : index
    %c0_272 = arith.constant 0 : index
    %c0_273 = arith.constant 0 : index
    %263 = vector.load %arg19[%c0_271, %c0_272, %c0_273] : memref<1x1x5xf32, #tpu.memory_space<vmem>>, vector<1x1x5xf32>
    %264 = vector.shape_cast %263 : vector<1x1x5xf32> to vector<1x5xf32>
    %265 = vector.shape_cast %262 : vector<1x5xf32> to vector<1x1x5xf32>
    tpu.vector_store %arg19[%c0_271, %c0_272, %c0_273], %265 {strides = array<i32>} : memref<1x1x5xf32, #tpu.memory_space<vmem>>, vector<1x1x5xf32>,
    return
  }
  func.func @transform_0(%arg0: i32) -> (i32, i32) {
    %c0_i32 = arith.constant 0 : i32
    %c0_i32_0 = arith.constant 0 : i32
    return %arg0, %c0_i32 : i32, i32
  }
  func.func @transform_1(%arg0: i32) -> (i32, i32) {
    %c0_i32 = arith.constant 0 : i32
    %c0_i32_0 = arith.constant 0 : i32
    %c0_i32_1 = arith.constant 0 : i32
    return %c0_i32, %c0_i32_0 : i32, i32
  }
  func.func @transform_2(%arg0: i32) -> (i32, i32) {
    %c0_i32 = arith.constant 0 : i32
    %c0_i32_0 = arith.constant 0 : i32
    %c0_i32_1 = arith.constant 0 : i32
    return %c0_i32, %c0_i32_0 : i32, i32
  }
  func.func @transform_3(%arg0: i32) -> (i32, i32, i32) {
    %c0_i32 = arith.constant 0 : i32
    %c0_i32_0 = arith.constant 0 : i32
    %c0_i32_1 = arith.constant 0 : i32
    %c0_i32_2 = arith.constant 0 : i32
    return %c0_i32, %c0_i32_0, %c0_i32_1 : i32, i32, i32
  }
  func.func @transform_4(%arg0: i32) -> (i32, i32, i32) {
    %c0_i32 = arith.constant 0 : i32
    %c0_i32_0 = arith.constant 0 : i32
    %c0_i32_1 = arith.constant 0 : i32
    %c0_i32_2 = arith.constant 0 : i32
    return %c0_i32, %c0_i32_0, %c0_i32_1 : i32, i32, i32
  }
  func.func @transform_5(%arg0: i32) -> (i32, i32) {
    %c0_i32 = arith.constant 0 : i32
    %c0_i32_0 = arith.constant 0 : i32
    %c0_i32_1 = arith.constant 0 : i32
    return %c0_i32, %c0_i32_0 : i32, i32
  }
  func.func @transform_6(%arg0: i32) -> (i32, i32, i32) {
    %c0_i32 = arith.constant 0 : i32
    %c0_i32_0 = arith.constant 0 : i32
    %c0_i32_1 = arith.constant 0 : i32
    %c0_i32_2 = arith.constant 0 : i32
    return %c0_i32, %c0_i32_0, %c0_i32_1 : i32, i32, i32
  }
  func.func @transform_7(%arg0: i32) -> (i32, i32, i32) {
    %c0_i32 = arith.constant 0 : i32
    %c0_i32_0 = arith.constant 0 : i32
    %c0_i32_1 = arith.constant 0 : i32
    %c0_i32_2 = arith.constant 0 : i32
    return %c0_i32, %c0_i32_0, %c0_i32_1 : i32, i32, i32
  }
  func.func @transform_8(%arg0: i32) -> (i32, i32) {
    %c0_i32 = arith.constant 0 : i32
    %c0_i32_0 = arith.constant 0 : i32
    %c0_i32_1 = arith.constant 0 : i32
    return %c0_i32, %c0_i32_0 : i32, i32
  }
  func.func @transform_9(%arg0: i32) -> (i32, i32, i32) {
    %c0_i32 = arith.constant 0 : i32
    %c0_i32_0 = arith.constant 0 : i32
    %c0_i32_1 = arith.constant 0 : i32
    %c0_i32_2 = arith.constant 0 : i32
    return %c0_i32, %c0_i32_0, %c0_i32_1 : i32, i32, i32
  }
  func.func @transform_10(%arg0: i32) -> (i32, i32, i32) {
    %c0_i32 = arith.constant 0 : i32
    %c0_i32_0 = arith.constant 0 : i32
    %c0_i32_1 = arith.constant 0 : i32
    %c0_i32_2 = arith.constant 0 : i32
    return %c0_i32, %c0_i32_0, %c0_i32_1 : i32, i32, i32
  }
  func.func @transform_11(%arg0: i32) -> (i32, i32) {
    %c0_i32 = arith.constant 0 : i32
    %c0_i32_0 = arith.constant 0 : i32
    %c0_i32_1 = arith.constant 0 : i32
    return %c0_i32, %c0_i32_0 : i32, i32
  }
  func.func @transform_12(%arg0: i32) -> (i32, i32, i32) {
    %c0_i32 = arith.constant 0 : i32
    %c0_i32_0 = arith.constant 0 : i32
    %c0_i32_1 = arith.constant 0 : i32
    %c0_i32_2 = arith.constant 0 : i32
    return %c0_i32, %c0_i32_0, %c0_i32_1 : i32, i32, i32
  }
  func.func @transform_13(%arg0: i32) -> (i32, i32) {
    %c0_i32 = arith.constant 0 : i32
    %c0_i32_0 = arith.constant 0 : i32
    %c0_i32_1 = arith.constant 0 : i32
    return %c0_i32, %c0_i32_0 : i32, i32
  }
  func.func @transform_14(%arg0: i32) -> (i32, i32) {
    %c0_i32 = arith.constant 0 : i32
    %c0_i32_0 = arith.constant 0 : i32
    %c0_i32_1 = arith.constant 0 : i32
    return %c0_i32, %c0_i32_0 : i32, i32
  }
  func.func @transform_15(%arg0: i32) -> (i32, i32) {
    %c0_i32 = arith.constant 0 : i32
    %c0_i32_0 = arith.constant 0 : i32
    %c0_i32_1 = arith.constant 0 : i32
    return %c0_i32, %c0_i32_0 : i32, i32
  }
  func.func @transform_16(%arg0: i32) -> (i32, i32) {
    %c0_i32 = arith.constant 0 : i32
    %c0_i32_0 = arith.constant 0 : i32
    %c0_i32_1 = arith.constant 0 : i32
    return %c0_i32, %c0_i32_0 : i32, i32
  }
  func.func @transform_17(%arg0: i32) -> (i32, i32) {
    %c0_i32 = arith.constant 0 : i32
    %c0_i32_0 = arith.constant 0 : i32
    %c0_i32_1 = arith.constant 0 : i32
    return %c0_i32, %c0_i32_0 : i32, i32
  }
  func.func @transform_18(%arg0: i32) -> (i32, i32, i32) {
    %c0_i32 = arith.constant 0 : i32
    %c0_i32_0 = arith.constant 0 : i32
    %c0_i32_1 = arith.constant 0 : i32
    return %arg0, %c0_i32, %c0_i32_0 : i32, i32, i32
  }
}

</mosaic_0001>

<bundles_post_ra>
// kernel: cnet_forward.1
= control target key start
LH: loop header
LB: loop body
LE: loop exit
PB: predicated region body
PF: predicated region fallthrough
CT: control target
= control target key end

     0   :  { %s20157_s0 = inlined_call_operand.vmem [shape: f32[800,9], index: 0, kind: input, shape index: {}]   ;;  %s20158_s1 = inlined_call_operand.vmem [shape: f32[9,16], index: 1, kind: input, shape index: {}]   ;;  %s20159_s2 = inlined_call_operand.vmem [shape: f32[1,16], index: 2, kind: input, shape index: {}]   ;;  %s20160_s3 = inlined_call_operand.vmem [shape: f32[9,100,400], index: 3, kind: input, shape index: {}]   ;;  %s20161_s4 = inlined_call_operand.vmem [shape: f32[9,16,32], index: 4, kind: input, shape index: {}]   ;;  %s20162_s5 = inlined_call_operand.vmem [shape: f32[1,32], index: 5, kind: input, shape index: {}]   ;;  %s20163_s6 = inlined_call_operand.vmem [shape: f32[9,25,100], index: 6, kind: input, shape index: {}]   ;;  %s20164_s7 = inlined_call_operand.vmem [shape: f32[9,32,64], index: 7, kind: input, shape index: {}]   ;;  %s20165_s8 = inlined_call_operand.vmem [shape: f32[1,64], index: 8, kind: input, shape index: {}]   ;;  %s20166_s9 = inlined_call_operand.vmem [shape: f32[9,9,25], index: 9, kind: input, shape index: {}]   ;;  %s20167_s10 = inlined_call_operand.vmem [shape: f32[9,64,64], index: 10, kind: input, shape index: {}]   ;;  %s20168_s11 = inlined_call_operand.vmem [shape: f32[1,64], index: 11, kind: input, shape index: {}]   ;;  %s20169_s12 = inlined_call_operand.vmem [shape: f32[9,64,100], index: 12, kind: input, shape index: {}]   ;;  %s20170_s13 = inlined_call_operand.vmem [shape: f32[1,100], index: 13, kind: input, shape index: {}]   ;;  %s20171_s14 = inlined_call_operand.vmem [shape: f32[100,20], index: 14, kind: input, shape index: {}]   ;;  %s20172_s15 = inlined_call_operand.vmem [shape: f32[1,20], index: 15, kind: input, shape index: {}]   ;;  %s20173_s16 = inlined_call_operand.vmem [shape: f32[20,5], index: 16, kind: input, shape index: {}]   ;;  %s20174_s17 = inlined_call_operand.vmem [shape: f32[1,5], index: 17, kind: input, shape index: {}]   ;;  %s20175_s18 = inlined_call_operand.hbm [shape: f32[2,1,5], index: 18, kind: output, shape index: {}]  }
   0x1   :  { %20189 = sst [smem:[#allocation14_spill]] %s20157_s0 }
   0x2   :  { %20190 = sst [smem:[#allocation15_spill]] %s20158_s1 }
   0x3   :  { %20191 = sst [smem:[#allocation16_spill]] %s20159_s2 }
   0x4   :  { %23 = vsyncpa [#allocation3], 0 }
   0x5   :  { %25 = vsyncpa [#allocation3 + $0x1], 0  ;;  %s15692_s27 = smov 0   ;;  %s15694_s28 = smov 0  }
   0x6   :  { %s15696_s29 = smov 0   ;;  %s15698_s30 = smov 0  }
   0x7 LB: > { %20192 = sst [smem:[#allocation5_spill]] %s15578_s27  ;;  %s15713_s0 = sadd.s32 4294967295, %s15590_s30   ;;  %s15590_s30 = sphi %s15698_s30, %s20230_s30   ;;  %s15586_s29 = sphi %s15696_s29, %s20232_s29   ;;  %s15582_s28 = sphi %s15694_s28, %s20234_s28   ;;  %s15578_s27 = sphi %s15692_s27, %s20233_s27  }
   0x8   : > { %20193 = sst [smem:[#allocation6_spill]] %s15586_s29  ;;  %s10458_s19 = sadd.s32 4294967294, %s15590_s30  }
   0x9   : > { %s15717_s1 = sadd.s32 1, %s15590_s30   ;;  %s421_s20 = sadd.s32 1, %s15586_s29 }
   0xa   : > { %20194 = sst [smem:[#allocation7_spill]] %s15717_s1  ;;  %s418_s21 = ssub.s32 %s15590_s30, %s15717_s1 }
   0xb   : > { %p431_p0 = scmp.ne.s32.totalorder %s15586_s29, %s15582_s28  ;;  %p419_p1 = scmp.eq.s32.totalorder %s418_s21, 0 }
   0xc   : > { %p432_p2 = scmp.eq.s32.totalorder %s15713_s0, 1  ;;  %p437_p3 = scmp.ne.s32.totalorder %s15582_s28, %s15578_s27 }
   0xd   : > { %p438_p4 = scmp.eq.s32.totalorder %s10458_s19, 1  ;;  %p10461_p7 = scmp.ge.s32.totalorder %s15590_s30, 1 }
   0xe   : > { %s15728_s22 = scalar_select %p419_p1, %s15586_s29, %s421_s20  }
   0xf   : > { %p15730_p5 = por %p432_p2, %p431_p0  ;;  %p15734_p6 = por %p438_p4, %p437_p3 }
  0x10   : > { %20195 = sst [smem:[#allocation8_spill]] %s15728_s22  ;;  %p516_p8 = scmp.lt.s32.totalorder %s15590_s30, 3 }
  0x11   : > { %s20197_s23 = scalar_select %p15734_p6, 1, 0 }
  0x12   : > { %p517_p9 = pnand %p10461_p7, %p516_p8 }
  0x13   : > { %20198 = sst [smem:[#allocation9_spill]] %s20197_s23 }
  0x14   : > { %520 = sbr.rel (%p517_p9) target bundleno = 5312 (0x14c0), region = 92 }
  0x1b   : > { %s20199_s26 = sld [smem:[#allocation15_spill]]  ;;  %vm785_vm0 = vcmask 1040384   ;;  %s569_s21 = smul.u32 50, %s15713_s0  ;;  %vm15592_vm1 = vmmov 1   ;;  %v20200_v3 = vmov 0  ;;  %vm634_vm3 = vcmask 72704  }
  0x1c   : > { %vm15747_vm2 = vmpackc.low %vm785_vm0, %vm15592_vm1  ;;  %s20203_s20 = sld [smem:[#allocation14_spill]]  ;;  %v1155_v54 = vld [vmem:[%s20160_s3 + $0x8] sm:$0xff]  ;;  %s20204_s29 = sld [smem:[#allocation16_spill]]  ;;  %vm1206_vm4 = vcmask 130048   ;;  %vm15594_vm5 = vmmov 0   ;;  %vm5997_vm6 = vcmask 818176  }
  0x1d   : > { %v20201_v3 = vsel %vm15747_vm2, 4294967295, %v20200_v3  ;;  %p570_p10 = scmp.lt.s32.totalorder %s569_s21, 99  ;;  %v10529_v55 = vld [vmem:[%s20160_s3 + $0x1a8] sm:$0xff]  ;;  %1310 = vmatprep.mubr.f32.mxu1 %v1155_v54  ;;  %vm6010_vm7 = vcmask 1043456   ;;  %vm6210_vm8 = vcmask 261120   ;;  %vm7878_vm9 = vcmask 203776  }
  0x1e   : > { %20202 = vst [vmem:[#allocation10_spill] sm:$0xff] %v20201_v3  ;;  %vm8064_vm10 = vcmask 523264   ;;  %vm10311_vm11 = vcmask 162816   ;;  %s567_s27 = sand.u32 1, %s15582_s28   ;;  %s11531_s25 = sshll.u32 %s15713_s0, 4  ;;  %vm10388_vm12 = vcmask 32768  }
  0x1f   : > { %s20236_s21 = smov (!%p570_p10, %s569_s21), 99  ;;  %s568_s19 = scalar_lea.vmem [#allocation2], %s567_s27 }
  0x20   : > { %s10462_s24 = sshll.u32 %s20236_s21, 3  ;;  %s10391_s22 = scalar_lea.sflag [#allocation3], %s567_s27 }
  0x21   : > { %v625_v0 = vld [vmem:[%s20199_s26] sm:$0xff]  ;;  %v626_v1 = vld [vmem:[%s20199_s26 + $0x8] sm:$0x1]  ;;  %s15596_s0 = smov [#allocation2]  }
  0x22   : > { %v14187_v2 = vpack.c.bf16 %v626_v1, %v625_v0  ;;  %s15758_s26 = scalar_lea.vmem %s20203_s20, %s10462_s24  ;;  %v15869_v56 = vld [vmem:[%s20204_s29] ss:$0 sm:$0xff]  ;;  %s10403_s20 = sshll.u32 %s568_s19, 4  ;;  %s20117_s20 = int_to_ptr.vmem [resolvable:$true] %s10403_s20 }
  0x23   : > { %v575_v4 = vld [vmem:[%s15758_s26] sm:$0xff]  ;;  %v576_v5 = vld [vmem:[%s15758_s26 + $0x8] sm:$0xff]  ;;  %v577_v6 = vld [vmem:[%s15758_s26 + $0x10] sm:$0xff]  ;;  %s20115_s29 = scalar_lea.hbm %s20175_s18, %s11531_s25  ;;  %s15532_s21 = sshll.u32 %s15596_s0, 4  ;;  %s15533_s21 = int_to_ptr.vmem [resolvable:$false] %s15532_s21 }
  0x24   : > { %14189 = vmatprep.subr.msk.bf16.mxu0 %vm15747_vm2, %v14187_v2  ;;  %12832 = vmatprep.mubr.msk.f32.mxu0 %vm634_vm3, %v575_v4  ;;  %v578_v7 = vld [vmem:[%s15758_s26 + $0x18] sm:$0xff]  ;;  %v579_v8 = vld [vmem:[%s15758_s26 + $0x20] sm:$0xff]  ;;  %v580_v9 = vld [vmem:[%s15758_s26 + $0x28] sm:$0xff]  ;;  %s15534_s24 = scalar_lea.vmem %s15533_s21, 32  ;;  %p15535_p0 = scmp.lt.s32.totalorder %s20117_s20, %s15533_s21 }
  0x25   : > { %14192 = vmatpush3.bf16.msk.msra.mxu0 %vm15747_vm2, %v14187_v2  ;;  %v581_v10 = vld [vmem:[%s15758_s26 + $0x30] sm:$0xff]  ;;  %v582_v11 = vld [vmem:[%s15758_s26 + $0x38] sm:$0xff]  ;;  %v583_v12 = vld [vmem:[%s15758_s26 + $0x40] sm:$0xff] }
  0x26   : > { %v584_v13 = vld [vmem:[%s15758_s26 + $0x48] sm:$0xff]  ;;  %v585_v14 = vld [vmem:[%s15758_s26 + $0x50] sm:$0xff]  ;;  %v586_v15 = vld [vmem:[%s15758_s26 + $0x58] sm:$0xff] }
  0x27   : > { %v587_v16 = vld [vmem:[%s15758_s26 + $0x60] sm:$0xff]  ;;  %v588_v17 = vld [vmem:[%s15758_s26 + $0x68] sm:$0xff]  ;;  %v589_v18 = vld [vmem:[%s15758_s26 + $0x70] sm:$0xff] }
  0x28   : > { %12833 = vmatmul.mubr.msk.f32.vlgmr.msra.gmra.mrb[0].mxu0 %vm634_vm3, %v576_v5  ;;  %v590_v19 = vld [vmem:[%s15758_s26 + $0x78] sm:$0xff]  ;;  %v591_v20 = vld [vmem:[%s15758_s26 + $0x80] sm:$0xff]  ;;  %v592_v21 = vld [vmem:[%s15758_s26 + $0x88] sm:$0xff] }
  0x29   : > { %12835 = vmatprep.mubr.msk.f32.mxu0 %vm634_vm3, %v577_v6  ;;  %v593_v22 = vld [vmem:[%s15758_s26 + $0x90] sm:$0xff]  ;;  %v594_v23 = vld [vmem:[%s15758_s26 + $0x98] sm:$0xff]  ;;  %v595_v24 = vld [vmem:[%s15758_s26 + $0xa0] sm:$0xff] }
  0x2a   : > { %v596_v25 = vld [vmem:[%s15758_s26 + $0xa8] sm:$0xff]  ;;  %v597_v26 = vld [vmem:[%s15758_s26 + $0xb0] sm:$0xff]  ;;  %v598_v27 = vld [vmem:[%s15758_s26 + $0xb8] sm:$0xff] }
  0x2b   : > { %v599_v28 = vld [vmem:[%s15758_s26 + $0xc0] sm:$0xff]  ;;  %v600_v29 = vld [vmem:[%s15758_s26 + $0xc8] sm:$0xff]  ;;  %v601_v30 = vld [vmem:[%s15758_s26 + $0xd0] sm:$0xff] }
  0x2c   : > { %12836 = vmatmul.mubr.msk.f32.gmra.mrb[2].mxu0 %vm634_vm3, %v578_v7  ;;  %v602_v31 = vld [vmem:[%s15758_s26 + $0xd8] sm:$0xff]  ;;  %v603_v32 = vld [vmem:[%s15758_s26 + $0xe0] sm:$0xff]  ;;  %v604_v33 = vld [vmem:[%s15758_s26 + $0xe8] sm:$0xff] }
  0x2d   : > { %12838 = vmatprep.mubr.msk.f32.mxu0 %vm634_vm3, %v579_v8  ;;  %v605_v34 = vld [vmem:[%s15758_s26 + $0xf0] sm:$0xff]  ;;  %v606_v35 = vld [vmem:[%s15758_s26 + $0xf8] sm:$0xff]  ;;  %v607_v36 = vld [vmem:[%s15758_s26 + $0x100] sm:$0xff] }
  0x2e   : > { %v608_v37 = vld [vmem:[%s15758_s26 + $0x108] sm:$0xff]  ;;  %v609_v38 = vld [vmem:[%s15758_s26 + $0x110] sm:$0xff]  ;;  %v610_v39 = vld [vmem:[%s15758_s26 + $0x118] sm:$0xff] }
  0x2f   : > { %v611_v40 = vld [vmem:[%s15758_s26 + $0x120] sm:$0xff]  ;;  %v612_v41 = vld [vmem:[%s15758_s26 + $0x128] sm:$0xff]  ;;  %v613_v42 = vld [vmem:[%s15758_s26 + $0x130] sm:$0xff] }
  0x30   : > { %12839 = vmatmul.mubr.msk.f32.gmra.mrb[4].mxu0 %vm634_vm3, %v580_v9  ;;  %v614_v43 = vld [vmem:[%s15758_s26 + $0x138] sm:$0xff]  ;;  %v615_v44 = vld [vmem:[%s15758_s26 + $0x140] sm:$0xff]  ;;  %v616_v45 = vld [vmem:[%s15758_s26 + $0x148] sm:$0xff] }
  0x31   : > { %12841 = vmatprep.mubr.msk.f32.mxu0 %vm634_vm3, %v581_v10  ;;  %v617_v46 = vld [vmem:[%s15758_s26 + $0x150] sm:$0xff]  ;;  %v618_v47 = vld [vmem:[%s15758_s26 + $0x158] sm:$0xff]  ;;  %v619_v48 = vld [vmem:[%s15758_s26 + $0x160] sm:$0xff] }
  0x32   : > { %v620_v49 = vld [vmem:[%s15758_s26 + $0x168] sm:$0xff]  ;;  %v621_v50 = vld [vmem:[%s15758_s26 + $0x170] sm:$0xff]  ;;  %v622_v51 = vld [vmem:[%s15758_s26 + $0x178] sm:$0xff] }
  0x33   : > { %v623_v52 = vld [vmem:[%s15758_s26 + $0x180] sm:$0xff]  ;;  %v624_v53 = vld [vmem:[%s15758_s26 + $0x188] sm:$0xff]  ;;  %s15528_s26 = scalar_lea.vmem %s20117_s20, 16 }
  0x34   : > { %12842 = vmatmul.mubr.msk.f32.gmra.mrb[6].mxu0 %vm634_vm3, %v582_v11  ;;  %p15529_p11 = scmp.ne.s32.totalorder %s20117_s20, %s15528_s26  ;;  %p15536_p1 = scmp.lt.s32.totalorder %s15534_s24, %s15528_s26 }
  0x35   : > { %12844 = vmatprep.mubr.msk.f32.mxu0 %vm634_vm3, %v583_v12 }
  0x36   : > { %p15530_p12 = pnand %p15529_p11, %p15730_p5  ;;  %p15537_p2 = por %p15536_p1, %p15535_p0 }
  0x38   : > { %12845 = vmatmul.mubr.msk.f32.gmra.mrb[8].mxu0 %vm634_vm3, %v584_v13  ;;  %p15531_p13 = pneg %p15530_p12 }
  0x39   : > { %12847 = vmatprep.mubr.msk.f32.mxu0 %vm634_vm3, %v585_v14 }
  0x3a   : > { %p15538_p3 = pnand %p15537_p2, %p15531_p13 }
  0x3c   : > { %12848 = vmatmul.mubr.msk.f32.gmra.mrb[10].mxu0 %vm634_vm3, %v586_v15 }
  0x3d   : > { %12850 = vmatprep.mubr.msk.f32.mxu0 %vm634_vm3, %v587_v16 }
  0x40   : > { %12851 = vmatmul.mubr.msk.f32.gmra.mrb[12].mxu0 %vm634_vm3, %v588_v17 }
  0x41   : > { %12853 = vmatprep.mubr.msk.f32.mxu0 %vm634_vm3, %v589_v18 }
  0x44   : > { %12854 = vmatmul.mubr.msk.f32.gmra.mrb[14].mxu0 %vm634_vm3, %v590_v19 }
  0x45   : > { %12856 = vmatprep.mubr.msk.f32.mxu0 %vm634_vm3, %v591_v20 }
  0x48   : > { %12857 = vmatmul.mubr.msk.f32.gmra.mrb[16].mxu0 %vm634_vm3, %v592_v21 }
  0x49   : > { %12859 = vmatprep.mubr.msk.f32.mxu0 %vm634_vm3, %v593_v22 }
  0x4c   : > { %12860 = vmatmul.mubr.msk.f32.gmra.mrb[18].mxu0 %vm634_vm3, %v594_v23 }
  0x4d   : > { %12862 = vmatprep.mubr.msk.f32.mxu0 %vm634_vm3, %v595_v24 }
  0x50   : > { %12863 = vmatmul.mubr.msk.f32.gmra.mrb[20].mxu0 %vm634_vm3, %v596_v25 }
  0x51   : > { %12865 = vmatprep.mubr.msk.f32.mxu0 %vm634_vm3, %v597_v26 }
  0x54   : > { %12866 = vmatmul.mubr.msk.f32.gmra.mrb[22].mxu0 %vm634_vm3, %v598_v27 }
  0x55   : > { %12868 = vmatprep.mubr.msk.f32.mxu0 %vm634_vm3, %v599_v28 }
  0x58   : > { %12869 = vmatmul.mubr.msk.f32.gmra.mrb[24].mxu0 %vm634_vm3, %v600_v29 }
  0x59   : > { %12871 = vmatprep.mubr.msk.f32.mxu0 %vm634_vm3, %v601_v30 }
  0x5c   : > { %12872 = vmatmul.mubr.msk.f32.gmra.mrb[26].mxu0 %vm634_vm3, %v602_v31 }
  0x5d   : > { %12874 = vmatprep.mubr.msk.f32.mxu0 %vm634_vm3, %v603_v32 }
  0x60   : > { %12875 = vmatmul.mubr.msk.f32.gmra.mrb[28].mxu0 %vm634_vm3, %v604_v33 }
  0x61   : > { %12877 = vmatprep.mubr.msk.f32.mxu0 %vm634_vm3, %v605_v34 }
  0x64   : > { %12878 = vmatmul.mubr.msk.f32.gmra.mrb[30].mxu0 %vm634_vm3, %v606_v35 }
  0x65   : > { %12880 = vmatprep.mubr.msk.f32.mxu0 %vm634_vm3, %v607_v36 }
  0x68   : > { %12881 = vmatmul.mubr.msk.f32.gmra.mrb[32].mxu0 %vm634_vm3, %v608_v37 }
  0x69   : > { %12883 = vmatprep.mubr.msk.f32.mxu0 %vm634_vm3, %v609_v38 }
  0x6c   : > { %12884 = vmatmul.mubr.msk.f32.gmra.mrb[34].mxu0 %vm634_vm3, %v610_v39 }
  0x6d   : > { %12886 = vmatprep.mubr.msk.f32.mxu0 %vm634_vm3, %v611_v40 }
  0x70   : > { %12887 = vmatmul.mubr.msk.f32.gmra.mrb[36].mxu0 %vm634_vm3, %v612_v41 }
  0x71   : > { %12889 = vmatprep.mubr.msk.f32.mxu0 %vm634_vm3, %v613_v42 }
  0x74   : > { %12890 = vmatmul.mubr.msk.f32.gmra.mrb[38].mxu0 %vm634_vm3, %v614_v43 }
  0x75   : > { %12892 = vmatprep.mubr.msk.f32.mxu0 %vm634_vm3, %v615_v44 }
  0x78   : > { %12893 = vmatmul.mubr.msk.f32.gmra.mrb[40].mxu0 %vm634_vm3, %v616_v45 }
  0x79   : > { %12895 = vmatprep.mubr.msk.f32.mxu0 %vm634_vm3, %v617_v46 }
  0x7c   : > { %12896 = vmatmul.mubr.msk.f32.gmra.mrb[42].mxu0 %vm634_vm3, %v618_v47 }
  0x7d   : > { %12898 = vmatprep.mubr.msk.f32.mxu0 %vm634_vm3, %v619_v48 }
  0x80   : > { %12899 = vmatmul.mubr.msk.f32.gmra.mrb[44].mxu0 %vm634_vm3, %v620_v49 }
  0x81   : > { %12901 = vmatprep.mubr.msk.f32.mxu0 %vm634_vm3, %v621_v50 }
  0x84   : > { %12902 = vmatmul.mubr.msk.f32.gmra.mrb[46].mxu0 %vm634_vm3, %v622_v51 }
  0x85   : > { %12904 = vmatprep.mubr.msk.f32.mxu0 %vm634_vm3, %v623_v52 }
  0x88   : > { %12905 = vmatmul.mubr.msk.f32.gmra.mrb[48].mxu0 %vm634_vm3, %v624_v53 }
  0x89   : > { %1664 = vmatprep.mubr.f32.mxu0 %v10529_v55 }
  0xfb   : > { %v12834_v57 = vpop.f32.mrb[0].mxu0 }
  0xfc   : > { %v861_v58 = vadd.f32 %v12834_v57, %v15869_v56  ;;  %v855_v59 = vpop.f32.mrb[1].mxu0 }
  0xfd   : > { %v856_v60 = vadd.f32 %v15869_v56, %v855_v59 }
  0xfe   : > { %v1105_v61 = vmax.f32 %v861_v58, 0.0 }
  0xff   : > { %v1104_v62 = vmax.f32 %v856_v60, 0.0  ;;  %v12837_v63 = vpop.f32.mrb[2].mxu0 }
 0x100   : > { %v871_v0 = vadd.f32 %v12837_v63, %v15869_v56  ;;  %v865_v1 = vpop.f32.mrb[3].mxu0 }
 0x101   : > { %v15874_v2 = vpack.c.bf16 %v1105_v61, %v1104_v62  ;;  %v866_v4 = vadd.f32 %v15869_v56, %v865_v1 }
 0x102   : > { %v1107_v5 = vmax.f32 %v871_v0, 0.0 }
 0x103   : > { %v1106_v6 = vmax.f32 %v866_v4, 0.0  ;;  %v12840_v7 = vpop.f32.mrb[4].mxu0 }
 0x104   : > { %v881_v8 = vadd.f32 %v12840_v7, %v15869_v56  ;;  %v875_v9 = vpop.f32.mrb[5].mxu0 }
 0x105   : > { %v15878_v10 = vpack.c.bf16 %v1107_v5, %v1106_v6  ;;  %v876_v11 = vadd.f32 %v15869_v56, %v875_v9 }
 0x106   : > { %v1109_v12 = vmax.f32 %v881_v8, 0.0 }
 0x107   : > { %v1108_v13 = vmax.f32 %v876_v11, 0.0  ;;  %v12843_v14 = vpop.f32.mrb[6].mxu0 }
 0x108   : > { %v891_v15 = vadd.f32 %v12843_v14, %v15869_v56  ;;  %v885_v16 = vpop.f32.mrb[7].mxu0 }
 0x109   : > { %v15882_v17 = vpack.c.bf16 %v1109_v12, %v1108_v13  ;;  %v886_v18 = vadd.f32 %v15869_v56, %v885_v16 }
 0x10a   : > { %v1111_v19 = vmax.f32 %v891_v15, 0.0 }
 0x10b   : > { %v1110_v20 = vmax.f32 %v886_v18, 0.0  ;;  %v12846_v21 = vpop.f32.mrb[8].mxu0 }
 0x10c   : > { %v901_v22 = vadd.f32 %v12846_v21, %v15869_v56  ;;  %v895_v23 = vpop.f32.mrb[9].mxu0 }
 0x10d   : > { %v15886_v24 = vpack.c.bf16 %v1111_v19, %v1110_v20  ;;  %v896_v25 = vadd.f32 %v15869_v56, %v895_v23 }
 0x10e   : > { %v1113_v26 = vmax.f32 %v901_v22, 0.0 }
 0x10f   : > { %v1112_v27 = vmax.f32 %v896_v25, 0.0  ;;  %v12849_v28 = vpop.f32.mrb[10].mxu0 }
 0x110   : > { %v911_v29 = vadd.f32 %v12849_v28, %v15869_v56  ;;  %v905_v30 = vpop.f32.mrb[11].mxu0 }
 0x111   : > { %v15890_v31 = vpack.c.bf16 %v1113_v26, %v1112_v27  ;;  %v906_v32 = vadd.f32 %v15869_v56, %v905_v30 }
 0x112   : > { %v1115_v33 = vmax.f32 %v911_v29, 0.0 }
 0x113   : > { %v1114_v34 = vmax.f32 %v906_v32, 0.0  ;;  %v12852_v35 = vpop.f32.mrb[12].mxu0 }
 0x114   : > { %v921_v36 = vadd.f32 %v12852_v35, %v15869_v56  ;;  %v915_v37 = vpop.f32.mrb[13].mxu0 }
 0x115   : > { %v15894_v38 = vpack.c.bf16 %v1115_v33, %v1114_v34  ;;  %v916_v39 = vadd.f32 %v15869_v56, %v915_v37 }
 0x116   : > { %v1117_v40 = vmax.f32 %v921_v36, 0.0 }
 0x117   : > { %v1116_v41 = vmax.f32 %v916_v39, 0.0  ;;  %v12855_v42 = vpop.f32.mrb[14].mxu0 }
 0x118   : > { %v931_v43 = vadd.f32 %v12855_v42, %v15869_v56  ;;  %v925_v44 = vpop.f32.mrb[15].mxu0 }
 0x119   : > { %v15898_v45 = vpack.c.bf16 %v1117_v40, %v1116_v41  ;;  %v926_v46 = vadd.f32 %v15869_v56, %v925_v44 }
 0x11a   : > { %v1119_v47 = vmax.f32 %v931_v43, 0.0 }
 0x11b   : > { %v1118_v48 = vmax.f32 %v926_v46, 0.0  ;;  %v12858_v49 = vpop.f32.mrb[16].mxu0 }
 0x11c   : > { %v941_v50 = vadd.f32 %v12858_v49, %v15869_v56  ;;  %v935_v51 = vpop.f32.mrb[17].mxu0 }
 0x11d   : > { %v15902_v52 = vpack.c.bf16 %v1119_v47, %v1118_v48  ;;  %v936_v53 = vadd.f32 %v15869_v56, %v935_v51 }
 0x11e   : > { %v1121_v54 = vmax.f32 %v941_v50, 0.0 }
 0x11f   : > { %v1120_v55 = vmax.f32 %v936_v53, 0.0  ;;  %v12861_v57 = vpop.f32.mrb[18].mxu0 }
 0x120   : > { %v951_v58 = vadd.f32 %v12861_v57, %v15869_v56  ;;  %v945_v59 = vpop.f32.mrb[19].mxu0 }
 0x121   : > { %v15906_v60 = vpack.c.bf16 %v1121_v54, %v1120_v55  ;;  %v946_v61 = vadd.f32 %v15869_v56, %v945_v59 }
 0x122   : > { %v1123_v62 = vmax.f32 %v951_v58, 0.0 }
 0x123   : > { %v1122_v63 = vmax.f32 %v946_v61, 0.0  ;;  %v12864_v0 = vpop.f32.mrb[20].mxu0  ;;  %14194 = vmatprep.subr.bf16.mxu1 %v15906_v60  ;;  %14253 = vmatprep.subr.bf16.mxu0 %v15906_v60  ;;  %v1154_v61 = vld [vmem:[%s20160_s3] sm:$0xff] }
 0x124   : > { %v961_v1 = vadd.f32 %v12864_v0, %v15869_v56  ;;  %v955_v4 = vpop.f32.mrb[21].mxu0  ;;  %14196 = vmatpush3.bf16.msra.mxu1 %v15874_v2  ;;  %14255 = vmatpush3.bf16.msra.mxu0 %v15874_v2 }
 0x125   : > { %v15914_v5 = vpack.c.bf16 %v1123_v62, %v1122_v63  ;;  %v956_v6 = vadd.f32 %v15869_v56, %v955_v4  ;;  %v10528_v62 = vld [vmem:[%s20160_s3 + $0x1a0] sm:$0xff]  ;;  %v10533_v4 = vld [vmem:[%s20160_s3 + $0x1c8] sm:$0xff] }
 0x126   : > { %v1125_v7 = vmax.f32 %v961_v1, 0.0  ;;  %v1159_v1 = vld [vmem:[%s20160_s3 + $0x28] sm:$0xff] }
 0x127   : > { %v1124_v8 = vmax.f32 %v956_v6, 0.0  ;;  %v12867_v9 = vpop.f32.mrb[22].mxu0  ;;  %14198 = vmatprep.subr.bf16.mxu1 %v15914_v5  ;;  %14257 = vmatprep.subr.bf16.mxu0 %v15914_v5 }
 0x128   : > { %v971_v11 = vadd.f32 %v12867_v9, %v15869_v56  ;;  %v965_v12 = vpop.f32.mrb[23].mxu0  ;;  %14200 = vmatpush3.bf16.msra.mxu1 %v15878_v10  ;;  %14259 = vmatpush3.bf16.msra.mxu0 %v15878_v10 }
 0x129   : > { %v15922_v13 = vpack.c.bf16 %v1125_v7, %v1124_v8  ;;  %v966_v14 = vadd.f32 %v15869_v56, %v965_v12  ;;  %v20183_v8 = vmov 0.0|0.0  }
 0x12a   : > { %v1127_v15 = vmax.f32 %v971_v11, 0.0 }
 0x12b   : > { %v1126_v16 = vmax.f32 %v966_v14, 0.0  ;;  %v12870_v18 = vpop.f32.mrb[24].mxu0  ;;  %14202 = vmatprep.subr.bf16.mxu1 %v15922_v13  ;;  %14261 = vmatprep.subr.bf16.mxu0 %v15922_v13  ;;  %v1158_v14 = vld [vmem:[%s20160_s3 + $0x20] sm:$0xff] }
 0x12c   : > { %v981_v19 = vadd.f32 %v12870_v18, %v15869_v56  ;;  %v975_v20 = vpop.f32.mrb[25].mxu0  ;;  %14204 = vmatpush3.bf16.msra.mxu1 %v15882_v17  ;;  %14263 = vmatpush3.bf16.msra.mxu0 %v15882_v17 }
 0x12d   : > { %v15930_v21 = vpack.c.bf16 %v1127_v15, %v1126_v16  ;;  %v976_v22 = vadd.f32 %v15869_v56, %v975_v20  ;;  %v10532_v15 = vld [vmem:[%s20160_s3 + $0x1c0] sm:$0xff]  ;;  %v10537_v20 = vld [vmem:[%s20160_s3 + $0x1e8] sm:$0xff] }
 0x12e   : > { %v1129_v23 = vmax.f32 %v981_v19, 0.0  ;;  %v1163_v19 = vld [vmem:[%s20160_s3 + $0x48] sm:$0xff] }
 0x12f   : > { %v1128_v25 = vmax.f32 %v976_v22, 0.0  ;;  %v12873_v26 = vpop.f32.mrb[26].mxu0  ;;  %14206 = vmatprep.subr.bf16.mxu1 %v15930_v21  ;;  %14265 = vmatprep.subr.bf16.mxu0 %v15930_v21 }
 0x130   : > { %v991_v27 = vadd.f32 %v12873_v26, %v15869_v56  ;;  %v985_v28 = vpop.f32.mrb[27].mxu0  ;;  %14208 = vmatpush3.bf16.msra.mxu1 %v15886_v24  ;;  %14267 = vmatpush3.bf16.msra.mxu0 %v15886_v24 }
 0x131   : > { %v15938_v29 = vpack.c.bf16 %v1129_v23, %v1128_v25  ;;  %v986_v30 = vadd.f32 %v15869_v56, %v985_v28  ;;  %v1162_v28 = vld [vmem:[%s20160_s3 + $0x40] sm:$0xff] }
 0x132   : > { %v1131_v32 = vmax.f32 %v991_v27, 0.0 }
 0x133   : > { %v1130_v33 = vmax.f32 %v986_v30, 0.0  ;;  %v12876_v34 = vpop.f32.mrb[28].mxu0  ;;  %14210 = vmatprep.subr.bf16.mxu1 %v15938_v29  ;;  %14269 = vmatprep.subr.bf16.mxu0 %v15938_v29  ;;  %v10536_v30 = vld [vmem:[%s20160_s3 + $0x1e0] sm:$0xff] }
 0x134   : > { %v1001_v35 = vadd.f32 %v12876_v34, %v15869_v56  ;;  %v995_v36 = vpop.f32.mrb[29].mxu0  ;;  %14212 = vmatpush3.bf16.msra.mxu1 %v15890_v31  ;;  %14271 = vmatpush3.bf16.msra.mxu0 %v15890_v31  ;;  %v1167_v34 = vld [vmem:[%s20160_s3 + $0x68] sm:$0xff] }
 0x135   : > { %v15946_v37 = vpack.c.bf16 %v1131_v32, %v1130_v33  ;;  %v996_v39 = vadd.f32 %v15869_v56, %v995_v36 }
 0x136   : > { %v1133_v40 = vmax.f32 %v1001_v35, 0.0  ;;  %v10541_v35 = vld [vmem:[%s20160_s3 + $0x208] sm:$0xff] }
 0x137   : > { %v1132_v41 = vmax.f32 %v996_v39, 0.0  ;;  %v12879_v42 = vpop.f32.mrb[30].mxu0  ;;  %14214 = vmatprep.subr.bf16.mxu1 %v15946_v37  ;;  %14273 = vmatprep.subr.bf16.mxu0 %v15946_v37 }
 0x138   : > { %v1011_v43 = vadd.f32 %v12879_v42, %v15869_v56  ;;  %v1005_v44 = vpop.f32.mrb[31].mxu0  ;;  %14216 = vmatpush3.bf16.msra.mxu1 %v15894_v38  ;;  %14275 = vmatpush3.bf16.msra.mxu0 %v15894_v38 }
 0x139   : > { %v15954_v46 = vpack.c.bf16 %v1133_v40, %v1132_v41  ;;  %v1006_v47 = vadd.f32 %v15869_v56, %v1005_v44  ;;  %v10540_v44 = vld [vmem:[%s20160_s3 + $0x200] sm:$0xff] }
 0x13a   : > { %v1135_v48 = vmax.f32 %v1011_v43, 0.0  ;;  %v1166_v43 = vld [vmem:[%s20160_s3 + $0x60] sm:$0xff] }
 0x13b   : > { %v1134_v49 = vmax.f32 %v1006_v47, 0.0  ;;  %14218 = vmatprep.subr.bf16.mxu1 %v15954_v46  ;;  %14277 = vmatprep.subr.bf16.mxu0 %v15954_v46  ;;  %v12882_v50 = vpop.f32.mrb[32].mxu0 }
 0x13c   : > { %14220 = vmatpush3.bf16.msra.mxu1 %v15898_v45  ;;  %14279 = vmatpush3.bf16.msra.mxu0 %v15898_v45  ;;  %v1021_v51 = vadd.f32 %v12882_v50, %v15869_v56  ;;  %v1015_v53 = vpop.f32.mrb[33].mxu0  ;;  %v10545_v50 = vld [vmem:[%s20160_s3 + $0x228] sm:$0xff] }
 0x13d   : > { %v15962_v54 = vpack.c.bf16 %v1135_v48, %v1134_v49  ;;  %v1016_v55 = vadd.f32 %v15869_v56, %v1015_v53  ;;  %v1171_v49 = vld [vmem:[%s20160_s3 + $0x88] sm:$0xff] }
 0x13e   : > { %v1137_v57 = vmax.f32 %v1021_v51, 0.0 }
 0x13f   : > { %14222 = vmatprep.subr.bf16.mxu1 %v15962_v54  ;;  %14281 = vmatprep.subr.bf16.mxu0 %v15962_v54  ;;  %v1136_v58 = vmax.f32 %v1016_v55, 0.0  ;;  %v12885_v59 = vpop.f32.mrb[34].mxu0 }
 0x140   : > { %14224 = vmatpush3.bf16.msra.mxu1 %v15902_v52  ;;  %14283 = vmatpush3.bf16.msra.mxu0 %v15902_v52  ;;  %v1031_v63 = vadd.f32 %v12885_v59, %v15869_v56  ;;  %v1025_v0 = vpop.f32.mrb[35].mxu0  ;;  %v1170_v59 = vld [vmem:[%s20160_s3 + $0x80] sm:$0xff] }
 0x141   : > { %v15982_v6 = vpack.c.bf16 %v1137_v57, %v1136_v58  ;;  %v1026_v7 = vadd.f32 %v15869_v56, %v1025_v0  ;;  %14225 = vmatprep.subr.bf16.mxu1 %v20183_v8  ;;  %14284 = vmatprep.subr.bf16.mxu0 %v20183_v8  ;;  %v1175_v0 = vld [vmem:[%s20160_s3 + $0xa8] sm:$0xff] }
 0x142   : > { %v1139_v9 = vmax.f32 %v1031_v63, 0.0 }
 0x143   : > { %1311 = vmatmul.mubr.f32.vlgmr.msra.gmra.mrb[0].mxu1 %v1154_v61  ;;  %1665 = vmatmul.mubr.f32.vlgmr.msra.gmra.mrb[50].mxu0 %v10528_v62  ;;  %v1138_v11 = vmax.f32 %v1026_v7, 0.0  ;;  %v12888_v12 = vpop.f32.mrb[36].mxu0  ;;  %v10544_v61 = vld [vmem:[%s20160_s3 + $0x220] sm:$0xff] }
 0x144   : > { %1315 = vmatprep.mubr.f32.mxu1 %v1159_v1  ;;  %1669 = vmatprep.mubr.f32.mxu0 %v10533_v4  ;;  %v1041_v16 = vadd.f32 %v12888_v12, %v15869_v56  ;;  %v1035_v18 = vpop.f32.mrb[37].mxu0  ;;  %v10549_v1 = vld [vmem:[%s20160_s3 + $0x248] sm:$0xff] }
 0x145   : > { %v16000_v22 = vpack.c.bf16 %v1139_v9, %v1138_v11  ;;  %14227 = vmatpush1.bf16.msra.mxu1 %v15982_v6  ;;  %14286 = vmatpush1.bf16.msra.mxu0 %v15982_v6  ;;  %v1036_v23 = vadd.f32 %v15869_v56, %v1035_v18 }
 0x146   : > { %v1141_v25 = vmax.f32 %v1041_v16, 0.0  ;;  %14228 = vmatprep.subr.bf16.mxu1 %v20183_v8  ;;  %14287 = vmatprep.subr.bf16.mxu0 %v20183_v8 }
 0x147   : > { %1316 = vmatmul.mubr.f32.gmra.mrb[2].mxu1 %v1158_v14  ;;  %1670 = vmatmul.mubr.f32.gmra.mrb[52].mxu0 %v10532_v15  ;;  %v1140_v26 = vmax.f32 %v1036_v23, 0.0  ;;  %v12891_v27 = vpop.f32.mrb[38].mxu0  ;;  %v1174_v14 = vld [vmem:[%s20160_s3 + $0xa0] sm:$0xff] }
 0x148   : > { %1320 = vmatprep.mubr.f32.mxu1 %v1163_v19  ;;  %1674 = vmatprep.mubr.f32.mxu0 %v10537_v20  ;;  %v1051_v32 = vadd.f32 %v12891_v27, %v15869_v56  ;;  %v1045_v33 = vpop.f32.mrb[39].mxu0  ;;  %v10548_v15 = vld [vmem:[%s20160_s3 + $0x240] sm:$0xff]  ;;  %v1179_v19 = vld [vmem:[%s20160_s3 + $0xc8] sm:$0xff] }
 0x149   : > { %v16020_v36 = vpack.c.bf16 %v1141_v25, %v1140_v26  ;;  %14230 = vmatpush1.bf16.msra.mxu1 %v16000_v22  ;;  %14289 = vmatpush1.bf16.msra.mxu0 %v16000_v22  ;;  %v1046_v39 = vadd.f32 %v15869_v56, %v1045_v33  ;;  %v10553_v20 = vld [vmem:[%s20160_s3 + $0x268] sm:$0xff] }
 0x14a   : > { %v1143_v40 = vmax.f32 %v1051_v32, 0.0  ;;  %14231 = vmatprep.subr.bf16.mxu1 %v20183_v8  ;;  %14290 = vmatprep.subr.bf16.mxu0 %v20183_v8  ;;  %v10552_v32 = vld [vmem:[%s20160_s3 + $0x260] sm:$0xff] }
 0x14b   : > { %1321 = vmatmul.mubr.f32.gmra.mrb[4].mxu1 %v1162_v28  ;;  %1675 = vmatmul.mubr.f32.gmra.mrb[54].mxu0 %v10536_v30  ;;  %v1142_v41 = vmax.f32 %v1046_v39, 0.0  ;;  %v12894_v42 = vpop.f32.mrb[40].mxu0  ;;  %v1178_v30 = vld [vmem:[%s20160_s3 + $0xc0] sm:$0xff]  ;;  %v10557_v39 = vld [vmem:[%s20160_s3 + $0x288] sm:$0xff] }
 0x14c   : > { %1325 = vmatprep.mubr.f32.mxu1 %v1167_v34  ;;  %1679 = vmatprep.mubr.f32.mxu0 %v10541_v35  ;;  %v1061_v47 = vadd.f32 %v12894_v42, %v15869_v56  ;;  %v1055_v48 = vpop.f32.mrb[41].mxu0  ;;  %v1183_v35 = vld [vmem:[%s20160_s3 + $0xe8] sm:$0xff] }
 0x14d   : > { %v16040_v51 = vpack.c.bf16 %v1143_v40, %v1142_v41  ;;  %14233 = vmatpush1.bf16.msra.mxu1 %v16020_v36  ;;  %14292 = vmatpush1.bf16.msra.mxu0 %v16020_v36  ;;  %v1056_v53 = vadd.f32 %v15869_v56, %v1055_v48  ;;  %v10556_v48 = vld [vmem:[%s20160_s3 + $0x280] sm:$0xff] }
 0x14e   : > { %v1145_v55 = vmax.f32 %v1061_v47, 0.0  ;;  %14234 = vmatprep.subr.bf16.mxu1 %v20183_v8  ;;  %14293 = vmatprep.subr.bf16.mxu0 %v20183_v8  ;;  %v1182_v47 = vld [vmem:[%s20160_s3 + $0xe0] sm:$0xff] }
 0x14f   : > { %1326 = vmatmul.mubr.f32.gmra.mrb[6].mxu1 %v1166_v43  ;;  %1680 = vmatmul.mubr.f32.gmra.mrb[56].mxu0 %v10540_v44  ;;  %v1144_v57 = vmax.f32 %v1056_v53, 0.0  ;;  %v12897_v58 = vpop.f32.mrb[42].mxu0  ;;  %v1187_v53 = vld [vmem:[%s20160_s3 + $0x108] sm:$0xff] }
 0x150   : > { %1330 = vmatprep.mubr.f32.mxu1 %v1171_v49  ;;  %1684 = vmatprep.mubr.f32.mxu0 %v10545_v50  ;;  %v1071_v62 = vadd.f32 %v12897_v58, %v15869_v56  ;;  %v1065_v63 = vpop.f32.mrb[43].mxu0 }
 0x151   : > { %v16060_v4 = vpack.c.bf16 %v1145_v55, %v1144_v57  ;;  %14236 = vmatpush1.bf16.msra.mxu1 %v16040_v51  ;;  %14295 = vmatpush1.bf16.msra.mxu0 %v16040_v51  ;;  %v1066_v7 = vadd.f32 %v15869_v56, %v1065_v63  ;;  %v10561_v55 = vld [vmem:[%s20160_s3 + $0x2a8] sm:$0xff]  ;;  %v10560_v63 = vld [vmem:[%s20160_s3 + $0x2a0] sm:$0xff] }
 0x152   : > { %v1147_v9 = vmax.f32 %v1071_v62, 0.0  ;;  %14237 = vmatprep.subr.bf16.mxu1 %v20183_v8  ;;  %14296 = vmatprep.subr.bf16.mxu0 %v20183_v8  ;;  %v1186_v62 = vld [vmem:[%s20160_s3 + $0x100] sm:$0xff] }
 0x153   : > { %1331 = vmatmul.mubr.f32.gmra.mrb[8].mxu1 %v1170_v59  ;;  %1685 = vmatmul.mubr.f32.gmra.mrb[58].mxu0 %v10544_v61  ;;  %v1146_v11 = vmax.f32 %v1066_v7, 0.0  ;;  %v12900_v12 = vpop.f32.mrb[44].mxu0  ;;  %v1190_v7 = vld [vmem:[%s20160_s3 + $0x120] sm:$0xff] }
 0x154   : > { %1335 = vmatprep.mubr.f32.mxu1 %v1175_v0  ;;  %1689 = vmatprep.mubr.f32.mxu0 %v10549_v1  ;;  %v1081_v16 = vadd.f32 %v12900_v12, %v15869_v56  ;;  %v1075_v18 = vpop.f32.mrb[45].mxu0  ;;  %v10565_v0 = vld [vmem:[%s20160_s3 + $0x2c8] sm:$0xff] }
 0x155   : > { %v16080_v23 = vpack.c.bf16 %v1147_v9, %v1146_v11  ;;  %14239 = vmatpush1.bf16.msra.mxu1 %v16060_v4  ;;  %14298 = vmatpush1.bf16.msra.mxu0 %v16060_v4  ;;  %v1076_v25 = vadd.f32 %v15869_v56, %v1075_v18  ;;  %v10564_v9 = vld [vmem:[%s20160_s3 + $0x2c0] sm:$0xff]  ;;  %v1195_v11 = vld [vmem:[%s20160_s3 + $0x148] sm:$0xff] }
 0x156   : > { %v1149_v26 = vmax.f32 %v1081_v16, 0.0  ;;  %14240 = vmatprep.subr.bf16.mxu1 %v20183_v8  ;;  %14299 = vmatprep.subr.bf16.mxu0 %v20183_v8  ;;  %v10569_v12 = vld [vmem:[%s20160_s3 + $0x2e8] sm:$0xff] }
 0x157   : > { %1336 = vmatmul.mubr.f32.gmra.mrb[10].mxu1 %v1174_v14  ;;  %1690 = vmatmul.mubr.f32.gmra.mrb[60].mxu0 %v10548_v15  ;;  %v1148_v27 = vmax.f32 %v1076_v25, 0.0  ;;  %v12903_v28 = vpop.f32.mrb[46].mxu0  ;;  %v1194_v14 = vld [vmem:[%s20160_s3 + $0x140] sm:$0xff]  ;;  %v1199_v16 = vld [vmem:[%s20160_s3 + $0x168] sm:$0xff] }
 0x158   : > { %1340 = vmatprep.mubr.f32.mxu1 %v1179_v19  ;;  %1694 = vmatprep.mubr.f32.mxu0 %v10553_v20  ;;  %v1091_v33 = vadd.f32 %v12903_v28, %v15869_v56  ;;  %v1085_v34 = vpop.f32.mrb[47].mxu0  ;;  %v10568_v15 = vld [vmem:[%s20160_s3 + $0x2e0] sm:$0xff]  ;;  %v10573_v18 = vld [vmem:[%s20160_s3 + $0x308] sm:$0xff] }
 0x159   : > { %v16100_v40 = vpack.c.bf16 %v1149_v26, %v1148_v27  ;;  %14242 = vmatpush1.bf16.msra.mxu1 %v16080_v23  ;;  %14301 = vmatpush1.bf16.msra.mxu0 %v16080_v23  ;;  %v1086_v41 = vadd.f32 %v15869_v56, %v1085_v34  ;;  %v1198_v19 = vld [vmem:[%s20160_s3 + $0x160] sm:$0xff]  ;;  %v1203_v25 = vld [vmem:[%s20160_s3 + $0x188] sm:$0xf]  ;;  %v10594_v34 = vld [vmem:[%s20161_s4 + $0x18] sm:$0xff] }
 0x15a   : > { %v1151_v42 = vmax.f32 %v1091_v33, 0.0  ;;  %14243 = vmatprep.subr.bf16.mxu1 %v20183_v8  ;;  %14302 = vmatprep.subr.bf16.mxu0 %v20183_v8  ;;  %v10572_v20 = vld [vmem:[%s20160_s3 + $0x300] sm:$0xff]  ;;  %v10577_v26 = vld [vmem:[%s20160_s3 + $0x328] sm:$0xf]  ;;  %v10593_v33 = vld [vmem:[%s20161_s4 + $0x10] sm:$0xff] }
 0x15b   : > { %1341 = vmatmul.mubr.f32.gmra.mrb[12].mxu1 %v1178_v30  ;;  %1695 = vmatmul.mubr.f32.gmra.mrb[62].mxu0 %v10552_v32  ;;  %v1150_v43 = vmax.f32 %v1086_v41, 0.0  ;;  %v12906_v44 = vpop.f32.mrb[48].mxu0  ;;  %v1202_v27 = vld [vmem:[%s20160_s3 + $0x180] sm:$0xf]  ;;  %v1157_v30 = vld [vmem:[%s20160_s3 + $0x18] sm:$0xff]  ;;  %v14312_v41 = vpack.c.bf16 %v10594_v34, %v10593_v33  ;;  %v10550_v34 = vld [vmem:[%s20160_s3 + $0x250] sm:$0xff] }
 0x15c   : > { %1345 = vmatprep.mubr.f32.mxu1 %v1183_v35  ;;  %1699 = vmatprep.mubr.f32.mxu0 %v10557_v39  ;;  %v1101_v49 = vadd.f32 %v12906_v44, %v15869_v56  ;;  %v1095_v50 = vpop.f32.mrb[49].mxu0  ;;  %v10576_v28 = vld [vmem:[%s20160_s3 + $0x320] sm:$0xf]  ;;  %v10531_v32 = vld [vmem:[%s20160_s3 + $0x1b8] sm:$0xff]  ;;  %v1156_v35 = vld [vmem:[%s20160_s3 + $0x10] sm:$0xff] }
 0x15d   : > { %v16120_v57 = vpack.c.bf16 %v1151_v42, %v1150_v43  ;;  %14245 = vmatpush1.bf16.msra.mxu1 %v16100_v40  ;;  %14304 = vmatpush1.bf16.msra.mxu0 %v16100_v40  ;;  %v1096_v58 = vadd.f32 %v15869_v56, %v1095_v50  ;;  %v1191_v56 = vld [vmem:[%s20160_s3 + $0x128] sm:$0xff]  ;;  %v10530_v39 = vld [vmem:[%s20160_s3 + $0x1b0] sm:$0xff]  ;;  %v1161_v42 = vld [vmem:[%s20160_s3 + $0x38] sm:$0xff] }
 0x15e   : > { %v1153_v59 = vmax.f32 %v1101_v49, 0.0  ;;  %14246 = vmatprep.subr.bf16.mxu1 %v20183_v8  ;;  %14305 = vmatprep.subr.bf16.mxu0 %v20183_v8  ;;  %v10535_v43 = vld [vmem:[%s20160_s3 + $0x1d8] sm:$0xff]  ;;  %v1160_v44 = vld [vmem:[%s20160_s3 + $0x30] sm:$0xff] }
 0x15f   : > { %1346 = vmatmul.mubr.f32.gmra.mrb[14].mxu1 %v1182_v47  ;;  %1700 = vmatmul.mubr.f32.gmra.mrb[64].mxu0 %v10556_v48  ;;  %v1152_v61 = vmax.f32 %v1096_v58, 0.0  ;;  %v10534_v47 = vld [vmem:[%s20160_s3 + $0x1d0] sm:$0xff]  ;;  %v1165_v48 = vld [vmem:[%s20160_s3 + $0x58] sm:$0xff] }
 0x160   : > { %1350 = vmatprep.mubr.f32.mxu1 %v1187_v53  ;;  %1704 = vmatprep.mubr.f32.mxu0 %v10561_v55  ;;  %v10539_v49 = vld [vmem:[%s20160_s3 + $0x1f8] sm:$0xff]  ;;  %v1164_v50 = vld [vmem:[%s20160_s3 + $0x50] sm:$0xff] }
 0x161   : > { %v16139_v1 = vpack.c.bf16 %v1153_v59, %v1152_v61  ;;  %14248 = vmatpush1.bf16.msra.mxu1 %v16120_v57  ;;  %14307 = vmatpush1.bf16.msra.mxu0 %v16120_v57  ;;  %v10538_v53 = vld [vmem:[%s20160_s3 + $0x1f0] sm:$0xff]  ;;  %v1169_v55 = vld [vmem:[%s20160_s3 + $0x78] sm:$0xff] }
 0x162   : > { %14249 = vmatprep.subr.bf16.mxu1 %v20183_v8  ;;  %14308 = vmatprep.subr.bf16.mxu0 %v20183_v8  ;;  %v10543_v58 = vld [vmem:[%s20160_s3 + $0x218] sm:$0xff]  ;;  %v1168_v59 = vld [vmem:[%s20160_s3 + $0x70] sm:$0xff] }
 0x163   : > { %1351 = vmatmul.mubr.f32.gmra.mrb[16].mxu1 %v1186_v62  ;;  %1705 = vmatmul.mubr.f32.gmra.mrb[66].mxu0 %v10560_v63  ;;  %v10542_v61 = vld [vmem:[%s20160_s3 + $0x210] sm:$0xff]  ;;  %v1173_v62 = vld [vmem:[%s20160_s3 + $0x98] sm:$0xff] }
 0x164   : > { %1355 = vmatprep.mubr.f32.mxu1 %v1191_v56  ;;  %1709 = vmatprep.mubr.f32.mxu0 %v10565_v0  ;;  %v1172_v63 = vld [vmem:[%s20160_s3 + $0x90] sm:$0xff]  ;;  %v1177_v56 = vld [vmem:[%s20160_s3 + $0xb8] sm:$0xff] }
 0x165   : > { %14251 = vmatpush1.bf16.msra.mxu1 %v16139_v1  ;;  %14310 = vmatpush1.bf16.msra.mxu0 %v16139_v1  ;;  %v1176_v0 = vld [vmem:[%s20160_s3 + $0xb0] sm:$0xff]  ;;  %v10551_v33 = vld [vmem:[%s20160_s3 + $0x258] sm:$0xff] }
 0x166   : > { %15402 = vmatprep.subr.bf16.mxu1 %v20183_v8  ;;  %14311 = vmatprep.subr.bf16.mxu0 %v20183_v8 }
 0x167   : > { %1356 = vmatmul.mubr.f32.gmra.mrb[18].mxu1 %v1190_v7  ;;  %1710 = vmatmul.mubr.f32.gmra.mrb[68].mxu0 %v10564_v9  ;;  %v1181_v7 = vld [vmem:[%s20160_s3 + $0xd8] sm:$0xff]  ;;  %v1180_v9 = vld [vmem:[%s20160_s3 + $0xd0] sm:$0xff] }
 0x168   : > { %1360 = vmatprep.mubr.f32.mxu1 %v1195_v11  ;;  %1714 = vmatprep.mubr.f32.mxu0 %v10569_v12  ;;  %v1185_v11 = vld [vmem:[%s20160_s3 + $0xf8] sm:$0xff]  ;;  %v1184_v12 = vld [vmem:[%s20160_s3 + $0xf0] sm:$0xff] }
 0x16b   : > { %1361 = vmatmul.mubr.f32.gmra.mrb[20].mxu1 %v1194_v14  ;;  %1715 = vmatmul.mubr.f32.gmra.mrb[70].mxu0 %v10568_v15  ;;  %v1189_v14 = vld [vmem:[%s20160_s3 + $0x118] sm:$0xff]  ;;  %v1188_v15 = vld [vmem:[%s20160_s3 + $0x110] sm:$0xff] }
 0x16c   : > { %1365 = vmatprep.mubr.f32.mxu1 %v1199_v16  ;;  %1719 = vmatprep.mubr.f32.mxu0 %v10573_v18  ;;  %v1193_v16 = vld [vmem:[%s20160_s3 + $0x138] sm:$0xff]  ;;  %v1192_v18 = vld [vmem:[%s20160_s3 + $0x130] sm:$0xff] }
 0x16f   : > { %1366 = vmatmul.mubr.f32.gmra.mrb[22].mxu1 %v1198_v19  ;;  %1720 = vmatmul.mubr.f32.gmra.mrb[72].mxu0 %v10572_v20  ;;  %v1197_v19 = vld [vmem:[%s20160_s3 + $0x158] sm:$0xff]  ;;  %v1196_v20 = vld [vmem:[%s20160_s3 + $0x150] sm:$0xff] }
 0x170   : > { %1370 = vmatprep.mubr.f32.mxu1 %v1203_v25  ;;  %1724 = vmatprep.mubr.f32.mxu0 %v10577_v26  ;;  %v1201_v25 = vld [vmem:[%s20160_s3 + $0x178] sm:$0xff]  ;;  %v1200_v26 = vld [vmem:[%s20160_s3 + $0x170] sm:$0xff] }
 0x173   : > { %1371 = vmatmul.mubr.f32.gmra.mrb[24].mxu1 %v1202_v27  ;;  %1725 = vmatmul.mubr.f32.gmra.mrb[74].mxu0 %v10576_v28  ;;  %v1205_v27 = vld [vmem:[%s20160_s3 + $0x198] sm:$0xf]  ;;  %v1204_v28 = vld [vmem:[%s20160_s3 + $0x190] sm:$0xf] }
 0x174   : > { %10515 = vmatprep.mubr.msk.f32.mxu1 %vm1206_vm4, %v1157_v30  ;;  %10580 = vmatprep.mubr.msk.f32.mxu0 %vm1206_vm4, %v10531_v32  ;;  %v10547_v30 = vld [vmem:[%s20160_s3 + $0x238] sm:$0xff]  ;;  %v10546_v32 = vld [vmem:[%s20160_s3 + $0x230] sm:$0xff] }
 0x177   : > { %1441 = vmatmul.mubr.f32.vlgmr.msra.gmra.mrb[26].mxu1 %v1156_v35  ;;  %1795 = vmatmul.mubr.f32.vlgmr.msra.gmra.mrb[76].mxu0 %v10530_v39  ;;  %v10555_v35 = vld [vmem:[%s20160_s3 + $0x278] sm:$0xff]  ;;  %v10554_v39 = vld [vmem:[%s20160_s3 + $0x270] sm:$0xff] }
 0x178   : > { %15411 = vmatpush1.bf16.msra.mxu1 %v15982_v6  ;;  %14313 = vmatpush3.bf16.msra.mxu0 %v14312_v41  ;;  %v10559_v41 = vld [vmem:[%s20160_s3 + $0x298] sm:$0xff] }
 0x179   : > { %14318 = vmatprep.subr.bf16.mxu0 %v15906_v60  ;;  %10516 = vmatprep.mubr.msk.f32.mxu1 %vm1206_vm4, %v1161_v42  ;;  %v10558_v42 = vld [vmem:[%s20160_s3 + $0x290] sm:$0xff] }
 0x17a   : > { %15403 = vmatprep.subr.bf16.mxu1 %v20183_v8  ;;  %10581 = vmatprep.mubr.msk.f32.mxu0 %vm1206_vm4, %v10535_v43  ;;  %v10563_v43 = vld [vmem:[%s20160_s3 + $0x2b8] sm:$0xff] }
 0x17b   : > { %1446 = vmatmul.mubr.f32.gmra.mrb[28].mxu1 %v1160_v44  ;;  %1800 = vmatmul.mubr.f32.gmra.mrb[78].mxu0 %v10534_v47  ;;  %v10562_v44 = vld [vmem:[%s20160_s3 + $0x2b0] sm:$0xff]  ;;  %v10567_v47 = vld [vmem:[%s20160_s3 + $0x2d8] sm:$0xff] }
 0x17c   : > { %15412 = vmatpush1.bf16.msra.mxu1 %v16000_v22  ;;  %10517 = vmatprep.mubr.msk.f32.mxu1 %vm1206_vm4, %v1165_v48  ;;  %v10566_v48 = vld [vmem:[%s20160_s3 + $0x2d0] sm:$0xff] }
 0x17d   : > { %15404 = vmatprep.subr.bf16.mxu1 %v20183_v8  ;;  %10582 = vmatprep.mubr.msk.f32.mxu0 %vm1206_vm4, %v10539_v49  ;;  %v10571_v49 = vld [vmem:[%s20160_s3 + $0x2f8] sm:$0xff] }
 0x17f   : > { %1451 = vmatmul.mubr.f32.gmra.mrb[30].mxu1 %v1164_v50  ;;  %1805 = vmatmul.mubr.f32.gmra.mrb[80].mxu0 %v10538_v53  ;;  %v10570_v50 = vld [vmem:[%s20160_s3 + $0x2f0] sm:$0xff]  ;;  %v10575_v53 = vld [vmem:[%s20160_s3 + $0x318] sm:$0xff] }
 0x180   : > { %15413 = vmatpush1.bf16.msra.mxu1 %v16020_v36  ;;  %10518 = vmatprep.mubr.msk.f32.mxu1 %vm1206_vm4, %v1169_v55  ;;  %v10574_v55 = vld [vmem:[%s20160_s3 + $0x310] sm:$0xff] }
 0x181   : > { %15405 = vmatprep.subr.bf16.mxu1 %v20183_v8  ;;  %10583 = vmatprep.mubr.msk.f32.mxu0 %vm1206_vm4, %v10543_v58  ;;  %v10579_v58 = vld [vmem:[%s20160_s3 + $0x338] sm:$0xf] }
 0x183   : > { %1456 = vmatmul.mubr.f32.gmra.mrb[32].mxu1 %v1168_v59  ;;  %1810 = vmatmul.mubr.f32.gmra.mrb[82].mxu0 %v10542_v61  ;;  %v1506_v59 = vld [vmem:[%s20161_s4] sm:$0xff]  ;;  %v1507_v61 = vld [vmem:[%s20161_s4 + $0x8] sm:$0xff] }
 0x184   : > { %15414 = vmatpush1.bf16.msra.mxu1 %v16040_v51  ;;  %10519 = vmatprep.mubr.msk.f32.mxu1 %vm1206_vm4, %v1173_v62  ;;  %v10578_v62 = vld [vmem:[%s20160_s3 + $0x330] sm:$0xf] }
 0x185   : > { %15406 = vmatprep.subr.bf16.mxu1 %v20183_v8 }
 0x187   : > { %1461 = vmatmul.mubr.f32.gmra.mrb[34].mxu1 %v1172_v63  ;;  %v14315_v63 = vpack.c.bf16 %v1507_v61, %v1506_v59 }
 0x188   : > { %15415 = vmatpush1.bf16.msra.mxu1 %v16060_v4  ;;  %10520 = vmatprep.mubr.msk.f32.mxu1 %vm1206_vm4, %v1177_v56  ;;  %v20185_v56 = vmov 0.0  }
 0x189   : > { %15407 = vmatprep.subr.bf16.mxu1 %v20183_v8  ;;  %12911 = vmatprep.mubr.msk.f32.mxu0 %vm15594_vm5, %v20185_v56 }
 0x18b   : > { %1466 = vmatmul.mubr.f32.gmra.mrb[36].mxu1 %v1176_v0 }
 0x18c   : > { %15416 = vmatpush1.bf16.msra.mxu1 %v16080_v23  ;;  %10521 = vmatprep.mubr.msk.f32.mxu1 %vm1206_vm4, %v1181_v7 }
 0x18d   : > { %15408 = vmatprep.subr.bf16.mxu1 %v20183_v8 }
 0x18f   : > { %1471 = vmatmul.mubr.f32.gmra.mrb[38].mxu1 %v1180_v9 }
 0x190   : > { %15417 = vmatpush1.bf16.msra.mxu1 %v16100_v40  ;;  %10522 = vmatprep.mubr.msk.f32.mxu1 %vm1206_vm4, %v1185_v11 }
 0x191   : > { %15409 = vmatprep.subr.bf16.mxu1 %v20183_v8 }
 0x193   : > { %1476 = vmatmul.mubr.f32.gmra.mrb[40].mxu1 %v1184_v12 }
 0x194   : > { %15418 = vmatpush1.bf16.msra.mxu1 %v16120_v57  ;;  %10523 = vmatprep.mubr.msk.f32.mxu1 %vm1206_vm4, %v1189_v14 }
 0x195   : > { %15410 = vmatprep.subr.bf16.mxu1 %v20183_v8 }
 0x197   : > { %1481 = vmatmul.mubr.f32.gmra.mrb[42].mxu1 %v1188_v15 }
 0x198   : > { %15419 = vmatpush1.bf16.msra.mxu1 %v16139_v1  ;;  %10524 = vmatprep.mubr.msk.f32.mxu1 %vm1206_vm4, %v1193_v16 }
 0x199   : > { %14314 = vmatprep.subr.bf16.mxu1 %v20183_v8 }
 0x19b   : > { %1486 = vmatmul.mubr.f32.gmra.mrb[44].mxu1 %v1192_v18 }
 0x19c   : > { %10525 = vmatprep.mubr.msk.f32.mxu1 %vm1206_vm4, %v1197_v19 }
 0x19f   : > { %1491 = vmatmul.mubr.f32.gmra.mrb[46].mxu1 %v1196_v20 }
 0x1a0   : > { %10526 = vmatprep.mubr.msk.f32.mxu1 %vm1206_vm4, %v1201_v25 }
 0x1a3   : > { %1496 = vmatmul.mubr.f32.gmra.mrb[48].mxu1 %v1200_v26 }
 0x1a4   : > { %10527 = vmatprep.mubr.msk.f32.mxu1 %vm1206_vm4, %v1205_v27 }
 0x1a7   : > { %1501 = vmatmul.mubr.f32.gmra.mrb[50].mxu1 %v1204_v28 }
 0x1a8   : > { %10584 = vmatprep.mubr.msk.f32.mxu1 %vm1206_vm4, %v10547_v30 }
 0x1ab   : > { %1815 = vmatmul.mubr.f32.vlgmr.msra.gmra.mrb[52].mxu1 %v10546_v32 }
 0x1ac   : > { %10585 = vmatprep.mubr.msk.f32.mxu1 %vm1206_vm4, %v10551_v33  ;;  %14316 = vmatpush3.bf16.msra.mxu1 %v14315_v63 }
 0x1ad   : > { %14349 = vmatprep.subr.bf16.mxu1 %v20183_v8 }
 0x1af   : > { %1820 = vmatmul.mubr.f32.gmra.mrb[54].mxu1 %v10550_v34 }
 0x1b0   : > { %10586 = vmatprep.mubr.msk.f32.mxu1 %vm1206_vm4, %v10555_v35 }
 0x1b3   : > { %1825 = vmatmul.mubr.f32.gmra.mrb[56].mxu1 %v10554_v39 }
 0x1b4   : > { %10587 = vmatprep.mubr.msk.f32.mxu1 %vm1206_vm4, %v10559_v41 }
 0x1b7   : > { %1830 = vmatmul.mubr.f32.gmra.mrb[58].mxu1 %v10558_v42 }
 0x1b8   : > { %10588 = vmatprep.mubr.msk.f32.mxu1 %vm1206_vm4, %v10563_v43 }
 0x1bb   : > { %1835 = vmatmul.mubr.f32.gmra.mrb[60].mxu1 %v10562_v44 }
 0x1bc   : > { %10589 = vmatprep.mubr.msk.f32.mxu1 %vm1206_vm4, %v10567_v47 }
 0x1bf   : > { %1840 = vmatmul.mubr.f32.gmra.mrb[62].mxu1 %v10566_v48 }
 0x1c0   : > { %10590 = vmatprep.mubr.msk.f32.mxu1 %vm1206_vm4, %v10571_v49 }
 0x1c3   : > { %1845 = vmatmul.mubr.f32.gmra.mrb[64].mxu1 %v10570_v50 }
 0x1c4   : > { %10591 = vmatprep.mubr.msk.f32.mxu1 %vm1206_vm4, %v10575_v53 }
 0x1c7   : > { %1850 = vmatmul.mubr.f32.gmra.mrb[66].mxu1 %v10574_v55 }
 0x1c8   : > { %10592 = vmatprep.mubr.msk.f32.mxu1 %vm1206_vm4, %v10579_v58 }
 0x1cb   : > { %1855 = vmatmul.mubr.f32.gmra.mrb[68].mxu1 %v10578_v62 }
 0x1cc   : > { %12954 = vmatprep.mubr.msk.f32.mxu1 %vm15594_vm5, %v20185_v56 }
 0x216   : > { %v11618_v0 = vpop.f32.mrb[0].mxu1  ;;  %v11689_v7 = vpop.f32.mrb[50].mxu0 }
 0x217   : > { %v11619_v9 = vpop.f32.mrb[1].mxu1  ;;  %v11690_v11 = vpop.f32.mrb[51].mxu0 }
 0x218   : > { %v16409_v12 = vadd.f32 %v11619_v9, %v11618_v0  ;;  %v16411_v14 = vadd.f32 %v11690_v11, %v11689_v7 }
 0x21a   : > { %v11621_v15 = vpop.f32.mrb[2].mxu1  ;;  %v11692_v16 = vpop.f32.mrb[52].mxu0 }
 0x21b   : > { %v11622_v18 = vpop.f32.mrb[3].mxu1  ;;  %v11693_v19 = vpop.f32.mrb[53].mxu0 }
 0x21c   : > { %v16413_v20 = vadd.f32 %v11622_v18, %v11621_v15  ;;  %v16415_v25 = vadd.f32 %v11693_v19, %v11692_v16 }
 0x21e   : > { %v11624_v26 = vpop.f32.mrb[4].mxu1  ;;  %v11695_v27 = vpop.f32.mrb[54].mxu0 }
 0x21f   : > { %v11625_v28 = vpop.f32.mrb[5].mxu1  ;;  %v11696_v30 = vpop.f32.mrb[55].mxu0 }
 0x220   : > { %v16417_v32 = vadd.f32 %v11625_v28, %v11624_v26  ;;  %v16419_v33 = vadd.f32 %v11696_v30, %v11695_v27 }
 0x222   : > { %v11627_v34 = vpop.f32.mrb[6].mxu1  ;;  %v11698_v35 = vpop.f32.mrb[56].mxu0 }
 0x223   : > { %v11628_v39 = vpop.f32.mrb[7].mxu1  ;;  %v11699_v41 = vpop.f32.mrb[57].mxu0 }
 0x224   : > { %v16421_v42 = vadd.f32 %v11628_v39, %v11627_v34  ;;  %v16423_v43 = vadd.f32 %v11699_v41, %v11698_v35 }
 0x226   : > { %v11630_v44 = vpop.f32.mrb[8].mxu1  ;;  %v11701_v47 = vpop.f32.mrb[58].mxu0 }
 0x227   : > { %v11631_v48 = vpop.f32.mrb[9].mxu1  ;;  %v11702_v49 = vpop.f32.mrb[59].mxu0 }
 0x228   : > { %v16425_v50 = vadd.f32 %v11631_v48, %v11630_v44  ;;  %v16427_v53 = vadd.f32 %v11702_v49, %v11701_v47 }
 0x22a   : > { %v11633_v55 = vpop.f32.mrb[10].mxu1  ;;  %v11704_v58 = vpop.f32.mrb[60].mxu0 }
 0x22b   : > { %v11634_v59 = vpop.f32.mrb[11].mxu1  ;;  %v11705_v61 = vpop.f32.mrb[61].mxu0 }
 0x22c   : > { %v16429_v62 = vadd.f32 %v11634_v59, %v11633_v55  ;;  %v16431_v63 = vadd.f32 %v11705_v61, %v11704_v58 }
 0x22e   : > { %v11636_v0 = vpop.f32.mrb[12].mxu1  ;;  %v11707_v7 = vpop.f32.mrb[62].mxu0 }
 0x22f   : > { %v11637_v9 = vpop.f32.mrb[13].mxu1  ;;  %v11708_v11 = vpop.f32.mrb[63].mxu0 }
 0x230   : > { %v16433_v15 = vadd.f32 %v11637_v9, %v11636_v0  ;;  %v16435_v16 = vadd.f32 %v11708_v11, %v11707_v7 }
 0x232   : > { %v11639_v18 = vpop.f32.mrb[14].mxu1  ;;  %v11710_v19 = vpop.f32.mrb[64].mxu0 }
 0x233   : > { %v11640_v26 = vpop.f32.mrb[15].mxu1  ;;  %v11711_v27 = vpop.f32.mrb[65].mxu0 }
 0x234   : > { %v16437_v28 = vadd.f32 %v11640_v26, %v11639_v18  ;;  %v16439_v30 = vadd.f32 %v11711_v27, %v11710_v19 }
 0x236   : > { %v11642_v34 = vpop.f32.mrb[16].mxu1  ;;  %v11713_v35 = vpop.f32.mrb[66].mxu0 }
 0x237   : > { %v11643_v39 = vpop.f32.mrb[17].mxu1  ;;  %v11714_v41 = vpop.f32.mrb[67].mxu0 }
 0x238   : > { %v16441_v44 = vadd.f32 %v11643_v39, %v11642_v34  ;;  %v16443_v47 = vadd.f32 %v11714_v41, %v11713_v35 }
 0x23a   : > { %v11645_v48 = vpop.f32.mrb[18].mxu1  ;;  %v11716_v49 = vpop.f32.mrb[68].mxu0 }
 0x23b   : > { %v11646_v55 = vpop.f32.mrb[19].mxu1  ;;  %v11717_v58 = vpop.f32.mrb[69].mxu0 }
 0x23c   : > { %v16445_v59 = vadd.f32 %v11646_v55, %v11645_v48  ;;  %v16447_v61 = vadd.f32 %v11717_v58, %v11716_v49 }
 0x23e   : > { %v11648_v0 = vpop.f32.mrb[20].mxu1  ;;  %v11719_v7 = vpop.f32.mrb[70].mxu0 }
 0x23f   : > { %v11649_v9 = vpop.f32.mrb[21].mxu1  ;;  %v11720_v11 = vpop.f32.mrb[71].mxu0 }
 0x240   : > { %v16449_v18 = vadd.f32 %v11649_v9, %v11648_v0  ;;  %v16451_v19 = vadd.f32 %v11720_v11, %v11719_v7 }
 0x242   : > { %20205 = vst [vmem:[#allocation11_spill] sm:$0xff] %v16451_v19  ;;  %v11651_v26 = vpop.f32.mrb[22].mxu1  ;;  %v11722_v27 = vpop.f32.mrb[72].mxu0 }
 0x243   : > { %v11652_v34 = vpop.f32.mrb[23].mxu1  ;;  %v11723_v35 = vpop.f32.mrb[73].mxu0 }
 0x244   : > { %v16453_v39 = vadd.f32 %v11652_v34, %v11651_v26  ;;  %v16455_v41 = vadd.f32 %v11723_v35, %v11722_v27 }
 0x246   : > { %v11654_v48 = vpop.f32.mrb[24].mxu1  ;;  %v11725_v55 = vpop.f32.mrb[74].mxu0 }
 0x247   : > { %v11655_v49 = vpop.f32.mrb[25].mxu1  ;;  %v11726_v58 = vpop.f32.mrb[75].mxu0 }
 0x248   : > { %v16457_v8 = vadd.f32 %v11655_v49, %v11654_v48  ;;  %v16459_v56 = vadd.f32 %v11726_v58, %v11725_v55 }
 0x24a   : > { %v1442_v0 = vpop.f32.mrb[26].mxu1  ;;  %v1796_v9 = vpop.f32.mrb[76].mxu0 }
 0x24b   : > { %v1443_v7 = vadd.f32 %v16409_v12, %v1442_v0  ;;  %v1797_v11 = vadd.f32 %v16411_v14, %v1796_v9  ;;  %v1444_v3 = vpop.f32.mrb[27].mxu1  ;;  %v1798_v19 = vpop.f32.mrb[77].mxu0  ;;  %v20206_v12 = vmov 0.0  }
 0x24c   : > { %v20207_v19 = vmov 0.0|0.0  }
 0x24d   : > { %12912 = vmatmul.mubr.msk.f32.vlgmr.msra.gmra.mrb[84].mxu0 %vm1206_vm4, %v1797_v11  ;;  %12955 = vmatmul.mubr.msk.f32.vlgmr.msra.gmra.mrb[70].mxu1 %vm1206_vm4, %v1443_v7 }
 0x24e   : > { %14320 = vmatpush3.bf16.msra.mxu0 %v15874_v2  ;;  %14351 = vmatpush1.bf16.msra.mxu1 %v15982_v6  ;;  %v1447_v26 = vpop.f32.mrb[28].mxu1  ;;  %v1801_v27 = vpop.f32.mrb[78].mxu0 }
 0x24f   : > { %v1448_v34 = vadd.f32 %v16413_v20, %v1447_v26  ;;  %v1802_v35 = vadd.f32 %v16415_v25, %v1801_v27  ;;  %14322 = vmatprep.subr.bf16.mxu0 %v15914_v5  ;;  %12914 = vmatprep.mubr.msk.f32.mxu0 %vm15594_vm5, %v20206_v12  ;;  %v1449_v3 = vpop.f32.mrb[29].mxu1  ;;  %v1803_v14 = vpop.f32.mrb[79].mxu0 }
 0x250   : > { %12957 = vmatprep.mubr.msk.f32.mxu1 %vm15594_vm5, %v20206_v12  ;;  %14352 = vmatprep.subr.bf16.mxu1 %v20207_v19 }
 0x251   : > { %12915 = vmatmul.mubr.msk.f32.gmra.mrb[86].mxu0 %vm1206_vm4, %v1802_v35  ;;  %12958 = vmatmul.mubr.msk.f32.gmra.mrb[72].mxu1 %vm1206_vm4, %v1448_v34 }
 0x252   : > { %14324 = vmatpush3.bf16.msra.mxu0 %v15878_v10  ;;  %14354 = vmatpush1.bf16.msra.mxu1 %v16000_v22  ;;  %v1452_v20 = vpop.f32.mrb[30].mxu1  ;;  %v1806_v25 = vpop.f32.mrb[80].mxu0 }
 0x253   : > { %v1453_v48 = vadd.f32 %v16417_v32, %v1452_v20  ;;  %v1807_v55 = vadd.f32 %v16419_v33, %v1806_v25  ;;  %14326 = vmatprep.subr.bf16.mxu0 %v15922_v13  ;;  %12917 = vmatprep.mubr.msk.f32.mxu0 %vm15594_vm5, %v20206_v12  ;;  %v1454_v49 = vpop.f32.mrb[31].mxu1  ;;  %v1808_v58 = vpop.f32.mrb[81].mxu0 }
 0x254   : > { %12960 = vmatprep.mubr.msk.f32.mxu1 %vm15594_vm5, %v20206_v12  ;;  %14355 = vmatprep.subr.bf16.mxu1 %v20207_v19 }
 0x255   : > { %12918 = vmatmul.mubr.msk.f32.gmra.mrb[88].mxu0 %vm1206_vm4, %v1807_v55  ;;  %12961 = vmatmul.mubr.msk.f32.gmra.mrb[74].mxu1 %vm1206_vm4, %v1453_v48 }
 0x256   : > { %14328 = vmatpush3.bf16.msra.mxu0 %v15882_v17  ;;  %14357 = vmatpush1.bf16.msra.mxu1 %v16020_v36  ;;  %v1457_v32 = vpop.f32.mrb[32].mxu1  ;;  %v1811_v33 = vpop.f32.mrb[82].mxu0 }
 0x257   : > { %v1458_v0 = vadd.f32 %v16421_v42, %v1457_v32  ;;  %v1812_v9 = vadd.f32 %v16423_v43, %v1811_v33  ;;  %14330 = vmatprep.subr.bf16.mxu0 %v15930_v21  ;;  %12920 = vmatprep.mubr.msk.f32.mxu0 %vm15594_vm5, %v20206_v12  ;;  %v1459_v7 = vpop.f32.mrb[33].mxu1  ;;  %v1813_v11 = vpop.f32.mrb[83].mxu0 }
 0x258   : > { %12963 = vmatprep.mubr.msk.f32.mxu1 %vm15594_vm5, %v20206_v12  ;;  %14358 = vmatprep.subr.bf16.mxu1 %v20207_v19 }
 0x259   : > { %12921 = vmatmul.mubr.msk.f32.gmra.mrb[90].mxu0 %vm1206_vm4, %v1812_v9  ;;  %12964 = vmatmul.mubr.msk.f32.gmra.mrb[76].mxu1 %vm1206_vm4, %v1458_v0 }
 0x25a   : > { %14332 = vmatpush3.bf16.msra.mxu0 %v15886_v24  ;;  %14360 = vmatpush1.bf16.msra.mxu1 %v16040_v51  ;;  %v1462_v42 = vpop.f32.mrb[34].mxu1 }
 0x25b   : > { %v1463_v43 = vadd.f32 %v16425_v50, %v1462_v42  ;;  %14334 = vmatprep.subr.bf16.mxu0 %v15938_v29  ;;  %12966 = vmatprep.mubr.msk.f32.mxu1 %vm15594_vm5, %v20206_v12  ;;  %v1464_v26 = vpop.f32.mrb[35].mxu1 }
 0x25c   : > { %14361 = vmatprep.subr.bf16.mxu1 %v20207_v19  ;;  %12923 = vmatprep.mubr.msk.f32.mxu0 %vm15594_vm5, %v20206_v12 }
 0x25d   : > { %12967 = vmatmul.mubr.msk.f32.gmra.mrb[78].mxu1 %vm1206_vm4, %v1463_v43 }
 0x25e   : > { %14336 = vmatpush3.bf16.msra.mxu0 %v15890_v31  ;;  %14363 = vmatpush1.bf16.msra.mxu1 %v16060_v4  ;;  %v1467_v27 = vpop.f32.mrb[36].mxu1 }
 0x25f   : > { %v1468_v50 = vadd.f32 %v16429_v62, %v1467_v27  ;;  %14338 = vmatprep.subr.bf16.mxu0 %v15946_v37  ;;  %12969 = vmatprep.mubr.msk.f32.mxu1 %vm15594_vm5, %v20206_v12  ;;  %v1469_v34 = vpop.f32.mrb[37].mxu1 }
 0x260   : > { %14364 = vmatprep.subr.bf16.mxu1 %v20207_v19  ;;  %v10627_v34 = vld [vmem:[%s20160_s3 + $0x370] sm:$0xff] }
 0x261   : > { %12970 = vmatmul.mubr.msk.f32.gmra.mrb[80].mxu1 %vm1206_vm4, %v1468_v50 }
 0x262   : > { %14340 = vmatpush3.bf16.msra.mxu0 %v15894_v38  ;;  %14366 = vmatpush1.bf16.msra.mxu1 %v16080_v23  ;;  %v1472_v35 = vpop.f32.mrb[38].mxu1 }
 0x263   : > { %v1473_v3 = vadd.f32 %v16433_v15, %v1472_v35  ;;  %14342 = vmatprep.subr.bf16.mxu0 %v15954_v46  ;;  %12972 = vmatprep.mubr.msk.f32.mxu1 %vm15594_vm5, %v20206_v12  ;;  %v1474_v62 = vpop.f32.mrb[39].mxu1 }
 0x264   : > { %14367 = vmatprep.subr.bf16.mxu1 %v20207_v19 }
 0x265   : > { %12973 = vmatmul.mubr.msk.f32.gmra.mrb[82].mxu1 %vm1206_vm4, %v1473_v3  ;;  %v10632_v3 = vld [vmem:[%s20160_s3 + $0x398] sm:$0xff] }
 0x266   : > { %14344 = vmatpush3.bf16.msra.mxu0 %v15898_v45  ;;  %14369 = vmatpush1.bf16.msra.mxu1 %v16100_v40  ;;  %v1477_v14 = vpop.f32.mrb[40].mxu1 }
 0x267   : > { %v1478_v20 = vadd.f32 %v16437_v28, %v1477_v14  ;;  %14346 = vmatprep.subr.bf16.mxu0 %v15962_v54  ;;  %12975 = vmatprep.mubr.msk.f32.mxu1 %vm15594_vm5, %v20206_v12  ;;  %v1479_v15 = vpop.f32.mrb[41].mxu1 }
 0x268   : > { %14370 = vmatprep.subr.bf16.mxu1 %v20207_v19  ;;  %v10636_v15 = vld [vmem:[%s20160_s3 + $0x3b8] sm:$0xff] }
 0x269   : > { %12976 = vmatmul.mubr.msk.f32.gmra.mrb[84].mxu1 %vm1206_vm4, %v1478_v20 }
 0x26a   : > { %14348 = vmatpush3.bf16.msra.mxu0 %v15902_v52  ;;  %14372 = vmatpush1.bf16.msra.mxu1 %v16120_v57  ;;  %v1482_v25 = vpop.f32.mrb[42].mxu1 }
 0x26b   : > { %v1483_v48 = vadd.f32 %v16441_v44, %v1482_v25  ;;  %12978 = vmatprep.mubr.msk.f32.mxu1 %vm15594_vm5, %v20206_v12  ;;  %14373 = vmatprep.subr.bf16.mxu1 %v20207_v19  ;;  %v1484_v28 = vpop.f32.mrb[43].mxu1 }
 0x26c   : > { %14376 = vmatprep.subr.bf16.mxu0 %v20207_v19 }
 0x26d   : > { %12979 = vmatmul.mubr.msk.f32.gmra.mrb[86].mxu1 %vm1206_vm4, %v1483_v48 }
 0x26e   : > { %14375 = vmatpush1.bf16.msra.mxu1 %v16139_v1  ;;  %v1487_v55 = vpop.f32.mrb[44].mxu1  ;;  %12981 = vmatprep.mubr.msk.f32.mxu1 %vm15594_vm5, %v20206_v12 }
 0x26f   : > { %v1488_v49 = vadd.f32 %v16445_v59, %v1487_v55  ;;  %14380 = vmatprep.subr.bf16.mxu1 %v15906_v60  ;;  %v1489_v44 = vpop.f32.mrb[45].mxu1  ;;  %v10640_v55 = vld [vmem:[%s20160_s3 + $0x3d8] sm:$0xff] }
 0x271   : > { %12982 = vmatmul.mubr.msk.f32.gmra.mrb[88].mxu1 %vm1206_vm4, %v1488_v49 }
 0x272   : > { %v1492_v58 = vpop.f32.mrb[46].mxu1  ;;  %12984 = vmatprep.mubr.msk.f32.mxu1 %vm15594_vm5, %v20206_v12 }
 0x273   : > { %v1493_v32 = vadd.f32 %v16449_v18, %v1492_v58  ;;  %v1494_v33 = vpop.f32.mrb[47].mxu1  ;;  %v10624_v18 = vld [vmem:[%s20160_s3 + $0x358] sm:$0xff] }
 0x275   : > { %12985 = vmatmul.mubr.msk.f32.gmra.mrb[90].mxu1 %vm1206_vm4, %v1493_v32  ;;  %v10644_v32 = vld [vmem:[%s20160_s3 + $0x3f8] sm:$0xff] }
 0x276   : > { %v1497_v0 = vpop.f32.mrb[48].mxu1  ;;  %12987 = vmatprep.mubr.msk.f32.mxu1 %vm15594_vm5, %v20206_v12 }
 0x277   : > { %v1498_v59 = vadd.f32 %v16453_v39, %v1497_v0  ;;  %v1499_v9 = vpop.f32.mrb[49].mxu1  ;;  %v10623_v39 = vld [vmem:[%s20160_s3 + $0x350] sm:$0xff] }
 0x278   : > { %v10648_v9 = vld [vmem:[%s20160_s3 + $0x418] sm:$0xff] }
 0x279   : > { %12988 = vmatmul.mubr.msk.f32.gmra.mrb[92].mxu1 %vm1206_vm4, %v1498_v59 }
 0x27a   : > { %v1502_v7 = vpop.f32.mrb[50].mxu1  ;;  %12990 = vmatprep.mubr.msk.f32.mxu1 %vm15594_vm5, %v20206_v12 }
 0x27b   : > { %v1503_v11 = vadd.f32 %v16457_v8, %v1502_v7  ;;  %v1504_v42 = vpop.f32.mrb[51].mxu1  ;;  %v10628_v8 = vld [vmem:[%s20160_s3 + $0x378] sm:$0xff] }
 0x27d   : > { %12991 = vmatmul.mubr.msk.f32.gmra.mrb[94].mxu1 %vm1206_vm4, %v1503_v11  ;;  %v20208_v11 = vld [vmem:[#allocation11_spill] sm:$0xff] }
 0x27e   : > { %v1816_v43 = vpop.f32.mrb[52].mxu1  ;;  %10673 = vmatprep.mubr.msk.f32.mxu1 %vm1206_vm4, %v10624_v18 }
 0x27f   : > { %v1817_v26 = vadd.f32 %v16427_v53, %v1816_v43  ;;  %v1818_v27 = vpop.f32.mrb[53].mxu1  ;;  %v10652_v43 = vld [vmem:[%s20160_s3 + $0x438] sm:$0xff] }
 0x281   : > { %12924 = vmatmul.mubr.msk.f32.gmra.mrb[92].mxu0 %vm1206_vm4, %v1817_v26  ;;  %2488 = vmatmul.mubr.f32.vlgmr.msra.gmra.mrb[96].mxu1 %v10623_v39  ;;  %v10651_v26 = vld [vmem:[%s20160_s3 + $0x430] sm:$0xff] }
 0x282   : > { %14382 = vmatpush3.bf16.msra.mxu1 %v15874_v2  ;;  %v1821_v50 = vpop.f32.mrb[54].mxu1  ;;  %12926 = vmatprep.mubr.msk.f32.mxu0 %vm15594_vm5, %v20206_v12 }
 0x283   : > { %v1822_v53 = vadd.f32 %v16431_v63, %v1821_v50  ;;  %14384 = vmatprep.subr.bf16.mxu1 %v15914_v5  ;;  %v1823_v35 = vpop.f32.mrb[55].mxu1  ;;  %10674 = vmatprep.mubr.msk.f32.mxu1 %vm1206_vm4, %v10628_v8  ;;  %v10631_v63 = vld [vmem:[%s20160_s3 + $0x390] sm:$0xff]  ;;  %v10656_v50 = vld [vmem:[%s20160_s3 + $0x458] sm:$0xff] }
 0x284   : > { %v10622_v35 = vld [vmem:[%s20160_s3 + $0x348] sm:$0xff] }
 0x285   : > { %12927 = vmatmul.mubr.msk.f32.gmra.mrb[94].mxu0 %vm1206_vm4, %v1822_v53  ;;  %2493 = vmatmul.mubr.f32.gmra.mrb[98].mxu1 %v10627_v34 }
 0x286   : > { %14386 = vmatpush3.bf16.msra.mxu1 %v15878_v10  ;;  %v1826_v62 = vpop.f32.mrb[56].mxu1  ;;  %12929 = vmatprep.mubr.msk.f32.mxu0 %vm15594_vm5, %v20206_v12 }
 0x287   : > { %v1827_v14 = vadd.f32 %v16435_v16, %v1826_v62  ;;  %14388 = vmatprep.subr.bf16.mxu1 %v15922_v13  ;;  %v1828_v20 = vpop.f32.mrb[57].mxu1  ;;  %10675 = vmatprep.mubr.msk.f32.mxu1 %vm1206_vm4, %v10632_v3  ;;  %v10635_v16 = vld [vmem:[%s20160_s3 + $0x3b0] sm:$0xff]  ;;  %v10660_v62 = vld [vmem:[%s20160_s3 + $0x478] sm:$0xff] }
 0x288   : > { %v10664_v20 = vld [vmem:[%s20160_s3 + $0x498] sm:$0xff] }
 0x289   : > { %12930 = vmatmul.mubr.msk.f32.gmra.mrb[96].mxu0 %vm1206_vm4, %v1827_v14  ;;  %2498 = vmatmul.mubr.f32.gmra.mrb[100].mxu1 %v10631_v63  ;;  %v10659_v63 = vld [vmem:[%s20160_s3 + $0x470] sm:$0xff]  ;;  %v10626_v14 = vld [vmem:[%s20160_s3 + $0x368] sm:$0xff] }
 0x28a   : > { %14390 = vmatpush3.bf16.msra.mxu1 %v15882_v17  ;;  %v1831_v25 = vpop.f32.mrb[58].mxu1  ;;  %12932 = vmatprep.mubr.msk.f32.mxu0 %vm15594_vm5, %v20206_v12 }
 0x28b   : > { %v1832_v48 = vadd.f32 %v16439_v30, %v1831_v25  ;;  %14392 = vmatprep.subr.bf16.mxu1 %v15930_v21  ;;  %v1833_v28 = vpop.f32.mrb[59].mxu1  ;;  %10676 = vmatprep.mubr.msk.f32.mxu1 %vm1206_vm4, %v10636_v15  ;;  %v10639_v30 = vld [vmem:[%s20160_s3 + $0x3d0] sm:$0xff]  ;;  %v10625_v15 = vld [vmem:[%s20160_s3 + $0x360] sm:$0xff] }
 0x28c   : > { %v10663_v25 = vld [vmem:[%s20160_s3 + $0x490] sm:$0xff]  ;;  %v10629_v28 = vld [vmem:[%s20160_s3 + $0x380] sm:$0xff] }
 0x28d   : > { %12933 = vmatmul.mubr.msk.f32.gmra.mrb[98].mxu0 %vm1206_vm4, %v1832_v48  ;;  %2503 = vmatmul.mubr.f32.gmra.mrb[102].mxu1 %v10635_v16  ;;  %v10630_v16 = vld [vmem:[%s20160_s3 + $0x388] sm:$0xff]  ;;  %v10668_v48 = vld [vmem:[%s20160_s3 + $0x4b8] sm:$0xff] }
 0x28e   : > { %14394 = vmatpush3.bf16.msra.mxu1 %v15886_v24  ;;  %v1836_v49 = vpop.f32.mrb[60].mxu1  ;;  %12935 = vmatprep.mubr.msk.f32.mxu0 %vm15594_vm5, %v20206_v12 }
 0x28f   : > { %v1837_v44 = vadd.f32 %v16443_v47, %v1836_v49  ;;  %14396 = vmatprep.subr.bf16.mxu1 %v15938_v29  ;;  %v1838_v58 = vpop.f32.mrb[61].mxu1  ;;  %10677 = vmatprep.mubr.msk.f32.mxu1 %vm1206_vm4, %v10640_v55  ;;  %v10643_v47 = vld [vmem:[%s20160_s3 + $0x3f0] sm:$0xff]  ;;  %v10634_v49 = vld [vmem:[%s20160_s3 + $0x3a8] sm:$0xff] }
 0x290   : > { %v10667_v55 = vld [vmem:[%s20160_s3 + $0x4b0] sm:$0xff] }
 0x291   : > { %12936 = vmatmul.mubr.msk.f32.gmra.mrb[100].mxu0 %vm1206_vm4, %v1837_v44  ;;  %2508 = vmatmul.mubr.f32.gmra.mrb[104].mxu1 %v10639_v30  ;;  %v10672_v30 = vld [vmem:[%s20160_s3 + $0x4d8] sm:$0xf]  ;;  %v10633_v44 = vld [vmem:[%s20160_s3 + $0x3a0] sm:$0xff]  ;;  %v10671_v58 = vld [vmem:[%s20160_s3 + $0x4d0] sm:$0xf] }
 0x292   : > { %14398 = vmatpush3.bf16.msra.mxu1 %v15890_v31  ;;  %v1841_v33 = vpop.f32.mrb[62].mxu1  ;;  %12938 = vmatprep.mubr.msk.f32.mxu0 %vm15594_vm5, %v20206_v12 }
 0x293   : > { %v1842_v0 = vadd.f32 %v16447_v61, %v1841_v33  ;;  %14400 = vmatprep.subr.bf16.mxu1 %v15946_v37  ;;  %v1843_v59 = vpop.f32.mrb[63].mxu1  ;;  %10678 = vmatprep.mubr.msk.f32.mxu1 %vm1206_vm4, %v10644_v32  ;;  %v10647_v61 = vld [vmem:[%s20160_s3 + $0x410] sm:$0xff]  ;;  %v10638_v32 = vld [vmem:[%s20160_s3 + $0x3c8] sm:$0xff]  ;;  %v10637_v33 = vld [vmem:[%s20160_s3 + $0x3c0] sm:$0xff] }
 0x294   : > { %v10646_v59 = vld [vmem:[%s20160_s3 + $0x408] sm:$0xff] }
 0x295   : > { %12939 = vmatmul.mubr.msk.f32.gmra.mrb[102].mxu0 %vm1206_vm4, %v1842_v0  ;;  %2513 = vmatmul.mubr.f32.gmra.mrb[106].mxu1 %v10643_v47  ;;  %v10642_v47 = vld [vmem:[%s20160_s3 + $0x3e8] sm:$0xff]  ;;  %v10641_v0 = vld [vmem:[%s20160_s3 + $0x3e0] sm:$0xff] }
 0x296   : > { %14402 = vmatpush3.bf16.msra.mxu1 %v15894_v38  ;;  %v1846_v7 = vpop.f32.mrb[64].mxu1  ;;  %12941 = vmatprep.mubr.msk.f32.mxu0 %vm15594_vm5, %v20206_v12 }
 0x297   : > { %v1847_v42 = vadd.f32 %v20208_v11, %v1846_v7  ;;  %14404 = vmatprep.subr.bf16.mxu1 %v15954_v46  ;;  %v1848_v18 = vpop.f32.mrb[65].mxu1  ;;  %10679 = vmatprep.mubr.msk.f32.mxu1 %vm1206_vm4, %v10648_v9  ;;  %v10645_v9 = vld [vmem:[%s20160_s3 + $0x400] sm:$0xff]  ;;  %v10650_v7 = vld [vmem:[%s20160_s3 + $0x428] sm:$0xff] }
 0x298   : > { %v10654_v11 = vld [vmem:[%s20160_s3 + $0x448] sm:$0xff] }
 0x299   : > { %12942 = vmatmul.mubr.msk.f32.gmra.mrb[104].mxu0 %vm1206_vm4, %v1847_v42  ;;  %2518 = vmatmul.mubr.f32.gmra.mrb[108].mxu1 %v10647_v61  ;;  %v10649_v61 = vld [vmem:[%s20160_s3 + $0x420] sm:$0xff]  ;;  %v10658_v18 = vld [vmem:[%s20160_s3 + $0x468] sm:$0xff] }
 0x29a   : > { %14406 = vmatpush3.bf16.msra.mxu1 %v15898_v45  ;;  %v1851_v39 = vpop.f32.mrb[66].mxu1  ;;  %12944 = vmatprep.mubr.msk.f32.mxu0 %vm15594_vm5, %v20206_v12  ;;  %v10653_v42 = vld [vmem:[%s20160_s3 + $0x440] sm:$0xff] }
 0x29b   : > { %v1852_v27 = vadd.f32 %v16455_v41, %v1851_v39  ;;  %14408 = vmatprep.subr.bf16.mxu1 %v15962_v54  ;;  %v1853_v8 = vpop.f32.mrb[67].mxu1  ;;  %10680 = vmatprep.mubr.msk.f32.mxu1 %vm1206_vm4, %v10652_v43  ;;  %v10655_v41 = vld [vmem:[%s20160_s3 + $0x450] sm:$0xff]  ;;  %v10657_v43 = vld [vmem:[%s20160_s3 + $0x460] sm:$0xff]  ;;  %v10662_v39 = vld [vmem:[%s20160_s3 + $0x488] sm:$0xff] }
 0x29c   : > { %v10665_v8 = vld [vmem:[%s20160_s3 + $0x4a0] sm:$0xff] }
 0x29d   : > { %12945 = vmatmul.mubr.msk.f32.gmra.mrb[106].mxu0 %vm1206_vm4, %v1852_v27  ;;  %2523 = vmatmul.mubr.f32.gmra.mrb[110].mxu1 %v10651_v26  ;;  %v10661_v26 = vld [vmem:[%s20160_s3 + $0x480] sm:$0xff]  ;;  %v10666_v27 = vld [vmem:[%s20160_s3 + $0x4a8] sm:$0xff] }
 0x29e   : > { %14410 = vmatpush3.bf16.msra.mxu1 %v15902_v52  ;;  %v1856_v34 = vpop.f32.mrb[68].mxu1  ;;  %12947 = vmatprep.mubr.msk.f32.mxu0 %vm15594_vm5, %v20206_v12 }
 0x29f   : > { %v1857_v53 = vadd.f32 %v16459_v56, %v1856_v34  ;;  %v1858_v3 = vpop.f32.mrb[69].mxu1  ;;  %10681 = vmatprep.mubr.msk.f32.mxu1 %vm1206_vm4, %v10656_v50  ;;  %14438 = vmatprep.subr.bf16.mxu1 %v20207_v19  ;;  %v10621_v56 = vld [vmem:[%s20160_s3 + $0x340] sm:$0xff]  ;;  %v10670_v50 = vld [vmem:[%s20160_s3 + $0x4c8] sm:$0xf] }
 0x2a0   : > { %v10669_v34 = vld [vmem:[%s20160_s3 + $0x4c0] sm:$0xf] }
 0x2a1   : > { %12948 = vmatmul.mubr.msk.f32.gmra.mrb[108].mxu0 %vm1206_vm4, %v1857_v53  ;;  %2528 = vmatmul.mubr.f32.gmra.mrb[112].mxu1 %v10655_v41  ;;  %v10686_v41 = vld [vmem:[%s20161_s4 + $0x20] sm:$0xff]  ;;  %v10687_v53 = vld [vmem:[%s20161_s4 + $0x28] sm:$0xff] }
 0x2a2   : > { %2357 = vmatprep.mubr.f32.mxu0 %v10622_v35  ;;  %10682 = vmatprep.mubr.msk.f32.mxu1 %vm1206_vm4, %v10660_v62  ;;  %v14377_v35 = vpack.c.bf16 %v10687_v53, %v10686_v41  ;;  %v10718_v53 = vld [vmem:[%s20160_s3 + $0x568] sm:$0xff] }
 0x2a5   : > { %2358 = vmatmul.mubr.f32.vlgmr.msra.gmra.mrb[110].mxu0 %v10621_v56  ;;  %2533 = vmatmul.mubr.f32.gmra.mrb[114].mxu1 %v10659_v63 }
 0x2a6   : > { %2362 = vmatprep.mubr.f32.mxu0 %v10626_v14  ;;  %10683 = vmatprep.mubr.msk.f32.mxu1 %vm1206_vm4, %v10664_v20 }
 0x2a7   : > { %14378 = vmatpush3.bf16.msra.mxu0 %v14377_v35 }
 0x2a8   : > { %14411 = vmatprep.subr.bf16.mxu0 %v20207_v19 }
 0x2a9   : > { %2363 = vmatmul.mubr.f32.gmra.mrb[112].mxu0 %v10625_v15  ;;  %2538 = vmatmul.mubr.f32.gmra.mrb[116].mxu1 %v10663_v25 }
 0x2aa   : > { %2367 = vmatprep.mubr.f32.mxu0 %v10630_v16  ;;  %10684 = vmatprep.mubr.msk.f32.mxu1 %vm1206_vm4, %v10668_v48 }
 0x2ad   : > { %2368 = vmatmul.mubr.f32.gmra.mrb[114].mxu0 %v10629_v28  ;;  %2543 = vmatmul.mubr.f32.gmra.mrb[118].mxu1 %v10667_v55 }
 0x2ae   : > { %2372 = vmatprep.mubr.f32.mxu0 %v10634_v49  ;;  %10685 = vmatprep.mubr.msk.f32.mxu1 %vm1206_vm4, %v10672_v30 }
 0x2b1   : > { %2373 = vmatmul.mubr.f32.gmra.mrb[116].mxu0 %v10633_v44  ;;  %2548 = vmatmul.mubr.f32.gmra.mrb[120].mxu1 %v10671_v58 }
 0x2b2   : > { %2377 = vmatprep.mubr.f32.mxu0 %v10638_v32 }
 0x2b5   : > { %2378 = vmatmul.mubr.f32.gmra.mrb[118].mxu0 %v10637_v33 }
 0x2b6   : > { %2382 = vmatprep.mubr.f32.mxu0 %v10642_v47 }
 0x2b9   : > { %2383 = vmatmul.mubr.f32.gmra.mrb[120].mxu0 %v10641_v0 }
 0x2ba   : > { %2387 = vmatprep.mubr.f32.mxu0 %v10646_v59  ;;  %v10702_v59 = vld [vmem:[%s20160_s3 + $0x4e8] sm:$0xff] }
 0x2bb   : > { %2894 = vmatprep.mubr.f32.mxu1 %v10702_v59  ;;  %v10733_v59 = vld [vmem:[%s20160_s3 + $0x5e0] sm:$0xff] }
 0x2bd   : > { %2388 = vmatmul.mubr.f32.gmra.mrb[122].mxu0 %v10645_v9  ;;  %v10701_v9 = vld [vmem:[%s20160_s3 + $0x4e0] sm:$0xff] }
 0x2be   : > { %2392 = vmatprep.mubr.f32.mxu0 %v10650_v7  ;;  %2895 = vmatmul.mubr.f32.vlgmr.msra.gmra.mrb[122].mxu1 %v10701_v9  ;;  %v10706_v7 = vld [vmem:[%s20160_s3 + $0x508] sm:$0xff] }
 0x2bf   : > { %2899 = vmatprep.mubr.f32.mxu1 %v10706_v7  ;;  %v10738_v9 = vld [vmem:[%s20160_s3 + $0x608] sm:$0xff] }
 0x2c1   : > { %2393 = vmatmul.mubr.f32.gmra.mrb[124].mxu0 %v10649_v61 }
 0x2c2   : > { %2397 = vmatprep.mubr.f32.mxu0 %v10654_v11 }
 0x2c5   : > { %2398 = vmatmul.mubr.f32.gmra.mrb[126].mxu0 %v10653_v42  ;;  %v10705_v42 = vld [vmem:[%s20160_s3 + $0x500] sm:$0xff] }
 0x2c6   : > { %2402 = vmatprep.mubr.f32.mxu0 %v10658_v18  ;;  %2900 = vmatmul.mubr.f32.gmra.mrb[124].mxu1 %v10705_v42  ;;  %v10737_v42 = vld [vmem:[%s20160_s3 + $0x600] sm:$0xff] }
 0x2c9   : > { %2403 = vmatmul.mubr.f32.gmra.mrb[128].mxu0 %v10657_v43  ;;  %v10710_v43 = vld [vmem:[%s20160_s3 + $0x528] sm:$0xff] }
 0x2ca   : > { %2407 = vmatprep.mubr.f32.mxu0 %v10662_v39  ;;  %2904 = vmatprep.mubr.f32.mxu1 %v10710_v43  ;;  %v10742_v43 = vld [vmem:[%s20160_s3 + $0x628] sm:$0xff] }
 0x2cd   : > { %2408 = vmatmul.mubr.f32.gmra.mrb[130].mxu0 %v10661_v26  ;;  %v10709_v26 = vld [vmem:[%s20160_s3 + $0x520] sm:$0xff] }
 0x2ce   : > { %2412 = vmatprep.mubr.f32.mxu0 %v10666_v27  ;;  %2905 = vmatmul.mubr.f32.gmra.mrb[126].mxu1 %v10709_v26 }
 0x2d1   : > { %2413 = vmatmul.mubr.f32.gmra.mrb[132].mxu0 %v10665_v8  ;;  %v10714_v8 = vld [vmem:[%s20160_s3 + $0x548] sm:$0xff] }
 0x2d2   : > { %2417 = vmatprep.mubr.f32.mxu0 %v10670_v50  ;;  %2909 = vmatprep.mubr.f32.mxu1 %v10714_v8 }
 0x2d5   : > { %2418 = vmatmul.mubr.f32.gmra.mrb[134].mxu0 %v10669_v34  ;;  %v10713_v34 = vld [vmem:[%s20160_s3 + $0x540] sm:$0xff] }
 0x2d6   : > { %12997 = vmatprep.mubr.msk.f32.mxu0 %vm15594_vm5, %v20206_v12  ;;  %2910 = vmatmul.mubr.f32.gmra.mrb[128].mxu1 %v10713_v34 }
 0x2d7   : > { %2914 = vmatprep.mubr.f32.mxu1 %v10718_v53  ;;  %v10741_v53 = vld [vmem:[%s20160_s3 + $0x620] sm:$0xff] }
 0x320   : > { %v1968_v3 = vpop.f32.mrb[84].mxu0  ;;  %v2137_v62 = vpop.f32.mrb[70].mxu1 }
 0x321   : > { %v16789_v56 = vadd.f32 %v2137_v62, %v1968_v3  ;;  %v12956_v63 = vpop.f32.mrb[71].mxu1  ;;  %v12913_v14 = vpop.f32.mrb[85].mxu0  ;;  %v10717_v3 = vld [vmem:[%s20160_s3 + $0x560] sm:$0xff] }
 0x322   : > { %2915 = vmatmul.mubr.f32.gmra.mrb[130].mxu1 %v10717_v3  ;;  %v10722_v63 = vld [vmem:[%s20160_s3 + $0x588] sm:$0xff] }
 0x323   : > { %2919 = vmatprep.mubr.f32.mxu1 %v10722_v63 }
 0x324   : > { %v1973_v20 = vpop.f32.mrb[86].mxu0  ;;  %v2142_v15 = vpop.f32.mrb[72].mxu1 }
 0x325   : > { %v16791_v25 = vadd.f32 %v2142_v15, %v1973_v20  ;;  %v12959_v16 = vpop.f32.mrb[73].mxu1  ;;  %v12916_v48 = vpop.f32.mrb[87].mxu0  ;;  %v10721_v20 = vld [vmem:[%s20160_s3 + $0x580] sm:$0xff] }
 0x326   : > { %2920 = vmatmul.mubr.f32.gmra.mrb[132].mxu1 %v10721_v20  ;;  %v10726_v16 = vld [vmem:[%s20160_s3 + $0x5a8] sm:$0xff] }
 0x327   : > { %2924 = vmatprep.mubr.f32.mxu1 %v10726_v16 }
 0x328   : > { %v1978_v28 = vpop.f32.mrb[88].mxu0  ;;  %v2147_v55 = vpop.f32.mrb[74].mxu1 }
 0x329   : > { %v16793_v49 = vadd.f32 %v2147_v55, %v1978_v28  ;;  %v12962_v30 = vpop.f32.mrb[75].mxu1  ;;  %v12919_v44 = vpop.f32.mrb[89].mxu0  ;;  %v10725_v28 = vld [vmem:[%s20160_s3 + $0x5a0] sm:$0xff] }
 0x32a   : > { %2925 = vmatmul.mubr.f32.gmra.mrb[134].mxu1 %v10725_v28  ;;  %v10730_v30 = vld [vmem:[%s20160_s3 + $0x5c8] sm:$0xff] }
 0x32b   : > { %2929 = vmatprep.mubr.f32.mxu1 %v10730_v30 }
 0x32c   : > { %v1983_v58 = vpop.f32.mrb[90].mxu0  ;;  %v2152_v32 = vpop.f32.mrb[76].mxu1 }
 0x32d   : > { %v16795_v33 = vadd.f32 %v2152_v32, %v1983_v58  ;;  %v12965_v47 = vpop.f32.mrb[77].mxu1  ;;  %v12922_v0 = vpop.f32.mrb[91].mxu0  ;;  %v10729_v58 = vld [vmem:[%s20160_s3 + $0x5c0] sm:$0xff] }
 0x32e   : > { %2930 = vmatmul.mubr.f32.gmra.mrb[136].mxu1 %v10729_v58  ;;  %v10734_v47 = vld [vmem:[%s20160_s3 + $0x5e8] sm:$0xff] }
 0x32f   : > { %2934 = vmatprep.mubr.f32.mxu1 %v10734_v47  ;;  %v10749_v47 = vld [vmem:[%s20160_s3 + $0x660] sm:$0xf] }
 0x330   : > { %v2157_v61 = vpop.f32.mrb[78].mxu1 }
 0x331   : > { %v12968_v11 = vpop.f32.mrb[79].mxu1 }
 0x332   : > { %2935 = vmatmul.mubr.f32.gmra.mrb[138].mxu1 %v10733_v59 }
 0x333   : > { %2939 = vmatprep.mubr.f32.mxu1 %v10738_v9 }
 0x334   : > { %v2162_v18 = vpop.f32.mrb[80].mxu1 }
 0x335   : > { %v12971_v39 = vpop.f32.mrb[81].mxu1 }
 0x336   : > { %2940 = vmatmul.mubr.f32.gmra.mrb[140].mxu1 %v10737_v42 }
 0x337   : > { %2944 = vmatprep.mubr.f32.mxu1 %v10742_v43 }
 0x338   : > { %v16815_v27 = vpop.f32.mrb[82].mxu1 }
 0x339   : > { %v12974_v50 = vpop.f32.mrb[83].mxu1 }
 0x33a   : > { %2945 = vmatmul.mubr.f32.gmra.mrb[142].mxu1 %v10741_v53 }
 0x33c   : > { %v16823_v41 = vpop.f32.mrb[84].mxu1 }
 0x33d   : > { %v12977_v35 = vpop.f32.mrb[85].mxu1 }
 0x33e   : > { %v10746_v35 = vld [vmem:[%s20160_s3 + $0x648] sm:$0xff] }
 0x33f   : > { %2949 = vmatprep.mubr.f32.mxu1 %v10746_v35 }
 0x340   : > { %v16831_v62 = vpop.f32.mrb[86].mxu1 }
 0x341   : > { %v12980_v14 = vpop.f32.mrb[87].mxu1 }
 0x344   : > { %v16839_v15 = vpop.f32.mrb[88].mxu1 }
 0x345   : > { %v12983_v48 = vpop.f32.mrb[89].mxu1 }
 0x346   : > { %v10750_v48 = vld [vmem:[%s20160_s3 + $0x668] sm:$0xf] }
 0x348   : > { %v16847_v55 = vpop.f32.mrb[90].mxu1 }
 0x349   : > { %v12986_v44 = vpop.f32.mrb[91].mxu1 }
 0x34c   : > { %v2192_v32 = vpop.f32.mrb[92].mxu1 }
 0x34d   : > { %v12989_v0 = vpop.f32.mrb[93].mxu1 }
 0x350   : > { %v2197_v7 = vpop.f32.mrb[94].mxu1 }
 0x351   : > { %v12992_v11 = vpop.f32.mrb[95].mxu1 }
 0x354   : > { %v1988_v39 = vpop.f32.mrb[92].mxu0  ;;  %v2489_v26 = vpop.f32.mrb[96].mxu1 }
 0x355   : > { %v16870_v8 = vadd.f32 %v2157_v61, %v1988_v39  ;;  %v12925_v50 = vpop.f32.mrb[93].mxu0  ;;  %v2491_v34 = vpop.f32.mrb[97].mxu1  ;;  %v10745_v61 = vld [vmem:[%s20160_s3 + $0x640] sm:$0xff] }
 0x356   : > { %2950 = vmatmul.mubr.f32.gmra.mrb[144].mxu1 %v10745_v61 }
 0x357   : > { %2954 = vmatprep.mubr.f32.mxu1 %v10750_v48 }
 0x358   : > { %v1993_v3 = vpop.f32.mrb[94].mxu0  ;;  %v2494_v63 = vpop.f32.mrb[98].mxu1 }
 0x359   : > { %v16878_v14 = vadd.f32 %v2162_v18, %v1993_v3  ;;  %v12928_v20 = vpop.f32.mrb[95].mxu0  ;;  %v2496_v16 = vpop.f32.mrb[99].mxu1 }
 0x35a   : > { %2955 = vmatmul.mubr.f32.gmra.mrb[146].mxu1 %v10749_v47 }
 0x35b   : > { %13040 = vmatprep.mubr.msk.f32.mxu1 %vm15594_vm5, %v20206_v12 }
 0x35c   : > { %v1998_v28 = vpop.f32.mrb[96].mxu0  ;;  %v2499_v30 = vpop.f32.mrb[100].mxu1 }
 0x35d   : > { %v16887_v44 = vadd.f32 %v16815_v27, %v1998_v28  ;;  %v12931_v58 = vpop.f32.mrb[97].mxu0  ;;  %v2501_v18 = vpop.f32.mrb[101].mxu1 }
 0x360   : > { %v2003_v0 = vpop.f32.mrb[98].mxu0  ;;  %v16892_v59 = vpop.f32.mrb[102].mxu1 }
 0x361   : > { %v16897_v9 = vadd.f32 %v16823_v41, %v2003_v0  ;;  %v12934_v11 = vpop.f32.mrb[99].mxu0  ;;  %v2506_v42 = vpop.f32.mrb[103].mxu1 }
 0x364   : > { %v2008_v27 = vpop.f32.mrb[100].mxu0  ;;  %v16899_v43 = vpop.f32.mrb[104].mxu1 }
 0x365   : > { %v16902_v39 = vadd.f32 %v16831_v62, %v2008_v27  ;;  %v12937_v50 = vpop.f32.mrb[101].mxu0  ;;  %v2511_v34 = vpop.f32.mrb[105].mxu1 }
 0x368   : > { %v2013_v53 = vpop.f32.mrb[102].mxu0  ;;  %v16904_v35 = vpop.f32.mrb[106].mxu1 }
 0x369   : > { %v16907_v3 = vadd.f32 %v16839_v15, %v2013_v53  ;;  %v12940_v20 = vpop.f32.mrb[103].mxu0  ;;  %v2516_v16 = vpop.f32.mrb[107].mxu1 }
 0x36c   : > { %v2018_v41 = vpop.f32.mrb[104].mxu0  ;;  %v16909_v61 = vpop.f32.mrb[108].mxu1 }
 0x36d   : > { %v16912_v48 = vadd.f32 %v16847_v55, %v2018_v41  ;;  %v12943_v28 = vpop.f32.mrb[105].mxu0  ;;  %v2521_v58 = vpop.f32.mrb[109].mxu1 }
 0x36f   : > { %20209 = vst [vmem:[#allocation11_spill] sm:$0xff] %v16912_v48 }
 0x370   : > { %v2023_v62 = vpop.f32.mrb[106].mxu0  ;;  %v16914_v18 = vpop.f32.mrb[110].mxu1 }
 0x371   : > { %v16916_v47 = vadd.f32 %v2192_v32, %v2023_v62  ;;  %v12946_v0 = vpop.f32.mrb[107].mxu0  ;;  %v2526_v11 = vpop.f32.mrb[111].mxu1 }
 0x374   : > { %v2028_v42 = vpop.f32.mrb[108].mxu0  ;;  %v16918_v15 = vpop.f32.mrb[112].mxu1 }
 0x375   : > { %v16920_v27 = vadd.f32 %v2197_v7, %v2028_v42  ;;  %v12949_v50 = vpop.f32.mrb[109].mxu0  ;;  %v2531_v34 = vpop.f32.mrb[113].mxu1 }
 0x378   : > { %v11790_v53 = vpop.f32.mrb[110].mxu0  ;;  %v16922_v20 = vpop.f32.mrb[114].mxu1 }
 0x379   : > { %v11791_v55 = vpop.f32.mrb[111].mxu0  ;;  %v2536_v16 = vpop.f32.mrb[115].mxu1 }
 0x37a   : > { %v11792_v41 = vadd.f32 %v11791_v55, %v11790_v53 }
 0x37c   : > { %v2490_v28 = vadd.f32 %v11792_v41, %v2489_v26  ;;  %v11793_v58 = vpop.f32.mrb[112].mxu0  ;;  %v16924_v48 = vpop.f32.mrb[116].mxu1 }
 0x37d   : > { %v11794_v32 = vpop.f32.mrb[113].mxu0  ;;  %v2541_v62 = vpop.f32.mrb[117].mxu1 }
 0x37e   : > { %v11795_v0 = vadd.f32 %v11794_v32, %v11793_v58  ;;  %12998 = vmatmul.mubr.msk.f32.vlgmr.msra.gmra.mrb[136].mxu0 %vm1206_vm4, %v2490_v28 }
 0x37f   : > { %14413 = vmatpush1.bf16.msra.mxu0 %v15982_v6  ;;  %13000 = vmatprep.mubr.msk.f32.mxu0 %vm15594_vm5, %v20206_v12 }
 0x380   : > { %v2495_v7 = vadd.f32 %v11795_v0, %v2494_v63  ;;  %v11796_v11 = vpop.f32.mrb[114].mxu0  ;;  %14414 = vmatprep.subr.bf16.mxu0 %v20207_v19  ;;  %v16931_v42 = vpop.f32.mrb[118].mxu1 }
 0x381   : > { %v11797_v26 = vpop.f32.mrb[115].mxu0  ;;  %v2546_v50 = vpop.f32.mrb[119].mxu1 }
 0x382   : > { %v11798_v34 = vadd.f32 %v11797_v26, %v11796_v11  ;;  %13001 = vmatmul.mubr.msk.f32.gmra.mrb[138].mxu0 %vm1206_vm4, %v2495_v7 }
 0x383   : > { %14416 = vmatpush1.bf16.msra.mxu0 %v16000_v22  ;;  %13003 = vmatprep.mubr.msk.f32.mxu0 %vm15594_vm5, %v20206_v12 }
 0x384   : > { %v2500_v53 = vadd.f32 %v11798_v34, %v2499_v30  ;;  %v11799_v55 = vpop.f32.mrb[116].mxu0  ;;  %14417 = vmatprep.subr.bf16.mxu0 %v20207_v19  ;;  %v16938_v63 = vpop.f32.mrb[120].mxu1 }
 0x385   : > { %v11800_v16 = vpop.f32.mrb[117].mxu0  ;;  %v2551_v41 = vpop.f32.mrb[121].mxu1 }
 0x386   : > { %v11801_v28 = vadd.f32 %v11800_v16, %v11799_v55  ;;  %13004 = vmatmul.mubr.msk.f32.gmra.mrb[140].mxu0 %vm1206_vm4, %v2500_v53 }
 0x387   : > { %14419 = vmatpush1.bf16.msra.mxu0 %v16020_v36  ;;  %13006 = vmatprep.mubr.msk.f32.mxu0 %vm15594_vm5, %v20206_v12 }
 0x388   : > { %v2505_v58 = vadd.f32 %v11801_v28, %v16892_v59  ;;  %v11802_v32 = vpop.f32.mrb[118].mxu0  ;;  %14420 = vmatprep.subr.bf16.mxu0 %v20207_v19 }
 0x389   : > { %v11803_v30 = vpop.f32.mrb[119].mxu0 }
 0x38a   : > { %v11804_v62 = vadd.f32 %v11803_v30, %v11802_v32  ;;  %13007 = vmatmul.mubr.msk.f32.gmra.mrb[142].mxu0 %vm1206_vm4, %v2505_v58 }
 0x38b   : > { %14422 = vmatpush1.bf16.msra.mxu0 %v16040_v51  ;;  %13009 = vmatprep.mubr.msk.f32.mxu0 %vm15594_vm5, %v20206_v12 }
 0x38c   : > { %v11805_v0 = vpop.f32.mrb[120].mxu0  ;;  %14423 = vmatprep.subr.bf16.mxu0 %v20207_v19  ;;  %v2510_v7 = vadd.f32 %v11804_v62, %v16899_v43 }
 0x38d   : > { %v11806_v11 = vpop.f32.mrb[121].mxu0 }
 0x38e   : > { %v11807_v26 = vadd.f32 %v11806_v11, %v11805_v0  ;;  %13010 = vmatmul.mubr.msk.f32.gmra.mrb[144].mxu0 %vm1206_vm4, %v2510_v7 }
 0x38f   : > { %14425 = vmatpush1.bf16.msra.mxu0 %v16060_v4  ;;  %13012 = vmatprep.mubr.msk.f32.mxu0 %vm15594_vm5, %v20206_v12 }
 0x390   : > { %v11808_v59 = vpop.f32.mrb[122].mxu0  ;;  %14426 = vmatprep.subr.bf16.mxu0 %v20207_v19  ;;  %v2515_v50 = vadd.f32 %v11807_v26, %v16904_v35 }
 0x391   : > { %v11809_v34 = vpop.f32.mrb[123].mxu0 }
 0x392   : > { %v11810_v53 = vadd.f32 %v11809_v34, %v11808_v59  ;;  %13013 = vmatmul.mubr.msk.f32.gmra.mrb[146].mxu0 %vm1206_vm4, %v2515_v50 }
 0x393   : > { %14428 = vmatpush1.bf16.msra.mxu0 %v16080_v23  ;;  %13015 = vmatprep.mubr.msk.f32.mxu0 %vm15594_vm5, %v20206_v12 }
 0x394   : > { %v2520_v43 = vadd.f32 %v11810_v53, %v16909_v61  ;;  %v11811_v55 = vpop.f32.mrb[124].mxu0  ;;  %14429 = vmatprep.subr.bf16.mxu0 %v20207_v19 }
 0x395   : > { %v11812_v16 = vpop.f32.mrb[125].mxu0 }
 0x396   : > { %v11813_v41 = vadd.f32 %v11812_v16, %v11811_v55  ;;  %13016 = vmatmul.mubr.msk.f32.gmra.mrb[148].mxu0 %vm1206_vm4, %v2520_v43  ;;  %v10704_v16 = vld [vmem:[%s20160_s3 + $0x4f8] sm:$0xff] }
 0x397   : > { %14431 = vmatpush1.bf16.msra.mxu0 %v16100_v40  ;;  %13018 = vmatprep.mubr.msk.f32.mxu0 %vm15594_vm5, %v20206_v12 }
 0x398   : > { %v2525_v35 = vadd.f32 %v11813_v41, %v16914_v18  ;;  %v11814_v28 = vpop.f32.mrb[126].mxu0  ;;  %14432 = vmatprep.subr.bf16.mxu0 %v20207_v19  ;;  %v10708_v41 = vld [vmem:[%s20160_s3 + $0x518] sm:$0xff] }
 0x399   : > { %v11815_v58 = vpop.f32.mrb[127].mxu0 }
 0x39a   : > { %v11816_v32 = vadd.f32 %v11815_v58, %v11814_v28  ;;  %13019 = vmatmul.mubr.msk.f32.gmra.mrb[150].mxu0 %vm1206_vm4, %v2525_v35  ;;  %v10712_v35 = vld [vmem:[%s20160_s3 + $0x538] sm:$0xff]  ;;  %v10711_v28 = vld [vmem:[%s20160_s3 + $0x530] sm:$0xff] }
 0x39b   : > { %14434 = vmatpush1.bf16.msra.mxu0 %v16120_v57  ;;  %13021 = vmatprep.mubr.msk.f32.mxu0 %vm15594_vm5, %v20206_v12  ;;  %v10716_v58 = vld [vmem:[%s20160_s3 + $0x558] sm:$0xff] }
 0x39c   : > { %v2530_v61 = vadd.f32 %v11816_v32, %v16918_v15  ;;  %v11817_v30 = vpop.f32.mrb[128].mxu0  ;;  %14435 = vmatprep.subr.bf16.mxu0 %v20207_v19  ;;  %v10715_v32 = vld [vmem:[%s20160_s3 + $0x550] sm:$0xff] }
 0x39d   : > { %v11818_v62 = vpop.f32.mrb[129].mxu0 }
 0x39e   : > { %v11819_v0 = vadd.f32 %v11818_v62, %v11817_v30  ;;  %13022 = vmatmul.mubr.msk.f32.gmra.mrb[152].mxu0 %vm1206_vm4, %v2530_v61  ;;  %v10720_v61 = vld [vmem:[%s20160_s3 + $0x578] sm:$0xff]  ;;  %v10719_v30 = vld [vmem:[%s20160_s3 + $0x570] sm:$0xff] }
 0x39f   : > { %14437 = vmatpush1.bf16.msra.mxu0 %v16139_v1  ;;  %13024 = vmatprep.mubr.msk.f32.mxu0 %vm15594_vm5, %v20206_v12  ;;  %v10724_v62 = vld [vmem:[%s20160_s3 + $0x598] sm:$0xff] }
 0x3a0   : > { %v2535_v18 = vadd.f32 %v11819_v0, %v16922_v20  ;;  %14442 = vmatprep.subr.bf16.mxu0 %v15906_v60  ;;  %v11820_v7 = vpop.f32.mrb[130].mxu0  ;;  %v10723_v0 = vld [vmem:[%s20160_s3 + $0x590] sm:$0xff] }
 0x3a1   : > { %v11821_v11 = vpop.f32.mrb[131].mxu0 }
 0x3a2   : > { %v11822_v26 = vadd.f32 %v11821_v11, %v11820_v7  ;;  %13025 = vmatmul.mubr.msk.f32.gmra.mrb[154].mxu0 %vm1206_vm4, %v2535_v18  ;;  %v10728_v18 = vld [vmem:[%s20160_s3 + $0x5b8] sm:$0xff]  ;;  %v10727_v7 = vld [vmem:[%s20160_s3 + $0x5b0] sm:$0xff] }
 0x3a3   : > { %13027 = vmatprep.mubr.msk.f32.mxu0 %vm15594_vm5, %v20206_v12  ;;  %v10732_v11 = vld [vmem:[%s20160_s3 + $0x5d8] sm:$0xff] }
 0x3a4   : > { %v2540_v15 = vadd.f32 %v11822_v26, %v16924_v48  ;;  %v11823_v59 = vpop.f32.mrb[132].mxu0  ;;  %v10731_v26 = vld [vmem:[%s20160_s3 + $0x5d0] sm:$0xff] }
 0x3a5   : > { %v11824_v50 = vpop.f32.mrb[133].mxu0 }
 0x3a6   : > { %v11825_v34 = vadd.f32 %v11824_v50, %v11823_v59  ;;  %13028 = vmatmul.mubr.msk.f32.gmra.mrb[156].mxu0 %vm1206_vm4, %v2540_v15  ;;  %v10736_v15 = vld [vmem:[%s20160_s3 + $0x5f8] sm:$0xff]  ;;  %v10735_v59 = vld [vmem:[%s20160_s3 + $0x5f0] sm:$0xff] }
 0x3a7   : > { %13030 = vmatprep.mubr.msk.f32.mxu0 %vm15594_vm5, %v20206_v12  ;;  %v10740_v50 = vld [vmem:[%s20160_s3 + $0x618] sm:$0xff] }
 0x3a8   : > { %v2545_v20 = vadd.f32 %v11825_v34, %v16931_v42  ;;  %v11826_v53 = vpop.f32.mrb[134].mxu0  ;;  %v10703_v42 = vld [vmem:[%s20160_s3 + $0x4f0] sm:$0xff] }
 0x3a9   : > { %v11827_v43 = vpop.f32.mrb[135].mxu0  ;;  %v10739_v34 = vld [vmem:[%s20160_s3 + $0x610] sm:$0xff] }
 0x3aa   : > { %v11828_v55 = vadd.f32 %v11827_v43, %v11826_v53  ;;  %13031 = vmatmul.mubr.msk.f32.gmra.mrb[158].mxu0 %vm1206_vm4, %v2545_v20  ;;  %v10744_v20 = vld [vmem:[%s20160_s3 + $0x638] sm:$0xff]  ;;  %v10743_v53 = vld [vmem:[%s20160_s3 + $0x630] sm:$0xff] }
 0x3ab   : > { %13033 = vmatprep.mubr.msk.f32.mxu0 %vm15594_vm5, %v20206_v12  ;;  %v10748_v43 = vld [vmem:[%s20160_s3 + $0x658] sm:$0xff] }
 0x3ac   : > { %v2550_v48 = vadd.f32 %v11828_v55, %v16938_v63  ;;  %v10707_v63 = vld [vmem:[%s20160_s3 + $0x510] sm:$0xff] }
 0x3ad   : > { %v10747_v55 = vld [vmem:[%s20160_s3 + $0x650] sm:$0xff] }
 0x3ae   : > { %13034 = vmatmul.mubr.msk.f32.gmra.mrb[160].mxu0 %vm1206_vm4, %v2550_v48  ;;  %v10752_v48 = vld [vmem:[%s20160_s3 + $0x678] sm:$0xf] }
 0x3af   : > { %10753 = vmatprep.mubr.msk.f32.mxu0 %vm1206_vm4, %v10704_v16  ;;  %v10751_v16 = vld [vmem:[%s20160_s3 + $0x670] sm:$0xf] }
 0x3b2   : > { %3025 = vmatmul.mubr.f32.vlgmr.msra.gmra.mrb[162].mxu0 %v10703_v42  ;;  %v10766_v42 = vld [vmem:[%s20161_s4 + $0x30] sm:$0xff] }
 0x3b3   : > { %14444 = vmatpush3.bf16.msra.mxu0 %v15874_v2  ;;  %10754 = vmatprep.mubr.msk.f32.mxu0 %vm1206_vm4, %v10708_v41  ;;  %v10767_v41 = vld [vmem:[%s20161_s4 + $0x38] sm:$0xff] }
 0x3b4   : > { %14446 = vmatprep.subr.bf16.mxu0 %v15914_v5 }
 0x3b6   : > { %3030 = vmatmul.mubr.f32.gmra.mrb[164].mxu0 %v10707_v63  ;;  %v14439_v63 = vpack.c.bf16 %v10767_v41, %v10766_v42 }
 0x3b7   : > { %14448 = vmatpush3.bf16.msra.mxu0 %v15878_v10  ;;  %10755 = vmatprep.mubr.msk.f32.mxu0 %vm1206_vm4, %v10712_v35  ;;  %v11876_v35 = vpop.f32.mrb[122].mxu1 }
 0x3b8   : > { %14450 = vmatprep.subr.bf16.mxu0 %v15922_v13  ;;  %14440 = vmatpush3.bf16.msra.mxu1 %v14439_v63 }
 0x3b9   : > { %14473 = vmatprep.subr.bf16.mxu1 %v20207_v19 }
 0x3ba   : > { %3035 = vmatmul.mubr.f32.gmra.mrb[166].mxu0 %v10711_v28  ;;  %v11877_v28 = vpop.f32.mrb[123].mxu1 }
 0x3bb   : > { %14452 = vmatpush3.bf16.msra.mxu0 %v15882_v17  ;;  %10756 = vmatprep.mubr.msk.f32.mxu0 %vm1206_vm4, %v10716_v58  ;;  %v17109_v58 = vadd.f32 %v11877_v28, %v11876_v35 }
 0x3bc   : > { %14454 = vmatprep.subr.bf16.mxu0 %v15930_v21 }
 0x3be   : > { %3040 = vmatmul.mubr.f32.gmra.mrb[168].mxu0 %v10715_v32  ;;  %v11879_v32 = vpop.f32.mrb[124].mxu1 }
 0x3bf   : > { %14456 = vmatpush3.bf16.msra.mxu0 %v15886_v24  ;;  %10757 = vmatprep.mubr.msk.f32.mxu0 %vm1206_vm4, %v10720_v61  ;;  %v11880_v61 = vpop.f32.mrb[125].mxu1 }
 0x3c0   : > { %14458 = vmatprep.subr.bf16.mxu0 %v15938_v29 }
 0x3c2   : > { %3045 = vmatmul.mubr.f32.gmra.mrb[170].mxu0 %v10719_v30  ;;  %v17111_v30 = vadd.f32 %v11880_v61, %v11879_v32 }
 0x3c3   : > { %14460 = vmatpush3.bf16.msra.mxu0 %v15890_v31  ;;  %10758 = vmatprep.mubr.msk.f32.mxu0 %vm1206_vm4, %v10724_v62  ;;  %v11882_v62 = vpop.f32.mrb[126].mxu1 }
 0x3c4   : > { %14462 = vmatprep.subr.bf16.mxu0 %v15946_v37 }
 0x3c6   : > { %3050 = vmatmul.mubr.f32.gmra.mrb[172].mxu0 %v10723_v0  ;;  %v11883_v0 = vpop.f32.mrb[127].mxu1 }
 0x3c7   : > { %14464 = vmatpush3.bf16.msra.mxu0 %v15894_v38  ;;  %10759 = vmatprep.mubr.msk.f32.mxu0 %vm1206_vm4, %v10728_v18  ;;  %v17113_v18 = vadd.f32 %v11883_v0, %v11882_v62 }
 0x3c8   : > { %14466 = vmatprep.subr.bf16.mxu0 %v15954_v46 }
 0x3ca   : > { %3055 = vmatmul.mubr.f32.gmra.mrb[174].mxu0 %v10727_v7  ;;  %v11885_v7 = vpop.f32.mrb[128].mxu1 }
 0x3cb   : > { %14468 = vmatpush3.bf16.msra.mxu0 %v15898_v45  ;;  %10760 = vmatprep.mubr.msk.f32.mxu0 %vm1206_vm4, %v10732_v11  ;;  %v11886_v11 = vpop.f32.mrb[129].mxu1 }
 0x3cc   : > { %14470 = vmatprep.subr.bf16.mxu0 %v15962_v54 }
 0x3ce   : > { %3060 = vmatmul.mubr.f32.gmra.mrb[176].mxu0 %v10731_v26  ;;  %v17115_v26 = vadd.f32 %v11886_v11, %v11885_v7 }
 0x3cf   : > { %14472 = vmatpush3.bf16.msra.mxu0 %v15902_v52  ;;  %10761 = vmatprep.mubr.msk.f32.mxu0 %vm1206_vm4, %v10736_v15 }
 0x3d0   : > { %14500 = vmatprep.subr.bf16.mxu0 %v20207_v19 }
 0x3d2   : > { %3065 = vmatmul.mubr.f32.gmra.mrb[178].mxu0 %v10735_v59 }
 0x3d3   : > { %10762 = vmatprep.mubr.msk.f32.mxu0 %vm1206_vm4, %v10740_v50 }
 0x3d6   : > { %3070 = vmatmul.mubr.f32.gmra.mrb[180].mxu0 %v10739_v34 }
 0x3d7   : > { %10763 = vmatprep.mubr.msk.f32.mxu0 %vm1206_vm4, %v10744_v20 }
 0x3da   : > { %3075 = vmatmul.mubr.f32.gmra.mrb[182].mxu0 %v10743_v53 }
 0x3db   : > { %10764 = vmatprep.mubr.msk.f32.mxu0 %vm1206_vm4, %v10748_v43 }
 0x3de   : > { %3080 = vmatmul.mubr.f32.gmra.mrb[184].mxu0 %v10747_v55 }
 0x3df   : > { %10765 = vmatprep.mubr.msk.f32.mxu0 %vm1206_vm4, %v10752_v48 }
 0x3e2   : > { %3085 = vmatmul.mubr.f32.gmra.mrb[186].mxu0 %v10751_v16 }
 0x3f5   : > { %v11888_v15 = vpop.f32.mrb[130].mxu1 }
 0x3f6   : > { %v11889_v59 = vpop.f32.mrb[131].mxu1 }
 0x3f7   : > { %v17117_v50 = vadd.f32 %v11889_v59, %v11888_v15 }
 0x3f9   : > { %v11891_v34 = vpop.f32.mrb[132].mxu1 }
 0x3fa   : > { %v11892_v20 = vpop.f32.mrb[133].mxu1 }
 0x3fb   : > { %v17119_v53 = vadd.f32 %v11892_v20, %v11891_v34 }
 0x3fd   : > { %v11894_v43 = vpop.f32.mrb[134].mxu1 }
 0x3fe   : > { %v11895_v55 = vpop.f32.mrb[135].mxu1 }
 0x3ff   : > { %v17121_v48 = vadd.f32 %v11895_v55, %v11894_v43 }
 0x401   : > { %v11897_v16 = vpop.f32.mrb[136].mxu1 }
 0x402   : > { %v11898_v42 = vpop.f32.mrb[137].mxu1 }
 0x403   : > { %v17123_v41 = vadd.f32 %v11898_v42, %v11897_v16  ;;  %v10782_v16 = vld [vmem:[%s20160_s3 + $0x688] sm:$0xff]  ;;  %v10781_v42 = vld [vmem:[%s20160_s3 + $0x680] sm:$0xff] }
 0x404   : > { %3431 = vmatprep.mubr.f32.mxu0 %v10782_v16  ;;  %v10806_v16 = vld [vmem:[%s20160_s3 + $0x748] sm:$0xff] }
 0x405   : > { %v11900_v63 = vpop.f32.mrb[138].mxu1  ;;  %3432 = vmatmul.mubr.f32.vlgmr.msra.gmra.mrb[188].mxu0 %v10781_v42  ;;  %v10805_v42 = vld [vmem:[%s20160_s3 + $0x740] sm:$0xff] }
 0x406   : > { %v11901_v35 = vpop.f32.mrb[139].mxu1 }
 0x407   : > { %v17125_v28 = vadd.f32 %v11901_v35, %v11900_v63  ;;  %v10786_v63 = vld [vmem:[%s20160_s3 + $0x6a8] sm:$0xff]  ;;  %v10785_v35 = vld [vmem:[%s20160_s3 + $0x6a0] sm:$0xff] }
 0x408   : > { %3436 = vmatprep.mubr.f32.mxu0 %v10786_v63 }
 0x409   : > { %v11903_v32 = vpop.f32.mrb[140].mxu1  ;;  %3437 = vmatmul.mubr.f32.gmra.mrb[190].mxu0 %v10785_v35 }
 0x40a   : > { %v11904_v61 = vpop.f32.mrb[141].mxu1 }
 0x40b   : > { %v17127_v62 = vadd.f32 %v11904_v61, %v11903_v32  ;;  %v10790_v32 = vld [vmem:[%s20160_s3 + $0x6c8] sm:$0xff]  ;;  %v10789_v61 = vld [vmem:[%s20160_s3 + $0x6c0] sm:$0xff] }
 0x40c   : > { %3441 = vmatprep.mubr.f32.mxu0 %v10790_v32  ;;  %v10810_v32 = vld [vmem:[%s20160_s3 + $0x768] sm:$0xff] }
 0x40d   : > { %v11906_v0 = vpop.f32.mrb[142].mxu1  ;;  %3442 = vmatmul.mubr.f32.gmra.mrb[192].mxu0 %v10789_v61 }
 0x40e   : > { %v11907_v7 = vpop.f32.mrb[143].mxu1 }
 0x40f   : > { %v17129_v11 = vadd.f32 %v11907_v7, %v11906_v0  ;;  %v10794_v0 = vld [vmem:[%s20160_s3 + $0x6e8] sm:$0xff]  ;;  %v10793_v7 = vld [vmem:[%s20160_s3 + $0x6e0] sm:$0xff] }
 0x410   : > { %3446 = vmatprep.mubr.f32.mxu0 %v10794_v0  ;;  %v10809_v0 = vld [vmem:[%s20160_s3 + $0x760] sm:$0xff] }
 0x411   : > { %3447 = vmatmul.mubr.f32.gmra.mrb[194].mxu0 %v10793_v7 }
 0x429   : > { %v11909_v15 = vpop.f32.mrb[144].mxu1 }
 0x42a   : > { %v11910_v59 = vpop.f32.mrb[145].mxu1 }
 0x42b   : > { %v17131_v34 = vadd.f32 %v11910_v59, %v11909_v15  ;;  %v10798_v15 = vld [vmem:[%s20160_s3 + $0x708] sm:$0xff]  ;;  %v10797_v59 = vld [vmem:[%s20160_s3 + $0x700] sm:$0xff] }
 0x42c   : > { %3451 = vmatprep.mubr.f32.mxu0 %v10798_v15 }
 0x42d   : > { %v11912_v20 = vpop.f32.mrb[146].mxu1  ;;  %3452 = vmatmul.mubr.f32.gmra.mrb[196].mxu0 %v10797_v59  ;;  %v10814_v59 = vld [vmem:[%s20160_s3 + $0x788] sm:$0xff] }
 0x42e   : > { %v11913_v43 = vpop.f32.mrb[147].mxu1 }
 0x42f   : > { %v17133_v55 = vadd.f32 %v11913_v43, %v11912_v20  ;;  %v10802_v20 = vld [vmem:[%s20160_s3 + $0x728] sm:$0xff]  ;;  %v10801_v43 = vld [vmem:[%s20160_s3 + $0x720] sm:$0xff] }
 0x430   : > { %3456 = vmatprep.mubr.f32.mxu0 %v10802_v20 }
 0x431   : > { %3457 = vmatmul.mubr.f32.gmra.mrb[198].mxu0 %v10801_v43 }
 0x432   : > { %3461 = vmatprep.mubr.f32.mxu0 %v10806_v16  ;;  %v10818_v16 = vld [vmem:[%s20160_s3 + $0x7a8] sm:$0xff] }
 0x435   : > { %3462 = vmatmul.mubr.f32.gmra.mrb[200].mxu0 %v10805_v42 }
 0x436   : > { %3466 = vmatprep.mubr.f32.mxu0 %v10810_v32  ;;  %v10822_v32 = vld [vmem:[%s20160_s3 + $0x7c8] sm:$0xff] }
 0x439   : > { %3467 = vmatmul.mubr.f32.gmra.mrb[202].mxu0 %v10809_v0 }
 0x43a   : > { %3471 = vmatprep.mubr.f32.mxu0 %v10814_v59  ;;  %v10826_v59 = vld [vmem:[%s20160_s3 + $0x7e8] sm:$0xff] }
 0x451   : > { %v2661_v63 = vpop.f32.mrb[136].mxu0 }
 0x452   : > { %v12999_v35 = vpop.f32.mrb[137].mxu0  ;;  %v17181_v61 = vadd.f32 %v2661_v63, %v16789_v56  ;;  %v10813_v56 = vld [vmem:[%s20160_s3 + $0x780] sm:$0xff] }
 0x453   : > { %3472 = vmatmul.mubr.f32.gmra.mrb[204].mxu0 %v10813_v56 }
 0x454   : > { %3476 = vmatprep.mubr.f32.mxu0 %v10818_v16 }
 0x455   : > { %v2666_v7 = vpop.f32.mrb[138].mxu0 }
 0x456   : > { %v13002_v15 = vpop.f32.mrb[139].mxu0  ;;  %v17190_v20 = vadd.f32 %v2666_v7, %v16791_v25  ;;  %v10817_v25 = vld [vmem:[%s20160_s3 + $0x7a0] sm:$0xff] }
 0x457   : > { %3477 = vmatmul.mubr.f32.gmra.mrb[206].mxu0 %v10817_v25 }
 0x458   : > { %3481 = vmatprep.mubr.f32.mxu0 %v10822_v32 }
 0x459   : > { %v2671_v43 = vpop.f32.mrb[140].mxu0 }
 0x45a   : > { %v13005_v42 = vpop.f32.mrb[141].mxu0  ;;  %v17199_v63 = vadd.f32 %v2671_v43, %v16793_v49  ;;  %v10821_v49 = vld [vmem:[%s20160_s3 + $0x7c0] sm:$0xff] }
 0x45b   : > { %3482 = vmatmul.mubr.f32.gmra.mrb[208].mxu0 %v10821_v49  ;;  %v10830_v42 = vld [vmem:[%s20160_s3 + $0x808] sm:$0xf] }
 0x45c   : > { %3486 = vmatprep.mubr.f32.mxu0 %v10826_v59 }
 0x45d   : > { %v2676_v35 = vpop.f32.mrb[142].mxu0 }
 0x45e   : > { %v13008_v0 = vpop.f32.mrb[143].mxu0  ;;  %v17208_v7 = vadd.f32 %v2676_v35, %v16795_v33  ;;  %v10825_v33 = vld [vmem:[%s20160_s3 + $0x7e0] sm:$0xff] }
 0x45f   : > { %3487 = vmatmul.mubr.f32.gmra.mrb[210].mxu0 %v10825_v33 }
 0x460   : > { %3491 = vmatprep.mubr.f32.mxu0 %v10830_v42 }
 0x461   : > { %v2681_v15 = vpop.f32.mrb[144].mxu0 }
 0x462   : > { %v13011_v56 = vpop.f32.mrb[145].mxu0  ;;  %v17217_v43 = vadd.f32 %v2681_v15, %v16870_v8  ;;  %v10829_v8 = vld [vmem:[%s20160_s3 + $0x800] sm:$0xf] }
 0x463   : > { %3492 = vmatmul.mubr.f32.gmra.mrb[212].mxu0 %v10829_v8 }
 0x464   : > { %13083 = vmatprep.mubr.msk.f32.mxu0 %vm15594_vm5, %v20206_v12 }
 0x465   : > { %v2686_v16 = vpop.f32.mrb[146].mxu0 }
 0x466   : > { %v13014_v25 = vpop.f32.mrb[147].mxu0  ;;  %v17226_v35 = vadd.f32 %v2686_v16, %v16878_v14 }
 0x468   : > { %20210 = vst [vmem:[#allocation12_spill] sm:$0xff] %v17226_v35 }
 0x469   : > { %v2691_v32 = vpop.f32.mrb[148].mxu0 }
 0x46a   : > { %v13017_v0 = vpop.f32.mrb[149].mxu0  ;;  %v17232_v49 = vadd.f32 %v2691_v32, %v16887_v44 }
 0x46b   : > { %v20212_v0 = vld [vmem:[#allocation11_spill] sm:$0xff] }
 0x46c   : > { %20211 = vst [vmem:[#allocation13_spill] sm:$0xff] %v17232_v49 }
 0x46d   : > { %v2696_v15 = vpop.f32.mrb[150].mxu0 }
 0x46e   : > { %v13020_v59 = vpop.f32.mrb[151].mxu0  ;;  %v17237_v56 = vadd.f32 %v2696_v15, %v16897_v9 }
 0x471   : > { %v2701_v14 = vpop.f32.mrb[152].mxu0 }
 0x472   : > { %v13023_v33 = vpop.f32.mrb[153].mxu0  ;;  %v17240_v16 = vadd.f32 %v2701_v14, %v16902_v39 }
 0x475   : > { %v2706_v42 = vpop.f32.mrb[154].mxu0 }
 0x476   : > { %v13026_v25 = vpop.f32.mrb[155].mxu0  ;;  %v17243_v8 = vadd.f32 %v2706_v42, %v16907_v3 }
 0x479   : > { %v2711_v44 = vpop.f32.mrb[156].mxu0 }
 0x47a   : > { %v13029_v32 = vpop.f32.mrb[157].mxu0  ;;  %v17246_v49 = vadd.f32 %v2711_v44, %v20212_v0 }
 0x47d   : > { %v2716_v35 = vpop.f32.mrb[158].mxu0 }
 0x47e   : > { %v13032_v59 = vpop.f32.mrb[159].mxu0  ;;  %v17249_v9 = vadd.f32 %v2716_v35, %v16916_v47 }
 0x481   : > { %v2721_v15 = vpop.f32.mrb[160].mxu0 }
 0x482   : > { %v13035_v33 = vpop.f32.mrb[161].mxu0  ;;  %v17252_v39 = vadd.f32 %v2721_v15, %v16920_v27 }
 0x485   : > { %v3026_v14 = vpop.f32.mrb[162].mxu0 }
 0x486   : > { %v3027_v25 = vadd.f32 %v17109_v58, %v3026_v14  ;;  %v3028_v3 = vpop.f32.mrb[163].mxu0 }
 0x488   : > { %13041 = vmatmul.mubr.msk.f32.vlgmr.msra.gmra.mrb[148].mxu1 %vm1206_vm4, %v3027_v25 }
 0x489   : > { %14475 = vmatpush1.bf16.msra.mxu1 %v15982_v6  ;;  %v3031_v42 = vpop.f32.mrb[164].mxu0  ;;  %13043 = vmatprep.mubr.msk.f32.mxu1 %vm15594_vm5, %v20206_v12 }
 0x48a   : > { %14476 = vmatprep.subr.bf16.mxu1 %v20207_v19  ;;  %v3033_v47 = vpop.f32.mrb[165].mxu0  ;;  %v3032_v35 = vadd.f32 %v17111_v30, %v3031_v42 }
 0x48c   : > { %13044 = vmatmul.mubr.msk.f32.gmra.mrb[150].mxu1 %vm1206_vm4, %v3032_v35 }
 0x48d   : > { %14478 = vmatpush1.bf16.msra.mxu1 %v16000_v22  ;;  %v3036_v27 = vpop.f32.mrb[166].mxu0  ;;  %13046 = vmatprep.mubr.msk.f32.mxu1 %vm15594_vm5, %v20206_v12 }
 0x48e   : > { %v3037_v58 = vadd.f32 %v17113_v18, %v3036_v27  ;;  %14479 = vmatprep.subr.bf16.mxu1 %v20207_v19  ;;  %v3038_v44 = vpop.f32.mrb[167].mxu0 }
 0x490   : > { %13047 = vmatmul.mubr.msk.f32.gmra.mrb[152].mxu1 %vm1206_vm4, %v3037_v58 }
 0x491   : > { %14481 = vmatpush1.bf16.msra.mxu1 %v16020_v36  ;;  %v3041_v32 = vpop.f32.mrb[168].mxu0  ;;  %13049 = vmatprep.mubr.msk.f32.mxu1 %vm15594_vm5, %v20206_v12 }
 0x492   : > { %v3042_v30 = vadd.f32 %v17115_v26, %v3041_v32  ;;  %14482 = vmatprep.subr.bf16.mxu1 %v20207_v19  ;;  %v3043_v0 = vpop.f32.mrb[169].mxu0 }
 0x494   : > { %13050 = vmatmul.mubr.msk.f32.gmra.mrb[154].mxu1 %vm1206_vm4, %v3042_v30 }
 0x495   : > { %14484 = vmatpush1.bf16.msra.mxu1 %v16040_v51  ;;  %v3046_v18 = vpop.f32.mrb[170].mxu0  ;;  %13052 = vmatprep.mubr.msk.f32.mxu1 %vm15594_vm5, %v20206_v12 }
 0x496   : > { %v3047_v59 = vadd.f32 %v17117_v50, %v3046_v18  ;;  %14485 = vmatprep.subr.bf16.mxu1 %v20207_v19  ;;  %v3048_v15 = vpop.f32.mrb[171].mxu0 }
 0x498   : > { %13053 = vmatmul.mubr.msk.f32.gmra.mrb[156].mxu1 %vm1206_vm4, %v3047_v59 }
 0x499   : > { %14487 = vmatpush1.bf16.msra.mxu1 %v16060_v4  ;;  %v3051_v26 = vpop.f32.mrb[172].mxu0  ;;  %13055 = vmatprep.mubr.msk.f32.mxu1 %vm15594_vm5, %v20206_v12 }
 0x49a   : > { %v3052_v33 = vadd.f32 %v17119_v53, %v3051_v26  ;;  %14488 = vmatprep.subr.bf16.mxu1 %v20207_v19  ;;  %v3053_v14 = vpop.f32.mrb[173].mxu0 }
 0x49b   : > { %v10792_v14 = vld [vmem:[%s20160_s3 + $0x6d8] sm:$0xff] }
 0x49c   : > { %13056 = vmatmul.mubr.msk.f32.gmra.mrb[158].mxu1 %vm1206_vm4, %v3052_v33  ;;  %v10788_v33 = vld [vmem:[%s20160_s3 + $0x6b8] sm:$0xff] }
 0x49d   : > { %14490 = vmatpush1.bf16.msra.mxu1 %v16080_v23  ;;  %v3056_v50 = vpop.f32.mrb[174].mxu0  ;;  %13058 = vmatprep.mubr.msk.f32.mxu1 %vm15594_vm5, %v20206_v12 }
 0x49e   : > { %v3057_v25 = vadd.f32 %v17121_v48, %v3056_v50  ;;  %14491 = vmatprep.subr.bf16.mxu1 %v20207_v19  ;;  %v3058_v3 = vpop.f32.mrb[175].mxu0  ;;  %v10791_v50 = vld [vmem:[%s20160_s3 + $0x6d0] sm:$0xff] }
 0x49f   : > { %v10795_v3 = vld [vmem:[%s20160_s3 + $0x6f0] sm:$0xff] }
 0x4a0   : > { %13059 = vmatmul.mubr.msk.f32.gmra.mrb[160].mxu1 %vm1206_vm4, %v3057_v25  ;;  %v10796_v25 = vld [vmem:[%s20160_s3 + $0x6f8] sm:$0xff] }
 0x4a1   : > { %14493 = vmatpush1.bf16.msra.mxu1 %v16100_v40  ;;  %v3061_v53 = vpop.f32.mrb[176].mxu0  ;;  %13061 = vmatprep.mubr.msk.f32.mxu1 %vm15594_vm5, %v20206_v12 }
 0x4a2   : > { %v3062_v42 = vadd.f32 %v17123_v41, %v3061_v53  ;;  %14494 = vmatprep.subr.bf16.mxu1 %v20207_v19  ;;  %v3063_v47 = vpop.f32.mrb[177].mxu0  ;;  %v10800_v53 = vld [vmem:[%s20160_s3 + $0x718] sm:$0xff] }
 0x4a3   : > { %v10804_v47 = vld [vmem:[%s20160_s3 + $0x738] sm:$0xff] }
 0x4a4   : > { %13062 = vmatmul.mubr.msk.f32.gmra.mrb[162].mxu1 %vm1206_vm4, %v3062_v42  ;;  %v10799_v42 = vld [vmem:[%s20160_s3 + $0x710] sm:$0xff] }
 0x4a5   : > { %14496 = vmatpush1.bf16.msra.mxu1 %v16120_v57  ;;  %v3066_v48 = vpop.f32.mrb[178].mxu0  ;;  %13064 = vmatprep.mubr.msk.f32.mxu1 %vm15594_vm5, %v20206_v12 }
 0x4a6   : > { %v3067_v35 = vadd.f32 %v17125_v28, %v3066_v48  ;;  %14497 = vmatprep.subr.bf16.mxu1 %v20207_v19  ;;  %v3068_v27 = vpop.f32.mrb[179].mxu0  ;;  %v10803_v48 = vld [vmem:[%s20160_s3 + $0x730] sm:$0xff] }
 0x4a7   : > { %v10807_v27 = vld [vmem:[%s20160_s3 + $0x750] sm:$0xff] }
 0x4a8   : > { %13065 = vmatmul.mubr.msk.f32.gmra.mrb[164].mxu1 %vm1206_vm4, %v3067_v35  ;;  %v10808_v35 = vld [vmem:[%s20160_s3 + $0x758] sm:$0xff] }
 0x4a9   : > { %14499 = vmatpush1.bf16.msra.mxu1 %v16139_v1  ;;  %v3071_v41 = vpop.f32.mrb[180].mxu0  ;;  %13067 = vmatprep.mubr.msk.f32.mxu1 %vm15594_vm5, %v20206_v12 }
 0x4aa   : > { %v3072_v58 = vadd.f32 %v17127_v62, %v3071_v41  ;;  %14504 = vmatprep.subr.bf16.mxu1 %v15906_v60  ;;  %v3073_v44 = vpop.f32.mrb[181].mxu0  ;;  %v10812_v41 = vld [vmem:[%s20160_s3 + $0x778] sm:$0xff] }
 0x4ab   : > { %v10816_v44 = vld [vmem:[%s20160_s3 + $0x798] sm:$0xff] }
 0x4ac   : > { %13068 = vmatmul.mubr.msk.f32.gmra.mrb[166].mxu1 %vm1206_vm4, %v3072_v58  ;;  %v10811_v58 = vld [vmem:[%s20160_s3 + $0x770] sm:$0xff] }
 0x4ad   : > { %v3076_v32 = vpop.f32.mrb[182].mxu0  ;;  %13070 = vmatprep.mubr.msk.f32.mxu1 %vm15594_vm5, %v20206_v12 }
 0x4ae   : > { %v3077_v28 = vadd.f32 %v17129_v11, %v3076_v32  ;;  %v3078_v30 = vpop.f32.mrb[183].mxu0  ;;  %v10784_v11 = vld [vmem:[%s20160_s3 + $0x698] sm:$0xff]  ;;  %v10815_v32 = vld [vmem:[%s20160_s3 + $0x790] sm:$0xff] }
 0x4af   : > { %v10819_v30 = vld [vmem:[%s20160_s3 + $0x7b0] sm:$0xff] }
 0x4b0   : > { %13071 = vmatmul.mubr.msk.f32.gmra.mrb[168].mxu1 %vm1206_vm4, %v3077_v28  ;;  %v10820_v28 = vld [vmem:[%s20160_s3 + $0x7b8] sm:$0xff] }
 0x4b1   : > { %v3081_v0 = vpop.f32.mrb[184].mxu0  ;;  %13073 = vmatprep.mubr.msk.f32.mxu1 %vm15594_vm5, %v20206_v12 }
 0x4b2   : > { %v3082_v62 = vadd.f32 %v17131_v34, %v3081_v0  ;;  %v3083_v18 = vpop.f32.mrb[185].mxu0  ;;  %v10783_v34 = vld [vmem:[%s20160_s3 + $0x690] sm:$0xff]  ;;  %v10824_v0 = vld [vmem:[%s20160_s3 + $0x7d8] sm:$0xff] }
 0x4b3   : > { %v10828_v18 = vld [vmem:[%s20160_s3 + $0x7f8] sm:$0xff] }
 0x4b4   : > { %13074 = vmatmul.mubr.msk.f32.gmra.mrb[170].mxu1 %vm1206_vm4, %v3082_v62  ;;  %v10823_v62 = vld [vmem:[%s20160_s3 + $0x7d0] sm:$0xff] }
 0x4b5   : > { %v3086_v59 = vpop.f32.mrb[186].mxu0  ;;  %13076 = vmatprep.mubr.msk.f32.mxu1 %vm15594_vm5, %v20206_v12 }
 0x4b6   : > { %v3087_v15 = vadd.f32 %v17133_v55, %v3086_v59  ;;  %v3088_v26 = vpop.f32.mrb[187].mxu0  ;;  %v10787_v55 = vld [vmem:[%s20160_s3 + $0x6b0] sm:$0xff] }
 0x4b7   : > { %v10827_v59 = vld [vmem:[%s20160_s3 + $0x7f0] sm:$0xff]  ;;  %v10846_v26 = vld [vmem:[%s20161_s4 + $0x40] sm:$0xff] }
 0x4b8   : > { %13077 = vmatmul.mubr.msk.f32.gmra.mrb[172].mxu1 %vm1206_vm4, %v3087_v15  ;;  %v10832_v15 = vld [vmem:[%s20160_s3 + $0x818] sm:$0xf] }
 0x4b9   : > { %10833 = vmatprep.mubr.msk.f32.mxu1 %vm1206_vm4, %v10784_v11  ;;  %v10831_v11 = vld [vmem:[%s20160_s3 + $0x810] sm:$0xf] }
 0x4bc   : > { %3562 = vmatmul.mubr.f32.vlgmr.msra.gmra.mrb[174].mxu1 %v10783_v34  ;;  %v10847_v34 = vld [vmem:[%s20161_s4 + $0x48] sm:$0xff] }
 0x4bd   : > { %14506 = vmatpush3.bf16.msra.mxu1 %v15874_v2  ;;  %10834 = vmatprep.mubr.msk.f32.mxu1 %vm1206_vm4, %v10788_v33  ;;  %v14501_v33 = vpack.c.bf16 %v10847_v34, %v10846_v26 }
 0x4be   : > { %14508 = vmatprep.subr.bf16.mxu1 %v15914_v5 }
 0x4bf   : > { %14502 = vmatpush3.bf16.msra.mxu0 %v14501_v33 }
 0x4c0   : > { %3567 = vmatmul.mubr.f32.gmra.mrb[176].mxu1 %v10787_v55  ;;  %14535 = vmatprep.subr.bf16.mxu0 %v20207_v19 }
 0x4c1   : > { %14510 = vmatpush3.bf16.msra.mxu1 %v15878_v10  ;;  %10835 = vmatprep.mubr.msk.f32.mxu1 %vm1206_vm4, %v10792_v14 }
 0x4c2   : > { %14512 = vmatprep.subr.bf16.mxu1 %v15922_v13 }
 0x4c4   : > { %3572 = vmatmul.mubr.f32.gmra.mrb[178].mxu1 %v10791_v50 }
 0x4c5   : > { %14514 = vmatpush3.bf16.msra.mxu1 %v15882_v17  ;;  %10836 = vmatprep.mubr.msk.f32.mxu1 %vm1206_vm4, %v10796_v25 }
 0x4c6   : > { %14516 = vmatprep.subr.bf16.mxu1 %v15930_v21 }
 0x4c8   : > { %3577 = vmatmul.mubr.f32.gmra.mrb[180].mxu1 %v10795_v3 }
 0x4c9   : > { %14518 = vmatpush3.bf16.msra.mxu1 %v15886_v24  ;;  %10837 = vmatprep.mubr.msk.f32.mxu1 %vm1206_vm4, %v10800_v53 }
 0x4ca   : > { %14520 = vmatprep.subr.bf16.mxu1 %v15938_v29 }
 0x4cc   : > { %3582 = vmatmul.mubr.f32.gmra.mrb[182].mxu1 %v10799_v42 }
 0x4cd   : > { %14522 = vmatpush3.bf16.msra.mxu1 %v15890_v31  ;;  %10838 = vmatprep.mubr.msk.f32.mxu1 %vm1206_vm4, %v10804_v47 }
 0x4ce   : > { %14524 = vmatprep.subr.bf16.mxu1 %v15946_v37 }
 0x4d0   : > { %3587 = vmatmul.mubr.f32.gmra.mrb[184].mxu1 %v10803_v48 }
 0x4d1   : > { %14526 = vmatpush3.bf16.msra.mxu1 %v15894_v38  ;;  %10839 = vmatprep.mubr.msk.f32.mxu1 %vm1206_vm4, %v10808_v35 }
 0x4d2   : > { %14528 = vmatprep.subr.bf16.mxu1 %v15954_v46 }
 0x4d4   : > { %3592 = vmatmul.mubr.f32.gmra.mrb[186].mxu1 %v10807_v27 }
 0x4d5   : > { %14530 = vmatpush3.bf16.msra.mxu1 %v15898_v45  ;;  %10840 = vmatprep.mubr.msk.f32.mxu1 %vm1206_vm4, %v10812_v41 }
 0x4d6   : > { %14532 = vmatprep.subr.bf16.mxu1 %v15962_v54 }
 0x4d8   : > { %3597 = vmatmul.mubr.f32.gmra.mrb[188].mxu1 %v10811_v58  ;;  %v11962_v55 = vpop.f32.mrb[188].mxu0 }
 0x4d9   : > { %14534 = vmatpush3.bf16.msra.mxu1 %v15902_v52  ;;  %10841 = vmatprep.mubr.msk.f32.mxu1 %vm1206_vm4, %v10816_v44  ;;  %v11963_v14 = vpop.f32.mrb[189].mxu0 }
 0x4da   : > { %14562 = vmatprep.subr.bf16.mxu1 %v20207_v19  ;;  %v17436_v50 = vadd.f32 %v11963_v14, %v11962_v55 }
 0x4dc   : > { %3602 = vmatmul.mubr.f32.gmra.mrb[190].mxu1 %v10815_v32  ;;  %v11965_v25 = vpop.f32.mrb[190].mxu0 }
 0x4dd   : > { %10842 = vmatprep.mubr.msk.f32.mxu1 %vm1206_vm4, %v10820_v28  ;;  %v11966_v3 = vpop.f32.mrb[191].mxu0 }
 0x4de   : > { %v17438_v53 = vadd.f32 %v11966_v3, %v11965_v25 }
 0x4e0   : > { %3607 = vmatmul.mubr.f32.gmra.mrb[192].mxu1 %v10819_v30  ;;  %v11968_v42 = vpop.f32.mrb[192].mxu0 }
 0x4e1   : > { %10843 = vmatprep.mubr.msk.f32.mxu1 %vm1206_vm4, %v10824_v0  ;;  %v11969_v47 = vpop.f32.mrb[193].mxu0 }
 0x4e2   : > { %v17440_v48 = vadd.f32 %v11969_v47, %v11968_v42 }
 0x4e4   : > { %3612 = vmatmul.mubr.f32.gmra.mrb[194].mxu1 %v10823_v62  ;;  %v11971_v35 = vpop.f32.mrb[194].mxu0 }
 0x4e5   : > { %10844 = vmatprep.mubr.msk.f32.mxu1 %vm1206_vm4, %v10828_v18  ;;  %v11972_v27 = vpop.f32.mrb[195].mxu0 }
 0x4e6   : > { %v17442_v41 = vadd.f32 %v11972_v27, %v11971_v35 }
 0x4e8   : > { %3617 = vmatmul.mubr.f32.gmra.mrb[196].mxu1 %v10827_v59 }
 0x4e9   : > { %10845 = vmatprep.mubr.msk.f32.mxu1 %vm1206_vm4, %v10832_v15 }
 0x4ec   : > { %3622 = vmatmul.mubr.f32.gmra.mrb[198].mxu1 %v10831_v11 }
 0x500   : > { %v11974_v58 = vpop.f32.mrb[196].mxu0 }
 0x501   : > { %v11975_v44 = vpop.f32.mrb[197].mxu0 }
 0x502   : > { %v17444_v32 = vadd.f32 %v11975_v44, %v11974_v58 }
 0x504   : > { %v11977_v28 = vpop.f32.mrb[198].mxu0 }
 0x505   : > { %v11978_v30 = vpop.f32.mrb[199].mxu0 }
 0x506   : > { %v17446_v0 = vadd.f32 %v11978_v30, %v11977_v28 }
 0x508   : > { %v11980_v62 = vpop.f32.mrb[200].mxu0 }
 0x509   : > { %v11981_v18 = vpop.f32.mrb[201].mxu0 }
 0x50a   : > { %v17448_v59 = vadd.f32 %v11981_v18, %v11980_v62  ;;  %v10862_v18 = vld [vmem:[%s20160_s3 + $0x828] sm:$0xff] }
 0x50b   : > { %3968 = vmatprep.mubr.f32.mxu1 %v10862_v18  ;;  %v10885_v18 = vld [vmem:[%s20160_s3 + $0x8e0] sm:$0xff] }
 0x50c   : > { %v11983_v15 = vpop.f32.mrb[202].mxu0 }
 0x50d   : > { %v11984_v11 = vpop.f32.mrb[203].mxu0 }
 0x50e   : > { %v17450_v26 = vadd.f32 %v11984_v11, %v11983_v15  ;;  %v10861_v15 = vld [vmem:[%s20160_s3 + $0x820] sm:$0xff]  ;;  %v10866_v11 = vld [vmem:[%s20160_s3 + $0x848] sm:$0xff] }
 0x50f   : > { %3969 = vmatmul.mubr.f32.vlgmr.msra.gmra.mrb[200].mxu1 %v10861_v15 }
 0x510   : > { %3973 = vmatprep.mubr.f32.mxu1 %v10866_v11 }
 0x526   : > { %v11986_v34 = vpop.f32.mrb[204].mxu0 }
 0x527   : > { %v11987_v33 = vpop.f32.mrb[205].mxu0 }
 0x528   : > { %v17452_v55 = vadd.f32 %v11987_v33, %v11986_v34  ;;  %v10865_v34 = vld [vmem:[%s20160_s3 + $0x840] sm:$0xff]  ;;  %v10870_v33 = vld [vmem:[%s20160_s3 + $0x868] sm:$0xff] }
 0x529   : > { %3974 = vmatmul.mubr.f32.gmra.mrb[202].mxu1 %v10865_v34 }
 0x52a   : > { %v11989_v14 = vpop.f32.mrb[206].mxu0  ;;  %3978 = vmatprep.mubr.f32.mxu1 %v10870_v33  ;;  %v10890_v33 = vld [vmem:[%s20160_s3 + $0x908] sm:$0xff] }
 0x52b   : > { %v11990_v25 = vpop.f32.mrb[207].mxu0 }
 0x52c   : > { %v17454_v3 = vadd.f32 %v11990_v25, %v11989_v14  ;;  %v10869_v14 = vld [vmem:[%s20160_s3 + $0x860] sm:$0xff]  ;;  %v10874_v25 = vld [vmem:[%s20160_s3 + $0x888] sm:$0xff] }
 0x52d   : > { %3979 = vmatmul.mubr.f32.gmra.mrb[204].mxu1 %v10869_v14  ;;  %v10889_v14 = vld [vmem:[%s20160_s3 + $0x900] sm:$0xff] }
 0x52e   : > { %v11992_v42 = vpop.f32.mrb[208].mxu0  ;;  %3983 = vmatprep.mubr.f32.mxu1 %v10874_v25 }
 0x52f   : > { %v11993_v47 = vpop.f32.mrb[209].mxu0 }
 0x530   : > { %v17456_v35 = vadd.f32 %v11993_v47, %v11992_v42  ;;  %v10873_v42 = vld [vmem:[%s20160_s3 + $0x880] sm:$0xff]  ;;  %v10878_v47 = vld [vmem:[%s20160_s3 + $0x8a8] sm:$0xff] }
 0x531   : > { %3984 = vmatmul.mubr.f32.gmra.mrb[206].mxu1 %v10873_v42 }
 0x532   : > { %v11995_v27 = vpop.f32.mrb[210].mxu0  ;;  %3988 = vmatprep.mubr.f32.mxu1 %v10878_v47 }
 0x533   : > { %v11996_v58 = vpop.f32.mrb[211].mxu0 }
 0x534   : > { %v17458_v44 = vadd.f32 %v11996_v58, %v11995_v27  ;;  %v10877_v27 = vld [vmem:[%s20160_s3 + $0x8a0] sm:$0xff]  ;;  %v10882_v58 = vld [vmem:[%s20160_s3 + $0x8c8] sm:$0xff] }
 0x535   : > { %3989 = vmatmul.mubr.f32.gmra.mrb[208].mxu1 %v10877_v27  ;;  %v10893_v27 = vld [vmem:[%s20160_s3 + $0x920] sm:$0xff] }
 0x536   : > { %v11998_v28 = vpop.f32.mrb[212].mxu0  ;;  %3993 = vmatprep.mubr.f32.mxu1 %v10882_v58 }
 0x537   : > { %v11999_v30 = vpop.f32.mrb[213].mxu0 }
 0x538   : > { %v17460_v62 = vadd.f32 %v11999_v30, %v11998_v28  ;;  %v10881_v28 = vld [vmem:[%s20160_s3 + $0x8c0] sm:$0xff]  ;;  %v10886_v30 = vld [vmem:[%s20160_s3 + $0x8e8] sm:$0xff] }
 0x539   : > { %3994 = vmatmul.mubr.f32.gmra.mrb[210].mxu1 %v10881_v28  ;;  %v10898_v28 = vld [vmem:[%s20160_s3 + $0x948] sm:$0xff] }
 0x53a   : > { %3998 = vmatprep.mubr.f32.mxu1 %v10886_v30 }
 0x53d   : > { %3999 = vmatmul.mubr.f32.gmra.mrb[212].mxu1 %v10885_v18  ;;  %v10897_v18 = vld [vmem:[%s20160_s3 + $0x940] sm:$0xff] }
 0x53e   : > { %4003 = vmatprep.mubr.f32.mxu1 %v10890_v33 }
 0x541   : > { %4004 = vmatmul.mubr.f32.gmra.mrb[214].mxu1 %v10889_v14 }
 0x55b   : > { %v3198_v15 = vpop.f32.mrb[148].mxu1 }
 0x55c   : > { %v17505_v11 = vadd.f32 %v3198_v15, %v17181_v61  ;;  %v13042_v34 = vpop.f32.mrb[149].mxu1  ;;  %v10894_v61 = vld [vmem:[%s20160_s3 + $0x928] sm:$0xff] }
 0x55d   : > { %4008 = vmatprep.mubr.f32.mxu1 %v10894_v61  ;;  %v10902_v34 = vld [vmem:[%s20160_s3 + $0x968] sm:$0xff] }
 0x55e   : > { %4009 = vmatmul.mubr.f32.gmra.mrb[216].mxu1 %v10893_v27 }
 0x55f   : > { %v3203_v25 = vpop.f32.mrb[150].mxu1  ;;  %4013 = vmatprep.mubr.f32.mxu1 %v10898_v28  ;;  %v10910_v28 = vld [vmem:[%s20160_s3 + $0x9a8] sm:$0xf] }
 0x560   : > { %v17514_v42 = vadd.f32 %v3203_v25, %v17190_v20  ;;  %v13045_v47 = vpop.f32.mrb[151].mxu1 }
 0x561   : > { %v10906_v47 = vld [vmem:[%s20160_s3 + $0x988] sm:$0xff] }
 0x562   : > { %4014 = vmatmul.mubr.f32.gmra.mrb[218].mxu1 %v10897_v18 }
 0x563   : > { %v3208_v58 = vpop.f32.mrb[152].mxu1  ;;  %4018 = vmatprep.mubr.f32.mxu1 %v10902_v34 }
 0x564   : > { %v17526_v30 = vadd.f32 %v3208_v58, %v17199_v63  ;;  %v13048_v20 = vpop.f32.mrb[153].mxu1  ;;  %v10901_v63 = vld [vmem:[%s20160_s3 + $0x960] sm:$0xff] }
 0x565   : > { %v20213_v20 = vld [vmem:[#allocation12_spill] sm:$0xff] }
 0x566   : > { %4019 = vmatmul.mubr.f32.gmra.mrb[220].mxu1 %v10901_v63 }
 0x567   : > { %v3213_v15 = vpop.f32.mrb[154].mxu1  ;;  %4023 = vmatprep.mubr.f32.mxu1 %v10906_v47 }
 0x568   : > { %v17535_v33 = vadd.f32 %v3213_v15, %v17208_v7  ;;  %v13051_v14 = vpop.f32.mrb[155].mxu1  ;;  %v10905_v7 = vld [vmem:[%s20160_s3 + $0x980] sm:$0xff] }
 0x569   : > { %v20215_v14 = vld [vmem:[#allocation13_spill] sm:$0xff] }
 0x56a   : > { %4024 = vmatmul.mubr.f32.gmra.mrb[222].mxu1 %v10905_v7 }
 0x56b   : > { %v3218_v25 = vpop.f32.mrb[156].mxu1  ;;  %4028 = vmatprep.mubr.f32.mxu1 %v10910_v28 }
 0x56c   : > { %v17544_v61 = vadd.f32 %v3218_v25, %v17217_v43  ;;  %v13054_v27 = vpop.f32.mrb[157].mxu1  ;;  %v10909_v43 = vld [vmem:[%s20160_s3 + $0x9a0] sm:$0xf] }
 0x56e   : > { %4029 = vmatmul.mubr.f32.gmra.mrb[224].mxu1 %v10909_v43 }
 0x56f   : > { %v3223_v58 = vpop.f32.mrb[158].mxu1  ;;  %13126 = vmatprep.mubr.msk.f32.mxu1 %vm15594_vm5, %v20206_v12 }
 0x570   : > { %v17553_v18 = vadd.f32 %v3223_v58, %v20213_v20  ;;  %v13057_v15 = vpop.f32.mrb[159].mxu1 }
 0x572   : > { %20214 = vst [vmem:[#allocation11_spill] sm:$0xff] %v17553_v18 }
 0x573   : > { %v3228_v34 = vpop.f32.mrb[160].mxu1 }
 0x574   : > { %v17559_v63 = vadd.f32 %v3228_v34, %v20215_v14  ;;  %v13060_v25 = vpop.f32.mrb[161].mxu1 }
 0x576   : > { %20216 = vst [vmem:[#allocation12_spill] sm:$0xff] %v17559_v63 }
 0x577   : > { %v3233_v47 = vpop.f32.mrb[162].mxu1 }
 0x578   : > { %v17564_v27 = vadd.f32 %v3233_v47, %v17237_v56  ;;  %v13063_v7 = vpop.f32.mrb[163].mxu1 }
 0x57b   : > { %v3238_v58 = vpop.f32.mrb[164].mxu1 }
 0x57c   : > { %v17567_v28 = vadd.f32 %v3238_v58, %v17240_v16  ;;  %v13066_v20 = vpop.f32.mrb[165].mxu1 }
 0x57f   : > { %v3243_v15 = vpop.f32.mrb[166].mxu1 }
 0x580   : > { %v17570_v43 = vadd.f32 %v3243_v15, %v17243_v8  ;;  %v13069_v34 = vpop.f32.mrb[167].mxu1 }
 0x583   : > { %v3248_v14 = vpop.f32.mrb[168].mxu1 }
 0x584   : > { %v17573_v25 = vadd.f32 %v3248_v14, %v17246_v49  ;;  %v13072_v63 = vpop.f32.mrb[169].mxu1 }
 0x587   : > { %v3253_v18 = vpop.f32.mrb[170].mxu1 }
 0x588   : > { %v17576_v56 = vadd.f32 %v3253_v18, %v17249_v9  ;;  %v13075_v47 = vpop.f32.mrb[171].mxu1 }
 0x58b   : > { %v3258_v7 = vpop.f32.mrb[172].mxu1 }
 0x58c   : > { %v17579_v16 = vadd.f32 %v3258_v7, %v17252_v39  ;;  %v13078_v58 = vpop.f32.mrb[173].mxu1 }
 0x58f   : > { %v3563_v20 = vpop.f32.mrb[174].mxu1 }
 0x590   : > { %v3564_v8 = vadd.f32 %v17436_v50, %v3563_v20  ;;  %v3565_v15 = vpop.f32.mrb[175].mxu1 }
 0x592   : > { %13084 = vmatmul.mubr.msk.f32.vlgmr.msra.gmra.mrb[214].mxu0 %vm1206_vm4, %v3564_v8 }
 0x593   : > { %14537 = vmatpush1.bf16.msra.mxu0 %v15982_v6  ;;  %v3568_v49 = vpop.f32.mrb[176].mxu1  ;;  %13086 = vmatprep.mubr.msk.f32.mxu0 %vm15594_vm5, %v20206_v12 }
 0x594   : > { %v3569_v9 = vadd.f32 %v17438_v53, %v3568_v49  ;;  %14538 = vmatprep.subr.bf16.mxu0 %v20207_v19  ;;  %v3570_v18 = vpop.f32.mrb[177].mxu1 }
 0x596   : > { %13087 = vmatmul.mubr.msk.f32.gmra.mrb[216].mxu0 %vm1206_vm4, %v3569_v9 }
 0x597   : > { %14540 = vmatpush1.bf16.msra.mxu0 %v16000_v22  ;;  %v3573_v39 = vpop.f32.mrb[178].mxu1  ;;  %13089 = vmatprep.mubr.msk.f32.mxu0 %vm15594_vm5, %v20206_v12 }
 0x598   : > { %v3574_v50 = vadd.f32 %v17440_v48, %v3573_v39  ;;  %14541 = vmatprep.subr.bf16.mxu0 %v20207_v19  ;;  %v3575_v63 = vpop.f32.mrb[179].mxu1 }
 0x59a   : > { %13090 = vmatmul.mubr.msk.f32.gmra.mrb[218].mxu0 %vm1206_vm4, %v3574_v50 }
 0x59b   : > { %14543 = vmatpush1.bf16.msra.mxu0 %v16020_v36  ;;  %v3578_v53 = vpop.f32.mrb[180].mxu1  ;;  %13092 = vmatprep.mubr.msk.f32.mxu0 %vm15594_vm5, %v20206_v12 }
 0x59c   : > { %v3579_v34 = vadd.f32 %v17442_v41, %v3578_v53  ;;  %14544 = vmatprep.subr.bf16.mxu0 %v20207_v19  ;;  %v3580_v14 = vpop.f32.mrb[181].mxu1 }
 0x59e   : > { %13093 = vmatmul.mubr.msk.f32.gmra.mrb[220].mxu0 %vm1206_vm4, %v3579_v34 }
 0x59f   : > { %14546 = vmatpush1.bf16.msra.mxu0 %v16040_v51  ;;  %v3583_v48 = vpop.f32.mrb[182].mxu1  ;;  %13095 = vmatprep.mubr.msk.f32.mxu0 %vm15594_vm5, %v20206_v12 }
 0x5a0   : > { %v3584_v47 = vadd.f32 %v17444_v32, %v3583_v48  ;;  %14547 = vmatprep.subr.bf16.mxu0 %v20207_v19  ;;  %v3585_v7 = vpop.f32.mrb[183].mxu1 }
 0x5a2   : > { %13096 = vmatmul.mubr.msk.f32.gmra.mrb[222].mxu0 %vm1206_vm4, %v3584_v47 }
 0x5a3   : > { %14549 = vmatpush1.bf16.msra.mxu0 %v16060_v4  ;;  %v3588_v41 = vpop.f32.mrb[184].mxu1  ;;  %13098 = vmatprep.mubr.msk.f32.mxu0 %vm15594_vm5, %v20206_v12 }
 0x5a4   : > { %v3589_v58 = vadd.f32 %v17446_v0, %v3588_v41  ;;  %14550 = vmatprep.subr.bf16.mxu0 %v20207_v19  ;;  %v3590_v20 = vpop.f32.mrb[185].mxu1 }
 0x5a5   : > { %v10872_v20 = vld [vmem:[%s20160_s3 + $0x878] sm:$0xff] }
 0x5a6   : > { %13099 = vmatmul.mubr.msk.f32.gmra.mrb[224].mxu0 %vm1206_vm4, %v3589_v58  ;;  %v10868_v58 = vld [vmem:[%s20160_s3 + $0x858] sm:$0xff] }
 0x5a7   : > { %14552 = vmatpush1.bf16.msra.mxu0 %v16080_v23  ;;  %v3593_v32 = vpop.f32.mrb[186].mxu1  ;;  %13101 = vmatprep.mubr.msk.f32.mxu0 %vm15594_vm5, %v20206_v12 }
 0x5a8   : > { %v3594_v8 = vadd.f32 %v17448_v59, %v3593_v32  ;;  %14553 = vmatprep.subr.bf16.mxu0 %v20207_v19  ;;  %v3595_v15 = vpop.f32.mrb[187].mxu1  ;;  %v10871_v32 = vld [vmem:[%s20160_s3 + $0x870] sm:$0xff] }
 0x5a9   : > { %v10875_v15 = vld [vmem:[%s20160_s3 + $0x890] sm:$0xff] }
 0x5aa   : > { %13102 = vmatmul.mubr.msk.f32.gmra.mrb[226].mxu0 %vm1206_vm4, %v3594_v8  ;;  %v10876_v8 = vld [vmem:[%s20160_s3 + $0x898] sm:$0xff] }
 0x5ab   : > { %14555 = vmatpush1.bf16.msra.mxu0 %v16100_v40  ;;  %v3598_v0 = vpop.f32.mrb[188].mxu1  ;;  %13104 = vmatprep.mubr.msk.f32.mxu0 %vm15594_vm5, %v20206_v12 }
 0x5ac   : > { %v3599_v49 = vadd.f32 %v17450_v26, %v3598_v0  ;;  %14556 = vmatprep.subr.bf16.mxu0 %v20207_v19  ;;  %v3600_v9 = vpop.f32.mrb[189].mxu1  ;;  %v10880_v0 = vld [vmem:[%s20160_s3 + $0x8b8] sm:$0xff] }
 0x5ad   : > { %v10884_v9 = vld [vmem:[%s20160_s3 + $0x8d8] sm:$0xff] }
 0x5ae   : > { %13105 = vmatmul.mubr.msk.f32.gmra.mrb[228].mxu0 %vm1206_vm4, %v3599_v49  ;;  %v10879_v49 = vld [vmem:[%s20160_s3 + $0x8b0] sm:$0xff] }
 0x5af   : > { %14558 = vmatpush1.bf16.msra.mxu0 %v16120_v57  ;;  %v3603_v59 = vpop.f32.mrb[190].mxu1  ;;  %13107 = vmatprep.mubr.msk.f32.mxu0 %vm15594_vm5, %v20206_v12 }
 0x5b0   : > { %v3604_v18 = vadd.f32 %v17452_v55, %v3603_v59  ;;  %14559 = vmatprep.subr.bf16.mxu0 %v20207_v19  ;;  %v3605_v39 = vpop.f32.mrb[191].mxu1  ;;  %v10883_v59 = vld [vmem:[%s20160_s3 + $0x8d0] sm:$0xff] }
 0x5b1   : > { %v10887_v39 = vld [vmem:[%s20160_s3 + $0x8f0] sm:$0xff] }
 0x5b2   : > { %13108 = vmatmul.mubr.msk.f32.gmra.mrb[230].mxu0 %vm1206_vm4, %v3604_v18  ;;  %v10888_v18 = vld [vmem:[%s20160_s3 + $0x8f8] sm:$0xff] }
 0x5b3   : > { %14561 = vmatpush1.bf16.msra.mxu0 %v16139_v1  ;;  %v3608_v26 = vpop.f32.mrb[192].mxu1  ;;  %13110 = vmatprep.mubr.msk.f32.mxu0 %vm15594_vm5, %v20206_v12 }
 0x5b4   : > { %v3609_v50 = vadd.f32 %v17454_v3, %v3608_v26  ;;  %14566 = vmatprep.subr.bf16.mxu0 %v15906_v60  ;;  %v3610_v63 = vpop.f32.mrb[193].mxu1  ;;  %v10892_v26 = vld [vmem:[%s20160_s3 + $0x918] sm:$0xff] }
 0x5b5   : > { %v10896_v63 = vld [vmem:[%s20160_s3 + $0x938] sm:$0xff] }
 0x5b6   : > { %13111 = vmatmul.mubr.msk.f32.gmra.mrb[232].mxu0 %vm1206_vm4, %v3609_v50  ;;  %v10891_v50 = vld [vmem:[%s20160_s3 + $0x910] sm:$0xff] }
 0x5b7   : > { %v3613_v53 = vpop.f32.mrb[194].mxu1  ;;  %13113 = vmatprep.mubr.msk.f32.mxu0 %vm15594_vm5, %v20206_v12 }
 0x5b8   : > { %v3614_v55 = vadd.f32 %v17456_v35, %v3613_v53  ;;  %v3615_v34 = vpop.f32.mrb[195].mxu1  ;;  %v10864_v35 = vld [vmem:[%s20160_s3 + $0x838] sm:$0xff]  ;;  %v10895_v53 = vld [vmem:[%s20160_s3 + $0x930] sm:$0xff] }
 0x5b9   : > { %v10899_v34 = vld [vmem:[%s20160_s3 + $0x950] sm:$0xff] }
 0x5ba   : > { %13114 = vmatmul.mubr.msk.f32.gmra.mrb[234].mxu0 %vm1206_vm4, %v3614_v55  ;;  %v10900_v55 = vld [vmem:[%s20160_s3 + $0x958] sm:$0xff] }
 0x5bb   : > { %v3618_v14 = vpop.f32.mrb[196].mxu1  ;;  %13116 = vmatprep.mubr.msk.f32.mxu0 %vm15594_vm5, %v20206_v12 }
 0x5bc   : > { %v3619_v3 = vadd.f32 %v17458_v44, %v3618_v14  ;;  %v3620_v48 = vpop.f32.mrb[197].mxu1  ;;  %v10863_v44 = vld [vmem:[%s20160_s3 + $0x830] sm:$0xff]  ;;  %v10904_v14 = vld [vmem:[%s20160_s3 + $0x978] sm:$0xff] }
 0x5bd   : > { %v10908_v48 = vld [vmem:[%s20160_s3 + $0x998] sm:$0xff] }
 0x5be   : > { %13117 = vmatmul.mubr.msk.f32.gmra.mrb[236].mxu0 %vm1206_vm4, %v3619_v3  ;;  %v10903_v3 = vld [vmem:[%s20160_s3 + $0x970] sm:$0xff] }
 0x5bf   : > { %v3623_v47 = vpop.f32.mrb[198].mxu1  ;;  %13119 = vmatprep.mubr.msk.f32.mxu0 %vm15594_vm5, %v20206_v12 }
 0x5c0   : > { %v3624_v7 = vadd.f32 %v17460_v62, %v3623_v47  ;;  %v3625_v41 = vpop.f32.mrb[199].mxu1  ;;  %v10867_v62 = vld [vmem:[%s20160_s3 + $0x850] sm:$0xff] }
 0x5c1   : > { %v10907_v47 = vld [vmem:[%s20160_s3 + $0x990] sm:$0xff] }
 0x5c2   : > { %13120 = vmatmul.mubr.msk.f32.gmra.mrb[238].mxu0 %vm1206_vm4, %v3624_v7  ;;  %v10912_v7 = vld [vmem:[%s20160_s3 + $0x9b8] sm:$0xf]  ;;  %v10926_v41 = vld [vmem:[%s20161_s4 + $0x50] sm:$0xff] }
 0x5c3   : > { %10913 = vmatprep.mubr.msk.f32.mxu0 %vm1206_vm4, %v10864_v35  ;;  %v10911_v35 = vld [vmem:[%s20160_s3 + $0x9b0] sm:$0xf] }
 0x5c6   : > { %4099 = vmatmul.mubr.f32.vlgmr.msra.gmra.mrb[240].mxu0 %v10863_v44  ;;  %v10927_v44 = vld [vmem:[%s20161_s4 + $0x58] sm:$0xff] }
 0x5c7   : > { %14568 = vmatpush3.bf16.msra.mxu0 %v15874_v2  ;;  %10914 = vmatprep.mubr.msk.f32.mxu0 %vm1206_vm4, %v10868_v58  ;;  %v14563_v58 = vpack.c.bf16 %v10927_v44, %v10926_v41 }
 0x5c8   : > { %14570 = vmatprep.subr.bf16.mxu0 %v15914_v5 }
 0x5c9   : > { %14564 = vmatpush3.bf16.msra.mxu1 %v14563_v58 }
 0x5ca   : > { %4104 = vmatmul.mubr.f32.gmra.mrb[242].mxu0 %v10867_v62  ;;  %14597 = vmatprep.subr.bf16.mxu1 %v20207_v19 }
 0x5cb   : > { %14572 = vmatpush3.bf16.msra.mxu0 %v15878_v10  ;;  %10915 = vmatprep.mubr.msk.f32.mxu0 %vm1206_vm4, %v10872_v20 }
 0x5cc   : > { %14574 = vmatprep.subr.bf16.mxu0 %v15922_v13 }
 0x5ce   : > { %4109 = vmatmul.mubr.f32.gmra.mrb[244].mxu0 %v10871_v32 }
 0x5cf   : > { %14576 = vmatpush3.bf16.msra.mxu0 %v15882_v17  ;;  %10916 = vmatprep.mubr.msk.f32.mxu0 %vm1206_vm4, %v10876_v8 }
 0x5d0   : > { %14578 = vmatprep.subr.bf16.mxu0 %v15930_v21 }
 0x5d2   : > { %4114 = vmatmul.mubr.f32.gmra.mrb[246].mxu0 %v10875_v15 }
 0x5d3   : > { %14580 = vmatpush3.bf16.msra.mxu0 %v15886_v24  ;;  %10917 = vmatprep.mubr.msk.f32.mxu0 %vm1206_vm4, %v10880_v0 }
 0x5d4   : > { %14582 = vmatprep.subr.bf16.mxu0 %v15938_v29 }
 0x5d6   : > { %4119 = vmatmul.mubr.f32.gmra.mrb[248].mxu0 %v10879_v49 }
 0x5d7   : > { %14584 = vmatpush3.bf16.msra.mxu0 %v15890_v31  ;;  %10918 = vmatprep.mubr.msk.f32.mxu0 %vm1206_vm4, %v10884_v9 }
 0x5d8   : > { %14586 = vmatprep.subr.bf16.mxu0 %v15946_v37 }
 0x5da   : > { %4124 = vmatmul.mubr.f32.gmra.mrb[250].mxu0 %v10883_v59 }
 0x5db   : > { %14588 = vmatpush3.bf16.msra.mxu0 %v15894_v38  ;;  %10919 = vmatprep.mubr.msk.f32.mxu0 %vm1206_vm4, %v10888_v18 }
 0x5dc   : > { %14590 = vmatprep.subr.bf16.mxu0 %v15954_v46 }
 0x5de   : > { %4129 = vmatmul.mubr.f32.gmra.mrb[252].mxu0 %v10887_v39 }
 0x5df   : > { %14592 = vmatpush3.bf16.msra.mxu0 %v15898_v45  ;;  %10920 = vmatprep.mubr.msk.f32.mxu0 %vm1206_vm4, %v10892_v26 }
 0x5e0   : > { %14594 = vmatprep.subr.bf16.mxu0 %v15962_v54 }
 0x5e2   : > { %4134 = vmatmul.mubr.f32.gmra.mrb[254].mxu0 %v10891_v50  ;;  %v12048_v62 = vpop.f32.mrb[200].mxu1 }
 0x5e3   : > { %14596 = vmatpush3.bf16.msra.mxu0 %v15902_v52  ;;  %10921 = vmatprep.mubr.msk.f32.mxu0 %vm1206_vm4, %v10896_v63  ;;  %v12049_v20 = vpop.f32.mrb[201].mxu1 }
 0x5e4   : > { %14624 = vmatprep.subr.bf16.mxu0 %v20207_v19  ;;  %v17763_v32 = vadd.f32 %v12049_v20, %v12048_v62 }
 0x5e6   : > { %4139 = vmatmul.mubr.f32.gmra.mrb[0].mxu0 %v10895_v53 }
 0x5e7   : > { %10922 = vmatprep.mubr.msk.f32.mxu0 %vm1206_vm4, %v10900_v55 }
 0x5ea   : > { %4144 = vmatmul.mubr.f32.gmra.mrb[2].mxu0 %v10899_v34 }
 0x5eb   : > { %10923 = vmatprep.mubr.msk.f32.mxu0 %vm1206_vm4, %v10904_v14 }
 0x5ee   : > { %4149 = vmatmul.mubr.f32.gmra.mrb[4].mxu0 %v10903_v3 }
 0x5ef   : > { %10924 = vmatprep.mubr.msk.f32.mxu0 %vm1206_vm4, %v10908_v48 }
 0x5f2   : > { %4154 = vmatmul.mubr.f32.gmra.mrb[6].mxu0 %v10907_v47 }
 0x5f3   : > { %10925 = vmatprep.mubr.msk.f32.mxu0 %vm1206_vm4, %v10912_v7 }
 0x5f6   : > { %4159 = vmatmul.mubr.f32.gmra.mrb[8].mxu0 %v10911_v35 }
 0x5fc   : > { %v12051_v8 = vpop.f32.mrb[202].mxu1 }
 0x5fd   : > { %v12052_v15 = vpop.f32.mrb[203].mxu1 }
 0x5fe   : > { %v17765_v0 = vadd.f32 %v12052_v15, %v12051_v8 }
 0x600   : > { %v12054_v49 = vpop.f32.mrb[204].mxu1 }
 0x601   : > { %v12055_v9 = vpop.f32.mrb[205].mxu1 }
 0x602   : > { %v17767_v59 = vadd.f32 %v12055_v9, %v12054_v49 }
 0x604   : > { %v12057_v18 = vpop.f32.mrb[206].mxu1 }
 0x605   : > { %v12058_v39 = vpop.f32.mrb[207].mxu1 }
 0x606   : > { %v17769_v26 = vadd.f32 %v12058_v39, %v12057_v18 }
 0x608   : > { %v12060_v50 = vpop.f32.mrb[208].mxu1 }
 0x609   : > { %v12061_v63 = vpop.f32.mrb[209].mxu1 }
 0x60a   : > { %v17771_v53 = vadd.f32 %v12061_v63, %v12060_v50 }
 0x60c   : > { %v12063_v55 = vpop.f32.mrb[210].mxu1 }
 0x60d   : > { %v12064_v34 = vpop.f32.mrb[211].mxu1 }
 0x60e   : > { %v17773_v14 = vadd.f32 %v12064_v34, %v12063_v55 }
 0x610   : > { %v12066_v3 = vpop.f32.mrb[212].mxu1 }
 0x611   : > { %v12067_v48 = vpop.f32.mrb[213].mxu1 }
 0x612   : > { %v17775_v47 = vadd.f32 %v12067_v48, %v12066_v3  ;;  %v10942_v48 = vld [vmem:[%s20160_s3 + $0x9c8] sm:$0xff] }
 0x613   : > { %4505 = vmatprep.mubr.f32.mxu0 %v10942_v48  ;;  %v10965_v48 = vld [vmem:[%s20160_s3 + $0xa80] sm:$0xff] }
 0x614   : > { %v12069_v7 = vpop.f32.mrb[214].mxu1 }
 0x615   : > { %v12070_v35 = vpop.f32.mrb[215].mxu1 }
 0x616   : > { %v17777_v41 = vadd.f32 %v12070_v35, %v12069_v7  ;;  %v10941_v7 = vld [vmem:[%s20160_s3 + $0x9c0] sm:$0xff]  ;;  %v10946_v35 = vld [vmem:[%s20160_s3 + $0x9e8] sm:$0xff] }
 0x617   : > { %4506 = vmatmul.mubr.f32.vlgmr.msra.gmra.mrb[10].mxu0 %v10941_v7 }
 0x618   : > { %4510 = vmatprep.mubr.f32.mxu0 %v10946_v35 }
 0x631   : > { %v12072_v44 = vpop.f32.mrb[216].mxu1 }
 0x632   : > { %v12073_v58 = vpop.f32.mrb[217].mxu1 }
 0x633   : > { %v17779_v62 = vadd.f32 %v12073_v58, %v12072_v44  ;;  %v10945_v44 = vld [vmem:[%s20160_s3 + $0x9e0] sm:$0xff]  ;;  %v10950_v58 = vld [vmem:[%s20160_s3 + $0xa08] sm:$0xff] }
 0x634   : > { %4511 = vmatmul.mubr.f32.gmra.mrb[12].mxu0 %v10945_v44 }
 0x635   : > { %v12075_v20 = vpop.f32.mrb[218].mxu1  ;;  %4515 = vmatprep.mubr.f32.mxu0 %v10950_v58  ;;  %v10970_v58 = vld [vmem:[%s20160_s3 + $0xaa8] sm:$0xff] }
 0x636   : > { %v12076_v8 = vpop.f32.mrb[219].mxu1 }
 0x637   : > { %v17781_v15 = vadd.f32 %v12076_v8, %v12075_v20  ;;  %v10949_v20 = vld [vmem:[%s20160_s3 + $0xa00] sm:$0xff]  ;;  %v10954_v8 = vld [vmem:[%s20160_s3 + $0xa28] sm:$0xff] }
 0x638   : > { %4516 = vmatmul.mubr.f32.gmra.mrb[14].mxu0 %v10949_v20  ;;  %v10969_v20 = vld [vmem:[%s20160_s3 + $0xaa0] sm:$0xff] }
 0x639   : > { %v12078_v49 = vpop.f32.mrb[220].mxu1  ;;  %4520 = vmatprep.mubr.f32.mxu0 %v10954_v8 }
 0x63a   : > { %v12079_v9 = vpop.f32.mrb[221].mxu1 }
 0x63b   : > { %v17783_v18 = vadd.f32 %v12079_v9, %v12078_v49  ;;  %v10953_v49 = vld [vmem:[%s20160_s3 + $0xa20] sm:$0xff]  ;;  %v10958_v9 = vld [vmem:[%s20160_s3 + $0xa48] sm:$0xff] }
 0x63c   : > { %4521 = vmatmul.mubr.f32.gmra.mrb[16].mxu0 %v10953_v49 }
 0x63d   : > { %v12081_v39 = vpop.f32.mrb[222].mxu1  ;;  %4525 = vmatprep.mubr.f32.mxu0 %v10958_v9 }
 0x63e   : > { %v12082_v50 = vpop.f32.mrb[223].mxu1 }
 0x63f   : > { %v17785_v63 = vadd.f32 %v12082_v50, %v12081_v39  ;;  %v10957_v39 = vld [vmem:[%s20160_s3 + $0xa40] sm:$0xff]  ;;  %v10962_v50 = vld [vmem:[%s20160_s3 + $0xa68] sm:$0xff] }
 0x640   : > { %4526 = vmatmul.mubr.f32.gmra.mrb[18].mxu0 %v10957_v39  ;;  %v10973_v39 = vld [vmem:[%s20160_s3 + $0xac0] sm:$0xff] }
 0x641   : > { %v12084_v55 = vpop.f32.mrb[224].mxu1  ;;  %4530 = vmatprep.mubr.f32.mxu0 %v10962_v50 }
 0x642   : > { %v12085_v34 = vpop.f32.mrb[225].mxu1 }
 0x643   : > { %v17787_v3 = vadd.f32 %v12085_v34, %v12084_v55  ;;  %v10961_v55 = vld [vmem:[%s20160_s3 + $0xa60] sm:$0xff]  ;;  %v10966_v34 = vld [vmem:[%s20160_s3 + $0xa88] sm:$0xff] }
 0x644   : > { %4531 = vmatmul.mubr.f32.gmra.mrb[20].mxu0 %v10961_v55  ;;  %v10978_v55 = vld [vmem:[%s20160_s3 + $0xae8] sm:$0xff] }
 0x645   : > { %4535 = vmatprep.mubr.f32.mxu0 %v10966_v34 }
 0x648   : > { %4536 = vmatmul.mubr.f32.gmra.mrb[22].mxu0 %v10965_v48  ;;  %v10977_v48 = vld [vmem:[%s20160_s3 + $0xae0] sm:$0xff] }
 0x649   : > { %4540 = vmatprep.mubr.f32.mxu0 %v10970_v58 }
 0x64c   : > { %4541 = vmatmul.mubr.f32.gmra.mrb[24].mxu0 %v10969_v20 }
 0x665   : > { %v3735_v7 = vpop.f32.mrb[214].mxu0 }
 0x666   : > { %v17832_v35 = vadd.f32 %v3735_v7, %v17505_v11  ;;  %v13085_v44 = vpop.f32.mrb[215].mxu0  ;;  %v10974_v11 = vld [vmem:[%s20160_s3 + $0xac8] sm:$0xff] }
 0x667   : > { %4545 = vmatprep.mubr.f32.mxu0 %v10974_v11  ;;  %v10982_v44 = vld [vmem:[%s20160_s3 + $0xb08] sm:$0xff] }
 0x668   : > { %4546 = vmatmul.mubr.f32.gmra.mrb[26].mxu0 %v10973_v39 }
 0x669   : > { %v3740_v8 = vpop.f32.mrb[216].mxu0  ;;  %4550 = vmatprep.mubr.f32.mxu0 %v10978_v55  ;;  %v10990_v55 = vld [vmem:[%s20160_s3 + $0xb48] sm:$0xf] }
 0x66a   : > { %v17841_v49 = vadd.f32 %v3740_v8, %v17514_v42  ;;  %v13088_v9 = vpop.f32.mrb[217].mxu0 }
 0x66b   : > { %v10986_v9 = vld [vmem:[%s20160_s3 + $0xb28] sm:$0xff] }
 0x66c   : > { %4551 = vmatmul.mubr.f32.gmra.mrb[28].mxu0 %v10977_v48 }
 0x66d   : > { %v3745_v50 = vpop.f32.mrb[218].mxu0  ;;  %4555 = vmatprep.mubr.f32.mxu0 %v10982_v44 }
 0x66e   : > { %v17853_v34 = vadd.f32 %v3745_v50, %v17526_v30  ;;  %v13091_v42 = vpop.f32.mrb[219].mxu0  ;;  %v10981_v30 = vld [vmem:[%s20160_s3 + $0xb00] sm:$0xff] }
 0x66f   : > { %v20217_v42 = vld [vmem:[#allocation11_spill] sm:$0xff] }
 0x670   : > { %4556 = vmatmul.mubr.f32.gmra.mrb[30].mxu0 %v10981_v30 }
 0x671   : > { %v3750_v7 = vpop.f32.mrb[220].mxu0  ;;  %4560 = vmatprep.mubr.f32.mxu0 %v10986_v9 }
 0x672   : > { %v17862_v58 = vadd.f32 %v3750_v7, %v17535_v33  ;;  %v13094_v20 = vpop.f32.mrb[221].mxu0  ;;  %v10985_v33 = vld [vmem:[%s20160_s3 + $0xb20] sm:$0xff] }
 0x673   : > { %v20219_v20 = vld [vmem:[#allocation12_spill] sm:$0xff] }
 0x674   : > { %4561 = vmatmul.mubr.f32.gmra.mrb[32].mxu0 %v10985_v33 }
 0x675   : > { %v3755_v8 = vpop.f32.mrb[222].mxu0  ;;  %4565 = vmatprep.mubr.f32.mxu0 %v10990_v55 }
 0x676   : > { %v17871_v11 = vadd.f32 %v3755_v8, %v17544_v61  ;;  %v13097_v39 = vpop.f32.mrb[223].mxu0  ;;  %v10989_v61 = vld [vmem:[%s20160_s3 + $0xb40] sm:$0xf] }
 0x678   : > { %4566 = vmatmul.mubr.f32.gmra.mrb[34].mxu0 %v10989_v61 }
 0x679   : > { %v3760_v50 = vpop.f32.mrb[224].mxu0  ;;  %13169 = vmatprep.mubr.msk.f32.mxu0 %vm15594_vm5, %v20206_v12 }
 0x67a   : > { %v17880_v48 = vadd.f32 %v3760_v50, %v20217_v42  ;;  %v13100_v7 = vpop.f32.mrb[225].mxu0 }
 0x67c   : > { %20218 = vst [vmem:[#allocation13_spill] sm:$0xff] %v17880_v48 }
 0x67d   : > { %v3765_v44 = vpop.f32.mrb[226].mxu0 }
 0x67e   : > { %v17886_v30 = vadd.f32 %v3765_v44, %v20219_v20  ;;  %v13103_v8 = vpop.f32.mrb[227].mxu0 }
 0x680   : > { %20220 = vst [vmem:[#allocation11_spill] sm:$0xff] %v17886_v30 }
 0x681   : > { %v3770_v9 = vpop.f32.mrb[228].mxu0 }
 0x682   : > { %v17891_v39 = vadd.f32 %v3770_v9, %v17564_v27  ;;  %v13106_v33 = vpop.f32.mrb[229].mxu0 }
 0x685   : > { %v3775_v50 = vpop.f32.mrb[230].mxu0 }
 0x686   : > { %v17894_v55 = vadd.f32 %v3775_v50, %v17567_v28  ;;  %v13109_v42 = vpop.f32.mrb[231].mxu0 }
 0x689   : > { %v3780_v7 = vpop.f32.mrb[232].mxu0 }
 0x68a   : > { %v17897_v61 = vadd.f32 %v3780_v7, %v17570_v43  ;;  %v13112_v44 = vpop.f32.mrb[233].mxu0 }
 0x68d   : > { %v3785_v20 = vpop.f32.mrb[234].mxu0 }
 0x68e   : > { %v17900_v8 = vadd.f32 %v3785_v20, %v17573_v25  ;;  %v13115_v30 = vpop.f32.mrb[235].mxu0 }
 0x691   : > { %v3790_v48 = vpop.f32.mrb[236].mxu0 }
 0x692   : > { %v17903_v27 = vadd.f32 %v3790_v48, %v17576_v56  ;;  %v13118_v9 = vpop.f32.mrb[237].mxu0 }
 0x695   : > { %v3795_v33 = vpop.f32.mrb[238].mxu0 }
 0x696   : > { %v17906_v28 = vadd.f32 %v3795_v33, %v17579_v16  ;;  %v13121_v50 = vpop.f32.mrb[239].mxu0 }
 0x699   : > { %v4100_v42 = vpop.f32.mrb[240].mxu0 }
 0x69a   : > { %v4101_v43 = vadd.f32 %v17763_v32, %v4100_v42  ;;  %v4102_v7 = vpop.f32.mrb[241].mxu0 }
 0x69c   : > { %13127 = vmatmul.mubr.msk.f32.vlgmr.msra.gmra.mrb[226].mxu1 %vm1206_vm4, %v4101_v43 }
 0x69d   : > { %14599 = vmatpush1.bf16.msra.mxu1 %v15982_v6  ;;  %v4105_v25 = vpop.f32.mrb[242].mxu0  ;;  %13129 = vmatprep.mubr.msk.f32.mxu1 %vm15594_vm5, %v20206_v12 }
 0x69e   : > { %v4106_v56 = vadd.f32 %v17765_v0, %v4105_v25  ;;  %14600 = vmatprep.subr.bf16.mxu1 %v20207_v19  ;;  %v4107_v48 = vpop.f32.mrb[243].mxu0 }
 0x6a0   : > { %13130 = vmatmul.mubr.msk.f32.gmra.mrb[228].mxu1 %vm1206_vm4, %v4106_v56 }
 0x6a1   : > { %14602 = vmatpush1.bf16.msra.mxu1 %v16000_v22  ;;  %v4110_v16 = vpop.f32.mrb[244].mxu0  ;;  %13132 = vmatprep.mubr.msk.f32.mxu1 %vm15594_vm5, %v20206_v12 }
 0x6a2   : > { %v4111_v32 = vadd.f32 %v17767_v59, %v4110_v16  ;;  %14603 = vmatprep.subr.bf16.mxu1 %v20207_v19  ;;  %v4112_v30 = vpop.f32.mrb[245].mxu0 }
 0x6a4   : > { %13133 = vmatmul.mubr.msk.f32.gmra.mrb[230].mxu1 %vm1206_vm4, %v4111_v32 }
 0x6a5   : > { %14605 = vmatpush1.bf16.msra.mxu1 %v16020_v36  ;;  %v4115_v0 = vpop.f32.mrb[246].mxu0  ;;  %13135 = vmatprep.mubr.msk.f32.mxu1 %vm15594_vm5, %v20206_v12 }
 0x6a6   : > { %v4116_v44 = vadd.f32 %v17769_v26, %v4115_v0  ;;  %14606 = vmatprep.subr.bf16.mxu1 %v20207_v19  ;;  %v4117_v20 = vpop.f32.mrb[247].mxu0 }
 0x6a8   : > { %13136 = vmatmul.mubr.msk.f32.gmra.mrb[232].mxu1 %vm1206_vm4, %v4116_v44 }
 0x6a9   : > { %14608 = vmatpush1.bf16.msra.mxu1 %v16040_v51  ;;  %v4120_v59 = vpop.f32.mrb[248].mxu0  ;;  %13138 = vmatprep.mubr.msk.f32.mxu1 %vm15594_vm5, %v20206_v12 }
 0x6aa   : > { %v4121_v9 = vadd.f32 %v17771_v53, %v4120_v59  ;;  %14609 = vmatprep.subr.bf16.mxu1 %v20207_v19  ;;  %v4122_v33 = vpop.f32.mrb[249].mxu0 }
 0x6ac   : > { %13139 = vmatmul.mubr.msk.f32.gmra.mrb[234].mxu1 %vm1206_vm4, %v4121_v9 }
 0x6ad   : > { %14611 = vmatpush1.bf16.msra.mxu1 %v16060_v4  ;;  %v4125_v26 = vpop.f32.mrb[250].mxu0  ;;  %13141 = vmatprep.mubr.msk.f32.mxu1 %vm15594_vm5, %v20206_v12 }
 0x6ae   : > { %v4126_v50 = vadd.f32 %v17773_v14, %v4125_v26  ;;  %14612 = vmatprep.subr.bf16.mxu1 %v20207_v19  ;;  %v4127_v42 = vpop.f32.mrb[251].mxu0 }
 0x6af   : > { %v10952_v42 = vld [vmem:[%s20160_s3 + $0xa18] sm:$0xff] }
 0x6b0   : > { %13142 = vmatmul.mubr.msk.f32.gmra.mrb[236].mxu1 %vm1206_vm4, %v4126_v50  ;;  %v10948_v50 = vld [vmem:[%s20160_s3 + $0x9f8] sm:$0xff] }
 0x6b1   : > { %14614 = vmatpush1.bf16.msra.mxu1 %v16080_v23  ;;  %v4130_v53 = vpop.f32.mrb[252].mxu0  ;;  %13144 = vmatprep.mubr.msk.f32.mxu1 %vm15594_vm5, %v20206_v12 }
 0x6b2   : > { %v4131_v43 = vadd.f32 %v17775_v47, %v4130_v53  ;;  %14615 = vmatprep.subr.bf16.mxu1 %v20207_v19  ;;  %v4132_v7 = vpop.f32.mrb[253].mxu0  ;;  %v10951_v53 = vld [vmem:[%s20160_s3 + $0xa10] sm:$0xff] }
 0x6b3   : > { %v10955_v7 = vld [vmem:[%s20160_s3 + $0xa30] sm:$0xff] }
 0x6b4   : > { %13145 = vmatmul.mubr.msk.f32.gmra.mrb[238].mxu1 %vm1206_vm4, %v4131_v43  ;;  %v10956_v43 = vld [vmem:[%s20160_s3 + $0xa38] sm:$0xff] }
 0x6b5   : > { %14617 = vmatpush1.bf16.msra.mxu1 %v16100_v40  ;;  %v4135_v14 = vpop.f32.mrb[254].mxu0  ;;  %13147 = vmatprep.mubr.msk.f32.mxu1 %vm15594_vm5, %v20206_v12 }
 0x6b6   : > { %v4136_v25 = vadd.f32 %v17777_v41, %v4135_v14  ;;  %14618 = vmatprep.subr.bf16.mxu1 %v20207_v19  ;;  %v4137_v56 = vpop.f32.mrb[255].mxu0  ;;  %v10960_v14 = vld [vmem:[%s20160_s3 + $0xa58] sm:$0xff] }
 0x6b7   : > { %v10964_v56 = vld [vmem:[%s20160_s3 + $0xa78] sm:$0xff] }
 0x6b8   : > { %13148 = vmatmul.mubr.msk.f32.gmra.mrb[240].mxu1 %vm1206_vm4, %v4136_v25  ;;  %v10959_v25 = vld [vmem:[%s20160_s3 + $0xa50] sm:$0xff] }
 0x6b9   : > { %14620 = vmatpush1.bf16.msra.mxu1 %v16120_v57  ;;  %v4140_v47 = vpop.f32.mrb[0].mxu0  ;;  %13150 = vmatprep.mubr.msk.f32.mxu1 %vm15594_vm5, %v20206_v12 }
 0x6ba   : > { %v4141_v48 = vadd.f32 %v17779_v62, %v4140_v47  ;;  %14621 = vmatprep.subr.bf16.mxu1 %v20207_v19  ;;  %v4142_v16 = vpop.f32.mrb[1].mxu0  ;;  %v10963_v47 = vld [vmem:[%s20160_s3 + $0xa70] sm:$0xff] }
 0x6bb   : > { %v10967_v16 = vld [vmem:[%s20160_s3 + $0xa90] sm:$0xff] }
 0x6bc   : > { %13151 = vmatmul.mubr.msk.f32.gmra.mrb[242].mxu1 %vm1206_vm4, %v4141_v48  ;;  %v10968_v48 = vld [vmem:[%s20160_s3 + $0xa98] sm:$0xff] }
 0x6bd   : > { %14623 = vmatpush1.bf16.msra.mxu1 %v16139_v1  ;;  %v4145_v41 = vpop.f32.mrb[2].mxu0  ;;  %13153 = vmatprep.mubr.msk.f32.mxu1 %vm15594_vm5, %v20206_v12 }
 0x6be   : > { %v4146_v32 = vadd.f32 %v17781_v15, %v4145_v41  ;;  %14628 = vmatprep.subr.bf16.mxu1 %v15906_v60  ;;  %v4147_v30 = vpop.f32.mrb[3].mxu0  ;;  %v10972_v41 = vld [vmem:[%s20160_s3 + $0xab8] sm:$0xff] }
 0x6bf   : > { %v10976_v30 = vld [vmem:[%s20160_s3 + $0xad8] sm:$0xff] }
 0x6c0   : > { %13154 = vmatmul.mubr.msk.f32.gmra.mrb[244].mxu1 %vm1206_vm4, %v4146_v32  ;;  %v10971_v32 = vld [vmem:[%s20160_s3 + $0xab0] sm:$0xff] }
 0x6c1   : > { %v4150_v0 = vpop.f32.mrb[4].mxu0  ;;  %13156 = vmatprep.mubr.msk.f32.mxu1 %vm15594_vm5, %v20206_v12 }
 0x6c2   : > { %v4151_v62 = vadd.f32 %v17783_v18, %v4150_v0  ;;  %v4152_v44 = vpop.f32.mrb[5].mxu0  ;;  %v10944_v18 = vld [vmem:[%s20160_s3 + $0x9d8] sm:$0xff]  ;;  %v10975_v0 = vld [vmem:[%s20160_s3 + $0xad0] sm:$0xff] }
 0x6c3   : > { %v10979_v44 = vld [vmem:[%s20160_s3 + $0xaf0] sm:$0xff] }
 0x6c4   : > { %13157 = vmatmul.mubr.msk.f32.gmra.mrb[246].mxu1 %vm1206_vm4, %v4151_v62  ;;  %v10980_v62 = vld [vmem:[%s20160_s3 + $0xaf8] sm:$0xff] }
 0x6c5   : > { %v4155_v20 = vpop.f32.mrb[6].mxu0  ;;  %13159 = vmatprep.mubr.msk.f32.mxu1 %vm15594_vm5, %v20206_v12 }
 0x6c6   : > { %v4156_v15 = vadd.f32 %v17785_v63, %v4155_v20  ;;  %v4157_v59 = vpop.f32.mrb[7].mxu0  ;;  %v10943_v63 = vld [vmem:[%s20160_s3 + $0x9d0] sm:$0xff]  ;;  %v10984_v20 = vld [vmem:[%s20160_s3 + $0xb18] sm:$0xff] }
 0x6c7   : > { %v10988_v59 = vld [vmem:[%s20160_s3 + $0xb38] sm:$0xff] }
 0x6c8   : > { %13160 = vmatmul.mubr.msk.f32.gmra.mrb[248].mxu1 %vm1206_vm4, %v4156_v15  ;;  %v10983_v15 = vld [vmem:[%s20160_s3 + $0xb10] sm:$0xff] }
 0x6c9   : > { %v4160_v9 = vpop.f32.mrb[8].mxu0  ;;  %13162 = vmatprep.mubr.msk.f32.mxu1 %vm15594_vm5, %v20206_v12 }
 0x6ca   : > { %v4161_v33 = vadd.f32 %v17787_v3, %v4160_v9  ;;  %v4162_v26 = vpop.f32.mrb[9].mxu0  ;;  %v10947_v3 = vld [vmem:[%s20160_s3 + $0x9f0] sm:$0xff] }
 0x6cb   : > { %v10987_v9 = vld [vmem:[%s20160_s3 + $0xb30] sm:$0xff]  ;;  %v11006_v26 = vld [vmem:[%s20161_s4 + $0x60] sm:$0xff] }
 0x6cc   : > { %13163 = vmatmul.mubr.msk.f32.gmra.mrb[250].mxu1 %vm1206_vm4, %v4161_v33  ;;  %v10992_v33 = vld [vmem:[%s20160_s3 + $0xb58] sm:$0xf] }
 0x6cd   : > { %10993 = vmatprep.mubr.msk.f32.mxu1 %vm1206_vm4, %v10944_v18  ;;  %v10991_v18 = vld [vmem:[%s20160_s3 + $0xb50] sm:$0xf] }
 0x6d0   : > { %4636 = vmatmul.mubr.f32.vlgmr.msra.gmra.mrb[252].mxu1 %v10943_v63  ;;  %v11007_v63 = vld [vmem:[%s20161_s4 + $0x68] sm:$0xff] }
 0x6d1   : > { %14630 = vmatpush3.bf16.msra.mxu1 %v15874_v2  ;;  %10994 = vmatprep.mubr.msk.f32.mxu1 %vm1206_vm4, %v10948_v50  ;;  %v14625_v50 = vpack.c.bf16 %v11007_v63, %v11006_v26 }
 0x6d2   : > { %14632 = vmatprep.subr.bf16.mxu1 %v15914_v5 }
 0x6d3   : > { %14626 = vmatpush3.bf16.msra.mxu0 %v14625_v50 }
 0x6d4   : > { %4641 = vmatmul.mubr.f32.gmra.mrb[254].mxu1 %v10947_v3  ;;  %14659 = vmatprep.subr.bf16.mxu0 %v20207_v19 }
 0x6d5   : > { %14634 = vmatpush3.bf16.msra.mxu1 %v15878_v10  ;;  %10995 = vmatprep.mubr.msk.f32.mxu1 %vm1206_vm4, %v10952_v42 }
 0x6d6   : > { %14636 = vmatprep.subr.bf16.mxu1 %v15922_v13 }
 0x6d8   : > { %4646 = vmatmul.mubr.f32.gmra.mrb[0].mxu1 %v10951_v53 }
 0x6d9   : > { %14638 = vmatpush3.bf16.msra.mxu1 %v15882_v17  ;;  %10996 = vmatprep.mubr.msk.f32.mxu1 %vm1206_vm4, %v10956_v43 }
 0x6da   : > { %14640 = vmatprep.subr.bf16.mxu1 %v15930_v21 }
 0x6dc   : > { %4651 = vmatmul.mubr.f32.gmra.mrb[2].mxu1 %v10955_v7 }
 0x6dd   : > { %14642 = vmatpush3.bf16.msra.mxu1 %v15886_v24  ;;  %10997 = vmatprep.mubr.msk.f32.mxu1 %vm1206_vm4, %v10960_v14 }
 0x6de   : > { %14644 = vmatprep.subr.bf16.mxu1 %v15938_v29 }
 0x6e0   : > { %4656 = vmatmul.mubr.f32.gmra.mrb[4].mxu1 %v10959_v25 }
 0x6e1   : > { %14646 = vmatpush3.bf16.msra.mxu1 %v15890_v31  ;;  %10998 = vmatprep.mubr.msk.f32.mxu1 %vm1206_vm4, %v10964_v56 }
 0x6e2   : > { %14648 = vmatprep.subr.bf16.mxu1 %v15946_v37 }
 0x6e4   : > { %4661 = vmatmul.mubr.f32.gmra.mrb[6].mxu1 %v10963_v47 }
 0x6e5   : > { %14650 = vmatpush3.bf16.msra.mxu1 %v15894_v38  ;;  %10999 = vmatprep.mubr.msk.f32.mxu1 %vm1206_vm4, %v10968_v48 }
 0x6e6   : > { %14652 = vmatprep.subr.bf16.mxu1 %v15954_v46 }
 0x6e8   : > { %4666 = vmatmul.mubr.f32.gmra.mrb[8].mxu1 %v10967_v16 }
 0x6e9   : > { %14654 = vmatpush3.bf16.msra.mxu1 %v15898_v45  ;;  %11000 = vmatprep.mubr.msk.f32.mxu1 %vm1206_vm4, %v10972_v41 }
 0x6ea   : > { %14656 = vmatprep.subr.bf16.mxu1 %v15962_v54  ;;  %v12134_v3 = vpop.f32.mrb[10].mxu0 }
 0x6eb   : > { %v12135_v42 = vpop.f32.mrb[11].mxu0 }
 0x6ec   : > { %4671 = vmatmul.mubr.f32.gmra.mrb[10].mxu1 %v10971_v32  ;;  %v18090_v53 = vadd.f32 %v12135_v42, %v12134_v3 }
 0x6ed   : > { %14658 = vmatpush3.bf16.msra.mxu1 %v15902_v52  ;;  %11001 = vmatprep.mubr.msk.f32.mxu1 %vm1206_vm4, %v10976_v30 }
 0x6ee   : > { %14686 = vmatprep.subr.bf16.mxu1 %v20207_v19 }
 0x6f0   : > { %4676 = vmatmul.mubr.f32.gmra.mrb[12].mxu1 %v10975_v0 }
 0x6f1   : > { %11002 = vmatprep.mubr.msk.f32.mxu1 %vm1206_vm4, %v10980_v62 }
 0x6f4   : > { %4681 = vmatmul.mubr.f32.gmra.mrb[14].mxu1 %v10979_v44 }
 0x6f5   : > { %11003 = vmatprep.mubr.msk.f32.mxu1 %vm1206_vm4, %v10984_v20 }
 0x6f8   : > { %4686 = vmatmul.mubr.f32.gmra.mrb[16].mxu1 %v10983_v15 }
 0x6f9   : > { %11004 = vmatprep.mubr.msk.f32.mxu1 %vm1206_vm4, %v10988_v59 }
 0x6fc   : > { %4691 = vmatmul.mubr.f32.gmra.mrb[18].mxu1 %v10987_v9 }
 0x6fd   : > { %11005 = vmatprep.mubr.msk.f32.mxu1 %vm1206_vm4, %v10992_v33 }
 0x700   : > { %4696 = vmatmul.mubr.f32.gmra.mrb[20].mxu1 %v10991_v18 }
 0x707   : > { %v12137_v43 = vpop.f32.mrb[12].mxu0 }
 0x708   : > { %v12138_v7 = vpop.f32.mrb[13].mxu0 }
 0x709   : > { %v18092_v14 = vadd.f32 %v12138_v7, %v12137_v43 }
 0x70b   : > { %v12140_v25 = vpop.f32.mrb[14].mxu0 }
 0x70c   : > { %v12141_v56 = vpop.f32.mrb[15].mxu0 }
 0x70d   : > { %v18094_v47 = vadd.f32 %v12141_v56, %v12140_v25 }
 0x70f   : > { %v12143_v48 = vpop.f32.mrb[16].mxu0 }
 0x710   : > { %v12144_v16 = vpop.f32.mrb[17].mxu0 }
 0x711   : > { %v18096_v41 = vadd.f32 %v12144_v16, %v12143_v48 }
 0x713   : > { %v12146_v32 = vpop.f32.mrb[18].mxu0 }
 0x714   : > { %v12147_v30 = vpop.f32.mrb[19].mxu0 }
 0x715   : > { %v18098_v0 = vadd.f32 %v12147_v30, %v12146_v32 }
 0x717   : > { %v12149_v62 = vpop.f32.mrb[20].mxu0 }
 0x718   : > { %v12150_v44 = vpop.f32.mrb[21].mxu0 }
 0x719   : > { %v18100_v20 = vadd.f32 %v12150_v44, %v12149_v62 }
 0x71b   : > { %v12152_v15 = vpop.f32.mrb[22].mxu0 }
 0x71c   : > { %v12153_v59 = vpop.f32.mrb[23].mxu0 }
 0x71d   : > { %v18102_v9 = vadd.f32 %v12153_v59, %v12152_v15  ;;  %v11022_v59 = vld [vmem:[%s20160_s3 + $0xb68] sm:$0xff] }
 0x71e   : > { %5042 = vmatprep.mubr.f32.mxu1 %v11022_v59  ;;  %v11045_v59 = vld [vmem:[%s20160_s3 + $0xc20] sm:$0xff] }
 0x71f   : > { %v12155_v33 = vpop.f32.mrb[24].mxu0 }
 0x720   : > { %v12156_v18 = vpop.f32.mrb[25].mxu0 }
 0x721   : > { %v18104_v26 = vadd.f32 %v12156_v18, %v12155_v33  ;;  %v11021_v33 = vld [vmem:[%s20160_s3 + $0xb60] sm:$0xff]  ;;  %v11026_v18 = vld [vmem:[%s20160_s3 + $0xb88] sm:$0xff] }
 0x722   : > { %5043 = vmatmul.mubr.f32.vlgmr.msra.gmra.mrb[22].mxu1 %v11021_v33 }
 0x723   : > { %5047 = vmatprep.mubr.f32.mxu1 %v11026_v18 }
 0x73b   : > { %v12158_v63 = vpop.f32.mrb[26].mxu0 }
 0x73c   : > { %v12159_v50 = vpop.f32.mrb[27].mxu0 }
 0x73d   : > { %v18106_v3 = vadd.f32 %v12159_v50, %v12158_v63  ;;  %v11025_v63 = vld [vmem:[%s20160_s3 + $0xb80] sm:$0xff]  ;;  %v11030_v50 = vld [vmem:[%s20160_s3 + $0xba8] sm:$0xff] }
 0x73e   : > { %5048 = vmatmul.mubr.f32.gmra.mrb[24].mxu1 %v11025_v63 }
 0x73f   : > { %v12161_v42 = vpop.f32.mrb[28].mxu0  ;;  %5052 = vmatprep.mubr.f32.mxu1 %v11030_v50  ;;  %v11050_v50 = vld [vmem:[%s20160_s3 + $0xc48] sm:$0xff] }
 0x740   : > { %v12162_v43 = vpop.f32.mrb[29].mxu0 }
 0x741   : > { %v18108_v7 = vadd.f32 %v12162_v43, %v12161_v42  ;;  %v11029_v42 = vld [vmem:[%s20160_s3 + $0xba0] sm:$0xff]  ;;  %v11034_v43 = vld [vmem:[%s20160_s3 + $0xbc8] sm:$0xff] }
 0x742   : > { %5053 = vmatmul.mubr.f32.gmra.mrb[26].mxu1 %v11029_v42  ;;  %v11049_v42 = vld [vmem:[%s20160_s3 + $0xc40] sm:$0xff] }
 0x743   : > { %v12164_v25 = vpop.f32.mrb[30].mxu0  ;;  %5057 = vmatprep.mubr.f32.mxu1 %v11034_v43 }
 0x744   : > { %v12165_v56 = vpop.f32.mrb[31].mxu0 }
 0x745   : > { %v18110_v48 = vadd.f32 %v12165_v56, %v12164_v25  ;;  %v11033_v25 = vld [vmem:[%s20160_s3 + $0xbc0] sm:$0xff]  ;;  %v11038_v56 = vld [vmem:[%s20160_s3 + $0xbe8] sm:$0xff] }
 0x746   : > { %5058 = vmatmul.mubr.f32.gmra.mrb[28].mxu1 %v11033_v25 }
 0x747   : > { %v12167_v16 = vpop.f32.mrb[32].mxu0  ;;  %5062 = vmatprep.mubr.f32.mxu1 %v11038_v56 }
 0x748   : > { %v12168_v32 = vpop.f32.mrb[33].mxu0 }
 0x749   : > { %v18112_v30 = vadd.f32 %v12168_v32, %v12167_v16  ;;  %v11037_v16 = vld [vmem:[%s20160_s3 + $0xbe0] sm:$0xff]  ;;  %v11042_v32 = vld [vmem:[%s20160_s3 + $0xc08] sm:$0xff] }
 0x74a   : > { %5063 = vmatmul.mubr.f32.gmra.mrb[30].mxu1 %v11037_v16  ;;  %v11053_v16 = vld [vmem:[%s20160_s3 + $0xc60] sm:$0xff] }
 0x74b   : > { %v12170_v62 = vpop.f32.mrb[34].mxu0  ;;  %5067 = vmatprep.mubr.f32.mxu1 %v11042_v32 }
 0x74c   : > { %v12171_v44 = vpop.f32.mrb[35].mxu0 }
 0x74d   : > { %v18114_v15 = vadd.f32 %v12171_v44, %v12170_v62  ;;  %v11041_v62 = vld [vmem:[%s20160_s3 + $0xc00] sm:$0xff]  ;;  %v11046_v44 = vld [vmem:[%s20160_s3 + $0xc28] sm:$0xff] }
 0x74e   : > { %5068 = vmatmul.mubr.f32.gmra.mrb[32].mxu1 %v11041_v62  ;;  %v11058_v62 = vld [vmem:[%s20160_s3 + $0xc88] sm:$0xff] }
 0x74f   : > { %5072 = vmatprep.mubr.f32.mxu1 %v11046_v44 }
 0x752   : > { %5073 = vmatmul.mubr.f32.gmra.mrb[34].mxu1 %v11045_v59  ;;  %v11057_v59 = vld [vmem:[%s20160_s3 + $0xc80] sm:$0xff] }
 0x753   : > { %5077 = vmatprep.mubr.f32.mxu1 %v11050_v50 }
 0x756   : > { %5078 = vmatmul.mubr.f32.gmra.mrb[36].mxu1 %v11049_v42 }
 0x76f   : > { %v4272_v33 = vpop.f32.mrb[226].mxu1 }
 0x770   : > { %v18159_v18 = vadd.f32 %v4272_v33, %v17832_v35  ;;  %v13128_v63 = vpop.f32.mrb[227].mxu1  ;;  %v11054_v35 = vld [vmem:[%s20160_s3 + $0xc68] sm:$0xff] }
 0x771   : > { %5082 = vmatprep.mubr.f32.mxu1 %v11054_v35  ;;  %v11062_v63 = vld [vmem:[%s20160_s3 + $0xca8] sm:$0xff] }
 0x772   : > { %5083 = vmatmul.mubr.f32.gmra.mrb[38].mxu1 %v11053_v16 }
 0x773   : > { %v4277_v43 = vpop.f32.mrb[228].mxu1  ;;  %5087 = vmatprep.mubr.f32.mxu1 %v11058_v62  ;;  %v11070_v62 = vld [vmem:[%s20160_s3 + $0xce8] sm:$0xf] }
 0x774   : > { %v18168_v25 = vadd.f32 %v4277_v43, %v17841_v49  ;;  %v13131_v56 = vpop.f32.mrb[229].mxu1 }
 0x775   : > { %v11066_v56 = vld [vmem:[%s20160_s3 + $0xcc8] sm:$0xff] }
 0x776   : > { %5088 = vmatmul.mubr.f32.gmra.mrb[40].mxu1 %v11057_v59 }
 0x777   : > { %v4282_v32 = vpop.f32.mrb[230].mxu1  ;;  %5092 = vmatprep.mubr.f32.mxu1 %v11062_v63 }
 0x778   : > { %v18180_v44 = vadd.f32 %v4282_v32, %v17853_v34  ;;  %v13134_v49 = vpop.f32.mrb[231].mxu1  ;;  %v11061_v34 = vld [vmem:[%s20160_s3 + $0xca0] sm:$0xff] }
 0x779   : > { %v20221_v49 = vld [vmem:[#allocation13_spill] sm:$0xff] }
 0x77a   : > { %5093 = vmatmul.mubr.f32.gmra.mrb[42].mxu1 %v11061_v34 }
 0x77b   : > { %v4287_v33 = vpop.f32.mrb[232].mxu1  ;;  %5097 = vmatprep.mubr.f32.mxu1 %v11066_v56 }
 0x77c   : > { %v18189_v50 = vadd.f32 %v4287_v33, %v17862_v58  ;;  %v13137_v42 = vpop.f32.mrb[233].mxu1  ;;  %v11065_v58 = vld [vmem:[%s20160_s3 + $0xcc0] sm:$0xff] }
 0x77d   : > { %v20223_v42 = vld [vmem:[#allocation11_spill] sm:$0xff] }
 0x77e   : > { %5098 = vmatmul.mubr.f32.gmra.mrb[44].mxu1 %v11065_v58 }
 0x77f   : > { %v4292_v43 = vpop.f32.mrb[234].mxu1  ;;  %5102 = vmatprep.mubr.f32.mxu1 %v11070_v62 }
 0x780   : > { %v18198_v35 = vadd.f32 %v4292_v43, %v17871_v11  ;;  %v13140_v16 = vpop.f32.mrb[235].mxu1  ;;  %v11069_v11 = vld [vmem:[%s20160_s3 + $0xce0] sm:$0xf] }
 0x782   : > { %5103 = vmatmul.mubr.f32.gmra.mrb[46].mxu1 %v11069_v11 }
 0x783   : > { %v4297_v32 = vpop.f32.mrb[236].mxu1  ;;  %13212 = vmatprep.mubr.msk.f32.mxu1 %vm15594_vm5, %v20206_v12 }
 0x784   : > { %v18207_v59 = vadd.f32 %v4297_v32, %v20221_v49  ;;  %v13143_v33 = vpop.f32.mrb[237].mxu1 }
 0x786   : > { %20222 = vst [vmem:[#allocation12_spill] sm:$0xff] %v18207_v59 }
 0x787   : > { %v4302_v63 = vpop.f32.mrb[238].mxu1 }
 0x788   : > { %v18213_v34 = vadd.f32 %v4302_v63, %v20223_v42  ;;  %v13146_v43 = vpop.f32.mrb[239].mxu1 }
 0x78a   : > { %20224 = vst [vmem:[#allocation13_spill] sm:$0xff] %v18213_v34 }
 0x78b   : > { %v4307_v56 = vpop.f32.mrb[240].mxu1 }
 0x78c   : > { %v18218_v16 = vadd.f32 %v4307_v56, %v17891_v39  ;;  %v13149_v58 = vpop.f32.mrb[241].mxu1 }
 0x78f   : > { %v4312_v32 = vpop.f32.mrb[242].mxu1 }
 0x790   : > { %v18221_v62 = vadd.f32 %v4312_v32, %v17894_v55  ;;  %v13152_v49 = vpop.f32.mrb[243].mxu1 }
 0x793   : > { %v4317_v33 = vpop.f32.mrb[244].mxu1 }
 0x794   : > { %v18224_v11 = vadd.f32 %v4317_v33, %v17897_v61  ;;  %v13155_v63 = vpop.f32.mrb[245].mxu1 }
 0x797   : > { %v4322_v42 = vpop.f32.mrb[246].mxu1 }
 0x798   : > { %v18227_v43 = vadd.f32 %v4322_v42, %v17900_v8  ;;  %v13158_v34 = vpop.f32.mrb[247].mxu1 }
 0x79b   : > { %v4327_v59 = vpop.f32.mrb[248].mxu1 }
 0x79c   : > { %v18230_v39 = vadd.f32 %v4327_v59, %v17903_v27  ;;  %v13161_v56 = vpop.f32.mrb[249].mxu1 }
 0x79f   : > { %v4332_v58 = vpop.f32.mrb[250].mxu1 }
 0x7a0   : > { %v18233_v55 = vadd.f32 %v4332_v58, %v17906_v28  ;;  %v13164_v32 = vpop.f32.mrb[251].mxu1 }
 0x7a3   : > { %v4637_v49 = vpop.f32.mrb[252].mxu1 }
 0x7a4   : > { %v4638_v61 = vadd.f32 %v18090_v53, %v4637_v49  ;;  %v4639_v33 = vpop.f32.mrb[253].mxu1 }
 0x7a6   : > { %13170 = vmatmul.mubr.msk.f32.vlgmr.msra.gmra.mrb[36].mxu0 %vm1206_vm4, %v4638_v61 }
 0x7a7   : > { %14661 = vmatpush1.bf16.msra.mxu0 %v15982_v6  ;;  %v4642_v8 = vpop.f32.mrb[254].mxu1  ;;  %13172 = vmatprep.mubr.msk.f32.mxu0 %vm15594_vm5, %v20206_v12 }
 0x7a8   : > { %v4643_v27 = vadd.f32 %v18092_v14, %v4642_v8  ;;  %14662 = vmatprep.subr.bf16.mxu0 %v20207_v19  ;;  %v4644_v59 = vpop.f32.mrb[255].mxu1 }
 0x7aa   : > { %13173 = vmatmul.mubr.msk.f32.gmra.mrb[38].mxu0 %vm1206_vm4, %v4643_v27 }
 0x7ab   : > { %14664 = vmatpush1.bf16.msra.mxu0 %v16000_v22  ;;  %v4647_v28 = vpop.f32.mrb[0].mxu1  ;;  %13175 = vmatprep.mubr.msk.f32.mxu0 %vm15594_vm5, %v20206_v12 }
 0x7ac   : > { %v4648_v53 = vadd.f32 %v18094_v47, %v4647_v28  ;;  %14665 = vmatprep.subr.bf16.mxu0 %v20207_v19  ;;  %v4649_v34 = vpop.f32.mrb[1].mxu1 }
 0x7ae   : > { %13176 = vmatmul.mubr.msk.f32.gmra.mrb[40].mxu0 %vm1206_vm4, %v4648_v53 }
 0x7af   : > { %14667 = vmatpush1.bf16.msra.mxu0 %v16020_v36  ;;  %v4652_v14 = vpop.f32.mrb[2].mxu1  ;;  %13178 = vmatprep.mubr.msk.f32.mxu0 %vm15594_vm5, %v20206_v12 }
 0x7b0   : > { %v4653_v63 = vadd.f32 %v18096_v41, %v4652_v14  ;;  %14668 = vmatprep.subr.bf16.mxu0 %v20207_v19  ;;  %v4654_v42 = vpop.f32.mrb[3].mxu1 }
 0x7b2   : > { %13179 = vmatmul.mubr.msk.f32.gmra.mrb[42].mxu0 %vm1206_vm4, %v4653_v63 }
 0x7b3   : > { %14670 = vmatpush1.bf16.msra.mxu0 %v16040_v51  ;;  %v4657_v47 = vpop.f32.mrb[4].mxu1  ;;  %13181 = vmatprep.mubr.msk.f32.mxu0 %vm15594_vm5, %v20206_v12 }
 0x7b4   : > { %v4658_v56 = vadd.f32 %v18098_v0, %v4657_v47  ;;  %14671 = vmatprep.subr.bf16.mxu0 %v20207_v19  ;;  %v4659_v58 = vpop.f32.mrb[5].mxu1 }
 0x7b6   : > { %13182 = vmatmul.mubr.msk.f32.gmra.mrb[44].mxu0 %vm1206_vm4, %v4658_v56 }
 0x7b7   : > { %14673 = vmatpush1.bf16.msra.mxu0 %v16060_v4  ;;  %v4662_v41 = vpop.f32.mrb[6].mxu1  ;;  %13184 = vmatprep.mubr.msk.f32.mxu0 %vm15594_vm5, %v20206_v12 }
 0x7b8   : > { %v4663_v32 = vadd.f32 %v18100_v20, %v4662_v41  ;;  %14674 = vmatprep.subr.bf16.mxu0 %v20207_v19  ;;  %v4664_v49 = vpop.f32.mrb[7].mxu1  ;;  %v11028_v41 = vld [vmem:[%s20160_s3 + $0xb98] sm:$0xff] }
 0x7b9   : > { %v11036_v49 = vld [vmem:[%s20160_s3 + $0xbd8] sm:$0xff] }
 0x7ba   : > { %13185 = vmatmul.mubr.msk.f32.gmra.mrb[46].mxu0 %vm1206_vm4, %v4663_v32  ;;  %v11032_v32 = vld [vmem:[%s20160_s3 + $0xbb8] sm:$0xff] }
 0x7bb   : > { %14676 = vmatpush1.bf16.msra.mxu0 %v16080_v23  ;;  %v4667_v0 = vpop.f32.mrb[8].mxu1  ;;  %13187 = vmatprep.mubr.msk.f32.mxu0 %vm15594_vm5, %v20206_v12 }
 0x7bc   : > { %v4668_v61 = vadd.f32 %v18102_v9, %v4667_v0  ;;  %14677 = vmatprep.subr.bf16.mxu0 %v20207_v19  ;;  %v4669_v33 = vpop.f32.mrb[9].mxu1  ;;  %v11063_v0 = vld [vmem:[%s20160_s3 + $0xcb0] sm:$0xff] }
 0x7bd   : > { %v11067_v33 = vld [vmem:[%s20160_s3 + $0xcd0] sm:$0xff] }
 0x7be   : > { %13188 = vmatmul.mubr.msk.f32.gmra.mrb[48].mxu0 %vm1206_vm4, %v4668_v61  ;;  %v11068_v61 = vld [vmem:[%s20160_s3 + $0xcd8] sm:$0xff] }
 0x7bf   : > { %14679 = vmatpush1.bf16.msra.mxu0 %v16100_v40  ;;  %v4672_v20 = vpop.f32.mrb[10].mxu1  ;;  %13190 = vmatprep.mubr.msk.f32.mxu0 %vm15594_vm5, %v20206_v12 }
 0x7c0   : > { %v4673_v8 = vadd.f32 %v18104_v26, %v4672_v20  ;;  %14680 = vmatprep.subr.bf16.mxu0 %v20207_v19  ;;  %v4674_v27 = vpop.f32.mrb[11].mxu1  ;;  %v11072_v20 = vld [vmem:[%s20160_s3 + $0xcf8] sm:$0xf] }
 0x7c1   : > { %v11086_v27 = vld [vmem:[%s20161_s4 + $0x70] sm:$0xff] }
 0x7c2   : > { %13191 = vmatmul.mubr.msk.f32.gmra.mrb[50].mxu0 %vm1206_vm4, %v4673_v8  ;;  %v11071_v8 = vld [vmem:[%s20160_s3 + $0xcf0] sm:$0xf] }
 0x7c3   : > { %14682 = vmatpush1.bf16.msra.mxu0 %v16120_v57  ;;  %v4677_v9 = vpop.f32.mrb[12].mxu1  ;;  %13193 = vmatprep.mubr.msk.f32.mxu0 %vm15594_vm5, %v20206_v12 }
 0x7c4   : > { %v4678_v59 = vadd.f32 %v18106_v3, %v4677_v9  ;;  %14683 = vmatprep.subr.bf16.mxu0 %v20207_v19  ;;  %v4679_v28 = vpop.f32.mrb[13].mxu1  ;;  %v11087_v9 = vld [vmem:[%s20161_s4 + $0x78] sm:$0xff] }
 0x7c6   : > { %13194 = vmatmul.mubr.msk.f32.gmra.mrb[52].mxu0 %vm1206_vm4, %v4678_v59  ;;  %v14687_v59 = vpack.c.bf16 %v11087_v9, %v11086_v27  ;;  %v11102_v27 = vld [vmem:[%s20160_s3 + $0xd08] sm:$0xff]  ;;  %v11101_v9 = vld [vmem:[%s20160_s3 + $0xd00] sm:$0xff] }
 0x7c7   : > { %14685 = vmatpush1.bf16.msra.mxu0 %v16139_v1  ;;  %v4682_v26 = vpop.f32.mrb[14].mxu1  ;;  %13196 = vmatprep.mubr.msk.f32.mxu0 %vm15594_vm5, %v20206_v12 }
 0x7c8   : > { %v4683_v53 = vadd.f32 %v18108_v7, %v4682_v26  ;;  %14690 = vmatprep.subr.bf16.mxu0 %v15906_v60  ;;  %v4684_v34 = vpop.f32.mrb[15].mxu1  ;;  %14688 = vmatpush3.bf16.msra.mxu1 %v14687_v59  ;;  %v11106_v59 = vld [vmem:[%s20160_s3 + $0xd28] sm:$0xff] }
 0x7c9   : > { %14721 = vmatprep.subr.bf16.mxu1 %v20207_v19 }
 0x7ca   : > { %13197 = vmatmul.mubr.msk.f32.gmra.mrb[54].mxu0 %vm1206_vm4, %v4683_v53 }
 0x7cb   : > { %v4687_v14 = vpop.f32.mrb[16].mxu1  ;;  %13199 = vmatprep.mubr.msk.f32.mxu0 %vm15594_vm5, %v20206_v12 }
 0x7cc   : > { %v4688_v3 = vadd.f32 %v18110_v48, %v4687_v14  ;;  %v4689_v63 = vpop.f32.mrb[17].mxu1  ;;  %v11024_v48 = vld [vmem:[%s20160_s3 + $0xb78] sm:$0xff] }
 0x7ce   : > { %13200 = vmatmul.mubr.msk.f32.gmra.mrb[56].mxu0 %vm1206_vm4, %v4688_v3 }
 0x7cf   : > { %v4692_v42 = vpop.f32.mrb[18].mxu1  ;;  %13202 = vmatprep.mubr.msk.f32.mxu0 %vm15594_vm5, %v20206_v12 }
 0x7d0   : > { %v4693_v7 = vadd.f32 %v18112_v30, %v4692_v42  ;;  %v4694_v47 = vpop.f32.mrb[19].mxu1  ;;  %v11023_v30 = vld [vmem:[%s20160_s3 + $0xb70] sm:$0xff] }
 0x7d2   : > { %13203 = vmatmul.mubr.msk.f32.gmra.mrb[58].mxu0 %vm1206_vm4, %v4693_v7 }
 0x7d3   : > { %v4697_v60 = vpop.f32.mrb[20].mxu1  ;;  %13205 = vmatprep.mubr.msk.f32.mxu0 %vm15594_vm5, %v20206_v12 }
 0x7d4   : > { %v4698_v56 = vadd.f32 %v18114_v15, %v4697_v60  ;;  %v4699_v58 = vpop.f32.mrb[21].mxu1  ;;  %v11027_v15 = vld [vmem:[%s20160_s3 + $0xb90] sm:$0xff] }
 0x7d6   : > { %13206 = vmatmul.mubr.msk.f32.gmra.mrb[60].mxu0 %vm1206_vm4, %v4698_v56 }
 0x7d7   : > { %11073 = vmatprep.mubr.msk.f32.mxu0 %vm1206_vm4, %v11024_v48 }
 0x7da   : > { %5173 = vmatmul.mubr.f32.vlgmr.msra.gmra.mrb[62].mxu0 %v11023_v30 }
 0x7db   : > { %14692 = vmatpush3.bf16.msra.mxu0 %v15874_v2  ;;  %11074 = vmatprep.mubr.msk.f32.mxu0 %vm1206_vm4, %v11028_v41  ;;  %v11031_v2 = vld [vmem:[%s20160_s3 + $0xbb0] sm:$0xff] }
 0x7dc   : > { %14694 = vmatprep.subr.bf16.mxu0 %v15914_v5  ;;  %v11040_v5 = vld [vmem:[%s20160_s3 + $0xbf8] sm:$0xff] }
 0x7de   : > { %5178 = vmatmul.mubr.f32.gmra.mrb[64].mxu0 %v11027_v15 }
 0x7df   : > { %14696 = vmatpush3.bf16.msra.mxu0 %v15878_v10  ;;  %11075 = vmatprep.mubr.msk.f32.mxu0 %vm1206_vm4, %v11032_v32  ;;  %v11035_v10 = vld [vmem:[%s20160_s3 + $0xbd0] sm:$0xff] }
 0x7e0   : > { %14698 = vmatprep.subr.bf16.mxu0 %v15922_v13  ;;  %v11044_v13 = vld [vmem:[%s20160_s3 + $0xc18] sm:$0xff] }
 0x7e2   : > { %5183 = vmatmul.mubr.f32.gmra.mrb[66].mxu0 %v11031_v2 }
 0x7e3   : > { %14700 = vmatpush3.bf16.msra.mxu0 %v15882_v17  ;;  %11076 = vmatprep.mubr.msk.f32.mxu0 %vm1206_vm4, %v11036_v49  ;;  %v11039_v17 = vld [vmem:[%s20160_s3 + $0xbf0] sm:$0xff] }
 0x7e4   : > { %14702 = vmatprep.subr.bf16.mxu0 %v15930_v21  ;;  %v11048_v21 = vld [vmem:[%s20160_s3 + $0xc38] sm:$0xff] }
 0x7e6   : > { %5188 = vmatmul.mubr.f32.gmra.mrb[68].mxu0 %v11035_v10 }
 0x7e7   : > { %14704 = vmatpush3.bf16.msra.mxu0 %v15886_v24  ;;  %11077 = vmatprep.mubr.msk.f32.mxu0 %vm1206_vm4, %v11040_v5  ;;  %v11043_v24 = vld [vmem:[%s20160_s3 + $0xc10] sm:$0xff] }
 0x7e8   : > { %14706 = vmatprep.subr.bf16.mxu0 %v15938_v29  ;;  %v11052_v29 = vld [vmem:[%s20160_s3 + $0xc58] sm:$0xff] }
 0x7ea   : > { %5193 = vmatmul.mubr.f32.gmra.mrb[70].mxu0 %v11039_v17 }
 0x7eb   : > { %14708 = vmatpush3.bf16.msra.mxu0 %v15890_v31  ;;  %11078 = vmatprep.mubr.msk.f32.mxu0 %vm1206_vm4, %v11044_v13  ;;  %v11047_v31 = vld [vmem:[%s20160_s3 + $0xc30] sm:$0xff] }
 0x7ec   : > { %14710 = vmatprep.subr.bf16.mxu0 %v15946_v37  ;;  %v11056_v37 = vld [vmem:[%s20160_s3 + $0xc78] sm:$0xff] }
 0x7ee   : > { %5198 = vmatmul.mubr.f32.gmra.mrb[72].mxu0 %v11043_v24 }
 0x7ef   : > { %14712 = vmatpush3.bf16.msra.mxu0 %v15894_v38  ;;  %11079 = vmatprep.mubr.msk.f32.mxu0 %vm1206_vm4, %v11048_v21  ;;  %v11051_v38 = vld [vmem:[%s20160_s3 + $0xc50] sm:$0xff] }
 0x7f0   : > { %14714 = vmatprep.subr.bf16.mxu0 %v15954_v46  ;;  %v11060_v46 = vld [vmem:[%s20160_s3 + $0xc98] sm:$0xff] }
 0x7f2   : > { %5203 = vmatmul.mubr.f32.gmra.mrb[74].mxu0 %v11047_v31 }
 0x7f3   : > { %14716 = vmatpush3.bf16.msra.mxu0 %v15898_v45  ;;  %11080 = vmatprep.mubr.msk.f32.mxu0 %vm1206_vm4, %v11052_v29  ;;  %v11055_v45 = vld [vmem:[%s20160_s3 + $0xc70] sm:$0xff] }
 0x7f4   : > { %14718 = vmatprep.subr.bf16.mxu0 %v15962_v54  ;;  %v11059_v54 = vld [vmem:[%s20160_s3 + $0xc90] sm:$0xff] }
 0x7f5   : > { %v12220_v28 = vpop.f32.mrb[22].mxu1 }
 0x7f6   : > { %5208 = vmatmul.mubr.f32.gmra.mrb[76].mxu0 %v11051_v38  ;;  %v12221_v26 = vpop.f32.mrb[23].mxu1 }
 0x7f7   : > { %14720 = vmatpush3.bf16.msra.mxu0 %v15902_v52  ;;  %11081 = vmatprep.mubr.msk.f32.mxu0 %vm1206_vm4, %v11056_v37  ;;  %v11064_v52 = vld [vmem:[%s20160_s3 + $0xcb8] sm:$0xff]  ;;  %v18417_v53 = vadd.f32 %v12221_v26, %v12220_v28  ;;  %v11105_v28 = vld [vmem:[%s20160_s3 + $0xd20] sm:$0xff]  ;;  %v11110_v26 = vld [vmem:[%s20160_s3 + $0xd48] sm:$0xff] }
 0x7f8   : > { %14748 = vmatprep.subr.bf16.mxu0 %v20207_v19 }
 0x7fa   : > { %5213 = vmatmul.mubr.f32.gmra.mrb[78].mxu0 %v11055_v45 }
 0x7fb   : > { %11082 = vmatprep.mubr.msk.f32.mxu0 %vm1206_vm4, %v11060_v46 }
 0x7fe   : > { %5218 = vmatmul.mubr.f32.gmra.mrb[80].mxu0 %v11059_v54 }
 0x7ff   : > { %11083 = vmatprep.mubr.msk.f32.mxu0 %vm1206_vm4, %v11064_v52 }
 0x802   : > { %5223 = vmatmul.mubr.f32.gmra.mrb[82].mxu0 %v11063_v0 }
 0x803   : > { %11084 = vmatprep.mubr.msk.f32.mxu0 %vm1206_vm4, %v11068_v61 }
 0x806   : > { %5228 = vmatmul.mubr.f32.gmra.mrb[84].mxu0 %v11067_v33 }
 0x807   : > { %11085 = vmatprep.mubr.msk.f32.mxu0 %vm1206_vm4, %v11072_v20 }
 0x80a   : > { %5233 = vmatmul.mubr.f32.gmra.mrb[86].mxu0 %v11071_v8 }
 0x80b   : > { %5579 = vmatprep.mubr.f32.mxu0 %v11102_v27 }
 0x80e   : > { %5580 = vmatmul.mubr.f32.vlgmr.msra.gmra.mrb[88].mxu0 %v11101_v9 }
 0x80f   : > { %5584 = vmatprep.mubr.f32.mxu0 %v11106_v59 }
 0x811   : > { %v12223_v34 = vpop.f32.mrb[24].mxu1 }
 0x812   : > { %v12224_v14 = vpop.f32.mrb[25].mxu1  ;;  %5585 = vmatmul.mubr.f32.gmra.mrb[90].mxu0 %v11105_v28  ;;  %v11146_v28 = vld [vmem:[%s20160_s3 + $0xe68] sm:$0xff] }
 0x813   : > { %v18419_v3 = vadd.f32 %v12224_v14, %v12223_v34  ;;  %5589 = vmatprep.mubr.f32.mxu0 %v11110_v26  ;;  %v11109_v34 = vld [vmem:[%s20160_s3 + $0xd40] sm:$0xff]  ;;  %v11114_v14 = vld [vmem:[%s20160_s3 + $0xd68] sm:$0xff] }
 0x815   : > { %v12226_v63 = vpop.f32.mrb[26].mxu1 }
 0x816   : > { %v12227_v42 = vpop.f32.mrb[27].mxu1  ;;  %5590 = vmatmul.mubr.f32.gmra.mrb[92].mxu0 %v11109_v34 }
 0x817   : > { %v18421_v7 = vadd.f32 %v12227_v42, %v12226_v63  ;;  %5594 = vmatprep.mubr.f32.mxu0 %v11114_v14  ;;  %v11113_v63 = vld [vmem:[%s20160_s3 + $0xd60] sm:$0xff]  ;;  %v11118_v42 = vld [vmem:[%s20160_s3 + $0xd88] sm:$0xff] }
 0x819   : > { %v12229_v47 = vpop.f32.mrb[28].mxu1 }
 0x81a   : > { %v12230_v60 = vpop.f32.mrb[29].mxu1  ;;  %5595 = vmatmul.mubr.f32.gmra.mrb[94].mxu0 %v11113_v63  ;;  %v11150_v63 = vld [vmem:[%s20160_s3 + $0xe88] sm:$0xf] }
 0x81b   : > { %v18423_v56 = vadd.f32 %v12230_v60, %v12229_v47  ;;  %5599 = vmatprep.mubr.f32.mxu0 %v11118_v42  ;;  %v11117_v47 = vld [vmem:[%s20160_s3 + $0xd80] sm:$0xff]  ;;  %v11122_v60 = vld [vmem:[%s20160_s3 + $0xda8] sm:$0xff]  ;;  %v20225_v42 = vld [vmem:[#allocation12_spill] sm:$0xff] }
 0x81d   : > { %v12232_v48 = vpop.f32.mrb[30].mxu1 }
 0x81e   : > { %v12233_v58 = vpop.f32.mrb[31].mxu1  ;;  %5600 = vmatmul.mubr.f32.gmra.mrb[96].mxu0 %v11117_v47 }
 0x81f   : > { %v18425_v30 = vadd.f32 %v12233_v58, %v12232_v48  ;;  %5604 = vmatprep.mubr.f32.mxu0 %v11122_v60  ;;  %v11121_v48 = vld [vmem:[%s20160_s3 + $0xda0] sm:$0xff]  ;;  %v11126_v58 = vld [vmem:[%s20160_s3 + $0xdc8] sm:$0xff] }
 0x821   : > { %v12235_v41 = vpop.f32.mrb[32].mxu1 }
 0x822   : > { %v12236_v15 = vpop.f32.mrb[33].mxu1  ;;  %5605 = vmatmul.mubr.f32.gmra.mrb[98].mxu0 %v11121_v48 }
 0x823   : > { %v18427_v32 = vadd.f32 %v12236_v15, %v12235_v41  ;;  %5609 = vmatprep.mubr.f32.mxu0 %v11126_v58  ;;  %v11125_v41 = vld [vmem:[%s20160_s3 + $0xdc0] sm:$0xff] }
 0x824   : > { %v20226_v58 = vld [vmem:[#allocation13_spill] sm:$0xff] }
 0x825   : > { %v12238_v2 = vpop.f32.mrb[34].mxu1 }
 0x826   : > { %v12239_v49 = vpop.f32.mrb[35].mxu1  ;;  %5610 = vmatmul.mubr.f32.gmra.mrb[100].mxu0 %v11125_v41 }
 0x827   : > { %v18429_v10 = vadd.f32 %v12239_v49, %v12238_v2  ;;  %v11130_v2 = vld [vmem:[%s20160_s3 + $0xde8] sm:$0xff] }
 0x828   : > { %5614 = vmatprep.mubr.f32.mxu0 %v11130_v2 }
 0x829   : > { %v12241_v5 = vpop.f32.mrb[36].mxu1 }
 0x82a   : > { %v12242_v17 = vpop.f32.mrb[37].mxu1 }
 0x82b   : > { %v18431_v13 = vadd.f32 %v12242_v17, %v12241_v5  ;;  %v11129_v17 = vld [vmem:[%s20160_s3 + $0xde0] sm:$0xff] }
 0x82c   : > { %5615 = vmatmul.mubr.f32.gmra.mrb[102].mxu0 %v11129_v17 }
 0x845   : > { %v12244_v24 = vpop.f32.mrb[38].mxu1 }
 0x846   : > { %v12245_v21 = vpop.f32.mrb[39].mxu1 }
 0x847   : > { %v18433_v31 = vadd.f32 %v12245_v21, %v12244_v24  ;;  %v11134_v21 = vld [vmem:[%s20160_s3 + $0xe08] sm:$0xff] }
 0x848   : > { %5619 = vmatprep.mubr.f32.mxu0 %v11134_v21 }
 0x849   : > { %v12247_v29 = vpop.f32.mrb[40].mxu1 }
 0x84a   : > { %v12248_v38 = vpop.f32.mrb[41].mxu1 }
 0x84b   : > { %v18435_v37 = vadd.f32 %v12248_v38, %v12247_v29 }
 0x84d   : > { %v12250_v45 = vpop.f32.mrb[42].mxu1 }
 0x84e   : > { %v12251_v46 = vpop.f32.mrb[43].mxu1 }
 0x84f   : > { %v18437_v54 = vadd.f32 %v12251_v46, %v12250_v45  ;;  %v11138_v46 = vld [vmem:[%s20160_s3 + $0xe28] sm:$0xff] }
 0x851   : > { %v12253_v52 = vpop.f32.mrb[44].mxu1 }
 0x852   : > { %v12254_v0 = vpop.f32.mrb[45].mxu1 }
 0x853   : > { %v18439_v61 = vadd.f32 %v12254_v0, %v12253_v52 }
 0x855   : > { %v12256_v33 = vpop.f32.mrb[46].mxu1 }
 0x856   : > { %v12257_v20 = vpop.f32.mrb[47].mxu1 }
 0x857   : > { %v18441_v8 = vadd.f32 %v12257_v20, %v12256_v33  ;;  %v11142_v20 = vld [vmem:[%s20160_s3 + $0xe48] sm:$0xff] }
 0x879   : > { %v4809_v15 = vpop.f32.mrb[36].mxu0 }
 0x87a   : > { %v18489_v49 = vadd.f32 %v4809_v15, %v18159_v18  ;;  %v13171_v5 = vpop.f32.mrb[37].mxu0  ;;  %v11133_v18 = vld [vmem:[%s20160_s3 + $0xe00] sm:$0xff] }
 0x87b   : > { %5620 = vmatmul.mubr.f32.gmra.mrb[104].mxu0 %v11133_v18 }
 0x87c   : > { %5624 = vmatprep.mubr.f32.mxu0 %v11138_v46 }
 0x87d   : > { %v4814_v24 = vpop.f32.mrb[38].mxu0 }
 0x87e   : > { %v18498_v29 = vadd.f32 %v4814_v24, %v18168_v25  ;;  %v13174_v38 = vpop.f32.mrb[39].mxu0  ;;  %v11137_v25 = vld [vmem:[%s20160_s3 + $0xe20] sm:$0xff] }
 0x87f   : > { %5625 = vmatmul.mubr.f32.gmra.mrb[106].mxu0 %v11137_v25 }
 0x880   : > { %5629 = vmatprep.mubr.f32.mxu0 %v11142_v20 }
 0x881   : > { %v4819_v45 = vpop.f32.mrb[40].mxu0 }
 0x882   : > { %v18507_v52 = vadd.f32 %v4819_v45, %v18180_v44  ;;  %v13177_v0 = vpop.f32.mrb[41].mxu0  ;;  %v11141_v44 = vld [vmem:[%s20160_s3 + $0xe40] sm:$0xff] }
 0x883   : > { %5630 = vmatmul.mubr.f32.gmra.mrb[108].mxu0 %v11141_v44 }
 0x884   : > { %5634 = vmatprep.mubr.f32.mxu0 %v11146_v28 }
 0x885   : > { %v4824_v33 = vpop.f32.mrb[42].mxu0 }
 0x886   : > { %v18516_v27 = vadd.f32 %v4824_v33, %v18189_v50  ;;  %v13180_v9 = vpop.f32.mrb[43].mxu0  ;;  %v11145_v50 = vld [vmem:[%s20160_s3 + $0xe60] sm:$0xff] }
 0x887   : > { %5635 = vmatmul.mubr.f32.gmra.mrb[110].mxu0 %v11145_v50 }
 0x888   : > { %5639 = vmatprep.mubr.f32.mxu0 %v11150_v63 }
 0x889   : > { %v4829_v59 = vpop.f32.mrb[44].mxu0 }
 0x88a   : > { %v18525_v26 = vadd.f32 %v4829_v59, %v18198_v35  ;;  %v13183_v34 = vpop.f32.mrb[45].mxu0  ;;  %v11149_v35 = vld [vmem:[%s20160_s3 + $0xe80] sm:$0xf] }
 0x88b   : > { %5640 = vmatmul.mubr.f32.gmra.mrb[112].mxu0 %v11149_v35 }
 0x88c   : > { %13255 = vmatprep.mubr.msk.f32.mxu0 %vm15594_vm5, %v20206_v12 }
 0x88d   : > { %v4834_v14 = vpop.f32.mrb[46].mxu0 }
 0x88e   : > { %v18534_v47 = vadd.f32 %v4834_v14, %v20225_v42  ;;  %v13186_v60 = vpop.f32.mrb[47].mxu0 }
 0x891   : > { %v4839_v48 = vpop.f32.mrb[48].mxu0 }
 0x892   : > { %v18540_v41 = vadd.f32 %v4839_v48, %v20226_v58  ;;  %v13189_v15 = vpop.f32.mrb[49].mxu0 }
 0x895   : > { %v4844_v2 = vpop.f32.mrb[50].mxu0 }
 0x896   : > { %v18545_v5 = vadd.f32 %v4844_v2, %v18218_v16  ;;  %v13192_v17 = vpop.f32.mrb[51].mxu0 }
 0x899   : > { %v4849_v24 = vpop.f32.mrb[52].mxu0 }
 0x89a   : > { %v18548_v21 = vadd.f32 %v4849_v24, %v18221_v62  ;;  %v13195_v38 = vpop.f32.mrb[53].mxu0 }
 0x89d   : > { %v4854_v18 = vpop.f32.mrb[54].mxu0 }
 0x89e   : > { %v18551_v45 = vadd.f32 %v4854_v18, %v18224_v11  ;;  %v13198_v46 = vpop.f32.mrb[55].mxu0 }
 0x89f   : > { %v11108_v46 = vld [vmem:[%s20160_s3 + $0xd38] sm:$0xff] }
 0x8a1   : > { %v4859_v0 = vpop.f32.mrb[56].mxu0 }
 0x8a2   : > { %v18554_v25 = vadd.f32 %v4859_v0, %v18227_v43  ;;  %v13201_v33 = vpop.f32.mrb[57].mxu0  ;;  %v11112_v0 = vld [vmem:[%s20160_s3 + $0xd58] sm:$0xff] }
 0x8a3   : > { %v11111_v33 = vld [vmem:[%s20160_s3 + $0xd50] sm:$0xff] }
 0x8a5   : > { %v4864_v20 = vpop.f32.mrb[58].mxu0 }
 0x8a6   : > { %v18557_v16 = vadd.f32 %v4864_v20, %v18230_v39  ;;  %v13204_v9 = vpop.f32.mrb[59].mxu0  ;;  %v11116_v20 = vld [vmem:[%s20160_s3 + $0xd78] sm:$0xff] }
 0x8a7   : > { %v11115_v9 = vld [vmem:[%s20160_s3 + $0xd70] sm:$0xff] }
 0x8a9   : > { %v4869_v44 = vpop.f32.mrb[60].mxu0 }
 0x8aa   : > { %v18560_v62 = vadd.f32 %v4869_v44, %v18233_v55  ;;  %v13207_v59 = vpop.f32.mrb[61].mxu0  ;;  %v11120_v44 = vld [vmem:[%s20160_s3 + $0xd98] sm:$0xff] }
 0x8ab   : > { %v11119_v59 = vld [vmem:[%s20160_s3 + $0xd90] sm:$0xff] }
 0x8ad   : > { %v5174_v28 = vpop.f32.mrb[62].mxu0 }
 0x8ae   : > { %v5175_v11 = vadd.f32 %v18417_v53, %v5174_v28  ;;  %v5176_v34 = vpop.f32.mrb[63].mxu0  ;;  %v11124_v28 = vld [vmem:[%s20160_s3 + $0xdb8] sm:$0xff] }
 0x8af   : > { %v11128_v34 = vld [vmem:[%s20160_s3 + $0xdd8] sm:$0xff] }
 0x8b0   : > { %13213 = vmatmul.mubr.msk.f32.vlgmr.msra.gmra.mrb[48].mxu1 %vm1206_vm4, %v5175_v11  ;;  %v11123_v11 = vld [vmem:[%s20160_s3 + $0xdb0] sm:$0xff] }
 0x8b1   : > { %14723 = vmatpush1.bf16.msra.mxu1 %v15982_v6  ;;  %v5179_v43 = vpop.f32.mrb[64].mxu0  ;;  %13215 = vmatprep.mubr.msk.f32.mxu1 %vm15594_vm5, %v20206_v12 }
 0x8b2   : > { %v5180_v39 = vadd.f32 %v18419_v3, %v5179_v43  ;;  %14724 = vmatprep.subr.bf16.mxu1 %v20207_v19  ;;  %v5181_v50 = vpop.f32.mrb[65].mxu0  ;;  %v11127_v43 = vld [vmem:[%s20160_s3 + $0xdd0] sm:$0xff] }
 0x8b3   : > { %v11131_v50 = vld [vmem:[%s20160_s3 + $0xdf0] sm:$0xff] }
 0x8b4   : > { %13216 = vmatmul.mubr.msk.f32.gmra.mrb[50].mxu1 %vm1206_vm4, %v5180_v39  ;;  %v11132_v39 = vld [vmem:[%s20160_s3 + $0xdf8] sm:$0xff] }
 0x8b5   : > { %14726 = vmatpush1.bf16.msra.mxu1 %v16000_v22  ;;  %v5184_v55 = vpop.f32.mrb[66].mxu0  ;;  %13218 = vmatprep.mubr.msk.f32.mxu1 %vm15594_vm5, %v20206_v12 }
 0x8b6   : > { %v5185_v53 = vadd.f32 %v18421_v7, %v5184_v55  ;;  %14727 = vmatprep.subr.bf16.mxu1 %v20207_v19  ;;  %v5186_v6 = vpop.f32.mrb[67].mxu0  ;;  %v11136_v55 = vld [vmem:[%s20160_s3 + $0xe18] sm:$0xff] }
 0x8b7   : > { %v11140_v6 = vld [vmem:[%s20160_s3 + $0xe38] sm:$0xff] }
 0x8b8   : > { %13219 = vmatmul.mubr.msk.f32.gmra.mrb[52].mxu1 %vm1206_vm4, %v5185_v53  ;;  %v11135_v53 = vld [vmem:[%s20160_s3 + $0xe10] sm:$0xff] }
 0x8b9   : > { %14729 = vmatpush1.bf16.msra.mxu1 %v16020_v36  ;;  %v5189_v3 = vpop.f32.mrb[68].mxu0  ;;  %13221 = vmatprep.mubr.msk.f32.mxu1 %vm15594_vm5, %v20206_v12 }
 0x8ba   : > { %v5190_v14 = vadd.f32 %v18423_v56, %v5189_v3  ;;  %14730 = vmatprep.subr.bf16.mxu1 %v20207_v19  ;;  %v5191_v22 = vpop.f32.mrb[69].mxu0  ;;  %v11139_v3 = vld [vmem:[%s20160_s3 + $0xe30] sm:$0xff] }
 0x8bb   : > { %v11143_v22 = vld [vmem:[%s20160_s3 + $0xe50] sm:$0xff] }
 0x8bc   : > { %13222 = vmatmul.mubr.msk.f32.gmra.mrb[54].mxu1 %vm1206_vm4, %v5190_v14  ;;  %v11144_v14 = vld [vmem:[%s20160_s3 + $0xe58] sm:$0xff] }
 0x8bd   : > { %14732 = vmatpush1.bf16.msra.mxu1 %v16040_v51  ;;  %v5194_v7 = vpop.f32.mrb[70].mxu0  ;;  %13224 = vmatprep.mubr.msk.f32.mxu1 %vm15594_vm5, %v20206_v12 }
 0x8be   : > { %v5195_v63 = vadd.f32 %v18425_v30, %v5194_v7  ;;  %14733 = vmatprep.subr.bf16.mxu1 %v20207_v19  ;;  %v5196_v36 = vpop.f32.mrb[71].mxu0  ;;  %v11148_v7 = vld [vmem:[%s20160_s3 + $0xe78] sm:$0xff] }
 0x8bf   : > { %v11152_v36 = vld [vmem:[%s20160_s3 + $0xe98] sm:$0xf] }
 0x8c0   : > { %13225 = vmatmul.mubr.msk.f32.gmra.mrb[56].mxu1 %vm1206_vm4, %v5195_v63  ;;  %v11147_v63 = vld [vmem:[%s20160_s3 + $0xe70] sm:$0xff] }
 0x8c1   : > { %14735 = vmatpush1.bf16.msra.mxu1 %v16060_v4  ;;  %v5199_v56 = vpop.f32.mrb[72].mxu0  ;;  %13227 = vmatprep.mubr.msk.f32.mxu1 %vm15594_vm5, %v20206_v12 }
 0x8c2   : > { %v5200_v42 = vadd.f32 %v18427_v32, %v5199_v56  ;;  %14736 = vmatprep.subr.bf16.mxu1 %v20207_v19  ;;  %v5201_v51 = vpop.f32.mrb[73].mxu0  ;;  %v11151_v56 = vld [vmem:[%s20160_s3 + $0xe90] sm:$0xf] }
 0x8c3   : > { %v11167_v51 = vld [vmem:[%s20161_s4 + $0x88] sm:$0xff] }
 0x8c4   : > { %13228 = vmatmul.mubr.msk.f32.gmra.mrb[58].mxu1 %vm1206_vm4, %v5200_v42  ;;  %v11166_v42 = vld [vmem:[%s20161_s4 + $0x80] sm:$0xff] }
 0x8c5   : > { %14738 = vmatpush1.bf16.msra.mxu1 %v16080_v23  ;;  %v5204_v30 = vpop.f32.mrb[74].mxu0  ;;  %13230 = vmatprep.mubr.msk.f32.mxu1 %vm15594_vm5, %v20206_v12 }
 0x8c6   : > { %v5205_v60 = vadd.f32 %v18429_v10, %v5204_v30  ;;  %14739 = vmatprep.subr.bf16.mxu1 %v20207_v19  ;;  %v5206_v4 = vpop.f32.mrb[75].mxu0  ;;  %v14749_v30 = vpack.c.bf16 %v11167_v51, %v11166_v42 }
 0x8c8   : > { %13231 = vmatmul.mubr.msk.f32.gmra.mrb[60].mxu1 %vm1206_vm4, %v5205_v60  ;;  %14750 = vmatpush3.bf16.msra.mxu0 %v14749_v30 }
 0x8c9   : > { %14741 = vmatpush1.bf16.msra.mxu1 %v16100_v40  ;;  %v5209_v32 = vpop.f32.mrb[76].mxu0  ;;  %13233 = vmatprep.mubr.msk.f32.mxu1 %vm15594_vm5, %v20206_v12 }
 0x8ca   : > { %v5210_v35 = vadd.f32 %v18431_v13, %v5209_v32  ;;  %14742 = vmatprep.subr.bf16.mxu1 %v20207_v19  ;;  %v5211_v23 = vpop.f32.mrb[77].mxu0 }
 0x8cc   : > { %13234 = vmatmul.mubr.msk.f32.gmra.mrb[62].mxu1 %vm1206_vm4, %v5210_v35 }
 0x8cd   : > { %14744 = vmatpush1.bf16.msra.mxu1 %v16120_v57  ;;  %v5214_v10 = vpop.f32.mrb[78].mxu0  ;;  %13236 = vmatprep.mubr.msk.f32.mxu1 %vm15594_vm5, %v20206_v12 }
 0x8ce   : > { %v5215_v48 = vadd.f32 %v18433_v31, %v5214_v10  ;;  %14745 = vmatprep.subr.bf16.mxu1 %v20207_v19  ;;  %v5216_v40 = vpop.f32.mrb[79].mxu0 }
 0x8d0   : > { %13237 = vmatmul.mubr.msk.f32.gmra.mrb[64].mxu1 %vm1206_vm4, %v5215_v48 }
 0x8d1   : > { %14747 = vmatpush1.bf16.msra.mxu1 %v16139_v1  ;;  %v5219_v13 = vpop.f32.mrb[80].mxu0  ;;  %13239 = vmatprep.mubr.msk.f32.mxu1 %vm15594_vm5, %v20206_v12 }
 0x8d2   : > { %v5220_v58 = vadd.f32 %v18435_v37, %v5219_v13  ;;  %v5221_v57 = vpop.f32.mrb[81].mxu0 }
 0x8d4   : > { %13240 = vmatmul.mubr.msk.f32.gmra.mrb[66].mxu1 %vm1206_vm4, %v5220_v58 }
 0x8d5   : > { %v5224_v15 = vpop.f32.mrb[82].mxu0  ;;  %13242 = vmatprep.mubr.msk.f32.mxu1 %vm15594_vm5, %v20206_v12 }
 0x8d6   : > { %v5225_v31 = vadd.f32 %v18437_v54, %v5224_v15  ;;  %v5226_v2 = vpop.f32.mrb[83].mxu0  ;;  %v11104_v54 = vld [vmem:[%s20160_s3 + $0xd18] sm:$0xff] }
 0x8d8   : > { %13243 = vmatmul.mubr.msk.f32.gmra.mrb[68].mxu1 %vm1206_vm4, %v5225_v31 }
 0x8d9   : > { %v5229_v17 = vpop.f32.mrb[84].mxu0  ;;  %13245 = vmatprep.mubr.msk.f32.mxu1 %vm15594_vm5, %v20206_v12 }
 0x8da   : > { %v5230_v1 = vadd.f32 %v18439_v61, %v5229_v17  ;;  %v5231_v24 = vpop.f32.mrb[85].mxu0  ;;  %v11103_v61 = vld [vmem:[%s20160_s3 + $0xd10] sm:$0xff] }
 0x8dc   : > { %13246 = vmatmul.mubr.msk.f32.gmra.mrb[70].mxu1 %vm1206_vm4, %v5230_v1 }
 0x8dd   : > { %v5234_v37 = vpop.f32.mrb[86].mxu0  ;;  %13248 = vmatprep.mubr.msk.f32.mxu1 %vm15594_vm5, %v20206_v12 }
 0x8de   : > { %v5235_v38 = vadd.f32 %v18441_v8, %v5234_v37  ;;  %v5236_v18 = vpop.f32.mrb[87].mxu0  ;;  %v11107_v8 = vld [vmem:[%s20160_s3 + $0xd30] sm:$0xff] }
 0x8e0   : > { %13249 = vmatmul.mubr.msk.f32.gmra.mrb[72].mxu1 %vm1206_vm4, %v5235_v38 }
 0x8e1   : > { %11153 = vmatprep.mubr.msk.f32.mxu1 %vm1206_vm4, %v11104_v54  ;;  %v12306_v60 = vpop.f32.mrb[88].mxu0 }
 0x8e2   : > { %v12307_v4 = vpop.f32.mrb[89].mxu0 }
 0x8e3   : > { %v18726_v32 = vadd.f32 %v12307_v4, %v12306_v60 }
 0x8e4   : > { %5710 = vmatmul.mubr.f32.vlgmr.msra.gmra.mrb[74].mxu1 %v11103_v61 }
 0x8e5   : > { %11154 = vmatprep.mubr.msk.f32.mxu1 %vm1206_vm4, %v11108_v46  ;;  %v12309_v35 = vpop.f32.mrb[90].mxu0 }
 0x8e6   : > { %v12310_v23 = vpop.f32.mrb[91].mxu0 }
 0x8e7   : > { %v18728_v10 = vadd.f32 %v12310_v23, %v12309_v35 }
 0x8e8   : > { %5715 = vmatmul.mubr.f32.gmra.mrb[76].mxu1 %v11107_v8 }
 0x8e9   : > { %11155 = vmatprep.mubr.msk.f32.mxu1 %vm1206_vm4, %v11112_v0  ;;  %v12312_v48 = vpop.f32.mrb[92].mxu0 }
 0x8ea   : > { %v12313_v40 = vpop.f32.mrb[93].mxu0 }
 0x8eb   : > { %v18730_v13 = vadd.f32 %v12313_v40, %v12312_v48 }
 0x8ec   : > { %5720 = vmatmul.mubr.f32.gmra.mrb[78].mxu1 %v11111_v33 }
 0x8ed   : > { %11156 = vmatprep.mubr.msk.f32.mxu1 %vm1206_vm4, %v11116_v20  ;;  %v12315_v58 = vpop.f32.mrb[94].mxu0 }
 0x8ee   : > { %v12316_v57 = vpop.f32.mrb[95].mxu0 }
 0x8ef   : > { %v18732_v15 = vadd.f32 %v12316_v57, %v12315_v58 }
 0x8f0   : > { %5725 = vmatmul.mubr.f32.gmra.mrb[80].mxu1 %v11115_v9 }
 0x8f1   : > { %11157 = vmatprep.mubr.msk.f32.mxu1 %vm1206_vm4, %v11120_v44  ;;  %v12318_v31 = vpop.f32.mrb[96].mxu0 }
 0x8f2   : > { %v12319_v2 = vpop.f32.mrb[97].mxu0 }
 0x8f3   : > { %v18734_v17 = vadd.f32 %v12319_v2, %v12318_v31 }
 0x8f4   : > { %5730 = vmatmul.mubr.f32.gmra.mrb[82].mxu1 %v11119_v59 }
 0x8f5   : > { %11158 = vmatprep.mubr.msk.f32.mxu1 %vm1206_vm4, %v11124_v28  ;;  %v12321_v1 = vpop.f32.mrb[98].mxu0 }
 0x8f6   : > { %v12322_v24 = vpop.f32.mrb[99].mxu0 }
 0x8f7   : > { %v18736_v37 = vadd.f32 %v12322_v24, %v12321_v1 }
 0x8f8   : > { %5735 = vmatmul.mubr.f32.gmra.mrb[84].mxu1 %v11123_v11 }
 0x8f9   : > { %11159 = vmatprep.mubr.msk.f32.mxu1 %vm1206_vm4, %v11128_v34  ;;  %v12324_v38 = vpop.f32.mrb[100].mxu0 }
 0x8fa   : > { %v12325_v54 = vpop.f32.mrb[101].mxu0 }
 0x8fb   : > { %v18738_v18 = vadd.f32 %v12325_v54, %v12324_v38 }
 0x8fc   : > { %5740 = vmatmul.mubr.f32.gmra.mrb[86].mxu1 %v11127_v43 }
 0x8fd   : > { %11160 = vmatprep.mubr.msk.f32.mxu1 %vm1206_vm4, %v11132_v39 }
 0x8ff   : > { %v12327_v61 = vpop.f32.mrb[102].mxu0 }
 0x900   : > { %5745 = vmatmul.mubr.f32.gmra.mrb[88].mxu1 %v11131_v50  ;;  %v12328_v46 = vpop.f32.mrb[103].mxu0 }
 0x901   : > { %11161 = vmatprep.mubr.msk.f32.mxu1 %vm1206_vm4, %v11136_v55  ;;  %v18740_v8 = vadd.f32 %v12328_v46, %v12327_v61 }
 0x904   : > { %5750 = vmatmul.mubr.f32.gmra.mrb[90].mxu1 %v11135_v53 }
 0x905   : > { %11162 = vmatprep.mubr.msk.f32.mxu1 %vm1206_vm4, %v11140_v6 }
 0x908   : > { %5755 = vmatmul.mubr.f32.gmra.mrb[92].mxu1 %v11139_v3 }
 0x909   : > { %11163 = vmatprep.mubr.msk.f32.mxu1 %vm1206_vm4, %v11144_v14 }
 0x90c   : > { %5760 = vmatmul.mubr.f32.gmra.mrb[94].mxu1 %v11143_v22 }
 0x90d   : > { %11164 = vmatprep.mubr.msk.f32.mxu1 %vm1206_vm4, %v11148_v7 }
 0x910   : > { %5765 = vmatmul.mubr.f32.gmra.mrb[96].mxu1 %v11147_v63 }
 0x911   : > { %11165 = vmatprep.mubr.msk.f32.mxu1 %vm1206_vm4, %v11152_v36 }
 0x914   : > { %5770 = vmatmul.mubr.f32.gmra.mrb[98].mxu1 %v11151_v56 }
 0x94e   : > { %v12330_v0 = vpop.f32.mrb[104].mxu0 }
 0x94f   : > { %v12331_v33 = vpop.f32.mrb[105].mxu0 }
 0x950   : > { %v18742_v20 = vadd.f32 %v12331_v33, %v12330_v0 }
 0x952   : > { %v12333_v9 = vpop.f32.mrb[106].mxu0 }
 0x953   : > { %v12334_v44 = vpop.f32.mrb[107].mxu0 }
 0x954   : > { %v18744_v59 = vadd.f32 %v12334_v44, %v12333_v9 }
 0x956   : > { %v12336_v28 = vpop.f32.mrb[108].mxu0 }
 0x957   : > { %v12337_v11 = vpop.f32.mrb[109].mxu0 }
 0x958   : > { %v18746_v34 = vadd.f32 %v12337_v11, %v12336_v28 }
 0x95a   : > { %v12339_v43 = vpop.f32.mrb[110].mxu0 }
 0x95b   : > { %v12340_v39 = vpop.f32.mrb[111].mxu0 }
 0x95c   : > { %v18748_v50 = vadd.f32 %v12340_v39, %v12339_v43 }
 0x95e   : > { %v12342_v55 = vpop.f32.mrb[112].mxu0 }
 0x95f   : > { %v12343_v53 = vpop.f32.mrb[113].mxu0 }
 0x960   : > { %v18750_v6 = vadd.f32 %v12343_v53, %v12342_v55 }
 0x983   : > { %v5346_v3 = vpop.f32.mrb[48].mxu1 }
 0x984   : > { %v18753_v14 = vadd.f32 %v5346_v3, %v18489_v49  ;;  %v13214_v22 = vpop.f32.mrb[49].mxu1 }
 0x987   : > { %v5351_v7 = vpop.f32.mrb[50].mxu1 }
 0x988   : > { %v18756_v63 = vadd.f32 %v5351_v7, %v18498_v29  ;;  %v13217_v36 = vpop.f32.mrb[51].mxu1 }
 0x98b   : > { %v5356_v56 = vpop.f32.mrb[52].mxu1 }
 0x98c   : > { %v18759_v42 = vadd.f32 %v5356_v56, %v18507_v52  ;;  %v13220_v51 = vpop.f32.mrb[53].mxu1 }
 0x98f   : > { %v5361_v30 = vpop.f32.mrb[54].mxu1 }
 0x990   : > { %v18762_v60 = vadd.f32 %v5361_v30, %v18516_v27  ;;  %v13223_v4 = vpop.f32.mrb[55].mxu1 }
 0x993   : > { %v5366_v35 = vpop.f32.mrb[56].mxu1 }
 0x994   : > { %v18765_v49 = vadd.f32 %v5366_v35, %v18525_v26  ;;  %v13226_v23 = vpop.f32.mrb[57].mxu1 }
 0x997   : > { %v5371_v48 = vpop.f32.mrb[58].mxu1 }
 0x998   : > { %v18768_v29 = vadd.f32 %v5371_v48, %v18534_v47  ;;  %v13229_v40 = vpop.f32.mrb[59].mxu1 }
 0x99b   : > { %v5376_v58 = vpop.f32.mrb[60].mxu1 }
 0x99c   : > { %v18771_v52 = vadd.f32 %v5376_v58, %v18540_v41  ;;  %v13232_v57 = vpop.f32.mrb[61].mxu1 }
 0x99f   : > { %v5381_v31 = vpop.f32.mrb[62].mxu1 }
 0x9a0   : > { %v18774_v27 = vadd.f32 %v5381_v31, %v18545_v5  ;;  %v13235_v2 = vpop.f32.mrb[63].mxu1 }
 0x9a3   : > { %v5386_v1 = vpop.f32.mrb[64].mxu1 }
 0x9a4   : > { %v18777_v26 = vadd.f32 %v5386_v1, %v18548_v21  ;;  %v13238_v24 = vpop.f32.mrb[65].mxu1 }
 0x9a7   : > { %v5391_v38 = vpop.f32.mrb[66].mxu1 }
 0x9a8   : > { %v18780_v47 = vadd.f32 %v5391_v38, %v18551_v45  ;;  %v13241_v54 = vpop.f32.mrb[67].mxu1 }
 0x9ab   : > { %v5396_v61 = vpop.f32.mrb[68].mxu1 }
 0x9ac   : > { %v18783_v41 = vadd.f32 %v5396_v61, %v18554_v25  ;;  %v13244_v46 = vpop.f32.mrb[69].mxu1 }
 0x9ad   : > { %v18853_v46 = vld [vmem:[%s20162_s5] ss:$0 sm:$0xff] }
 0x9af   : > { %v5401_v0 = vpop.f32.mrb[70].mxu1 }
 0x9b0   : > { %v18786_v5 = vadd.f32 %v5401_v0, %v18557_v16  ;;  %v13247_v33 = vpop.f32.mrb[71].mxu1 }
 0x9b3   : > { %v5406_v9 = vpop.f32.mrb[72].mxu1 }
 0x9b4   : > { %v18789_v21 = vadd.f32 %v5406_v9, %v18560_v62  ;;  %v13250_v44 = vpop.f32.mrb[73].mxu1 }
 0x9b7   : > { %v5711_v28 = vpop.f32.mrb[74].mxu1 }
 0x9b8   : > { %v5712_v45 = vadd.f32 %v18726_v32, %v5711_v28  ;;  %v5713_v11 = vpop.f32.mrb[75].mxu1 }
 0x9ba   : > { %13256 = vmatmul.mubr.msk.f32.vlgmr.msra.gmra.mrb[114].mxu0 %vm1206_vm4, %v5712_v45 }
 0x9bb   : > { %v5716_v43 = vpop.f32.mrb[76].mxu1  ;;  %13258 = vmatprep.mubr.msk.f32.mxu0 %vm15594_vm5, %v20206_v12 }
 0x9bc   : > { %v5717_v25 = vadd.f32 %v18728_v10, %v5716_v43  ;;  %v5718_v16 = vpop.f32.mrb[77].mxu1 }
 0x9be   : > { %13259 = vmatmul.mubr.msk.f32.gmra.mrb[116].mxu0 %vm1206_vm4, %v5717_v25 }
 0x9bf   : > { %v5721_v39 = vpop.f32.mrb[78].mxu1  ;;  %13261 = vmatprep.mubr.msk.f32.mxu0 %vm15594_vm5, %v20206_v12 }
 0x9c0   : > { %v5722_v62 = vadd.f32 %v18730_v13, %v5721_v39  ;;  %v5723_v55 = vpop.f32.mrb[79].mxu1 }
 0x9c2   : > { %13262 = vmatmul.mubr.msk.f32.gmra.mrb[118].mxu0 %vm1206_vm4, %v5722_v62 }
 0x9c3   : > { %v5726_v32 = vpop.f32.mrb[80].mxu1  ;;  %13264 = vmatprep.mubr.msk.f32.mxu0 %vm15594_vm5, %v20206_v12 }
 0x9c4   : > { %v5727_v53 = vadd.f32 %v18732_v15, %v5726_v32  ;;  %v5728_v3 = vpop.f32.mrb[81].mxu1 }
 0x9c6   : > { %13265 = vmatmul.mubr.msk.f32.gmra.mrb[120].mxu0 %vm1206_vm4, %v5727_v53 }
 0x9c7   : > { %v5731_v10 = vpop.f32.mrb[82].mxu1  ;;  %13267 = vmatprep.mubr.msk.f32.mxu0 %vm15594_vm5, %v20206_v12 }
 0x9c8   : > { %v5732_v22 = vadd.f32 %v18734_v17, %v5731_v10  ;;  %v5733_v7 = vpop.f32.mrb[83].mxu1 }
 0x9ca   : > { %13268 = vmatmul.mubr.msk.f32.gmra.mrb[122].mxu0 %vm1206_vm4, %v5732_v22 }
 0x9cb   : > { %v5736_v13 = vpop.f32.mrb[84].mxu1  ;;  %13270 = vmatprep.mubr.msk.f32.mxu0 %vm15594_vm5, %v20206_v12 }
 0x9cc   : > { %v5737_v36 = vadd.f32 %v18736_v37, %v5736_v13  ;;  %v5738_v56 = vpop.f32.mrb[85].mxu1 }
 0x9ce   : > { %13271 = vmatmul.mubr.msk.f32.gmra.mrb[124].mxu0 %vm1206_vm4, %v5737_v36 }
 0x9cf   : > { %v5741_v15 = vpop.f32.mrb[86].mxu1  ;;  %13273 = vmatprep.mubr.msk.f32.mxu0 %vm15594_vm5, %v20206_v12 }
 0x9d0   : > { %v5742_v51 = vadd.f32 %v18738_v18, %v5741_v15  ;;  %v5743_v30 = vpop.f32.mrb[87].mxu1 }
 0x9d2   : > { %13274 = vmatmul.mubr.msk.f32.gmra.mrb[126].mxu0 %vm1206_vm4, %v5742_v51 }
 0x9d3   : > { %v5746_v17 = vpop.f32.mrb[88].mxu1  ;;  %13276 = vmatprep.mubr.msk.f32.mxu0 %vm15594_vm5, %v20206_v12 }
 0x9d4   : > { %v5747_v4 = vadd.f32 %v18740_v8, %v5746_v17  ;;  %v5748_v35 = vpop.f32.mrb[89].mxu1 }
 0x9d6   : > { %13277 = vmatmul.mubr.msk.f32.gmra.mrb[128].mxu0 %vm1206_vm4, %v5747_v4 }
 0x9d7   : > { %v5751_v37 = vpop.f32.mrb[90].mxu1  ;;  %13279 = vmatprep.mubr.msk.f32.mxu0 %vm15594_vm5, %v20206_v12 }
 0x9d8   : > { %v5752_v23 = vadd.f32 %v18742_v20, %v5751_v37  ;;  %v5753_v48 = vpop.f32.mrb[91].mxu1 }
 0x9da   : > { %13280 = vmatmul.mubr.msk.f32.gmra.mrb[130].mxu0 %vm1206_vm4, %v5752_v23 }
 0x9db   : > { %v5756_v18 = vpop.f32.mrb[92].mxu1  ;;  %13282 = vmatprep.mubr.msk.f32.mxu0 %vm15594_vm5, %v20206_v12 }
 0x9dc   : > { %v5757_v40 = vadd.f32 %v18744_v59, %v5756_v18  ;;  %v5758_v58 = vpop.f32.mrb[93].mxu1 }
 0x9de   : > { %13283 = vmatmul.mubr.msk.f32.gmra.mrb[132].mxu0 %vm1206_vm4, %v5757_v40 }
 0x9df   : > { %v5761_v8 = vpop.f32.mrb[94].mxu1  ;;  %13285 = vmatprep.mubr.msk.f32.mxu0 %vm15594_vm5, %v20206_v12 }
 0x9e0   : > { %v5762_v57 = vadd.f32 %v18746_v34, %v5761_v8  ;;  %v5763_v31 = vpop.f32.mrb[95].mxu1  ;;  %v11187_v34 = vld [vmem:[%s20163_s6 + $0x20] sm:$0xff] }
 0x9e2   : > { %13286 = vmatmul.mubr.msk.f32.gmra.mrb[134].mxu0 %vm1206_vm4, %v5762_v57 }
 0x9e3   : > { %v5766_v20 = vpop.f32.mrb[96].mxu1  ;;  %13288 = vmatprep.mubr.msk.f32.mxu0 %vm15594_vm5, %v20206_v12 }
 0x9e4   : > { %v5767_v2 = vadd.f32 %v18748_v50, %v5766_v20  ;;  %v5768_v1 = vpop.f32.mrb[97].mxu1  ;;  %v5993_v50 = vld [vmem:[%s20163_s6] sm:$0xff] }
 0x9e5   : > { %13320 = vmatprep.mubr.msk.f32.mxu1 %vm5997_vm6, %v5993_v50 }
 0x9e6   : > { %13289 = vmatmul.mubr.msk.f32.gmra.mrb[136].mxu0 %vm1206_vm4, %v5767_v2 }
 0x9e7   : > { %v5771_v59 = vpop.f32.mrb[98].mxu1  ;;  %13291 = vmatprep.mubr.msk.f32.mxu0 %vm15594_vm5, %v20206_v12 }
 0x9e8   : > { %v5772_v24 = vadd.f32 %v18750_v6, %v5771_v59  ;;  %v5773_v38 = vpop.f32.mrb[99].mxu1 }
 0x9ea   : > { %13292 = vmatmul.mubr.msk.f32.gmra.mrb[138].mxu0 %vm1206_vm4, %v5772_v24 }
 0x9eb   : > { %13352 = vmatprep.mubr.msk.f32.mxu0 %vm5997_vm6, %v11187_v34 }
 0xa8d   : > { %v5883_v54 = vpop.f32.mrb[114].mxu0 }
 0xa8e   : > { %v5947_v61 = vadd.f32 %v5883_v54, %v18753_v14  ;;  %v13257_v6 = vpop.f32.mrb[115].mxu0 }
 0xa90   : > { %v5967_v33 = vadd.f32 %v18853_v46, %v5947_v61 }
 0xa91   : > { %v5888_v0 = vpop.f32.mrb[116].mxu0 }
 0xa92   : > { %v5948_v9 = vadd.f32 %v5888_v0, %v18756_v63  ;;  %v13260_v44 = vpop.f32.mrb[117].mxu0  ;;  %v5980_v11 = vmax.f32 %v5967_v33, 0.0 }
 0xa94   : > { %v5968_v28 = vadd.f32 %v18853_v46, %v5948_v9 }
 0xa95   : > { %v5893_v45 = vpop.f32.mrb[118].mxu0 }
 0xa96   : > { %v5981_v43 = vmax.f32 %v5968_v28, 0.0  ;;  %v5949_v25 = vadd.f32 %v5893_v45, %v18759_v42  ;;  %v13263_v14 = vpop.f32.mrb[119].mxu0 }
 0xa97   : > { %v11189_v14 = vld [vmem:[%s20163_s6 + $0x30] sm:$0xff] }
 0xa98   : > { %v18859_v16 = vpack.c.bf16 %v5981_v43, %v5980_v11  ;;  %v5969_v62 = vadd.f32 %v18853_v46, %v5949_v25  ;;  %v11188_v25 = vld [vmem:[%s20163_s6 + $0x28] sm:$0xff] }
 0xa99   : > { %v5898_v39 = vpop.f32.mrb[120].mxu0 }
 0xa9a   : > { %v5950_v55 = vadd.f32 %v5898_v39, %v18762_v60  ;;  %14752 = vmatprep.subr.bf16.mxu1 %v18859_v16  ;;  %14776 = vmatprep.subr.bf16.mxu0 %v18859_v16  ;;  %v13266_v63 = vpop.f32.mrb[121].mxu0  ;;  %v5982_v53 = vmax.f32 %v5969_v62, 0.0  ;;  %v5994_v39 = vld [vmem:[%s20163_s6 + $0x8] sm:$0xff] }
 0xa9b   : > { %14754 = vmatpush3.bf16.msra.mxu1 %v18859_v16  ;;  %14778 = vmatpush3.bf16.msra.mxu0 %v18859_v16  ;;  %v11198_v63 = vld [vmem:[%s20164_s7 + $0x30] sm:$0xff] }
 0xa9c   : > { %v5970_v32 = vadd.f32 %v18853_v46, %v5950_v55  ;;  %v5995_v55 = vld [vmem:[%s20163_s6 + $0x10] sm:$0xff] }
 0xa9d   : > { %v5903_v42 = vpop.f32.mrb[122].mxu0 }
 0xa9e   : > { %v5983_v3 = vmax.f32 %v5970_v32, 0.0  ;;  %v5951_v10 = vadd.f32 %v5903_v42, %v18765_v49  ;;  %v13269_v22 = vpop.f32.mrb[123].mxu0  ;;  %v11199_v32 = vld [vmem:[%s20164_s7 + $0x38] sm:$0xff] }
 0xa9f   : > { %v11190_v42 = vld [vmem:[%s20163_s6 + $0x38] sm:$0x1]  ;;  %v11226_v22 = vld [vmem:[%s20163_s6 + $0x68] sm:$0xff] }
 0xaa0   : > { %v18869_v7 = vpack.c.bf16 %v5983_v3, %v5982_v53  ;;  %v5971_v13 = vadd.f32 %v18853_v46, %v5951_v10  ;;  %v11225_v53 = vld [vmem:[%s20163_s6 + $0x60] sm:$0xff]  ;;  %v5996_v3 = vld [vmem:[%s20163_s6 + $0x18] sm:$0x1]  ;;  %v14803_v10 = vpack.c.bf16 %v11199_v32, %v11198_v63  ;;  %v11236_v32 = vld [vmem:[%s20164_s7 + $0x70] sm:$0xff] }
 0xaa1   : > { %v5908_v60 = vpop.f32.mrb[124].mxu0  ;;  %v11296_v63 = vld [vmem:[%s20163_s6 + $0xf8] sm:$0x1] }
 0xaa2   : > { %v5952_v36 = vadd.f32 %v5908_v60, %v18768_v29  ;;  %14756 = vmatprep.subr.bf16.mxu1 %v18869_v7  ;;  %14780 = vmatprep.subr.bf16.mxu0 %v18869_v7  ;;  %v13272_v56 = vpop.f32.mrb[125].mxu0  ;;  %v5984_v51 = vmax.f32 %v5971_v13, 0.0  ;;  %v11227_v60 = vld [vmem:[%s20163_s6 + $0x70] sm:$0xff]  ;;  %v11228_v13 = vld [vmem:[%s20163_s6 + $0x78] sm:$0x1] }
 0xaa3   : > { %14758 = vmatpush3.bf16.msra.mxu1 %v18869_v7  ;;  %14782 = vmatpush3.bf16.msra.mxu0 %v18869_v7  ;;  %v11243_v56 = vld [vmem:[%s20163_s6 + $0x88] sm:$0xff] }
 0xaa4   : > { %v5972_v15 = vadd.f32 %v18853_v46, %v5952_v36  ;;  %v11242_v36 = vld [vmem:[%s20163_s6 + $0x80] sm:$0xff] }
 0xaa5   : > { %v5913_v49 = vpop.f32.mrb[126].mxu0 }
 0xaa6   : > { %v5985_v30 = vmax.f32 %v5972_v15, 0.0  ;;  %v5953_v17 = vadd.f32 %v5913_v49, %v18771_v52  ;;  %v13275_v4 = vpop.f32.mrb[127].mxu0  ;;  %v11244_v15 = vld [vmem:[%s20163_s6 + $0x90] sm:$0xff]  ;;  %v11245_v49 = vld [vmem:[%s20163_s6 + $0x98] sm:$0x1] }
 0xaa7   : > { %v6100_v4 = vld [vmem:[%s20164_s7 + $0x8] sm:$0xff] }
 0xaa8   : > { %v18879_v35 = vpack.c.bf16 %v5985_v30, %v5984_v51  ;;  %v5973_v37 = vadd.f32 %v18853_v46, %v5953_v17  ;;  %v11276_v51 = vld [vmem:[%s20163_s6 + $0xc0] sm:$0xff]  ;;  %v11277_v30 = vld [vmem:[%s20163_s6 + $0xc8] sm:$0xff] }
 0xaa9   : > { %v5918_v29 = vpop.f32.mrb[128].mxu0  ;;  %v6099_v17 = vld [vmem:[%s20164_s7] sm:$0xff] }
 0xaaa   : > { %v5954_v23 = vadd.f32 %v5918_v29, %v18774_v27  ;;  %14760 = vmatprep.subr.bf16.mxu1 %v18879_v35  ;;  %14784 = vmatprep.subr.bf16.mxu0 %v18879_v35  ;;  %v13278_v48 = vpop.f32.mrb[129].mxu0  ;;  %v5986_v40 = vmax.f32 %v5973_v37, 0.0  ;;  %v14807_v29 = vpack.c.bf16 %v6100_v4, %v6099_v17  ;;  %v6101_v37 = vld [vmem:[%s20164_s7 + $0x10] sm:$0xff]  ;;  %v11268_v17 = vld [vmem:[%s20164_s7 + $0xa0] sm:$0xff]  ;;  %v11269_v4 = vld [vmem:[%s20164_s7 + $0xa8] sm:$0xff] }
 0xaab   : > { %14762 = vmatpush3.bf16.msra.mxu1 %v18879_v35  ;;  %14786 = vmatpush3.bf16.msra.mxu0 %v18879_v35 }
 0xaac   : > { %v5974_v18 = vadd.f32 %v18853_v46, %v5954_v23  ;;  %v6102_v23 = vld [vmem:[%s20164_s7 + $0x18] sm:$0xff] }
 0xaad   : > { %v5923_v52 = vpop.f32.mrb[130].mxu0 }
 0xaae   : > { %v5987_v58 = vmax.f32 %v5974_v18, 0.0  ;;  %v5955_v8 = vadd.f32 %v5923_v52, %v18777_v26  ;;  %v13281_v57 = vpop.f32.mrb[131].mxu0  ;;  %v14811_v52 = vpack.c.bf16 %v6102_v23, %v6101_v37  ;;  %v11271_v37 = vld [vmem:[%s20164_s7 + $0xb8] sm:$0xff]  ;;  %v14935_v23 = vpack.c.bf16 %v11269_v4, %v11268_v17 }
 0xab0   : > { %v18889_v31 = vpack.c.bf16 %v5987_v58, %v5986_v40  ;;  %v5975_v20 = vadd.f32 %v18853_v46, %v5955_v8 }
 0xab1   : > { %v5928_v27 = vpop.f32.mrb[132].mxu0 }
 0xab2   : > { %v5956_v2 = vadd.f32 %v5928_v27, %v18780_v47  ;;  %14764 = vmatprep.subr.bf16.mxu1 %v18889_v31  ;;  %14788 = vmatprep.subr.bf16.mxu0 %v18889_v31  ;;  %v13284_v1 = vpop.f32.mrb[133].mxu0  ;;  %v5988_v24 = vmax.f32 %v5975_v20, 0.0 }
 0xab3   : > { %14766 = vmatpush3.bf16.msra.mxu1 %v18889_v31  ;;  %14790 = vmatpush3.bf16.msra.mxu0 %v18889_v31  ;;  %v11217_v1 = vld [vmem:[%s20164_s7 + $0x40] sm:$0xff] }
 0xab4   : > { %v5976_v59 = vadd.f32 %v18853_v46, %v5956_v2  ;;  %v11208_v2 = vld [vmem:[%s20163_s6 + $0x40] sm:$0xff] }
 0xab5   : > { %v5933_v26 = vpop.f32.mrb[134].mxu0 }
 0xab6   : > { %v5989_v38 = vmax.f32 %v5976_v59, 0.0  ;;  %v5957_v34 = vadd.f32 %v5933_v26, %v18783_v41  ;;  %v13287_v50 = vpop.f32.mrb[135].mxu0  ;;  %v11218_v59 = vld [vmem:[%s20164_s7 + $0x48] sm:$0xff]  ;;  %v11219_v26 = vld [vmem:[%s20164_s7 + $0x50] sm:$0xff] }
 0xab7   : > { %v11210_v50 = vld [vmem:[%s20163_s6 + $0x50] sm:$0xff] }
 0xab8   : > { %v18899_v54 = vpack.c.bf16 %v5989_v38, %v5988_v24  ;;  %v5977_v61 = vadd.f32 %v18853_v46, %v5957_v34  ;;  %v11220_v24 = vld [vmem:[%s20164_s7 + $0x58] sm:$0xff]  ;;  %v14839_v38 = vpack.c.bf16 %v11218_v59, %v11217_v1  ;;  %v11209_v34 = vld [vmem:[%s20163_s6 + $0x48] sm:$0xff] }
 0xab9   : > { %v5938_v47 = vpop.f32.mrb[136].mxu0 }
 0xaba   : > { %v5958_v6 = vadd.f32 %v5938_v47, %v18786_v5  ;;  %14768 = vmatprep.subr.bf16.mxu1 %v18899_v54  ;;  %14792 = vmatprep.subr.bf16.mxu0 %v18899_v54  ;;  %v13290_v0 = vpop.f32.mrb[137].mxu0  ;;  %v5990_v9 = vmax.f32 %v5977_v61, 0.0  ;;  %v14843_v47 = vpack.c.bf16 %v11220_v24, %v11219_v26  ;;  %v11211_v61 = vld [vmem:[%s20163_s6 + $0x58] sm:$0x1] }
 0xabb   : > { %14770 = vmatpush3.bf16.msra.mxu1 %v18899_v54  ;;  %14794 = vmatpush3.bf16.msra.mxu0 %v18899_v54 }
 0xabc   : > { %v5978_v33 = vadd.f32 %v18853_v46, %v5958_v6 }
 0xabd   : > { %v5943_v41 = vpop.f32.mrb[138].mxu0 }
 0xabe   : > { %v5991_v44 = vmax.f32 %v5978_v33, 0.0  ;;  %v5959_v28 = vadd.f32 %v5943_v41, %v18789_v21  ;;  %v13293_v45 = vpop.f32.mrb[139].mxu0  ;;  %v11196_v21 = vld [vmem:[%s20164_s7 + $0x20] sm:$0xff]  ;;  %v11235_v41 = vld [vmem:[%s20164_s7 + $0x68] sm:$0xff] }
 0xabf   : > { %v11234_v33 = vld [vmem:[%s20164_s7 + $0x60] sm:$0xff] }
 0xac0   : > { %v18909_v11 = vpack.c.bf16 %v5991_v44, %v5990_v9  ;;  %v5979_v5 = vadd.f32 %v18853_v46, %v5959_v28  ;;  %v11197_v46 = vld [vmem:[%s20164_s7 + $0x28] sm:$0xff]  ;;  %v14871_v9 = vpack.c.bf16 %v11235_v41, %v11234_v33 }
 0xac1   : > { %v14799_v62 = vpack.c.bf16 %v11197_v46, %v11196_v21  ;;  %v11303_v33 = vld [vmem:[%s20164_s7 + $0xe8] sm:$0xff] }
 0xac2   : > { %v18912_v43 = vmax.f32 %v5979_v5, 0.0  ;;  %14772 = vmatprep.subr.bf16.mxu1 %v18909_v11  ;;  %14796 = vmatprep.subr.bf16.mxu0 %v18909_v11 }
 0xac3   : > { %14774 = vmatpush3.bf16.msra.mxu1 %v18909_v11  ;;  %14798 = vmatpush3.bf16.msra.mxu0 %v18909_v11 }
 0xac4   : > { %13318 = vmatprep.subr.msk.mxu1 %vm6010_vm7, %v18912_v43  ;;  %13350 = vmatprep.subr.msk.mxu0 %vm6010_vm7, %v18912_v43 }
 0xac7   : > { %13319 = vmatpush3.msk.msra.mxu1 %vm6010_vm7, %v18912_v43  ;;  %13351 = vmatpush3.msk.msra.mxu0 %vm6010_vm7, %v18912_v43 }
 0xac8   : > { %13353 = vmatmul.mubr.msk.f32.vlgmr.msra.gmra.mrb[140].mxu0 %vm5997_vm6, %v11188_v25  ;;  %14848 = vmatprep.subr.bf16.mxu0 %v18859_v16  ;;  %v11278_v25 = vld [vmem:[%s20163_s6 + $0xd0] sm:$0xff] }
 0xac9   : > { %14850 = vmatpush3.bf16.msra.mxu0 %v18859_v16  ;;  %13355 = vmatprep.mubr.msk.f32.mxu0 %vm5997_vm6, %v11189_v14  ;;  %v11279_v14 = vld [vmem:[%s20163_s6 + $0xd8] sm:$0x1] }
 0xaca   : > { %14852 = vmatprep.subr.bf16.mxu0 %v18869_v7  ;;  %13321 = vmatmul.mubr.msk.f32.vlgmr.msra.gmra.mrb[100].mxu1 %vm5997_vm6, %v5994_v39  ;;  %v11293_v39 = vld [vmem:[%s20163_s6 + $0xe0] sm:$0xff] }
 0xacb   : > { %13323 = vmatprep.mubr.msk.f32.mxu1 %vm5997_vm6, %v5995_v55  ;;  %14800 = vmatprep.subr.bf16.mxu1 %v14799_v62  ;;  %v11295_v55 = vld [vmem:[%s20163_s6 + $0xf0] sm:$0xff] }
 0xacc   : > { %13356 = vmatmul.mubr.msk.f32.gmra.mrb[142].mxu0 %vm5997_vm6, %v11190_v42  ;;  %14802 = vmatpush3.bf16.msra.mxu1 %v14799_v62  ;;  %v11294_v62 = vld [vmem:[%s20163_s6 + $0xe8] sm:$0xff]  ;;  %v11237_v42 = vld [vmem:[%s20164_s7 + $0x78] sm:$0xff] }
 0xacd   : > { %14854 = vmatpush3.bf16.msra.mxu0 %v18869_v7  ;;  %13458 = vmatprep.mubr.msk.f32.mxu0 %vm5997_vm6, %v11225_v53 }
 0xace   : > { %14856 = vmatprep.subr.bf16.mxu0 %v18879_v35  ;;  %13324 = vmatmul.mubr.msk.f32.gmra.mrb[102].mxu1 %vm5997_vm6, %v5996_v3 }
 0xacf   : > { %14804 = vmatprep.subr.bf16.mxu1 %v14803_v10 }
 0xad0   : > { %14806 = vmatpush3.bf16.msra.mxu1 %v14803_v10  ;;  %v14875_v10 = vpack.c.bf16 %v11237_v42, %v11236_v32  ;;  %v11348_v32 = vld [vmem:[%s20166_s9 + $0x20] sm:$0xff] }
 0xad1   : > { %14858 = vmatpush3.bf16.msra.mxu0 %v18879_v35  ;;  %14808 = vmatprep.subr.bf16.mxu1 %v14807_v29  ;;  %v11327_v42 = vld [vmem:[%s20165_s8] ss:$0 sm:$0xff] }
 0xad2   : > { %14860 = vmatprep.subr.bf16.mxu0 %v18889_v31 }
 0xad5   : > { %14862 = vmatpush3.bf16.msra.mxu0 %v18889_v31 }
 0xad6   : > { %14864 = vmatprep.subr.bf16.mxu0 %v18899_v54 }
 0xad9   : > { %14866 = vmatpush3.bf16.msra.mxu0 %v18899_v54 }
 0xada   : > { %14868 = vmatprep.subr.bf16.mxu0 %v18909_v11 }
 0xadd   : > { %14870 = vmatpush3.bf16.msra.mxu0 %v18909_v11 }
 0xade   : > { %13456 = vmatprep.subr.msk.mxu0 %vm6010_vm7, %v18912_v43 }
 0xae1   : > { %13457 = vmatpush3.msk.msra.mxu0 %vm6010_vm7, %v18912_v43 }
 0xae2   : > { %14880 = vmatprep.subr.bf16.mxu0 %v18859_v16  ;;  %13459 = vmatmul.mubr.msk.f32.vlgmr.msra.gmra.mrb[144].mxu0 %vm5997_vm6, %v11226_v22  ;;  %v11251_v22 = vld [vmem:[%s20164_s7 + $0x80] sm:$0xff] }
 0xae3   : > { %14882 = vmatpush3.bf16.msra.mxu0 %v18859_v16  ;;  %13461 = vmatprep.mubr.msk.f32.mxu0 %vm5997_vm6, %v11227_v60  ;;  %v11252_v60 = vld [vmem:[%s20164_s7 + $0x88] sm:$0xff] }
 0xae4   : > { %14884 = vmatprep.subr.bf16.mxu0 %v18869_v7 }
 0xae6   : > { %13462 = vmatmul.mubr.msk.f32.gmra.mrb[146].mxu0 %vm5997_vm6, %v11228_v13 }
 0xae7   : > { %14886 = vmatpush3.bf16.msra.mxu0 %v18869_v7  ;;  %13504 = vmatprep.mubr.msk.f32.mxu0 %vm5997_vm6, %v11242_v36 }
 0xae8   : > { %14888 = vmatprep.subr.bf16.mxu0 %v18879_v35 }
 0xaeb   : > { %14890 = vmatpush3.bf16.msra.mxu0 %v18879_v35 }
 0xaec   : > { %14892 = vmatprep.subr.bf16.mxu0 %v18889_v31 }
 0xaef   : > { %14894 = vmatpush3.bf16.msra.mxu0 %v18889_v31 }
 0xaf0   : > { %14896 = vmatprep.subr.bf16.mxu0 %v18899_v54 }
 0xaf3   : > { %14898 = vmatpush3.bf16.msra.mxu0 %v18899_v54 }
 0xaf4   : > { %14900 = vmatprep.subr.bf16.mxu0 %v18909_v11 }
 0xaf7   : > { %14902 = vmatpush3.bf16.msra.mxu0 %v18909_v11 }
 0xaf8   : > { %13502 = vmatprep.subr.msk.mxu0 %vm6010_vm7, %v18912_v43 }
 0xafb   : > { %13503 = vmatpush3.msk.msra.mxu0 %vm6010_vm7, %v18912_v43 }
 0xafc   : > { %14944 = vmatprep.subr.bf16.mxu0 %v18859_v16  ;;  %13505 = vmatmul.mubr.msk.f32.vlgmr.msra.gmra.mrb[148].mxu0 %vm5997_vm6, %v11243_v56  ;;  %v14903_v56 = vpack.c.bf16 %v11252_v60, %v11251_v22 }
 0xafd   : > { %14946 = vmatpush3.bf16.msra.mxu0 %v18859_v16  ;;  %13507 = vmatprep.mubr.msk.f32.mxu0 %vm5997_vm6, %v11244_v15  ;;  %v11253_v15 = vld [vmem:[%s20164_s7 + $0x90] sm:$0xff] }
 0xafe   : > { %14948 = vmatprep.subr.bf16.mxu0 %v18869_v7 }
 0xb00   : > { %13508 = vmatmul.mubr.msk.f32.gmra.mrb[150].mxu0 %vm5997_vm6, %v11245_v49  ;;  %v11254_v49 = vld [vmem:[%s20164_s7 + $0x98] sm:$0xff] }
 0xb01   : > { %14950 = vmatpush3.bf16.msra.mxu0 %v18869_v7  ;;  %13596 = vmatprep.mubr.msk.f32.mxu0 %vm5997_vm6, %v11276_v51  ;;  %v14907_v51 = vpack.c.bf16 %v11254_v49, %v11253_v15 }
 0xb02   : > { %14952 = vmatprep.subr.bf16.mxu0 %v18879_v35 }
 0xb05   : > { %14954 = vmatpush3.bf16.msra.mxu0 %v18879_v35 }
 0xb06   : > { %14956 = vmatprep.subr.bf16.mxu0 %v18889_v31 }
 0xb09   : > { %14958 = vmatpush3.bf16.msra.mxu0 %v18889_v31 }
 0xb0a   : > { %14960 = vmatprep.subr.bf16.mxu0 %v18899_v54 }
 0xb0d   : > { %14962 = vmatpush3.bf16.msra.mxu0 %v18899_v54 }
 0xb0e   : > { %14964 = vmatprep.subr.bf16.mxu0 %v18909_v11 }
 0xb11   : > { %14966 = vmatpush3.bf16.msra.mxu0 %v18909_v11 }
 0xb12   : > { %13594 = vmatprep.subr.msk.mxu0 %vm6010_vm7, %v18912_v43 }
 0xb15   : > { %13595 = vmatpush3.msk.msra.mxu0 %vm6010_vm7, %v18912_v43 }
 0xb16   : > { %14976 = vmatprep.subr.bf16.mxu0 %v18859_v16  ;;  %13597 = vmatmul.mubr.msk.f32.vlgmr.msra.gmra.mrb[152].mxu0 %vm5997_vm6, %v11277_v30  ;;  %v11259_v30 = vld [vmem:[%s20163_s6 + $0xa0] sm:$0xff] }
 0xb17   : > { %14978 = vmatpush3.bf16.msra.mxu0 %v18859_v16  ;;  %13599 = vmatprep.mubr.msk.f32.mxu0 %vm5997_vm6, %v11278_v25 }
 0xb18   : > { %14980 = vmatprep.subr.bf16.mxu0 %v18869_v7 }
 0xb1a   : > { %13600 = vmatmul.mubr.msk.f32.gmra.mrb[154].mxu0 %vm5997_vm6, %v11279_v14  ;;  %v11313_v14 = vld [vmem:[%s20163_s6 + $0x118] sm:$0x1] }
 0xb1b   : > { %14982 = vmatpush3.bf16.msra.mxu0 %v18869_v7  ;;  %13642 = vmatprep.mubr.msk.f32.mxu0 %vm5997_vm6, %v11293_v39 }
 0xb1c   : > { %14984 = vmatprep.subr.bf16.mxu0 %v18879_v35 }
 0xb1f   : > { %14986 = vmatpush3.bf16.msra.mxu0 %v18879_v35 }
 0xb20   : > { %14988 = vmatprep.subr.bf16.mxu0 %v18889_v31 }
 0xb23   : > { %14990 = vmatpush3.bf16.msra.mxu0 %v18889_v31 }
 0xb24   : > { %14992 = vmatprep.subr.bf16.mxu0 %v18899_v54 }
 0xb27   : > { %14994 = vmatpush3.bf16.msra.mxu0 %v18899_v54 }
 0xb28   : > { %14996 = vmatprep.subr.bf16.mxu0 %v18909_v11 }
 0xb2b   : > { %14998 = vmatpush3.bf16.msra.mxu0 %v18909_v11 }
 0xb2c   : > { %13640 = vmatprep.subr.msk.mxu0 %vm6010_vm7, %v18912_v43 }
 0xb2f   : > { %13641 = vmatpush3.msk.msra.mxu0 %vm6010_vm7, %v18912_v43 }
 0xb30   : > { %13643 = vmatmul.mubr.msk.f32.vlgmr.msra.gmra.mrb[156].mxu0 %vm5997_vm6, %v11294_v62 }
 0xb31   : > { %13645 = vmatprep.mubr.msk.f32.mxu0 %vm5997_vm6, %v11295_v55 }
 0xb34   : > { %13646 = vmatmul.mubr.msk.f32.gmra.mrb[158].mxu0 %vm5997_vm6, %v11296_v63  ;;  %v7876_v63 = vld [vmem:[%s20166_s9] sm:$0xff] }
 0xb35   : > { %13716 = vmatprep.mubr.msk.f32.mxu0 %vm7878_vm9, %v7876_v63  ;;  %v9471_v63 = vld [vmem:[%s20169_s12] sm:$0xff] }
 0xb9b   : > { %v13354_v48 = vpop.f32.mrb[140].mxu0 }
 0xb9c   : > { %v6186_v18 = vpop.f32.mrb[141].mxu0 }
 0xb9d   : > { %13366 = vmatprep.mubr.msk.f32.mxu1 %vm6210_vm8, %v6186_v18  ;;  %v13322_v40 = vpop.f32.mrb[100].mxu1  ;;  %v11261_v18 = vld [vmem:[%s20163_s6 + $0xb0] sm:$0xff] }
 0xb9e   : > { %13367 = vmatmul.mubr.msk.f32.vlgmr.msra.gmra.mrb[104].mxu1 %vm6210_vm8, %v13354_v48  ;;  %v6080_v58 = vpop.f32.mrb[101].mxu1  ;;  %v11260_v48 = vld [vmem:[%s20163_s6 + $0xa8] sm:$0xff] }
 0xb9f   : > { %14810 = vmatpush3.bf16.msra.mxu1 %v14807_v29  ;;  %v13357_v8 = vpop.f32.mrb[142].mxu0  ;;  %v11270_v29 = vld [vmem:[%s20164_s7 + $0xb0] sm:$0xff] }
 0xba0   : > { %v6196_v57 = vpop.f32.mrb[143].mxu0  ;;  %14812 = vmatprep.subr.bf16.mxu1 %v14811_v52 }
 0xba1   : > { %13369 = vmatprep.mubr.msk.f32.mxu1 %vm6210_vm8, %v6196_v57  ;;  %v13325_v27 = vpop.f32.mrb[102].mxu1  ;;  %v11285_v57 = vld [vmem:[%s20164_s7 + $0xc0] sm:$0xff] }
 0xba2   : > { %13370 = vmatmul.mubr.msk.f32.gmra.mrb[106].mxu1 %vm6210_vm8, %v13357_v8  ;;  %v6090_v20 = vpop.f32.mrb[103].mxu1 }
 0xba3   : > { %14814 = vmatpush3.bf16.msra.mxu1 %v14811_v52  ;;  %13380 = vmatprep.mubr.msk.f32.mxu1 %vm6210_vm8, %v6080_v58  ;;  %v14939_v52 = vpack.c.bf16 %v11271_v37, %v11270_v29  ;;  %v7877_v37 = vld [vmem:[%s20166_s9 + $0x8] sm:$0x1] }
 0xba4   : > { %14816 = vmatprep.subr.bf16.mxu1 %v18859_v16 }
 0xba6   : > { %13381 = vmatmul.mubr.msk.f32.vlgmr.msra.gmra.mrb[104].mxu1 %vm6210_vm8, %v13322_v40  ;;  %v11262_v40 = vld [vmem:[%s20163_s6 + $0xb8] sm:$0x1] }
 0xba7   : > { %14818 = vmatpush3.bf16.msra.mxu1 %v18859_v16  ;;  %13383 = vmatprep.mubr.msk.f32.mxu1 %vm6210_vm8, %v6090_v20 }
 0xba8   : > { %14820 = vmatprep.subr.bf16.mxu1 %v18869_v7 }
 0xbaa   : > { %13384 = vmatmul.mubr.msk.f32.gmra.mrb[106].mxu1 %vm6210_vm8, %v13325_v27  ;;  %v11286_v27 = vld [vmem:[%s20164_s7 + $0xc8] sm:$0xff] }
 0xbab   : > { %14822 = vmatpush3.bf16.msra.mxu1 %v18869_v7  ;;  %13412 = vmatprep.mubr.msk.f32.mxu1 %vm5997_vm6, %v11208_v2  ;;  %v14967_v20 = vpack.c.bf16 %v11286_v27, %v11285_v57  ;;  %v11339_v57 = vld [vmem:[%s20167_s10 + $0x58] sm:$0xff] }
 0xbac   : > { %14824 = vmatprep.subr.bf16.mxu1 %v18879_v35  ;;  %v11332_v27 = vld [vmem:[%s20166_s9 + $0x18] sm:$0x1] }
 0xbaf   : > { %14826 = vmatpush3.bf16.msra.mxu1 %v18879_v35 }
 0xbb0   : > { %14828 = vmatprep.subr.bf16.mxu1 %v18889_v31 }
 0xbb3   : > { %14830 = vmatpush3.bf16.msra.mxu1 %v18889_v31 }
 0xbb4   : > { %14832 = vmatprep.subr.bf16.mxu1 %v18899_v54 }
 0xbb5   : > { %v13460_v6 = vpop.f32.mrb[144].mxu0 }
 0xbb6   : > { %v6696_v0 = vpop.f32.mrb[145].mxu0 }
 0xbb7   : > { %14834 = vmatpush3.bf16.msra.mxu1 %v18899_v54 }
 0xbb8   : > { %14836 = vmatprep.subr.bf16.mxu1 %v18909_v11 }
 0xbb9   : > { %v13463_v44 = vpop.f32.mrb[146].mxu0 }
 0xbba   : > { %v6706_v28 = vpop.f32.mrb[147].mxu0 }
 0xbbb   : > { %14838 = vmatpush3.bf16.msra.mxu1 %v18909_v11 }
 0xbbc   : > { %13410 = vmatprep.subr.msk.mxu1 %vm6010_vm7, %v18912_v43 }
 0xbbf   : > { %13411 = vmatpush3.msk.msra.mxu1 %vm6010_vm7, %v18912_v43 }
 0xbc0   : > { %13413 = vmatmul.mubr.msk.f32.vlgmr.msra.gmra.mrb[108].mxu1 %vm5997_vm6, %v11209_v34  ;;  %14840 = vmatprep.subr.bf16.mxu1 %v14839_v38  ;;  %v11287_v34 = vld [vmem:[%s20164_s7 + $0xd0] sm:$0xff] }
 0xbc1   : > { %13415 = vmatprep.mubr.msk.f32.mxu1 %vm5997_vm6, %v11210_v50  ;;  %14842 = vmatpush3.bf16.msra.mxu1 %v14839_v38  ;;  %v11288_v50 = vld [vmem:[%s20164_s7 + $0xd8] sm:$0xff] }
 0xbc2   : > { %14844 = vmatprep.subr.bf16.mxu1 %v14843_v47 }
 0xbc4   : > { %13416 = vmatmul.mubr.msk.f32.gmra.mrb[110].mxu1 %vm5997_vm6, %v11211_v61 }
 0xbc5   : > { %14846 = vmatpush3.bf16.msra.mxu1 %v14843_v47 }
 0xbc6   : > { %14872 = vmatprep.subr.bf16.mxu1 %v14871_v9 }
 0xbcf   : > { %v13506_v45 = vpop.f32.mrb[148].mxu0 }
 0xbd0   : > { %v6904_v5 = vpop.f32.mrb[149].mxu0 }
 0xbd3   : > { %v13509_v21 = vpop.f32.mrb[150].mxu0 }
 0xbd4   : > { %v6914_v46 = vpop.f32.mrb[151].mxu0 }
 0xbe9   : > { %v13598_v58 = vpop.f32.mrb[152].mxu0 }
 0xbea   : > { %v7320_v8 = vpop.f32.mrb[153].mxu0 }
 0xbed   : > { %v13601_v2 = vpop.f32.mrb[154].mxu0 }
 0xbee   : > { %v7330_v1 = vpop.f32.mrb[155].mxu0 }
 0xc03   : > { %v13644_v59 = vpop.f32.mrb[156].mxu0 }
 0xc04   : > { %v7528_v26 = vpop.f32.mrb[157].mxu0 }
 0xc07   : > { %v13647_v24 = vpop.f32.mrb[158].mxu0 }
 0xc08   : > { %v7538_v38 = vpop.f32.mrb[159].mxu0 }
 0xc93   : > { %v13414_v53 = vpop.f32.mrb[108].mxu1 }
 0xc94   : > { %v6488_v3 = vpop.f32.mrb[109].mxu1 }
 0xc95   : > { %13426 = vmatprep.mubr.msk.f32.mxu1 %vm6210_vm8, %v6488_v3 }
 0xc96   : > { %13427 = vmatmul.mubr.msk.f32.vlgmr.msra.gmra.mrb[104].mxu1 %vm6210_vm8, %v13414_v53 }
 0xc97   : > { %14874 = vmatpush3.bf16.msra.mxu1 %v14871_v9  ;;  %v13417_v13 = vpop.f32.mrb[110].mxu1 }
 0xc98   : > { %v6498_v36 = vpop.f32.mrb[111].mxu1  ;;  %14876 = vmatprep.subr.bf16.mxu1 %v14875_v10 }
 0xc99   : > { %13429 = vmatprep.mubr.msk.f32.mxu1 %vm6210_vm8, %v6498_v36 }
 0xc9a   : > { %13430 = vmatmul.mubr.msk.f32.gmra.mrb[106].mxu1 %vm6210_vm8, %v13417_v13 }
 0xc9b   : > { %14878 = vmatpush3.bf16.msra.mxu1 %v14875_v10  ;;  %13472 = vmatprep.mubr.msk.f32.mxu1 %vm6210_vm8, %v6696_v0  ;;  %v11302_v0 = vld [vmem:[%s20164_s7 + $0xe0] sm:$0xff] }
 0xc9c   : > { %14904 = vmatprep.subr.bf16.mxu1 %v14903_v56 }
 0xc9e   : > { %13473 = vmatmul.mubr.msk.f32.vlgmr.msra.gmra.mrb[104].mxu1 %vm6210_vm8, %v13460_v6  ;;  %v14971_v6 = vpack.c.bf16 %v11288_v50, %v11287_v34  ;;  %v11393_v34 = vld [vmem:[%s20166_s9 + $0x50] sm:$0xff]  ;;  %v11394_v50 = vld [vmem:[%s20166_s9 + $0x58] sm:$0x1] }
 0xc9f   : > { %14906 = vmatpush3.bf16.msra.mxu1 %v14903_v56  ;;  %13475 = vmatprep.mubr.msk.f32.mxu1 %vm6210_vm8, %v6706_v28  ;;  %v11304_v28 = vld [vmem:[%s20164_s7 + $0xf0] sm:$0xff] }
 0xca0   : > { %14908 = vmatprep.subr.bf16.mxu1 %v14907_v51 }
 0xca2   : > { %13476 = vmatmul.mubr.msk.f32.gmra.mrb[106].mxu1 %vm6210_vm8, %v13463_v44  ;;  %v14999_v44 = vpack.c.bf16 %v11303_v33, %v11302_v0  ;;  %v11424_v0 = vld [vmem:[%s20166_s9 + $0x78] sm:$0x1]  ;;  %v11438_v33 = vld [vmem:[%s20166_s9 + $0x80] sm:$0xff] }
 0xca3   : > { %14910 = vmatpush3.bf16.msra.mxu1 %v14907_v51  ;;  %13518 = vmatprep.mubr.msk.f32.mxu1 %vm6210_vm8, %v6904_v5 }
 0xca4   : > { %14912 = vmatprep.subr.bf16.mxu1 %v18859_v16 }
 0xca6   : > { %13519 = vmatmul.mubr.msk.f32.vlgmr.msra.gmra.mrb[104].mxu1 %vm6210_vm8, %v13506_v45  ;;  %v11305_v45 = vld [vmem:[%s20164_s7 + $0xf8] sm:$0xff] }
 0xca7   : > { %14914 = vmatpush3.bf16.msra.mxu1 %v18859_v16  ;;  %13521 = vmatprep.mubr.msk.f32.mxu1 %vm6210_vm8, %v6914_v46  ;;  %v15003_v5 = vpack.c.bf16 %v11305_v45, %v11304_v28  ;;  %v11311_v46 = vld [vmem:[%s20163_s6 + $0x108] sm:$0xff]  ;;  %v7963_v45 = vld [vmem:[%s20167_s10] sm:$0xff] }
 0xca8   : > { %14916 = vmatprep.subr.bf16.mxu1 %v18869_v7 }
 0xcaa   : > { %13522 = vmatmul.mubr.msk.f32.gmra.mrb[106].mxu1 %vm6210_vm8, %v13509_v21  ;;  %v11310_v21 = vld [vmem:[%s20163_s6 + $0x100] sm:$0xff] }
 0xcab   : > { %14918 = vmatpush3.bf16.msra.mxu1 %v18869_v7  ;;  %13550 = vmatprep.mubr.msk.f32.mxu1 %vm5997_vm6, %v11259_v30 }
 0xcac   : > { %14920 = vmatprep.subr.bf16.mxu1 %v18879_v35 }
 0xcaf   : > { %14922 = vmatpush3.bf16.msra.mxu1 %v18879_v35 }
 0xcb0   : > { %14924 = vmatprep.subr.bf16.mxu1 %v18889_v31 }
 0xcb3   : > { %14926 = vmatpush3.bf16.msra.mxu1 %v18889_v31 }
 0xcb4   : > { %14928 = vmatprep.subr.bf16.mxu1 %v18899_v54 }
 0xcb7   : > { %14930 = vmatpush3.bf16.msra.mxu1 %v18899_v54 }
 0xcb8   : > { %14932 = vmatprep.subr.bf16.mxu1 %v18909_v11 }
 0xcbb   : > { %14934 = vmatpush3.bf16.msra.mxu1 %v18909_v11 }
 0xcbc   : > { %13548 = vmatprep.subr.msk.mxu1 %vm6010_vm7, %v18912_v43 }
 0xcbf   : > { %13549 = vmatpush3.msk.msra.mxu1 %vm6010_vm7, %v18912_v43 }
 0xcc0   : > { %13551 = vmatmul.mubr.msk.f32.vlgmr.msra.gmra.mrb[112].mxu1 %vm5997_vm6, %v11260_v48  ;;  %14936 = vmatprep.subr.bf16.mxu1 %v14935_v23  ;;  %v11336_v48 = vld [vmem:[%s20167_s10 + $0x40] sm:$0xff] }
 0xcc1   : > { %13553 = vmatprep.mubr.msk.f32.mxu1 %vm5997_vm6, %v11261_v18  ;;  %14938 = vmatpush3.bf16.msra.mxu1 %v14935_v23  ;;  %v11349_v23 = vld [vmem:[%s20166_s9 + $0x28] sm:$0x1] }
 0xcc2   : > { %14940 = vmatprep.subr.bf16.mxu1 %v14939_v52  ;;  %v11337_v18 = vld [vmem:[%s20167_s10 + $0x48] sm:$0xff] }
 0xcc4   : > { %13554 = vmatmul.mubr.msk.f32.gmra.mrb[114].mxu1 %vm5997_vm6, %v11262_v40  ;;  %v11363_v40 = vld [vmem:[%s20166_s9 + $0x30] sm:$0xff] }
 0xcc5   : > { %14942 = vmatpush3.bf16.msra.mxu1 %v14939_v52  ;;  %v11331_v52 = vld [vmem:[%s20166_s9 + $0x10] sm:$0xff] }
 0xcc6   : > { %14968 = vmatprep.subr.bf16.mxu1 %v14967_v20 }
 0xd93   : > { %v13552_v47 = vpop.f32.mrb[112].mxu1 }
 0xd94   : > { %v7112_v61 = vpop.f32.mrb[113].mxu1 }
 0xd95   : > { %13564 = vmatprep.mubr.msk.f32.mxu1 %vm6210_vm8, %v7112_v61  ;;  %v11409_v61 = vld [vmem:[%s20166_s9 + $0x68] sm:$0x1] }
 0xd96   : > { %13565 = vmatmul.mubr.msk.f32.vlgmr.msra.gmra.mrb[104].mxu1 %vm6210_vm8, %v13552_v47  ;;  %v11408_v47 = vld [vmem:[%s20166_s9 + $0x60] sm:$0xff] }
 0xd97   : > { %14970 = vmatpush3.bf16.msra.mxu1 %v14967_v20  ;;  %v13555_v41 = vpop.f32.mrb[114].mxu1  ;;  %v11364_v20 = vld [vmem:[%s20166_s9 + $0x38] sm:$0x1] }
 0xd98   : > { %v7122_v9 = vpop.f32.mrb[115].mxu1  ;;  %14972 = vmatprep.subr.bf16.mxu1 %v14971_v6 }
 0xd99   : > { %13567 = vmatprep.mubr.msk.f32.mxu1 %vm6210_vm8, %v7122_v9  ;;  %v11342_v9 = vld [vmem:[%s20167_s10 + $0x70] sm:$0xff] }
 0xd9a   : > { %13568 = vmatmul.mubr.msk.f32.gmra.mrb[106].mxu1 %vm6210_vm8, %v13555_v41  ;;  %v11439_v41 = vld [vmem:[%s20166_s9 + $0x88] sm:$0x1] }
 0xd9b   : > { %14974 = vmatpush3.bf16.msra.mxu1 %v14971_v6  ;;  %13610 = vmatprep.mubr.msk.f32.mxu1 %vm6210_vm8, %v7320_v8  ;;  %v11338_v8 = vld [vmem:[%s20167_s10 + $0x50] sm:$0xff] }
 0xd9c   : > { %15000 = vmatprep.subr.bf16.mxu1 %v14999_v44  ;;  %v11423_v6 = vld [vmem:[%s20166_s9 + $0x70] sm:$0xff] }
 0xd9e   : > { %13611 = vmatmul.mubr.msk.f32.vlgmr.msra.gmra.mrb[104].mxu1 %vm6210_vm8, %v13598_v58  ;;  %v15059_v58 = vpack.c.bf16 %v11337_v18, %v11336_v48 }
 0xd9f   : > { %15002 = vmatpush3.bf16.msra.mxu1 %v14999_v44  ;;  %13613 = vmatprep.mubr.msk.f32.mxu1 %vm6210_vm8, %v7330_v1  ;;  %v15063_v1 = vpack.c.bf16 %v11339_v57, %v11338_v8  ;;  %v11343_v44 = vld [vmem:[%s20167_s10 + $0x78] sm:$0xff]  ;;  %v11359_v57 = vld [vmem:[%s20167_s10 + $0xb0] sm:$0xff] }
 0xda0   : > { %15004 = vmatprep.subr.bf16.mxu1 %v15003_v5  ;;  %v15071_v28 = vpack.c.bf16 %v11343_v44, %v11342_v9  ;;  %v11375_v9 = vld [vmem:[%s20167_s10 + $0xf8] sm:$0xff] }
 0xda2   : > { %13614 = vmatmul.mubr.msk.f32.gmra.mrb[106].mxu1 %vm6210_vm8, %v13601_v2  ;;  %v11378_v2 = vld [vmem:[%s20166_s9 + $0x40] sm:$0xff] }
 0xda3   : > { %15006 = vmatpush3.bf16.msra.mxu1 %v15003_v5  ;;  %13656 = vmatprep.mubr.msk.f32.mxu1 %vm6210_vm8, %v7528_v26  ;;  %v11341_v26 = vld [vmem:[%s20167_s10 + $0x68] sm:$0xff] }
 0xda4   : > { %15008 = vmatprep.subr.bf16.mxu1 %v18859_v16  ;;  %v7964_v5 = vld [vmem:[%s20167_s10 + $0x8] sm:$0xff] }
 0xda6   : > { %13657 = vmatmul.mubr.msk.f32.vlgmr.msra.gmra.mrb[104].mxu1 %vm6210_vm8, %v13644_v59  ;;  %v11340_v59 = vld [vmem:[%s20167_s10 + $0x60] sm:$0xff] }
 0xda7   : > { %15010 = vmatpush3.bf16.msra.mxu1 %v18859_v16  ;;  %13659 = vmatprep.mubr.msk.f32.mxu1 %vm6210_vm8, %v7538_v38  ;;  %v11319_v16 = vld [vmem:[%s20164_s7 + $0x100] sm:$0xff]  ;;  %v11379_v38 = vld [vmem:[%s20166_s9 + $0x48] sm:$0x1] }
 0xda8   : > { %15012 = vmatprep.subr.bf16.mxu1 %v18869_v7 }
 0xdaa   : > { %13660 = vmatmul.mubr.msk.f32.gmra.mrb[106].mxu1 %vm6210_vm8, %v13647_v24  ;;  %v15067_v24 = vpack.c.bf16 %v11341_v26, %v11340_v59  ;;  %v11368_v59 = vld [vmem:[%s20167_s10 + $0xc0] sm:$0xff]  ;;  %v11369_v26 = vld [vmem:[%s20167_s10 + $0xc8] sm:$0xff] }
 0xdab   : > { %15014 = vmatpush3.bf16.msra.mxu1 %v18869_v7  ;;  %13688 = vmatprep.mubr.msk.f32.mxu1 %vm5997_vm6, %v11310_v21  ;;  %v11320_v7 = vld [vmem:[%s20164_s7 + $0x108] sm:$0xff]  ;;  %v15075_v21 = vpack.c.bf16 %v7964_v5, %v7963_v45  ;;  %v11383_v5 = vld [vmem:[%s20167_s10 + $0x100] sm:$0xff] }
 0xdac   : > { %15016 = vmatprep.subr.bf16.mxu1 %v18879_v35 }
 0xdaf   : > { %15018 = vmatpush3.bf16.msra.mxu1 %v18879_v35  ;;  %v11321_v35 = vld [vmem:[%s20164_s7 + $0x110] sm:$0xff] }
 0xdb0   : > { %15020 = vmatprep.subr.bf16.mxu1 %v18889_v31 }
 0xdb3   : > { %15022 = vmatpush3.bf16.msra.mxu1 %v18889_v31  ;;  %v11322_v31 = vld [vmem:[%s20164_s7 + $0x118] sm:$0xff] }
 0xdb4   : > { %15024 = vmatprep.subr.bf16.mxu1 %v18899_v54  ;;  %v15035_v25 = vpack.c.bf16 %v11322_v31, %v11321_v35 }
 0xdb7   : > { %15026 = vmatpush3.bf16.msra.mxu1 %v18899_v54  ;;  %v15031_v54 = vpack.c.bf16 %v11320_v7, %v11319_v16 }
 0xdb8   : > { %15028 = vmatprep.subr.bf16.mxu1 %v18909_v11 }
 0xdbb   : > { %15030 = vmatpush3.bf16.msra.mxu1 %v18909_v11  ;;  %v11312_v11 = vld [vmem:[%s20163_s6 + $0x110] sm:$0xff] }
 0xdbc   : > { %13686 = vmatprep.subr.msk.mxu1 %vm6010_vm7, %v18912_v43 }
 0xdbf   : > { %13687 = vmatpush3.msk.msra.mxu1 %vm6010_vm7, %v18912_v43 }
 0xdc0   : > { %13689 = vmatmul.mubr.msk.f32.vlgmr.msra.gmra.mrb[116].mxu1 %vm5997_vm6, %v11311_v46  ;;  %15032 = vmatprep.subr.bf16.mxu1 %v15031_v54  ;;  %v7966_v46 = vld [vmem:[%s20167_s10 + $0x18] sm:$0xff] }
 0xdc1   : > { %13691 = vmatprep.mubr.msk.f32.mxu1 %vm5997_vm6, %v11312_v11  ;;  %15034 = vmatpush3.bf16.msra.mxu1 %v15031_v54  ;;  %v7965_v54 = vld [vmem:[%s20167_s10 + $0x10] sm:$0xff] }
 0xdc2   : > { %15036 = vmatprep.subr.bf16.mxu1 %v15035_v25 }
 0xdc4   : > { %13692 = vmatmul.mubr.msk.f32.gmra.mrb[118].mxu1 %vm5997_vm6, %v11313_v14 }
 0xdc5   : > { %15038 = vmatpush3.bf16.msra.mxu1 %v15035_v25 }
 0xe93   : > { %v13690_v39 = vpop.f32.mrb[116].mxu1 }
 0xe94   : > { %v7736_v62 = vpop.f32.mrb[117].mxu1 }
 0xe95   : > { %13702 = vmatprep.mubr.msk.f32.mxu1 %vm6210_vm8, %v7736_v62 }
 0xe96   : > { %13703 = vmatmul.mubr.msk.f32.vlgmr.msra.gmra.mrb[104].mxu1 %vm6210_vm8, %v13690_v39  ;;  %v15079_v39 = vpack.c.bf16 %v7966_v46, %v7965_v54  ;;  %v11387_v54 = vld [vmem:[%s20167_s10 + $0x120] sm:$0xff]  ;;  %v11388_v46 = vld [vmem:[%s20167_s10 + $0x128] sm:$0xff] }
 0xe97   : > { %v13693_v43 = vpop.f32.mrb[118].mxu1 }
 0xe98   : > { %v7746_v55 = vpop.f32.mrb[119].mxu1 }
 0xe99   : > { %13705 = vmatprep.mubr.msk.f32.mxu1 %vm6210_vm8, %v7746_v55  ;;  %v7968_v55 = vld [vmem:[%s20167_s10 + $0x28] sm:$0xff] }
 0xe9a   : > { %13706 = vmatmul.mubr.msk.f32.gmra.mrb[106].mxu1 %vm6210_vm8, %v13693_v43  ;;  %v7967_v43 = vld [vmem:[%s20167_s10 + $0x20] sm:$0xff] }
 0xe9b   : > { %13776 = vmatprep.mubr.msk.f32.mxu1 %vm7878_vm9, %v11348_v32  ;;  %v9472_v32 = vld [vmem:[%s20169_s12 + $0x8] sm:$0xff] }
 0xf69   : > { %v13704_v53 = vpop.f32.mrb[104].mxu1 }
 0xf6a   : > { %v7869_v3 = vadd.f32 %v13704_v53, %v11327_v42  ;;  %v7838_v10 = vpop.f32.mrb[105].mxu1  ;;  %v15274_v53 = vpack.c.bf16 %v9472_v32, %v9471_v63  ;;  %v11400_v63 = vld [vmem:[%s20167_s10 + $0x150] sm:$0xff]  ;;  %v11401_v32 = vld [vmem:[%s20167_s10 + $0x158] sm:$0xff] }
 0xf6b   : > { %v7868_v22 = vadd.f32 %v11327_v42, %v7838_v10  ;;  %v15083_v10 = vpack.c.bf16 %v7968_v55, %v7967_v43  ;;  %v11399_v43 = vld [vmem:[%s20167_s10 + $0x148] sm:$0xff] }
 0xf6c   : > { %v7873_v60 = vmax.f32 %v7869_v3, 0.0  ;;  %v9474_v3 = vld [vmem:[%s20169_s12 + $0x18] sm:$0xff] }
 0xf6d   : > { %v7872_v13 = vmax.f32 %v7868_v22, 0.0  ;;  %v13707_v36 = vpop.f32.mrb[106].mxu1  ;;  %v7969_v22 = vld [vmem:[%s20167_s10 + $0x30] sm:$0xff] }
 0xf6e   : > { %v7871_v56 = vadd.f32 %v13707_v36, %v11327_v42  ;;  %v7848_v15 = vpop.f32.mrb[107].mxu1  ;;  %v9475_v36 = vld [vmem:[%s20169_s12 + $0x20] sm:$0xff] }
 0xf6f   : > { %v19329_v49 = vpack.c.bf16 %v7873_v60, %v7872_v13  ;;  %v7870_v51 = vadd.f32 %v11327_v42, %v7848_v15  ;;  %v9473_v42 = vld [vmem:[%s20169_s12 + $0x10] sm:$0xff]  ;;  %v7970_v60 = vld [vmem:[%s20167_s10 + $0x38] sm:$0xff] }
 0xf70   : > { %v7875_v30 = vmax.f32 %v7871_v56, 0.0  ;;  %v15277_v13 = vpack.c.bf16 %v9474_v3, %v9473_v42  ;;  %v9476_v56 = vld [vmem:[%s20169_s12 + $0x28] sm:$0xff]  ;;  %v15183_v42 = vpack.c.bf16 %v11401_v32, %v11400_v63  ;;  %v10219_v32 = vld [vmem:[%s20171_s14 + $0x10] sm:$0xff] }
 0xf71   : > { %v7874_v17 = vmax.f32 %v7870_v51, 0.0  ;;  %15040 = vmatprep.subr.bf16.mxu0 %v19329_v49  ;;  %15092 = vmatprep.subr.bf16.mxu1 %v19329_v49  ;;  %v11403_v3 = vld [vmem:[%s20167_s10 + $0x168] sm:$0xff] }
 0xf72   : > { %15042 = vmatpush3.bf16.msra.mxu0 %v19329_v49  ;;  %15094 = vmatpush3.bf16.msra.mxu1 %v19329_v49 }
 0xf73   : > { %v19335_v4 = vpack.c.bf16 %v7875_v30, %v7874_v17  ;;  %v11353_v30 = vld [vmem:[%s20167_s10 + $0x80] sm:$0xff]  ;;  %v11354_v17 = vld [vmem:[%s20167_s10 + $0x88] sm:$0xff] }
 0xf74   : > { %v15101_v29 = vpack.c.bf16 %v11354_v17, %v11353_v30  ;;  %v11417_v17 = vld [vmem:[%s20167_s10 + $0x1a0] sm:$0xff] }
 0xf75   : > { %15045 = vmatprep.subr.msk.bf16.mxu0 %vm15747_vm2, %v19335_v4  ;;  %15097 = vmatprep.subr.msk.bf16.mxu1 %vm15747_vm2, %v19335_v4 }
 0xf76   : > { %15048 = vmatpush3.bf16.msk.msra.mxu0 %vm15747_vm2, %v19335_v4  ;;  %15100 = vmatpush3.bf16.msk.msra.mxu1 %vm15747_vm2, %v19335_v4 }
 0xf77   : > { %15050 = vmatprep.subr.bf16.mxu0 %v19329_v49  ;;  %15118 = vmatprep.subr.bf16.mxu1 %v19329_v49 }
 0xf79   : > { %13717 = vmatmul.mubr.msk.f32.vlgmr.msra.gmra.mrb[160].mxu0 %vm7878_vm9, %v7877_v37  ;;  %13777 = vmatmul.mubr.msk.f32.vlgmr.msra.gmra.mrb[120].mxu1 %vm7878_vm9, %v11349_v23  ;;  %v11355_v37 = vld [vmem:[%s20167_s10 + $0x90] sm:$0xff]  ;;  %v11356_v23 = vld [vmem:[%s20167_s10 + $0x98] sm:$0xff] }
 0xf7a   : > { %15052 = vmatpush3.bf16.msra.mxu0 %v19329_v49  ;;  %15120 = vmatpush3.bf16.msra.mxu1 %v19329_v49  ;;  %v15105_v18 = vpack.c.bf16 %v11356_v23, %v11355_v37  ;;  %v11419_v37 = vld [vmem:[%s20167_s10 + $0x1b0] sm:$0xff]  ;;  %v11420_v23 = vld [vmem:[%s20167_s10 + $0x1b8] sm:$0xff] }
 0xf7b   : > { %15055 = vmatprep.subr.msk.bf16.mxu0 %vm15747_vm2, %v19335_v4  ;;  %15123 = vmatprep.subr.msk.bf16.mxu1 %vm15747_vm2, %v19335_v4 }
 0xf7c   : > { %13727 = vmatprep.mubr.msk.f32.mxu0 %vm7878_vm9, %v11331_v52  ;;  %13806 = vmatprep.mubr.msk.f32.mxu1 %vm7878_vm9, %v11363_v40  ;;  %v11357_v40 = vld [vmem:[%s20167_s10 + $0xa0] sm:$0xff] }
 0xf7e   : > { %15058 = vmatpush3.bf16.msk.msra.mxu0 %vm15747_vm2, %v19335_v4  ;;  %15126 = vmatpush3.bf16.msk.msra.mxu1 %vm15747_vm2, %v19335_v4 }
 0xf7f   : > { %15144 = vmatprep.subr.bf16.mxu1 %v19329_v49  ;;  %15060 = vmatprep.subr.bf16.mxu0 %v15059_v58 }
 0xf81   : > { %13728 = vmatmul.mubr.msk.f32.vlgmr.msra.gmra.mrb[162].mxu0 %vm7878_vm9, %v11332_v27  ;;  %13807 = vmatmul.mubr.msk.f32.vlgmr.msra.gmra.mrb[122].mxu1 %vm7878_vm9, %v11364_v20  ;;  %v11360_v27 = vld [vmem:[%s20167_s10 + $0xb8] sm:$0xff] }
 0xf82   : > { %15146 = vmatpush3.bf16.msra.mxu1 %v19329_v49  ;;  %13836 = vmatprep.mubr.msk.f32.mxu1 %vm7878_vm9, %v11378_v2  ;;  %v15113_v2 = vpack.c.bf16 %v11360_v27, %v11359_v57  ;;  %v11432_v27 = vld [vmem:[%s20167_s10 + $0x1e0] sm:$0xff] }
 0xf83   : > { %15149 = vmatprep.subr.msk.bf16.mxu1 %vm15747_vm2, %v19335_v4  ;;  %15062 = vmatpush3.bf16.msra.mxu0 %v15059_v58  ;;  %v11358_v58 = vld [vmem:[%s20167_s10 + $0xa8] sm:$0xff] }
 0xf84   : > { %15064 = vmatprep.subr.bf16.mxu0 %v15063_v1  ;;  %v15109_v8 = vpack.c.bf16 %v11358_v58, %v11357_v40  ;;  %v11430_v58 = vld [vmem:[%s20167_s10 + $0x1d0] sm:$0xff] }
 0xf86   : > { %15152 = vmatpush3.bf16.msk.msra.mxu1 %vm15747_vm2, %v19335_v4 }
 0xf87   : > { %15170 = vmatprep.subr.bf16.mxu1 %v19329_v49  ;;  %15066 = vmatpush3.bf16.msra.mxu0 %v15063_v1 }
 0xf88   : > { %15068 = vmatprep.subr.bf16.mxu0 %v15067_v24 }
 0xf89   : > { %13837 = vmatmul.mubr.msk.f32.vlgmr.msra.gmra.mrb[124].mxu1 %vm7878_vm9, %v11379_v38  ;;  %v11370_v38 = vld [vmem:[%s20167_s10 + $0xd0] sm:$0xff] }
 0xf8a   : > { %15172 = vmatpush3.bf16.msra.mxu1 %v19329_v49  ;;  %13866 = vmatprep.mubr.msk.f32.mxu1 %vm7878_vm9, %v11393_v34  ;;  %v11371_v34 = vld [vmem:[%s20167_s10 + $0xd8] sm:$0xff] }
 0xf8b   : > { %15175 = vmatprep.subr.msk.bf16.mxu1 %vm15747_vm2, %v19335_v4  ;;  %15070 = vmatpush3.bf16.msra.mxu0 %v15067_v24  ;;  %v15127_v24 = vpack.c.bf16 %v11369_v26, %v11368_v59  ;;  %v11434_v59 = vld [vmem:[%s20167_s10 + $0x1f0] sm:$0xff]  ;;  %v11435_v26 = vld [vmem:[%s20167_s10 + $0x1f8] sm:$0xff] }
 0xf8c   : > { %15072 = vmatprep.subr.bf16.mxu0 %v15071_v28 }
 0xf8e   : > { %15178 = vmatpush3.bf16.msk.msra.mxu1 %vm15747_vm2, %v19335_v4 }
 0xf8f   : > { %15196 = vmatprep.subr.bf16.mxu1 %v19329_v49  ;;  %15074 = vmatpush3.bf16.msra.mxu0 %v15071_v28 }
 0xf90   : > { %15076 = vmatprep.subr.bf16.mxu0 %v15075_v21 }
 0xf91   : > { %13867 = vmatmul.mubr.msk.f32.vlgmr.msra.gmra.mrb[126].mxu1 %vm7878_vm9, %v11394_v50 }
 0xf92   : > { %15198 = vmatpush3.bf16.msra.mxu1 %v19329_v49  ;;  %13896 = vmatprep.mubr.msk.f32.mxu1 %vm7878_vm9, %v11408_v47  ;;  %v15131_v47 = vpack.c.bf16 %v11371_v34, %v11370_v38  ;;  %v11444_v38 = vld [vmem:[%s20167_s10 + $0x208] sm:$0xff] }
 0xf93   : > { %15201 = vmatprep.subr.msk.bf16.mxu1 %vm15747_vm2, %v19335_v4 }
 0xf96   : > { %15204 = vmatpush3.bf16.msk.msra.mxu1 %vm15747_vm2, %v19335_v4 }
 0xf97   : > { %15222 = vmatprep.subr.bf16.mxu1 %v19329_v49 }
 0xf99   : > { %13897 = vmatmul.mubr.msk.f32.vlgmr.msra.gmra.mrb[128].mxu1 %vm7878_vm9, %v11409_v61 }
 0xf9a   : > { %15224 = vmatpush3.bf16.msra.mxu1 %v19329_v49  ;;  %13926 = vmatprep.mubr.msk.f32.mxu1 %vm7878_vm9, %v11423_v6  ;;  %v11372_v6 = vld [vmem:[%s20167_s10 + $0xe0] sm:$0xff] }
 0xf9b   : > { %15227 = vmatprep.subr.msk.bf16.mxu1 %vm15747_vm2, %v19335_v4 }
 0xf9e   : > { %15230 = vmatpush3.bf16.msk.msra.mxu1 %vm15747_vm2, %v19335_v4 }
 0xf9f   : > { %15248 = vmatprep.subr.bf16.mxu1 %v19329_v49 }
 0xfa1   : > { %13927 = vmatmul.mubr.msk.f32.vlgmr.msra.gmra.mrb[130].mxu1 %vm7878_vm9, %v11424_v0  ;;  %v11373_v0 = vld [vmem:[%s20167_s10 + $0xe8] sm:$0xff] }
 0xfa2   : > { %15250 = vmatpush3.bf16.msra.mxu1 %v19329_v49  ;;  %13956 = vmatprep.mubr.msk.f32.mxu1 %vm7878_vm9, %v11438_v33  ;;  %v15087_v49 = vpack.c.bf16 %v7970_v60, %v7969_v22  ;;  %v15135_v33 = vpack.c.bf16 %v11373_v0, %v11372_v6  ;;  %v11404_v22 = vld [vmem:[%s20167_s10 + $0x170] sm:$0xff]  ;;  %v11405_v60 = vld [vmem:[%s20167_s10 + $0x178] sm:$0xff]  ;;  %v11447_v0 = vld [vmem:[%s20167_s10 + $0x220] sm:$0xff] }
 0xfa3   : > { %15253 = vmatprep.subr.msk.bf16.mxu1 %vm15747_vm2, %v19335_v4 }
 0xfa6   : > { %15256 = vmatpush3.bf16.msk.msra.mxu1 %vm15747_vm2, %v19335_v4  ;;  %v15280_v4 = vpack.c.bf16 %v9476_v56, %v9475_v36  ;;  %v11413_v36 = vld [vmem:[%s20167_s10 + $0x180] sm:$0xff]  ;;  %v11414_v56 = vld [vmem:[%s20167_s10 + $0x188] sm:$0xff] }
 0xfa7   : > { %15273 = vmatprep.subr.bf16.mxu1 %v20207_v19 }
 0xfa9   : > { %13957 = vmatmul.mubr.msk.f32.vlgmr.msra.gmra.mrb[132].mxu1 %vm7878_vm9, %v11439_v41  ;;  %v11374_v41 = vld [vmem:[%s20167_s10 + $0xf0] sm:$0xff] }
 0xfaa   : > { %13994 = vmatprep.mubr.msk.f32.mxu1 %vm15594_vm5, %v20206_v12  ;;  %15275 = vmatpush3.bf16.msra.mxu1 %v15274_v53  ;;  %v15139_v28 = vpack.c.bf16 %v11375_v9, %v11374_v41  ;;  %v11402_v53 = vld [vmem:[%s20167_s10 + $0x160] sm:$0xff]  ;;  %v11449_v9 = vld [vmem:[%s20167_s10 + $0x230] sm:$0xff] }
 0xfab   : > { %15276 = vmatprep.subr.bf16.mxu1 %v20207_v19 }
 0xfae   : > { %15278 = vmatpush3.bf16.msra.mxu1 %v15277_v13  ;;  %v15191_v13 = vpack.c.bf16 %v11405_v60, %v11404_v22  ;;  %v10221_v22 = vld [vmem:[%s20171_s14 + $0x20] sm:$0xff]  ;;  %v10222_v60 = vld [vmem:[%s20171_s14 + $0x28] sm:$0xff] }
 0xfaf   : > { %15279 = vmatprep.subr.bf16.mxu1 %v20207_v19 }
 0xfb2   : > { %15281 = vmatpush3.bf16.msra.mxu1 %v15280_v4  ;;  %v11418_v4 = vld [vmem:[%s20167_s10 + $0x1a8] sm:$0xff] }
 0xfb3   : > { %15282 = vmatprep.subr.bf16.mxu1 %v20207_v19 }
0x104c   : > { %v13718_v16 = vpop.f32.mrb[160].mxu0  ;;  %v19502_v7 = vpop.f32.mrb[120].mxu1 }
0x104d   : > { %v7954_v35 = vpop.f32.mrb[161].mxu0  ;;  %v8302_v31 = vpop.f32.mrb[121].mxu1 }
0x1054   : > { %v13729_v11 = vpop.f32.mrb[162].mxu0  ;;  %v19510_v25 = vpop.f32.mrb[122].mxu1 }
0x1055   : > { %v8046_v14 = vpop.f32.mrb[163].mxu0  ;;  %v19512_v62 = vpop.f32.mrb[123].mxu1 }
0x1056   : > { %13746 = vmatprep.mubr.msk.f32.mxu0 %vm8064_vm10, %v8046_v14  ;;  %v11389_v14 = vld [vmem:[%s20167_s10 + $0x130] sm:$0xff] }
0x1057   : > { %13747 = vmatmul.mubr.msk.f32.vlgmr.msra.gmra.mrb[164].mxu0 %vm8064_vm10, %v13729_v11  ;;  %v15161_v11 = vpack.c.bf16 %v11388_v46, %v11387_v54 }
0x1058   : > { %15078 = vmatpush3.bf16.msra.mxu0 %v15075_v21  ;;  %13765 = vmatprep.mubr.msk.f32.mxu0 %vm8064_vm10, %v7954_v35  ;;  %v11384_v21 = vld [vmem:[%s20167_s10 + $0x108] sm:$0xff]  ;;  %v11386_v35 = vld [vmem:[%s20167_s10 + $0x118] sm:$0xff] }
0x1059   : > { %15080 = vmatprep.subr.bf16.mxu0 %v15079_v39 }
0x105c   : > { %15082 = vmatpush3.bf16.msra.mxu0 %v15079_v39  ;;  %v19548_v15 = vpop.f32.mrb[124].mxu1  ;;  %v11390_v39 = vld [vmem:[%s20167_s10 + $0x138] sm:$0xff] }
0x105d   : > { %15084 = vmatprep.subr.bf16.mxu0 %v15083_v10  ;;  %v19550_v51 = vpop.f32.mrb[125].mxu1 }
0x1060   : > { %15086 = vmatpush3.bf16.msra.mxu0 %v15083_v10  ;;  %v15187_v10 = vpack.c.bf16 %v11403_v3, %v11402_v53  ;;  %v11459_v53 = vld [vmem:[%s20169_s12 + $0x60] sm:$0xff]  ;;  %v11460_v3 = vld [vmem:[%s20169_s12 + $0x68] sm:$0xff] }
0x1061   : > { %15088 = vmatprep.subr.bf16.mxu0 %v15087_v49 }
0x1064   : > { %15090 = vmatpush3.bf16.msra.mxu0 %v15087_v49  ;;  %v19566_v48 = vpop.f32.mrb[126].mxu1  ;;  %v11415_v49 = vld [vmem:[%s20167_s10 + $0x190] sm:$0xff] }
0x1065   : > { %15102 = vmatprep.subr.bf16.mxu0 %v15101_v29  ;;  %v19568_v52 = vpop.f32.mrb[127].mxu1 }
0x1067   : > { %13766 = vmatmul.mubr.msk.f32.vlgmr.msra.gmra.mrb[164].mxu0 %vm8064_vm10, %v13718_v16  ;;  %v15153_v16 = vpack.c.bf16 %v11384_v21, %v11383_v5 }
0x1068   : > { %15104 = vmatpush3.bf16.msra.mxu0 %v15101_v29  ;;  %13795 = vmatprep.mubr.msk.f32.mxu0 %vm8064_vm10, %v8302_v31  ;;  %v15213_v29 = vpack.c.bf16 %v11418_v4, %v11417_v17  ;;  %v11464_v17 = vld [vmem:[%s20169_s12 + $0x80] sm:$0xff]  ;;  %v11465_v4 = vld [vmem:[%s20169_s12 + $0x88] sm:$0xff] }
0x1069   : > { %15106 = vmatprep.subr.bf16.mxu0 %v15105_v18 }
0x106c   : > { %15108 = vmatpush3.bf16.msra.mxu0 %v15105_v18  ;;  %v19584_v20 = vpop.f32.mrb[128].mxu1  ;;  %v15217_v18 = vpack.c.bf16 %v11420_v23, %v11419_v37  ;;  %v10225_v37 = vld [vmem:[%s20171_s14 + $0x40] sm:$0xff]  ;;  %v10226_v23 = vld [vmem:[%s20171_s14 + $0x48] sm:$0xff] }
0x106d   : > { %15110 = vmatprep.subr.bf16.mxu0 %v15109_v8  ;;  %v19586_v1 = vpop.f32.mrb[129].mxu1 }
0x1070   : > { %15112 = vmatpush3.bf16.msra.mxu0 %v15109_v8  ;;  %v11431_v8 = vld [vmem:[%s20167_s10 + $0x1d8] sm:$0xff] }
0x1071   : > { %15114 = vmatprep.subr.bf16.mxu0 %v15113_v2  ;;  %v15235_v57 = vpack.c.bf16 %v11431_v8, %v11430_v58  ;;  %v15394_v58 = vpack.c.bf16 %v10226_v23, %v10225_v37  ;;  %v10227_v8 = vld [vmem:[%s20171_s14 + $0x50] sm:$0xff]  ;;  %v11503_v23 = vld [vmem:[%s20169_s12 + $0x198] sm:$0xff] }
0x1072   : > { %v11502_v37 = vld [vmem:[%s20169_s12 + $0x190] sm:$0xff] }
0x1074   : > { %15116 = vmatpush3.bf16.msra.mxu0 %v15113_v2  ;;  %v19600_v50 = vpop.f32.mrb[130].mxu1  ;;  %v11433_v2 = vld [vmem:[%s20167_s10 + $0x1e8] sm:$0xff] }
0x1075   : > { %15128 = vmatprep.subr.bf16.mxu0 %v15127_v24  ;;  %v19602_v61 = vpop.f32.mrb[131].mxu1 }
0x1077   : > { %13796 = vmatmul.mubr.msk.f32.vlgmr.msra.gmra.mrb[164].mxu0 %vm8064_vm10, %v19502_v7  ;;  %v11385_v7 = vld [vmem:[%s20167_s10 + $0x110] sm:$0xff] }
0x1078   : > { %15130 = vmatpush3.bf16.msra.mxu0 %v15127_v24  ;;  %13825 = vmatprep.mubr.msk.f32.mxu0 %vm8064_vm10, %v19512_v62  ;;  %v15157_v31 = vpack.c.bf16 %v11386_v35, %v11385_v7  ;;  %v15165_v62 = vpack.c.bf16 %v11390_v39, %v11389_v14  ;;  %v15243_v24 = vpack.c.bf16 %v11435_v26, %v11434_v59  ;;  %v11455_v7 = vld [vmem:[%s20169_s12 + $0x40] sm:$0xff]  ;;  %v11456_v35 = vld [vmem:[%s20169_s12 + $0x48] sm:$0xff]  ;;  %v11457_v39 = vld [vmem:[%s20169_s12 + $0x50] sm:$0xff] }
0x1079   : > { %15132 = vmatprep.subr.bf16.mxu0 %v15131_v47 }
0x107c   : > { %15134 = vmatpush3.bf16.msra.mxu0 %v15131_v47  ;;  %v19620_v44 = vpop.f32.mrb[132].mxu1  ;;  %v11445_v47 = vld [vmem:[%s20167_s10 + $0x210] sm:$0xff] }
0x107d   : > { %15136 = vmatprep.subr.bf16.mxu0 %v15135_v33  ;;  %v19622_v45 = vpop.f32.mrb[133].mxu1 }
0x1080   : > { %15138 = vmatpush3.bf16.msra.mxu0 %v15135_v33  ;;  %v11448_v33 = vld [vmem:[%s20167_s10 + $0x228] sm:$0xff] }
0x1081   : > { %15140 = vmatprep.subr.bf16.mxu0 %v15139_v28  ;;  %v15265_v41 = vpack.c.bf16 %v11448_v33, %v11447_v0  ;;  %v11475_v0 = vld [vmem:[%s20169_s12 + $0xd0] sm:$0xff]  ;;  %v11476_v33 = vld [vmem:[%s20169_s12 + $0xd8] sm:$0xff] }
0x1084   : > { %15142 = vmatpush3.bf16.msra.mxu0 %v15139_v28  ;;  %v11450_v28 = vld [vmem:[%s20167_s10 + $0x238] sm:$0xff] }
0x1085   : > { %15154 = vmatprep.subr.bf16.mxu0 %v15153_v16  ;;  %v15269_v5 = vpack.c.bf16 %v11450_v28, %v11449_v9  ;;  %v11477_v9 = vld [vmem:[%s20169_s12 + $0xe0] sm:$0xff]  ;;  %v11478_v28 = vld [vmem:[%s20169_s12 + $0xe8] sm:$0xff] }
0x1087   : > { %13826 = vmatmul.mubr.msk.f32.vlgmr.msra.gmra.mrb[164].mxu0 %vm8064_vm10, %v19510_v25  ;;  %v11398_v25 = vld [vmem:[%s20167_s10 + $0x140] sm:$0xff] }
0x1088   : > { %15156 = vmatpush3.bf16.msra.mxu0 %v15153_v16  ;;  %13855 = vmatprep.mubr.msk.f32.mxu0 %vm8064_vm10, %v19550_v51  ;;  %v15179_v55 = vpack.c.bf16 %v11399_v43, %v11398_v25  ;;  %v11416_v51 = vld [vmem:[%s20167_s10 + $0x198] sm:$0xff]  ;;  %v11453_v16 = vld [vmem:[%s20168_s11] ss:$0 sm:$0xff]  ;;  %v10218_v43 = vld [vmem:[%s20171_s14 + $0x8] sm:$0xff] }
0x1089   : > { %15158 = vmatprep.subr.bf16.mxu0 %v15157_v31  ;;  %v15209_v30 = vpack.c.bf16 %v11416_v51, %v11415_v49  ;;  %v10217_v25 = vld [vmem:[%s20171_s14] sm:$0xff]  ;;  %v10223_v49 = vld [vmem:[%s20171_s14 + $0x30] sm:$0xff]  ;;  %v10224_v51 = vld [vmem:[%s20171_s14 + $0x38] sm:$0xff] }
0x108a   : > { %v15382_v63 = vpack.c.bf16 %v10218_v43, %v10217_v25  ;;  %v11488_v43 = vld [vmem:[%s20169_s12 + $0x130] sm:$0xff] }
0x108c   : > { %15160 = vmatpush3.bf16.msra.mxu0 %v15157_v31 }
0x108d   : > { %15162 = vmatprep.subr.bf16.mxu0 %v15161_v11 }
0x1090   : > { %15164 = vmatpush3.bf16.msra.mxu0 %v15161_v11  ;;  %v15286_v11 = vpack.c.bf16 %v11456_v35, %v11455_v7 }
0x1091   : > { %15166 = vmatprep.subr.bf16.mxu0 %v15165_v62 }
0x1094   : > { %15168 = vmatpush3.bf16.msra.mxu0 %v15165_v62  ;;  %v11458_v62 = vld [vmem:[%s20169_s12 + $0x58] sm:$0xff] }
0x1095   : > { %15180 = vmatprep.subr.bf16.mxu0 %v15179_v55 }
0x1097   : > { %13856 = vmatmul.mubr.msk.f32.vlgmr.msra.gmra.mrb[164].mxu0 %vm8064_vm10, %v19548_v15  ;;  %v15205_v15 = vpack.c.bf16 %v11414_v56, %v11413_v36  ;;  %v11461_v36 = vld [vmem:[%s20169_s12 + $0x70] sm:$0xff]  ;;  %v11462_v56 = vld [vmem:[%s20169_s12 + $0x78] sm:$0xff] }
0x1098   : > { %15182 = vmatpush3.bf16.msra.mxu0 %v15179_v55  ;;  %13885 = vmatprep.mubr.msk.f32.mxu0 %vm8064_vm10, %v19568_v52  ;;  %v11429_v52 = vld [vmem:[%s20167_s10 + $0x1c8] sm:$0xff]  ;;  %v15289_v55 = vpack.c.bf16 %v11458_v62, %v11457_v39  ;;  %v11486_v39 = vld [vmem:[%s20169_s12 + $0x120] sm:$0xff] }
0x1099   : > { %15184 = vmatprep.subr.bf16.mxu0 %v15183_v42  ;;  %v11487_v62 = vld [vmem:[%s20169_s12 + $0x128] sm:$0xff] }
0x109a   : > { %v15328_v25 = vpack.c.bf16 %v11487_v62, %v11486_v39  ;;  %v10308_v39 = vld [vmem:[%s20173_s16 + $0x8] sm:$0xff] }
0x109c   : > { %15186 = vmatpush3.bf16.msra.mxu0 %v15183_v42  ;;  %v10220_v42 = vld [vmem:[%s20171_s14 + $0x18] sm:$0xff] }
0x109d   : > { %15188 = vmatprep.subr.bf16.mxu0 %v15187_v10 }
0x10a0   : > { %15190 = vmatpush3.bf16.msra.mxu0 %v15187_v10  ;;  %v15385_v10 = vpack.c.bf16 %v10220_v42, %v10219_v32  ;;  %v11491_v32 = vld [vmem:[%s20169_s12 + $0x140] sm:$0xff]  ;;  %v11492_v42 = vld [vmem:[%s20169_s12 + $0x148] sm:$0xff] }
0x10a1   : > { %15192 = vmatprep.subr.bf16.mxu0 %v15191_v13 }
0x10a4   : > { %15194 = vmatpush3.bf16.msra.mxu0 %v15191_v13  ;;  %v15292_v13 = vpack.c.bf16 %v11460_v3, %v11459_v53  ;;  %v15334_v53 = vpack.c.bf16 %v11492_v42, %v11491_v32 }
0x10a5   : > { %15206 = vmatprep.subr.bf16.mxu0 %v15205_v15 }
0x10a7   : > { %13886 = vmatmul.mubr.msk.f32.vlgmr.msra.gmra.mrb[164].mxu0 %vm8064_vm10, %v19566_v48  ;;  %v11428_v48 = vld [vmem:[%s20167_s10 + $0x1c0] sm:$0xff] }
0x10a8   : > { %15208 = vmatpush3.bf16.msra.mxu0 %v15205_v15  ;;  %13915 = vmatprep.mubr.msk.f32.mxu0 %vm8064_vm10, %v19586_v1  ;;  %v15231_v40 = vpack.c.bf16 %v11429_v52, %v11428_v48  ;;  %v15239_v1 = vpack.c.bf16 %v11433_v2, %v11432_v27  ;;  %v15388_v15 = vpack.c.bf16 %v10222_v60, %v10221_v22  ;;  %v11466_v52 = vld [vmem:[%s20169_s12 + $0x90] sm:$0xff]  ;;  %v11468_v2 = vld [vmem:[%s20169_s12 + $0xa0] sm:$0xff]  ;;  %v11494_v22 = vld [vmem:[%s20169_s12 + $0x158] sm:$0xff] }
0x10a9   : > { %15210 = vmatprep.subr.bf16.mxu0 %v15209_v30 }
0x10ac   : > { %15212 = vmatpush3.bf16.msra.mxu0 %v15209_v30  ;;  %v15295_v30 = vpack.c.bf16 %v11462_v56, %v11461_v36  ;;  %v11496_v36 = vld [vmem:[%s20169_s12 + $0x168] sm:$0xff] }
0x10ad   : > { %15214 = vmatprep.subr.bf16.mxu0 %v15213_v29 }
0x10b0   : > { %15216 = vmatpush3.bf16.msra.mxu0 %v15213_v29  ;;  %v15391_v29 = vpack.c.bf16 %v10224_v51, %v10223_v49  ;;  %v11498_v49 = vld [vmem:[%s20169_s12 + $0x178] sm:$0xff] }
0x10b1   : > { %15218 = vmatprep.subr.bf16.mxu0 %v15217_v18 }
0x10b4   : > { %15220 = vmatpush3.bf16.msra.mxu0 %v15217_v18  ;;  %v15298_v18 = vpack.c.bf16 %v11465_v4, %v11464_v17  ;;  %v11501_v17 = vld [vmem:[%s20169_s12 + $0x188] sm:$0xff] }
0x10b5   : > { %15232 = vmatprep.subr.bf16.mxu0 %v15231_v40 }
0x10b7   : > { %13916 = vmatmul.mubr.msk.f32.vlgmr.msra.gmra.mrb[164].mxu0 %vm8064_vm10, %v19584_v20  ;;  %v11443_v20 = vld [vmem:[%s20167_s10 + $0x200] sm:$0xff] }
0x10b8   : > { %15234 = vmatpush3.bf16.msra.mxu0 %v15231_v40  ;;  %13945 = vmatprep.mubr.msk.f32.mxu0 %vm8064_vm10, %v19602_v61  ;;  %v15257_v34 = vpack.c.bf16 %v11444_v38, %v11443_v20  ;;  %v11446_v61 = vld [vmem:[%s20167_s10 + $0x218] sm:$0xff] }
0x10b9   : > { %15236 = vmatprep.subr.bf16.mxu0 %v15235_v57  ;;  %v15261_v6 = vpack.c.bf16 %v11446_v61, %v11445_v47  ;;  %v11467_v40 = vld [vmem:[%s20169_s12 + $0x98] sm:$0xff]  ;;  %v11474_v47 = vld [vmem:[%s20169_s12 + $0xc8] sm:$0xff] }
0x10ba   : > { %v15301_v27 = vpack.c.bf16 %v11467_v40, %v11466_v52  ;;  %v11471_v20 = vld [vmem:[%s20169_s12 + $0xb8] sm:$0xff]  ;;  %v11505_v52 = vld [vmem:[%s20169_s12 + $0x1a8] sm:$0xff] }
0x10bc   : > { %15238 = vmatpush3.bf16.msra.mxu0 %v15235_v57  ;;  %v10228_v57 = vld [vmem:[%s20171_s14 + $0x58] sm:$0xff] }
0x10bd   : > { %15240 = vmatprep.subr.bf16.mxu0 %v15239_v1  ;;  %v15397_v59 = vpack.c.bf16 %v10228_v57, %v10227_v8  ;;  %v11507_v8 = vld [vmem:[%s20169_s12 + $0x1b8] sm:$0xff] }
0x10c0   : > { %15242 = vmatpush3.bf16.msra.mxu0 %v15239_v1  ;;  %v11469_v1 = vld [vmem:[%s20169_s12 + $0xa8] sm:$0xff] }
0x10c1   : > { %15244 = vmatprep.subr.bf16.mxu0 %v15243_v24  ;;  %v15304_v26 = vpack.c.bf16 %v11469_v1, %v11468_v2  ;;  %v11510_v2 = vld [vmem:[%s20169_s12 + $0x1c8] sm:$0xff] }
0x10c4   : > { %15246 = vmatpush3.bf16.msra.mxu0 %v15243_v24  ;;  %v11470_v24 = vld [vmem:[%s20169_s12 + $0xb0] sm:$0xff] }
0x10c5   : > { %15258 = vmatprep.subr.bf16.mxu0 %v15257_v34  ;;  %v15307_v38 = vpack.c.bf16 %v11471_v20, %v11470_v24  ;;  %v11512_v24 = vld [vmem:[%s20169_s12 + $0x1d8] sm:$0xff] }
0x10c7   : > { %13946 = vmatmul.mubr.msk.f32.vlgmr.msra.gmra.mrb[164].mxu0 %vm8064_vm10, %v19600_v50  ;;  %v9477_v50 = vld [vmem:[%s20169_s12 + $0x30] sm:$0xff] }
0x10c8   : > { %15260 = vmatpush3.bf16.msra.mxu0 %v15257_v34  ;;  %13975 = vmatprep.mubr.msk.f32.mxu0 %vm8064_vm10, %v19622_v45  ;;  %v9478_v45 = vld [vmem:[%s20169_s12 + $0x38] sm:$0xff]  ;;  %v11473_v34 = vld [vmem:[%s20169_s12 + $0xc0] sm:$0xff] }
0x10c9   : > { %15262 = vmatprep.subr.bf16.mxu0 %v15261_v6  ;;  %v15283_v21 = vpack.c.bf16 %v9478_v45, %v9477_v50  ;;  %v15310_v61 = vpack.c.bf16 %v11474_v47, %v11473_v34  ;;  %v11479_v50 = vld [vmem:[%s20169_s12 + $0xf0] sm:$0xff]  ;;  %v11480_v45 = vld [vmem:[%s20169_s12 + $0xf8] sm:$0xff]  ;;  %v11514_v34 = vld [vmem:[%s20169_s12 + $0x1e8] sm:$0xff] }
0x10cb   : > { %15284 = vmatpush3.bf16.msra.mxu1 %v15283_v21  ;;  %v15319_v21 = vpack.c.bf16 %v11480_v45, %v11479_v50  ;;  %v11521_v50 = vld [vmem:[%s20169_s12 + $0x218] sm:$0xff] }
0x10cc   : > { %15264 = vmatpush3.bf16.msra.mxu0 %v15261_v6  ;;  %15285 = vmatprep.subr.bf16.mxu1 %v20207_v19 }
0x10cd   : > { %15266 = vmatprep.subr.bf16.mxu0 %v15265_v41 }
0x10d0   : > { %15268 = vmatpush3.bf16.msra.mxu0 %v15265_v41  ;;  %v15313_v41 = vpack.c.bf16 %v11476_v33, %v11475_v0  ;;  %v11518_v33 = vld [vmem:[%s20169_s12 + $0x200] sm:$0xff] }
0x10d1   : > { %15270 = vmatprep.subr.bf16.mxu0 %v15269_v5 }
0x10d4   : > { %15272 = vmatpush3.bf16.msra.mxu0 %v15269_v5  ;;  %v15316_v5 = vpack.c.bf16 %v11478_v28, %v11477_v9 }
0x10d5   : > { %15381 = vmatprep.subr.bf16.mxu0 %v20207_v19 }
0x10d7   : > { %13976 = vmatmul.mubr.msk.f32.vlgmr.msra.gmra.mrb[164].mxu0 %vm8064_vm10, %v19620_v44 }
0x10d8   : > { %14175 = vmatprep.mubr.msk.f32.mxu0 %vm15594_vm5, %v20206_v12  ;;  %15383 = vmatpush3.bf16.msra.mxu0 %v15382_v63 }
0x10d9   : > { %15384 = vmatprep.subr.bf16.mxu0 %v20207_v19 }
0x10dc   : > { %15386 = vmatpush3.bf16.msra.mxu0 %v15385_v10  ;;  %v11493_v10 = vld [vmem:[%s20169_s12 + $0x150] sm:$0xff] }
0x10dd   : > { %15387 = vmatprep.subr.bf16.mxu0 %v20207_v19  ;;  %v15337_v60 = vpack.c.bf16 %v11494_v22, %v11493_v10 }
0x10e0   : > { %15389 = vmatpush3.bf16.msra.mxu0 %v15388_v15  ;;  %v11497_v15 = vld [vmem:[%s20169_s12 + $0x170] sm:$0xff] }
0x10e1   : > { %15390 = vmatprep.subr.bf16.mxu0 %v20207_v19  ;;  %v15343_v51 = vpack.c.bf16 %v11498_v49, %v11497_v15 }
0x10e4   : > { %15392 = vmatpush3.bf16.msra.mxu0 %v15391_v29 }
0x10e5   : > { %15393 = vmatprep.subr.bf16.mxu0 %v20207_v19 }
0x10e8   : > { %15395 = vmatpush3.bf16.msra.mxu0 %v15394_v58  ;;  %v11506_v58 = vld [vmem:[%s20169_s12 + $0x1b0] sm:$0xff] }
0x10e9   : > { %15396 = vmatprep.subr.bf16.mxu0 %v20207_v19  ;;  %v15355_v57 = vpack.c.bf16 %v11507_v8, %v11506_v58 }
0x10ec   : > { %15398 = vmatpush3.bf16.msra.mxu0 %v15397_v59 }
0x10ed   : > { %14173 = vmatprep.subr.mxu0 %v20206_v12 }
0x11aa   : > { %v13977_v44 = vpop.f32.mrb[164].mxu0 }
0x11ab   : > { %v19785_v31 = vadd.f32 %v13977_v44, %v11453_v16  ;;  %v9448_v54 = vpop.f32.mrb[165].mxu0  ;;  %v11483_v44 = vld [vmem:[%s20169_s12 + $0x108] sm:$0xff] }
0x11ac   : > { %v9466_v46 = vadd.f32 %v11453_v16, %v9448_v54  ;;  %v11482_v16 = vld [vmem:[%s20169_s12 + $0x100] sm:$0xff]  ;;  %v11484_v54 = vld [vmem:[%s20169_s12 + $0x110] sm:$0xff] }
0x11ad   : > { %v15322_v7 = vpack.c.bf16 %v11483_v44, %v11482_v16  ;;  %v11524_v44 = vld [vmem:[%s20169_s12 + $0x230] sm:$0xff] }
0x11ae   : > { %v19787_v14 = vmax.f32 %v9466_v46, 0.0  ;;  %v11485_v46 = vld [vmem:[%s20169_s12 + $0x118] sm:$0xff] }
0x11b0   : > { %13995 = vmatmul.mubr.msk.f32.vlgmr.msra.gmra.mrb[134].mxu1 %vm8064_vm10, %v19787_v14  ;;  %v9562_v48 = vrot.slane %v19787_v14, 1  ;;  %v9645_v6 = vrot.slane %v19787_v14, 2  ;;  %v9728_v35 = vrot.slane %v19787_v14, 3  ;;  %v9811_v3 = vrot.slane %v19787_v14, 4 }
0x11b1   : > { %15287 = vmatpush3.bf16.msra.mxu1 %v15286_v11  ;;  %14013 = vmatprep.mubr.msk.f32.mxu1 %vm15594_vm5, %v20206_v12  ;;  %v15325_v11 = vpack.c.bf16 %v11485_v46, %v11484_v54  ;;  %v9894_v29 = vrot.slane %v19787_v14, 5  ;;  %v9977_v59 = vrot.slane %v19787_v14, 6  ;;  %v10060_v28 = vrot.slane %v19787_v14, 7  ;;  %v11522_v14 = vld [vmem:[%s20169_s12 + $0x220] sm:$0xff] }
0x11b2   : > { %15288 = vmatprep.subr.bf16.mxu1 %v20207_v19  ;;  %v9469_v54 = vmax.f32 %v19785_v31, 0.0  ;;  %v10229_v46 = vld [vmem:[%s20171_s14 + $0x60] sm:$0xf] }
0x11b3   : > { %14174 = vmatpush3.msk.msra.mxu0 %vm6010_vm7, %v10229_v46  ;;  %v9470_v31 = vld [vmem:[%s20170_s13] sm:$0x1] }
0x11b4   : > { %15399 = vmatprep.subr.bf16.mxu0 %v20207_v19 }
0x11b5   : > { %15290 = vmatpush3.bf16.msra.mxu1 %v15289_v55  ;;  %v11489_v55 = vld [vmem:[%s20169_s12 + $0x138] sm:$0xff] }
0x11b6   : > { %15291 = vmatprep.subr.bf16.mxu1 %v20207_v19  ;;  %v15331_v63 = vpack.c.bf16 %v11489_v55, %v11488_v43 }
0x11b9   : > { %15293 = vmatpush3.bf16.msra.mxu1 %v15292_v13  ;;  %v11495_v13 = vld [vmem:[%s20169_s12 + $0x160] sm:$0xff] }
0x11ba   : > { %15294 = vmatprep.subr.bf16.mxu1 %v20207_v19  ;;  %v15340_v56 = vpack.c.bf16 %v11496_v36, %v11495_v13 }
0x11bd   : > { %15296 = vmatpush3.bf16.msra.mxu1 %v15295_v30  ;;  %v11500_v30 = vld [vmem:[%s20169_s12 + $0x180] sm:$0xff] }
0x11be   : > { %15297 = vmatprep.subr.bf16.mxu1 %v20207_v19  ;;  %v15346_v4 = vpack.c.bf16 %v11501_v17, %v11500_v30 }
0x11c0   : > { %14014 = vmatmul.mubr.msk.f32.vlgmr.msra.gmra.mrb[134].mxu1 %vm8064_vm10, %v9562_v48  ;;  %v11504_v48 = vld [vmem:[%s20169_s12 + $0x1a0] sm:$0xff] }
0x11c1   : > { %15299 = vmatpush3.bf16.msra.mxu1 %v15298_v18  ;;  %14032 = vmatprep.mubr.msk.f32.mxu1 %vm15594_vm5, %v20206_v12  ;;  %v15349_v18 = vpack.c.bf16 %v11503_v23, %v11502_v37  ;;  %v15352_v40 = vpack.c.bf16 %v11505_v52, %v11504_v48 }
0x11c2   : > { %15300 = vmatprep.subr.bf16.mxu1 %v20207_v19 }
0x11c5   : > { %15302 = vmatpush3.bf16.msra.mxu1 %v15301_v27  ;;  %v11509_v27 = vld [vmem:[%s20169_s12 + $0x1c0] sm:$0xff] }
0x11c6   : > { %15303 = vmatprep.subr.bf16.mxu1 %v20207_v19  ;;  %v15358_v1 = vpack.c.bf16 %v11510_v2, %v11509_v27 }
0x11c9   : > { %15305 = vmatpush3.bf16.msra.mxu1 %v15304_v26  ;;  %v11511_v26 = vld [vmem:[%s20169_s12 + $0x1d0] sm:$0xff] }
0x11ca   : > { %15306 = vmatprep.subr.bf16.mxu1 %v20207_v19  ;;  %v15361_v20 = vpack.c.bf16 %v11512_v24, %v11511_v26 }
0x11cd   : > { %15308 = vmatpush3.bf16.msra.mxu1 %v15307_v38  ;;  %v11513_v38 = vld [vmem:[%s20169_s12 + $0x1e0] sm:$0xff] }
0x11ce   : > { %15309 = vmatprep.subr.bf16.mxu1 %v20207_v19  ;;  %v15364_v47 = vpack.c.bf16 %v11514_v34, %v11513_v38 }
0x11d0   : > { %14033 = vmatmul.mubr.msk.f32.vlgmr.msra.gmra.mrb[134].mxu1 %vm8064_vm10, %v9645_v6  ;;  %v11516_v6 = vld [vmem:[%s20169_s12 + $0x1f8] sm:$0xff] }
0x11d1   : > { %15311 = vmatpush3.bf16.msra.mxu1 %v15310_v61  ;;  %14051 = vmatprep.mubr.msk.f32.mxu1 %vm15594_vm5, %v20206_v12  ;;  %v11515_v61 = vld [vmem:[%s20169_s12 + $0x1f0] sm:$0xff] }
0x11d2   : > { %15312 = vmatprep.subr.bf16.mxu1 %v20207_v19  ;;  %v15367_v0 = vpack.c.bf16 %v11516_v6, %v11515_v61 }
0x11d5   : > { %15314 = vmatpush3.bf16.msra.mxu1 %v15313_v41  ;;  %v11519_v41 = vld [vmem:[%s20169_s12 + $0x208] sm:$0xff] }
0x11d6   : > { %15315 = vmatprep.subr.bf16.mxu1 %v20207_v19  ;;  %v15370_v9 = vpack.c.bf16 %v11519_v41, %v11518_v33 }
0x11d9   : > { %15317 = vmatpush3.bf16.msra.mxu1 %v15316_v5  ;;  %v11520_v5 = vld [vmem:[%s20169_s12 + $0x210] sm:$0xff] }
0x11da   : > { %15318 = vmatprep.subr.bf16.mxu1 %v20207_v19  ;;  %v15373_v45 = vpack.c.bf16 %v11521_v50, %v11520_v5 }
0x11dd   : > { %15320 = vmatpush3.bf16.msra.mxu1 %v15319_v21  ;;  %v11523_v21 = vld [vmem:[%s20169_s12 + $0x228] sm:$0xff] }
0x11de   : > { %15321 = vmatprep.subr.bf16.mxu1 %v20207_v19  ;;  %v15376_v16 = vpack.c.bf16 %v11523_v21, %v11522_v14 }
0x11e0   : > { %14052 = vmatmul.mubr.msk.f32.vlgmr.msra.gmra.mrb[134].mxu1 %vm8064_vm10, %v9728_v35 }
0x11e1   : > { %15323 = vmatpush3.bf16.msra.mxu1 %v15322_v7  ;;  %14070 = vmatprep.mubr.msk.f32.mxu1 %vm15594_vm5, %v20206_v12  ;;  %v11525_v7 = vld [vmem:[%s20169_s12 + $0x238] sm:$0xff] }
0x11e2   : > { %15324 = vmatprep.subr.bf16.mxu1 %v20207_v19  ;;  %v15379_v35 = vpack.c.bf16 %v11525_v7, %v11524_v44 }
0x11e5   : > { %15326 = vmatpush3.bf16.msra.mxu1 %v15325_v11  ;;  %v10307_v11 = vld [vmem:[%s20173_s16] sm:$0xff] }
0x11e6   : > { %15327 = vmatprep.subr.bf16.mxu1 %v20207_v19 }
0x11e9   : > { %15329 = vmatpush3.bf16.msra.mxu1 %v15328_v25  ;;  %v15400_v25 = vpack.c.bf16 %v10308_v39, %v10307_v11 }
0x11ea   : > { %15330 = vmatprep.subr.bf16.mxu1 %v20207_v19 }
0x11ed   : > { %15332 = vmatpush3.bf16.msra.mxu1 %v15331_v63  ;;  %v10230_v63 = vld [vmem:[%s20172_s15] sm:$0x1] }
0x11ee   : > { %15333 = vmatprep.subr.bf16.mxu1 %v20207_v19 }
0x11f0   : > { %14071 = vmatmul.mubr.msk.f32.vlgmr.msra.gmra.mrb[134].mxu1 %vm8064_vm10, %v9811_v3 }
0x11f1   : > { %15335 = vmatpush3.bf16.msra.mxu1 %v15334_v53  ;;  %14089 = vmatprep.mubr.msk.f32.mxu1 %vm15594_vm5, %v20206_v12 }
0x11f2   : > { %15336 = vmatprep.subr.bf16.mxu1 %v20207_v19 }
0x11f5   : > { %15338 = vmatpush3.bf16.msra.mxu1 %v15337_v60 }
0x11f6   : > { %15339 = vmatprep.subr.bf16.mxu1 %v20207_v19 }
0x11f9   : > { %15341 = vmatpush3.bf16.msra.mxu1 %v15340_v56 }
0x11fa   : > { %15342 = vmatprep.subr.bf16.mxu1 %v20207_v19 }
0x11fd   : > { %15344 = vmatpush3.bf16.msra.mxu1 %v15343_v51 }
0x11fe   : > { %15345 = vmatprep.subr.bf16.mxu1 %v20207_v19 }
0x1200   : > { %14090 = vmatmul.mubr.msk.f32.vlgmr.msra.gmra.mrb[134].mxu1 %vm8064_vm10, %v9894_v29 }
0x1201   : > { %15347 = vmatpush3.bf16.msra.mxu1 %v15346_v4  ;;  %14108 = vmatprep.mubr.msk.f32.mxu1 %vm15594_vm5, %v20206_v12 }
0x1202   : > { %15348 = vmatprep.subr.bf16.mxu1 %v20207_v19 }
0x1205   : > { %15350 = vmatpush3.bf16.msra.mxu1 %v15349_v18 }
0x1206   : > { %15351 = vmatprep.subr.bf16.mxu1 %v20207_v19 }
0x1209   : > { %15353 = vmatpush3.bf16.msra.mxu1 %v15352_v40 }
0x120a   : > { %15354 = vmatprep.subr.bf16.mxu1 %v20207_v19 }
0x120d   : > { %15356 = vmatpush3.bf16.msra.mxu1 %v15355_v57 }
0x120e   : > { %15357 = vmatprep.subr.bf16.mxu1 %v20207_v19 }
0x1210   : > { %14109 = vmatmul.mubr.msk.f32.vlgmr.msra.gmra.mrb[134].mxu1 %vm8064_vm10, %v9977_v59 }
0x1211   : > { %15359 = vmatpush3.bf16.msra.mxu1 %v15358_v1  ;;  %14127 = vmatprep.mubr.msk.f32.mxu1 %vm15594_vm5, %v20206_v12 }
0x1212   : > { %15360 = vmatprep.subr.bf16.mxu1 %v20207_v19 }
0x1215   : > { %15362 = vmatpush3.bf16.msra.mxu1 %v15361_v20 }
0x1216   : > { %15363 = vmatprep.subr.bf16.mxu1 %v20207_v19 }
0x1219   : > { %15365 = vmatpush3.bf16.msra.mxu1 %v15364_v47 }
0x121a   : > { %15366 = vmatprep.subr.bf16.mxu1 %v20207_v19 }
0x121d   : > { %15368 = vmatpush3.bf16.msra.mxu1 %v15367_v0 }
0x121e   : > { %15369 = vmatprep.subr.bf16.mxu1 %v20207_v19 }
0x1220   : > { %14128 = vmatmul.mubr.msk.f32.vlgmr.msra.gmra.mrb[134].mxu1 %vm8064_vm10, %v10060_v28 }
0x1221   : > { %15371 = vmatpush3.bf16.msra.mxu1 %v15370_v9  ;;  %14146 = vmatprep.mubr.msk.f32.mxu1 %vm15594_vm5, %v20206_v12 }
0x1222   : > { %15372 = vmatprep.subr.bf16.mxu1 %v20207_v19 }
0x1225   : > { %15374 = vmatpush3.bf16.msra.mxu1 %v15373_v45 }
0x1226   : > { %15375 = vmatprep.subr.bf16.mxu1 %v20207_v19 }
0x1229   : > { %15377 = vmatpush3.bf16.msra.mxu1 %v15376_v16 }
0x122a   : > { %15378 = vmatprep.subr.bf16.mxu1 %v20207_v19  ;;  %v10309_v19 = vld [vmem:[%s20173_s16 + $0x10] sm:$0xf] }
0x122d   : > { %15380 = vmatpush3.bf16.msra.mxu1 %v15379_v35 }
0x1230   : > { %14147 = vmatmul.mubr.msk.f32.vlgmr.msra.gmra.mrb[134].mxu1 %vm8064_vm10, %v9469_v54 }
0x1303   : > { %v10212_v62 = vpop.f32.mrb[134].mxu1 }
0x1304   : > { %v15420_v43 = vadd.f32 %v10212_v62, %v9470_v31  ;;  %v14148_v55 = vpop.f32.mrb[135].mxu1 }
0x1306   : > { %14176 = vmatmul.mubr.msk.f32.vlgmr.msra.gmra.mrb[166].mxu0 %vm5997_vm6, %v15420_v43 }
0x1307   : > { %15401 = vmatpush3.bf16.msra.mxu0 %v15400_v25  ;;  %14184 = vmatprep.mubr.msk.f32.mxu0 %vm15594_vm5, %v20206_v12 }
0x1308   : > { %14182 = vmatprep.subr.mxu0 %v20206_v12  ;;  %v10310_v12 = vld [vmem:[%s20174_s17] sm:$0x1] }
0x130b   : > { %14183 = vmatpush3.msk.msra.mxu0 %vm6010_vm7, %v10309_v19 }
0x13d9   : > { %v10303_v32 = vpop.f32.mrb[166].mxu0 }
0x13da   : > { %v10304_v42 = vadd.f32 %v10303_v32, %v10230_v63  ;;  %v14177_v53 = vpop.f32.mrb[167].mxu0 }
0x13dc   : > { %14185 = vmatmul.mubr.msk.f32.vlgmr.msra.gmra.mrb[168].mxu0 %vm10311_vm11, %v10304_v42 }
0x14af   : > { %v10384_v3 = vpop.f32.mrb[168].mxu0 }
0x14b0   : > { %v10385_v10 = vadd.f32 %v10384_v3, %v10310_v12  ;;  %v14186_v22 = vpop.f32.mrb[169].mxu0 }
0x14b2   : > { %10389 = vst.msk [vmem:[%s568_s19] sm:$0x1] %vm10388_vm12, %v10385_v10 }
0x14b3   : > { %15541 = shalt.err (!%p15538_p3)
}
0x14b4   : > { %s15542_s27 = scalar_lea.hbm %s20115_s29, 16  ;;  %s15546_s1 = scalar_lea.hbm %s20175_s18, 32 }
0x14b5   : > { %p15543_p4 = scmp.ne.s32.totalorder %s20115_s29, %s15542_s27  ;;  %p15547_p9 = scmp.lt.u32.totalorder %s20115_s29, %s20175_s18 }
0x14b6   : > { %p15548_p10 = scmp.lt.u32.totalorder %s15546_s1, %s15542_s27  ;;  %p15550_p12 = scmp.lt.u32.totalorder %s15542_s27, %s20115_s29 }
0x14b7   : > { %p15544_p7 = pnand %p15543_p4, %p15730_p5 }
0x14b8   : > { %p15549_p11 = por %p15548_p10, %p15547_p9 }
0x14b9   : > { %p15545_p8 = pneg %p15544_p7 }
0x14ba   : > { %p15551_p13 = por %p15550_p12, %p15549_p11 }
0x14bc   : > { %p15552_p0 = pnand %p15551_p13, %p15545_p8 }
0x14be   : > { %15555 = shalt.err (!%p15552_p0)
}
0x14bf   : > { %15485 = dma.vmem_to_hbm [thread:$0]  (%p15730_p5), %s20117_s20, 16, %s20115_s29, %s10391_s22  }
0x14c0 PF: > { %s20228_s26 = sld [smem:[#allocation5_spill]]  ;;  %p15491_p1 = scmp.ge.s32.totalorder %s15590_s30, 2 }
0x14c2   : > { %p15488_p2 = pnand %p15491_p1, %p15734_p6 }
0x14c6   : > { %s10415_s24 = sand.u32 1, %s20228_s26  }
0x14c7   : > { %s10416_s25 = scalar_lea.sflag [#allocation3], %s10415_s24 }
0x14c8   : > { %15573 = dma.done.wait (!%p15488_p2), %s10416_s25, 16  }
0x14c9   : > { %15575 = vsyncadd (!%p15488_p2), %s10416_s25, 4294967280  ;;  %s20230_s30 = sld [smem:[#allocation7_spill]]  ;;  %s20231_s19 = sld [smem:[#allocation6_spill]] }
0x14ca   : > { %s20232_s29 = sld [smem:[#allocation8_spill]]  ;;  %s20233_s27 = smov %s15582_s28 }
0x14cf   : > { %p28_p3 = scmp.ge.s32.totalorder %s20230_s30, 4   ;;  %s20234_s28 = smov %s20231_s19 }
0x14d1   :  { %30 = sbr.rel (!%p28_p3) target bundleno = 7 (0x7), region = 183 }
0x14d8   :  { %10420 = vsyncpa [#allocation3], 1 }
0x14d9   :  { %10422 = vsyncpa [#allocation3 + $0x1], 1 }

</bundles_post_ra>
